<compile_context>
chip_gen: v5e
topology: v5e:2x2
jax: 0.10.0
libtpu: 0.0.40
codegen_flags: <defaults>
</compile_context>

<pallas_src>
import jax
import jax.numpy as jnp
from jax.experimental import pallas as pl
from jax.experimental.pallas import tpu as pltpu

# ---- config (mirrors num_channels[2], num_layers[2], edge_features[2]) ----
C = 32    # hidden_nf = in_node_nf = out_node_nf
L = 2     # num_layers[2]
EF = 4    # edge_features[2]
N = 32    # atoms per graph
E = 64    # edges per graph
B = 4     # graphs in the batch

G = 2             # graphs packed block-diagonally per grid step (2 steps -> both v7x TCs)
GB = B // G       # grid size
GN = G * N        # 64 nodes per super-graph
GE = G * E        # 128 edges per super-graph

BF16 = jnp.bfloat16
F32 = jnp.float32


def _silu(v):
    return v * jax.nn.sigmoid(v)


# ---------------------------- kernel ----------------------------
# Weight slot layout (static Python indices -> free slicing):
#   wcc (bf16, (2+8L, C, C)): 0=win, 1=wout, per layer l at 2+8l:
#        [we1h, we1hc, we2, wn1h, wn1a, wn2, wc1, wc2(zero-padded to CxC)]
#   wrow (f32, (2+5L, C)):    0=bin, 1=bout, per layer l at 2+5l:
#        [we1r, be2, bn1, bn2, bc1]
def egnn_kernel(h_ref, x_ref, srow_ref, scol_ref, srowT_ref, srowTm_ref, eb_ref,
                wcc_ref, wrow_ref, hout_ref):
    srow = srow_ref[0]           # (GE, GN) f32 one-hot  (exact gather)
    scol = scol_ref[0]           # (GE, GN)
    sdiff = srow - scol          # (GE, GN) entries {-1,0,1}; loop-invariant VPU subtract
    srowT = srowT_ref[0]         # (GN, GE) segment-sum scatter
    srowTm = srowTm_ref[0]       # (GN, GE) segment-mean scatter (rows pre-scaled by 1/deg)

    def fdot(a, b):              # exact f32 gather / scatter / coord matmul
        return jnp.dot(a, b, precision=jax.lax.Precision.HIGHEST,
                       preferred_element_type=jnp.float32)

    def bdot(a16, i):            # bf16 weight transform, f32 accumulation
        return jnp.dot(a16, wcc_ref[i], preferred_element_type=jnp.float32)

    def row(i):                  # (1, C) f32 bias / row weight
        return wrow_ref[i:i + 1, :]

    # embedding_in
    h = bdot(h_ref[0].astype(BF16), 0) + row(0)            # (GN, C) f32
    x = x_ref[0]                                            # (GN, 3) f32

    for l in range(L):                                      # static unroll over layers
        cc = 2 + 8 * l
        rr = 2 + 5 * l
        h16 = h.astype(BF16)

        # ---- edge model: split accumulated dots, no concats -------------
        t1 = bdot(h16, cc + 0)                              # h @ we1h   (node granularity)
        t2 = bdot(h16, cc + 1)                              # h @ we1hc
        cd = fdot(sdiff, x)                                 # coord_diff, exact f32 (GE, 3)
        radial = (cd[:, 0:1] * cd[:, 0:1] + cd[:, 1:2] * cd[:, 1:2]
                  + cd[:, 2:3] * cd[:, 2:3])                # (GE, 1), VPU only
        pre = (fdot(srow, t1) + fdot(scol, t2)              # exact endpoint gathers
               + radial * row(rr + 0)                       # radial * we1r (broadcast mul)
               + eb_ref[0, l])                              # precomputed ea@we1e + be1
        m = _silu(pre)
        m = _silu(bdot(m.astype(BF16), cc + 2) + row(rr + 1))   # we2, be2  (GE, C)
        m16 = m.astype(BF16)

        # ---- coord model -------------------------------------------------
        pm = _silu(bdot(m16, cc + 6) + row(rr + 4))         # wc1, bc1
        phi = bdot(pm.astype(BF16), cc + 7)[:, 0:1]         # wc2 (zero-padded), (GE, 1)
        x = x + fdot(srowTm, cd * phi)                      # segment-mean coord update

        # ---- node model --------------------------------------------------
        agg = fdot(srowT, m)                                # exact segment-sum (GN, C)
        node = _silu(bdot(h16, cc + 3) + bdot(agg.astype(BF16), cc + 4)
                     + row(rr + 2))                         # wn1h, wn1a, bn1
        h = h + bdot(node.astype(BF16), cc + 5) + row(rr + 3)   # wn2, bn2 (residual)

    # embedding_out
    hout_ref[0] = (bdot(h.astype(BF16), 1) + row(1)).astype(hout_ref.dtype)


# ---------------------------- wrapper ----------------------------
def _cost_estimate(operands, out_nbytes):
    mm = lambda m, k, n: 2 * m * k * n
    per_layer = (2 * mm(GN, C, C)        # we1h / we1hc node-granularity transforms
                 + mm(GE, GN, 3)         # coord_diff
                 + 2 * mm(GE, GN, C)     # row / col gathers
                 + 3 * mm(GE, C, C)      # we2, wc1, wc2(pad)
                 + mm(GN, GE, 3)         # coord segment-mean scatter
                 + mm(GN, GE, C)         # m segment-sum scatter
                 + 3 * mm(GN, C, C))     # wn1h, wn1a, wn2
    flops = GB * (2 * mm(GN, C, C) + L * per_layer)
    transcendentals = GB * L * (3 * GE * C + GN * C)
    bytes_accessed = sum(int(a.size) * a.dtype.itemsize for a in operands) + out_nbytes
    return pl.CostEstimate(flops=flops, transcendentals=transcendentals,
                           bytes_accessed=bytes_accessed)


def run_egnn_pallas(h_pk, x_pk, srow, scol, srowT, srowTm, eb_pk, wcc, wrow):
    def per_graph(shape):
        nd = len(shape)
        return pl.BlockSpec((1,) + tuple(shape[1:]),
                            lambda b, _nd=nd: (b,) + (0,) * (_nd - 1))

    def shared(shape):
        nd = len(shape)
        return pl.BlockSpec(tuple(shape), lambda b, _nd=nd: (0,) * _nd)

    data = (h_pk, x_pk, srow, scol, srowT, srowTm, eb_pk)
    in_specs = [per_graph(a.shape) for a in data] + [shared(wcc.shape), shared(wrow.shape)]
    out_nbytes = GB * GN * C * 4

    return pl.pallas_call(
        egnn_kernel,
        out_shape=jax.ShapeDtypeStruct((GB, GN, C), jnp.float32),
        grid=(GB,),
        in_specs=in_specs,
        out_specs=pl.BlockSpec((1, GN, C), lambda b: (b, 0, 0)),
        compiler_params=pltpu.CompilerParams(
            dimension_semantics=("parallel",)),
        cost_estimate=_cost_estimate(data + (wcc, wrow), out_nbytes),
    )(*data, wcc, wrow)


# ---------------- pure-JAX reference (f32, per graph) ----------------
def egnn_ref(h0, x0, rows, cols, ea, p):
    h = h0 @ p['win'] + p['bin']
    x = x0
    for l in range(L):
        hr, hc = h[rows], h[cols]
        cd = x[rows] - x[cols]
        radial = jnp.sum(cd * cd, axis=-1, keepdims=True)
        pre = (hr @ p['we1h'][l] + hc @ p['we1hc'][l]
               + radial * p['we1r'][l] + ea @ p['we1e'][l] + p['be1'][l])
        m = _silu(pre)
        m = _silu(m @ p['we2'][l] + p['be2'][l])
        phi = _silu(m @ p['wc1'][l] + p['bc1'][l]) @ p['wc2'][l]
        trans = cd * phi
        aggx = jax.ops.segment_sum(trans, rows, N)
        cnt = jnp.maximum(jax.ops.segment_sum(jnp.ones((E, 1)), rows, N), 1.0)
        x = x + aggx / cnt
        agg = jax.ops.segment_sum(m, rows, N)
        node = _silu(h @ p['wn1h'][l] + agg @ p['wn1a'][l] + p['bn1'][l])
        h = h + node @ p['wn2'][l] + p['bn2'][l]
    return h @ p['wout'] + p['bout']


# ---------------- deterministic parameter init (PyTorch Linear style) ----------------
def _linear(key, fan_in, shape):
    bound = 1.0 / jnp.sqrt(jnp.float32(fan_in))
    return jax.random.uniform(key, shape, jnp.float32, -bound, bound)


def init_params(key):
    ks = iter(jax.random.split(key, 64))
    p = {}
    p['win'] = _linear(next(ks), C, (C, C))
    p['bin'] = _linear(next(ks), C, (1, C))
    p['wout'] = _linear(next(ks), C, (C, C))
    p['bout'] = _linear(next(ks), C, (1, C))
    edge_in = 2 * C + 1 + EF
    node_in = 2 * C
    p['we1h'] = _linear(next(ks), edge_in, (L, C, C))
    p['we1hc'] = _linear(next(ks), edge_in, (L, C, C))
    p['we1r'] = _linear(next(ks), edge_in, (L, 1, C))
    p['we1e'] = _linear(next(ks), edge_in, (L, EF, C))
    p['be1'] = _linear(next(ks), edge_in, (L, 1, C))
    p['we2'] = _linear(next(ks), C, (L, C, C))
    p['be2'] = _linear(next(ks), C, (L, 1, C))
    p['wn1h'] = _linear(next(ks), node_in, (L, C, C))
    p['wn1a'] = _linear(next(ks), node_in, (L, C, C))
    p['bn1'] = _linear(next(ks), node_in, (L, 1, C))
    p['wn2'] = _linear(next(ks), C, (L, C, C))
    p['bn2'] = _linear(next(ks), C, (L, 1, C))
    p['wc1'] = _linear(next(ks), C, (L, C, C))
    p['bc1'] = _linear(next(ks), C, (L, 1, C))
    p['wc2'] = _linear(next(ks), C, (L, C, 1))   # coord head, bias=False
    return p


def pack_weights(p):
    """Fold all weights into one bf16 (C,C)-slot stack and one f32 row stack."""
    wc2pad = jnp.pad(p['wc2'], ((0, 0), (0, 0), (0, C - 1)))        # (L, C, C), col 0 = wc2
    layer_cc = jnp.stack([p['we1h'], p['we1hc'], p['we2'],
                          p['wn1h'], p['wn1a'], p['wn2'],
                          p['wc1'], wc2pad], axis=1)                # (L, 8, C, C)
    wcc = jnp.concatenate([p['win'][None], p['wout'][None],
                           layer_cc.reshape(L * 8, C, C)], axis=0).astype(BF16)
    layer_r = jnp.stack([p['we1r'][:, 0], p['be2'][:, 0], p['bn1'][:, 0],
                         p['bn2'][:, 0], p['bc1'][:, 0]], axis=1)   # (L, 5, C)
    wrow = jnp.concatenate([p['bin'], p['bout'],
                            layer_r.reshape(L * 5, C)], axis=0)     # (2+5L, C) f32
    return wcc, wrow


def pack_inputs(atom_feature, coords, rows, cols, edge_attr, p):
    """Block-diagonal packing of G graphs per grid step + precomputed edge-attr term."""
    h_pk = atom_feature.reshape(GB, GN, C)
    x_pk = coords.reshape(GB, GN, 3)
    offs = (jnp.arange(G) * N)[None, :, None]                       # node offset per sub-graph
    rows_pk = (rows.reshape(GB, G, E) + offs).reshape(GB, GE)
    cols_pk = (cols.reshape(GB, G, E) + offs).reshape(GB, GE)
    srow = jax.nn.one_hot(rows_pk, GN, dtype=jnp.float32)           # (GB, GE, GN)
    scol = jax.nn.one_hot(cols_pk, GN, dtype=jnp.float32)
    srowT = jnp.swapaxes(srow, -1, -2)                              # (GB, GN, GE) segment-sum
    inv_cnt = 1.0 / jnp.maximum(jnp.sum(srowT, axis=-1, keepdims=True), 1.0)
    srowTm = srowT * inv_cnt                                        # segment-mean scatter
    # layer-invariant edge-attr contribution, precomputed: ea @ we1e[l] + be1[l]
    eb = jnp.einsum('bef,lfc->blec', edge_attr, p['we1e']) + p['be1'][None]   # (B, L, E, C)
    eb_pk = eb.reshape(GB, G, L, E, C).transpose(0, 2, 1, 3, 4).reshape(GB, L, GE, C)
    return h_pk, x_pk, srow, scol, srowT, srowTm, eb_pk


if __name__ == "__main__":
    key = jax.random.PRNGKey(0)
    k_h, k_x, k_r, k_c, k_e, k_p = jax.random.split(key, 6)

    atom_feature = jax.random.normal(k_h, (B, N, C), jnp.float32)       # h_atm
    coords = jax.random.normal(k_x, (B, N, 3), jnp.float32)             # G.ndata['x'].squeeze(1)
    rows = jax.random.randint(k_r, (B, E), 0, N)                        # G.edges()[0]
    cols = jax.random.randint(k_c, (B, E), 0, N)                        # G.edges()[1]
    edge_attr = jax.random.normal(k_e, (B, E, EF), jnp.float32)         # G.edata['0']

    params = init_params(k_p)
    wcc, wrow = pack_weights(params)
    data = pack_inputs(atom_feature, coords, rows, cols, edge_attr, params)

    h_out = run_egnn_pallas(*data, wcc, wrow)                            # (GB, GN, C)
    h_out = jax.block_until_ready(h_out).reshape(B, N, C)

    h_ref = jnp.stack([
        egnn_ref(atom_feature[b], coords[b], rows[b], cols[b], edge_attr[b], params)
        for b in range(B)])

    assert h_out.shape == (B, N, C)
    max_err = float(jnp.max(jnp.abs(h_out - h_ref)))
    assert jnp.allclose(h_out, h_ref, atol=5e-2, rtol=1e-1), f"max abs err {max_err}"
    print("KERNEL_OK")
</pallas_src>

<mosaic_0001>
module attributes {stable_mosaic.version = 11 : i64} {
  func.func @egnn_kernel(%arg0: i32, %arg1: memref<1x64x32xf32, #tpu.memory_space<vmem>>, %arg2: memref<1x64x3xf32, #tpu.memory_space<vmem>>, %arg3: memref<1x128x64xf32, #tpu.memory_space<vmem>>, %arg4: memref<1x128x64xf32, #tpu.memory_space<vmem>>, %arg5: memref<1x64x128xf32, #tpu.memory_space<vmem>>, %arg6: memref<1x64x128xf32, #tpu.memory_space<vmem>>, %arg7: memref<1x2x128x32xf32, #tpu.memory_space<vmem>>, %arg8: memref<18x32x32xbf16, #tpu.memory_space<vmem>>, %arg9: memref<12x32xf32, #tpu.memory_space<vmem>>, %arg10: memref<1x64x32xf32, #tpu.memory_space<vmem>>) attributes {dimension_semantics = [#tpu.dimension_semantics<parallel>], iteration_bounds = array<i64: 2>, scalar_prefetch = 0 : i64, scratch_operands = 0 : i64, tpu.core_type = #tpu.core_type<tc>, window_params = [{transform_indices = @transform_0, window_bounds = array<i64: 1, 64, 32>}, {transform_indices = @transform_1, window_bounds = array<i64: 1, 64, 3>}, {transform_indices = @transform_2, window_bounds = array<i64: 1, 128, 64>}, {transform_indices = @transform_3, window_bounds = array<i64: 1, 128, 64>}, {transform_indices = @transform_4, window_bounds = array<i64: 1, 64, 128>}, {transform_indices = @transform_5, window_bounds = array<i64: 1, 64, 128>}, {transform_indices = @transform_6, window_bounds = array<i64: 1, 2, 128, 32>}, {pipeline_mode = #tpu.pipeline_mode<synchronous>, transform_indices = @transform_7, window_bounds = array<i64: 18, 32, 32>}, {pipeline_mode = #tpu.pipeline_mode<synchronous>, transform_indices = @transform_8, window_bounds = array<i64: 12, 32>}, {transform_indices = @transform_9, window_bounds = array<i64: 1, 64, 32>}]} {
    %c0 = arith.constant 0 : index
    %c0_0 = arith.constant 0 : index
    %c0_1 = arith.constant 0 : index
    %0 = vector.load %arg3[%c0, %c0_0, %c0_1] : memref<1x128x64xf32, #tpu.memory_space<vmem>>, vector<1x128x64xf32>
    %1 = vector.shape_cast %0 : vector<1x128x64xf32> to vector<128x64xf32>
    %c0_2 = arith.constant 0 : index
    %c0_3 = arith.constant 0 : index
    %c0_4 = arith.constant 0 : index
    %2 = vector.load %arg4[%c0_2, %c0_3, %c0_4] : memref<1x128x64xf32, #tpu.memory_space<vmem>>, vector<1x128x64xf32>
    %3 = vector.shape_cast %2 : vector<1x128x64xf32> to vector<128x64xf32>
    %4 = arith.subf %1, %3 : vector<128x64xf32>
    %c0_5 = arith.constant 0 : index
    %c0_6 = arith.constant 0 : index
    %c0_7 = arith.constant 0 : index
    %5 = vector.load %arg5[%c0_5, %c0_6, %c0_7] : memref<1x64x128xf32, #tpu.memory_space<vmem>>, vector<1x64x128xf32>
    %6 = vector.shape_cast %5 : vector<1x64x128xf32> to vector<64x128xf32>
    %c0_8 = arith.constant 0 : index
    %c0_9 = arith.constant 0 : index
    %c0_10 = arith.constant 0 : index
    %7 = vector.load %arg6[%c0_8, %c0_9, %c0_10] : memref<1x64x128xf32, #tpu.memory_space<vmem>>, vector<1x64x128xf32>
    %8 = vector.shape_cast %7 : vector<1x64x128xf32> to vector<64x128xf32>
    %c0_11 = arith.constant 0 : index
    %c0_12 = arith.constant 0 : index
    %c0_13 = arith.constant 0 : index
    %9 = vector.load %arg1[%c0_11, %c0_12, %c0_13] : memref<1x64x32xf32, #tpu.memory_space<vmem>>, vector<1x64x32xf32>
    %10 = vector.shape_cast %9 : vector<1x64x32xf32> to vector<64x32xf32>
    %11 = arith.truncf %10 : vector<64x32xf32> to vector<64x32xbf16>
    %c0_14 = arith.constant 0 : index
    %c0_15 = arith.constant 0 : index
    %c0_16 = arith.constant 0 : index
    %12 = vector.load %arg8[%c0_14, %c0_15, %c0_16] : memref<18x32x32xbf16, #tpu.memory_space<vmem>>, vector<1x32x32xbf16>
    %13 = vector.shape_cast %12 : vector<1x32x32xbf16> to vector<32x32xbf16>
    %cst = arith.constant dense<0.000000e+00> : vector<64x32xf32>
    %14 = tpu.matmul %11, %13, %cst {dimension_numbers = #tpu.dot_dimension_numbers<[1], [0], [0], [1], [0, 0, 1, 1], [], []>} : vector<64x32xbf16>, vector<32x32xbf16>, vector<64x32xf32> -> vector<64x32xf32>
    %c0_17 = arith.constant 0 : index
    %c0_18 = arith.constant 0 : index
    %15 = vector.load %arg9[%c0_17, %c0_18] : memref<12x32xf32, #tpu.memory_space<vmem>>, vector<1x32xf32>
    %16 = vector.broadcast %15 : vector<1x32xf32> to vector<64x32xf32>
    %17 = arith.addf %14, %16 : vector<64x32xf32>
    %c0_19 = arith.constant 0 : index
    %c0_20 = arith.constant 0 : index
    %c0_21 = arith.constant 0 : index
    %18 = vector.load %arg2[%c0_19, %c0_20, %c0_21] : memref<1x64x3xf32, #tpu.memory_space<vmem>>, vector<1x64x3xf32>
    %19 = vector.shape_cast %18 : vector<1x64x3xf32> to vector<64x3xf32>
    %20 = arith.truncf %17 : vector<64x32xf32> to vector<64x32xbf16>
    %c2 = arith.constant 2 : index
    %c0_22 = arith.constant 0 : index
    %c0_23 = arith.constant 0 : index
    %21 = vector.load %arg8[%c2, %c0_22, %c0_23] : memref<18x32x32xbf16, #tpu.memory_space<vmem>>, vector<1x32x32xbf16>
    %22 = vector.shape_cast %21 : vector<1x32x32xbf16> to vector<32x32xbf16>
    %cst_24 = arith.constant dense<0.000000e+00> : vector<64x32xf32>
    %23 = tpu.matmul %20, %22, %cst_24 {dimension_numbers = #tpu.dot_dimension_numbers<[1], [0], [0], [1], [0, 0, 1, 1], [], []>} : vector<64x32xbf16>, vector<32x32xbf16>, vector<64x32xf32> -> vector<64x32xf32>
    %c3 = arith.constant 3 : index
    %c0_25 = arith.constant 0 : index
    %c0_26 = arith.constant 0 : index
    %24 = vector.load %arg8[%c3, %c0_25, %c0_26] : memref<18x32x32xbf16, #tpu.memory_space<vmem>>, vector<1x32x32xbf16>
    %25 = vector.shape_cast %24 : vector<1x32x32xbf16> to vector<32x32xbf16>
    %cst_27 = arith.constant dense<0.000000e+00> : vector<64x32xf32>
    %26 = tpu.matmul %20, %25, %cst_27 {dimension_numbers = #tpu.dot_dimension_numbers<[1], [0], [0], [1], [0, 0, 1, 1], [], []>} : vector<64x32xbf16>, vector<32x32xbf16>, vector<64x32xf32> -> vector<64x32xf32>
    %cst_28 = arith.constant dense<0.000000e+00> : vector<128x3xf32>
    %27 = tpu.matmul %4, %19, %cst_28 {dimension_numbers = #tpu.dot_dimension_numbers<[1], [0], [0], [1], [0, 0, 1, 1], [], []>, precision = #tpu.contract_precision<fp32>} : vector<128x64xf32>, vector<64x3xf32>, vector<128x3xf32> -> vector<128x3xf32>
    %28 = vector.extract_strided_slice %27 {offsets = [0, 0], sizes = [128, 1], strides = [1, 1]} : vector<128x3xf32> to vector<128x1xf32>
    %29 = vector.extract_strided_slice %27 {offsets = [0, 0], sizes = [128, 1], strides = [1, 1]} : vector<128x3xf32> to vector<128x1xf32>
    %30 = arith.mulf %28, %29 : vector<128x1xf32>
    %31 = vector.extract_strided_slice %27 {offsets = [0, 1], sizes = [128, 1], strides = [1, 1]} : vector<128x3xf32> to vector<128x1xf32>
    %32 = vector.extract_strided_slice %27 {offsets = [0, 1], sizes = [128, 1], strides = [1, 1]} : vector<128x3xf32> to vector<128x1xf32>
    %33 = arith.mulf %31, %32 : vector<128x1xf32>
    %34 = arith.addf %30, %33 : vector<128x1xf32>
    %35 = vector.extract_strided_slice %27 {offsets = [0, 2], sizes = [128, 1], strides = [1, 1]} : vector<128x3xf32> to vector<128x1xf32>
    %36 = vector.extract_strided_slice %27 {offsets = [0, 2], sizes = [128, 1], strides = [1, 1]} : vector<128x3xf32> to vector<128x1xf32>
    %37 = arith.mulf %35, %36 : vector<128x1xf32>
    %38 = arith.addf %34, %37 : vector<128x1xf32>
    %cst_29 = arith.constant dense<0.000000e+00> : vector<128x32xf32>
    %39 = tpu.matmul %1, %23, %cst_29 {dimension_numbers = #tpu.dot_dimension_numbers<[1], [0], [0], [1], [0, 0, 1, 1], [], []>, precision = #tpu.contract_precision<fp32>} : vector<128x64xf32>, vector<64x32xf32>, vector<128x32xf32> -> vector<128x32xf32>
    %cst_30 = arith.constant dense<0.000000e+00> : vector<128x32xf32>
    %40 = tpu.matmul %3, %26, %cst_30 {dimension_numbers = #tpu.dot_dimension_numbers<[1], [0], [0], [1], [0, 0, 1, 1], [], []>, precision = #tpu.contract_precision<fp32>} : vector<128x64xf32>, vector<64x32xf32>, vector<128x32xf32> -> vector<128x32xf32>
    %41 = arith.addf %39, %40 : vector<128x32xf32>
    %c2_31 = arith.constant 2 : index
    %c0_32 = arith.constant 0 : index
    %42 = vector.load %arg9[%c2_31, %c0_32] : memref<12x32xf32, #tpu.memory_space<vmem>>, vector<1x32xf32>
    %43 = vector.broadcast %38 : vector<128x1xf32> to vector<128x32xf32>
    %44 = vector.broadcast %42 : vector<1x32xf32> to vector<128x32xf32>
    %45 = arith.mulf %43, %44 : vector<128x32xf32>
    %46 = arith.addf %41, %45 : vector<128x32xf32>
    %c0_33 = arith.constant 0 : index
    %c0_34 = arith.constant 0 : index
    %c0_35 = arith.constant 0 : index
    %c0_36 = arith.constant 0 : index
    %47 = vector.load %arg7[%c0_33, %c0_34, %c0_35, %c0_36] : memref<1x2x128x32xf32, #tpu.memory_space<vmem>>, vector<1x1x128x32xf32>
    %48 = vector.shape_cast %47 : vector<1x1x128x32xf32> to vector<128x32xf32>
    %49 = arith.addf %46, %48 : vector<128x32xf32>
    %50 = arith.negf %49 : vector<128x32xf32>
    %51 = math.exp %50 : vector<128x32xf32>
    %cst_37 = arith.constant 1.000000e+00 : f32
    %52 = vector.broadcast %cst_37 : f32 to vector<128x32xf32>
    %53 = arith.addf %52, %51 : vector<128x32xf32>
    %54 = arith.divf %52, %53 : vector<128x32xf32>
    %55 = arith.mulf %49, %54 : vector<128x32xf32>
    %56 = arith.truncf %55 : vector<128x32xf32> to vector<128x32xbf16>
    %c4 = arith.constant 4 : index
    %c0_38 = arith.constant 0 : index
    %c0_39 = arith.constant 0 : index
    %57 = vector.load %arg8[%c4, %c0_38, %c0_39] : memref<18x32x32xbf16, #tpu.memory_space<vmem>>, vector<1x32x32xbf16>
    %58 = vector.shape_cast %57 : vector<1x32x32xbf16> to vector<32x32xbf16>
    %cst_40 = arith.constant dense<0.000000e+00> : vector<128x32xf32>
    %59 = tpu.matmul %56, %58, %cst_40 {dimension_numbers = #tpu.dot_dimension_numbers<[1], [0], [0], [1], [0, 0, 1, 1], [], []>} : vector<128x32xbf16>, vector<32x32xbf16>, vector<128x32xf32> -> vector<128x32xf32>
    %c3_41 = arith.constant 3 : index
    %c0_42 = arith.constant 0 : index
    %60 = vector.load %arg9[%c3_41, %c0_42] : memref<12x32xf32, #tpu.memory_space<vmem>>, vector<1x32xf32>
    %61 = vector.broadcast %60 : vector<1x32xf32> to vector<128x32xf32>
    %62 = arith.addf %59, %61 : vector<128x32xf32>
    %63 = arith.negf %62 : vector<128x32xf32>
    %64 = math.exp %63 : vector<128x32xf32>
    %cst_43 = arith.constant 1.000000e+00 : f32
    %65 = vector.broadcast %cst_43 : f32 to vector<128x32xf32>
    %66 = arith.addf %65, %64 : vector<128x32xf32>
    %67 = arith.divf %65, %66 : vector<128x32xf32>
    %68 = arith.mulf %62, %67 : vector<128x32xf32>
    %69 = arith.truncf %68 : vector<128x32xf32> to vector<128x32xbf16>
    %c8 = arith.constant 8 : index
    %c0_44 = arith.constant 0 : index
    %c0_45 = arith.constant 0 : index
    %70 = vector.load %arg8[%c8, %c0_44, %c0_45] : memref<18x32x32xbf16, #tpu.memory_space<vmem>>, vector<1x32x32xbf16>
    %71 = vector.shape_cast %70 : vector<1x32x32xbf16> to vector<32x32xbf16>
    %cst_46 = arith.constant dense<0.000000e+00> : vector<128x32xf32>
    %72 = tpu.matmul %69, %71, %cst_46 {dimension_numbers = #tpu.dot_dimension_numbers<[1], [0], [0], [1], [0, 0, 1, 1], [], []>} : vector<128x32xbf16>, vector<32x32xbf16>, vector<128x32xf32> -> vector<128x32xf32>
    %c6 = arith.constant 6 : index
    %c0_47 = arith.constant 0 : index
    %73 = vector.load %arg9[%c6, %c0_47] : memref<12x32xf32, #tpu.memory_space<vmem>>, vector<1x32xf32>
    %74 = vector.broadcast %73 : vector<1x32xf32> to vector<128x32xf32>
    %75 = arith.addf %72, %74 : vector<128x32xf32>
    %76 = arith.negf %75 : vector<128x32xf32>
    %77 = math.exp %76 : vector<128x32xf32>
    %cst_48 = arith.constant 1.000000e+00 : f32
    %78 = vector.broadcast %cst_48 : f32 to vector<128x32xf32>
    %79 = arith.addf %78, %77 : vector<128x32xf32>
    %80 = arith.divf %78, %79 : vector<128x32xf32>
    %81 = arith.mulf %75, %80 : vector<128x32xf32>
    %82 = arith.truncf %81 : vector<128x32xf32> to vector<128x32xbf16>
    %c9 = arith.constant 9 : index
    %c0_49 = arith.constant 0 : index
    %c0_50 = arith.constant 0 : index
    %83 = vector.load %arg8[%c9, %c0_49, %c0_50] : memref<18x32x32xbf16, #tpu.memory_space<vmem>>, vector<1x32x32xbf16>
    %84 = vector.shape_cast %83 : vector<1x32x32xbf16> to vector<32x32xbf16>
    %cst_51 = arith.constant dense<0.000000e+00> : vector<128x32xf32>
    %85 = tpu.matmul %82, %84, %cst_51 {dimension_numbers = #tpu.dot_dimension_numbers<[1], [0], [0], [1], [0, 0, 1, 1], [], []>} : vector<128x32xbf16>, vector<32x32xbf16>, vector<128x32xf32> -> vector<128x32xf32>
    %86 = vector.extract_strided_slice %85 {offsets = [0, 0], sizes = [128, 1], strides = [1, 1]} : vector<128x32xf32> to vector<128x1xf32>
    %87 = vector.broadcast %86 : vector<128x1xf32> to vector<128x3xf32>
    %88 = arith.mulf %27, %87 : vector<128x3xf32>
    %cst_52 = arith.constant dense<0.000000e+00> : vector<64x3xf32>
    %89 = tpu.matmul %8, %88, %cst_52 {dimension_numbers = #tpu.dot_dimension_numbers<[1], [0], [0], [1], [0, 0, 1, 1], [], []>, precision = #tpu.contract_precision<fp32>} : vector<64x128xf32>, vector<128x3xf32>, vector<64x3xf32> -> vector<64x3xf32>
    %90 = arith.addf %19, %89 : vector<64x3xf32>
    %cst_53 = arith.constant dense<0.000000e+00> : vector<64x32xf32>
    %91 = tpu.matmul %6, %68, %cst_53 {dimension_numbers = #tpu.dot_dimension_numbers<[1], [0], [0], [1], [0, 0, 1, 1], [], []>, precision = #tpu.contract_precision<fp32>} : vector<64x128xf32>, vector<128x32xf32>, vector<64x32xf32> -> vector<64x32xf32>
    %c5 = arith.constant 5 : index
    %c0_54 = arith.constant 0 : index
    %c0_55 = arith.constant 0 : index
    %92 = vector.load %arg8[%c5, %c0_54, %c0_55] : memref<18x32x32xbf16, #tpu.memory_space<vmem>>, vector<1x32x32xbf16>
    %93 = vector.shape_cast %92 : vector<1x32x32xbf16> to vector<32x32xbf16>
    %cst_56 = arith.constant dense<0.000000e+00> : vector<64x32xf32>
    %94 = tpu.matmul %20, %93, %cst_56 {dimension_numbers = #tpu.dot_dimension_numbers<[1], [0], [0], [1], [0, 0, 1, 1], [], []>} : vector<64x32xbf16>, vector<32x32xbf16>, vector<64x32xf32> -> vector<64x32xf32>
    %95 = arith.truncf %91 : vector<64x32xf32> to vector<64x32xbf16>
    %c6_57 = arith.constant 6 : index
    %c0_58 = arith.constant 0 : index
    %c0_59 = arith.constant 0 : index
    %96 = vector.load %arg8[%c6_57, %c0_58, %c0_59] : memref<18x32x32xbf16, #tpu.memory_space<vmem>>, vector<1x32x32xbf16>
    %97 = vector.shape_cast %96 : vector<1x32x32xbf16> to vector<32x32xbf16>
    %cst_60 = arith.constant dense<0.000000e+00> : vector<64x32xf32>
    %98 = tpu.matmul %95, %97, %cst_60 {dimension_numbers = #tpu.dot_dimension_numbers<[1], [0], [0], [1], [0, 0, 1, 1], [], []>} : vector<64x32xbf16>, vector<32x32xbf16>, vector<64x32xf32> -> vector<64x32xf32>
    %99 = arith.addf %94, %98 : vector<64x32xf32>
    %c4_61 = arith.constant 4 : index
    %c0_62 = arith.constant 0 : index
    %100 = vector.load %arg9[%c4_61, %c0_62] : memref<12x32xf32, #tpu.memory_space<vmem>>, vector<1x32xf32>
    %101 = vector.broadcast %100 : vector<1x32xf32> to vector<64x32xf32>
    %102 = arith.addf %99, %101 : vector<64x32xf32>
    %103 = arith.negf %102 : vector<64x32xf32>
    %104 = math.exp %103 : vector<64x32xf32>
    %cst_63 = arith.constant 1.000000e+00 : f32
    %105 = vector.broadcast %cst_63 : f32 to vector<64x32xf32>
    %106 = arith.addf %105, %104 : vector<64x32xf32>
    %107 = arith.divf %105, %106 : vector<64x32xf32>
    %108 = arith.mulf %102, %107 : vector<64x32xf32>
    %109 = arith.truncf %108 : vector<64x32xf32> to vector<64x32xbf16>
    %c7 = arith.constant 7 : index
    %c0_64 = arith.constant 0 : index
    %c0_65 = arith.constant 0 : index
    %110 = vector.load %arg8[%c7, %c0_64, %c0_65] : memref<18x32x32xbf16, #tpu.memory_space<vmem>>, vector<1x32x32xbf16>
    %111 = vector.shape_cast %110 : vector<1x32x32xbf16> to vector<32x32xbf16>
    %cst_66 = arith.constant dense<0.000000e+00> : vector<64x32xf32>
    %112 = tpu.matmul %109, %111, %cst_66 {dimension_numbers = #tpu.dot_dimension_numbers<[1], [0], [0], [1], [0, 0, 1, 1], [], []>} : vector<64x32xbf16>, vector<32x32xbf16>, vector<64x32xf32> -> vector<64x32xf32>
    %113 = arith.addf %17, %112 : vector<64x32xf32>
    %c5_67 = arith.constant 5 : index
    %c0_68 = arith.constant 0 : index
    %114 = vector.load %arg9[%c5_67, %c0_68] : memref<12x32xf32, #tpu.memory_space<vmem>>, vector<1x32xf32>
    %115 = vector.broadcast %114 : vector<1x32xf32> to vector<64x32xf32>
    %116 = arith.addf %113, %115 : vector<64x32xf32>
    %117 = arith.truncf %116 : vector<64x32xf32> to vector<64x32xbf16>
    %c10 = arith.constant 10 : index
    %c0_69 = arith.constant 0 : index
    %c0_70 = arith.constant 0 : index
    %118 = vector.load %arg8[%c10, %c0_69, %c0_70] : memref<18x32x32xbf16, #tpu.memory_space<vmem>>, vector<1x32x32xbf16>
    %119 = vector.shape_cast %118 : vector<1x32x32xbf16> to vector<32x32xbf16>
    %cst_71 = arith.constant dense<0.000000e+00> : vector<64x32xf32>
    %120 = tpu.matmul %117, %119, %cst_71 {dimension_numbers = #tpu.dot_dimension_numbers<[1], [0], [0], [1], [0, 0, 1, 1], [], []>} : vector<64x32xbf16>, vector<32x32xbf16>, vector<64x32xf32> -> vector<64x32xf32>
    %c11 = arith.constant 11 : index
    %c0_72 = arith.constant 0 : index
    %c0_73 = arith.constant 0 : index
    %121 = vector.load %arg8[%c11, %c0_72, %c0_73] : memref<18x32x32xbf16, #tpu.memory_space<vmem>>, vector<1x32x32xbf16>
    %122 = vector.shape_cast %121 : vector<1x32x32xbf16> to vector<32x32xbf16>
    %cst_74 = arith.constant dense<0.000000e+00> : vector<64x32xf32>
    %123 = tpu.matmul %117, %122, %cst_74 {dimension_numbers = #tpu.dot_dimension_numbers<[1], [0], [0], [1], [0, 0, 1, 1], [], []>} : vector<64x32xbf16>, vector<32x32xbf16>, vector<64x32xf32> -> vector<64x32xf32>
    %cst_75 = arith.constant dense<0.000000e+00> : vector<128x3xf32>
    %124 = tpu.matmul %4, %90, %cst_75 {dimension_numbers = #tpu.dot_dimension_numbers<[1], [0], [0], [1], [0, 0, 1, 1], [], []>, precision = #tpu.contract_precision<fp32>} : vector<128x64xf32>, vector<64x3xf32>, vector<128x3xf32> -> vector<128x3xf32>
    %125 = vector.extract_strided_slice %124 {offsets = [0, 0], sizes = [128, 1], strides = [1, 1]} : vector<128x3xf32> to vector<128x1xf32>
    %126 = vector.extract_strided_slice %124 {offsets = [0, 0], sizes = [128, 1], strides = [1, 1]} : vector<128x3xf32> to vector<128x1xf32>
    %127 = arith.mulf %125, %126 : vector<128x1xf32>
    %128 = vector.extract_strided_slice %124 {offsets = [0, 1], sizes = [128, 1], strides = [1, 1]} : vector<128x3xf32> to vector<128x1xf32>
    %129 = vector.extract_strided_slice %124 {offsets = [0, 1], sizes = [128, 1], strides = [1, 1]} : vector<128x3xf32> to vector<128x1xf32>
    %130 = arith.mulf %128, %129 : vector<128x1xf32>
    %131 = arith.addf %127, %130 : vector<128x1xf32>
    %132 = vector.extract_strided_slice %124 {offsets = [0, 2], sizes = [128, 1], strides = [1, 1]} : vector<128x3xf32> to vector<128x1xf32>
    %133 = vector.extract_strided_slice %124 {offsets = [0, 2], sizes = [128, 1], strides = [1, 1]} : vector<128x3xf32> to vector<128x1xf32>
    %134 = arith.mulf %132, %133 : vector<128x1xf32>
    %135 = arith.addf %131, %134 : vector<128x1xf32>
    %cst_76 = arith.constant dense<0.000000e+00> : vector<128x32xf32>
    %136 = tpu.matmul %1, %120, %cst_76 {dimension_numbers = #tpu.dot_dimension_numbers<[1], [0], [0], [1], [0, 0, 1, 1], [], []>, precision = #tpu.contract_precision<fp32>} : vector<128x64xf32>, vector<64x32xf32>, vector<128x32xf32> -> vector<128x32xf32>
    %cst_77 = arith.constant dense<0.000000e+00> : vector<128x32xf32>
    %137 = tpu.matmul %3, %123, %cst_77 {dimension_numbers = #tpu.dot_dimension_numbers<[1], [0], [0], [1], [0, 0, 1, 1], [], []>, precision = #tpu.contract_precision<fp32>} : vector<128x64xf32>, vector<64x32xf32>, vector<128x32xf32> -> vector<128x32xf32>
    %138 = arith.addf %136, %137 : vector<128x32xf32>
    %c7_78 = arith.constant 7 : index
    %c0_79 = arith.constant 0 : index
    %139 = vector.load %arg9[%c7_78, %c0_79] : memref<12x32xf32, #tpu.memory_space<vmem>>, vector<1x32xf32>
    %140 = vector.broadcast %135 : vector<128x1xf32> to vector<128x32xf32>
    %141 = vector.broadcast %139 : vector<1x32xf32> to vector<128x32xf32>
    %142 = arith.mulf %140, %141 : vector<128x32xf32>
    %143 = arith.addf %138, %142 : vector<128x32xf32>
    %c0_80 = arith.constant 0 : index
    %c1 = arith.constant 1 : index
    %c0_81 = arith.constant 0 : index
    %c0_82 = arith.constant 0 : index
    %144 = vector.load %arg7[%c0_80, %c1, %c0_81, %c0_82] : memref<1x2x128x32xf32, #tpu.memory_space<vmem>>, vector<1x1x128x32xf32>
    %145 = vector.shape_cast %144 : vector<1x1x128x32xf32> to vector<128x32xf32>
    %146 = arith.addf %143, %145 : vector<128x32xf32>
    %147 = arith.negf %146 : vector<128x32xf32>
    %148 = math.exp %147 : vector<128x32xf32>
    %cst_83 = arith.constant 1.000000e+00 : f32
    %149 = vector.broadcast %cst_83 : f32 to vector<128x32xf32>
    %150 = arith.addf %149, %148 : vector<128x32xf32>
    %151 = arith.divf %149, %150 : vector<128x32xf32>
    %152 = arith.mulf %146, %151 : vector<128x32xf32>
    %153 = arith.truncf %152 : vector<128x32xf32> to vector<128x32xbf16>
    %c12 = arith.constant 12 : index
    %c0_84 = arith.constant 0 : index
    %c0_85 = arith.constant 0 : index
    %154 = vector.load %arg8[%c12, %c0_84, %c0_85] : memref<18x32x32xbf16, #tpu.memory_space<vmem>>, vector<1x32x32xbf16>
    %155 = vector.shape_cast %154 : vector<1x32x32xbf16> to vector<32x32xbf16>
    %cst_86 = arith.constant dense<0.000000e+00> : vector<128x32xf32>
    %156 = tpu.matmul %153, %155, %cst_86 {dimension_numbers = #tpu.dot_dimension_numbers<[1], [0], [0], [1], [0, 0, 1, 1], [], []>} : vector<128x32xbf16>, vector<32x32xbf16>, vector<128x32xf32> -> vector<128x32xf32>
    %c8_87 = arith.constant 8 : index
    %c0_88 = arith.constant 0 : index
    %157 = vector.load %arg9[%c8_87, %c0_88] : memref<12x32xf32, #tpu.memory_space<vmem>>, vector<1x32xf32>
    %158 = vector.broadcast %157 : vector<1x32xf32> to vector<128x32xf32>
    %159 = arith.addf %156, %158 : vector<128x32xf32>
    %160 = arith.negf %159 : vector<128x32xf32>
    %161 = math.exp %160 : vector<128x32xf32>
    %cst_89 = arith.constant 1.000000e+00 : f32
    %162 = vector.broadcast %cst_89 : f32 to vector<128x32xf32>
    %163 = arith.addf %162, %161 : vector<128x32xf32>
    %164 = arith.divf %162, %163 : vector<128x32xf32>
    %165 = arith.mulf %159, %164 : vector<128x32xf32>
    %cst_90 = arith.constant dense<0.000000e+00> : vector<64x32xf32>
    %166 = tpu.matmul %6, %165, %cst_90 {dimension_numbers = #tpu.dot_dimension_numbers<[1], [0], [0], [1], [0, 0, 1, 1], [], []>, precision = #tpu.contract_precision<fp32>} : vector<64x128xf32>, vector<128x32xf32>, vector<64x32xf32> -> vector<64x32xf32>
    %c13 = arith.constant 13 : index
    %c0_91 = arith.constant 0 : index
    %c0_92 = arith.constant 0 : index
    %167 = vector.load %arg8[%c13, %c0_91, %c0_92] : memref<18x32x32xbf16, #tpu.memory_space<vmem>>, vector<1x32x32xbf16>
    %168 = vector.shape_cast %167 : vector<1x32x32xbf16> to vector<32x32xbf16>
    %cst_93 = arith.constant dense<0.000000e+00> : vector<64x32xf32>
    %169 = tpu.matmul %117, %168, %cst_93 {dimension_numbers = #tpu.dot_dimension_numbers<[1], [0], [0], [1], [0, 0, 1, 1], [], []>} : vector<64x32xbf16>, vector<32x32xbf16>, vector<64x32xf32> -> vector<64x32xf32>
    %170 = arith.truncf %166 : vector<64x32xf32> to vector<64x32xbf16>
    %c14 = arith.constant 14 : index
    %c0_94 = arith.constant 0 : index
    %c0_95 = arith.constant 0 : index
    %171 = vector.load %arg8[%c14, %c0_94, %c0_95] : memref<18x32x32xbf16, #tpu.memory_space<vmem>>, vector<1x32x32xbf16>
    %172 = vector.shape_cast %171 : vector<1x32x32xbf16> to vector<32x32xbf16>
    %cst_96 = arith.constant dense<0.000000e+00> : vector<64x32xf32>
    %173 = tpu.matmul %170, %172, %cst_96 {dimension_numbers = #tpu.dot_dimension_numbers<[1], [0], [0], [1], [0, 0, 1, 1], [], []>} : vector<64x32xbf16>, vector<32x32xbf16>, vector<64x32xf32> -> vector<64x32xf32>
    %174 = arith.addf %169, %173 : vector<64x32xf32>
    %c9_97 = arith.constant 9 : index
    %c0_98 = arith.constant 0 : index
    %175 = vector.load %arg9[%c9_97, %c0_98] : memref<12x32xf32, #tpu.memory_space<vmem>>, vector<1x32xf32>
    %176 = vector.broadcast %175 : vector<1x32xf32> to vector<64x32xf32>
    %177 = arith.addf %174, %176 : vector<64x32xf32>
    %178 = arith.negf %177 : vector<64x32xf32>
    %179 = math.exp %178 : vector<64x32xf32>
    %cst_99 = arith.constant 1.000000e+00 : f32
    %180 = vector.broadcast %cst_99 : f32 to vector<64x32xf32>
    %181 = arith.addf %180, %179 : vector<64x32xf32>
    %182 = arith.divf %180, %181 : vector<64x32xf32>
    %183 = arith.mulf %177, %182 : vector<64x32xf32>
    %184 = arith.truncf %183 : vector<64x32xf32> to vector<64x32xbf16>
    %c15 = arith.constant 15 : index
    %c0_100 = arith.constant 0 : index
    %c0_101 = arith.constant 0 : index
    %185 = vector.load %arg8[%c15, %c0_100, %c0_101] : memref<18x32x32xbf16, #tpu.memory_space<vmem>>, vector<1x32x32xbf16>
    %186 = vector.shape_cast %185 : vector<1x32x32xbf16> to vector<32x32xbf16>
    %cst_102 = arith.constant dense<0.000000e+00> : vector<64x32xf32>
    %187 = tpu.matmul %184, %186, %cst_102 {dimension_numbers = #tpu.dot_dimension_numbers<[1], [0], [0], [1], [0, 0, 1, 1], [], []>} : vector<64x32xbf16>, vector<32x32xbf16>, vector<64x32xf32> -> vector<64x32xf32>
    %188 = arith.addf %116, %187 : vector<64x32xf32>
    %c10_103 = arith.constant 10 : index
    %c0_104 = arith.constant 0 : index
    %189 = vector.load %arg9[%c10_103, %c0_104] : memref<12x32xf32, #tpu.memory_space<vmem>>, vector<1x32xf32>
    %190 = vector.broadcast %189 : vector<1x32xf32> to vector<64x32xf32>
    %191 = arith.addf %188, %190 : vector<64x32xf32>
    %192 = arith.truncf %191 : vector<64x32xf32> to vector<64x32xbf16>
    %c1_105 = arith.constant 1 : index
    %c0_106 = arith.constant 0 : index
    %c0_107 = arith.constant 0 : index
    %193 = vector.load %arg8[%c1_105, %c0_106, %c0_107] : memref<18x32x32xbf16, #tpu.memory_space<vmem>>, vector<1x32x32xbf16>
    %194 = vector.shape_cast %193 : vector<1x32x32xbf16> to vector<32x32xbf16>
    %cst_108 = arith.constant dense<0.000000e+00> : vector<64x32xf32>
    %195 = tpu.matmul %192, %194, %cst_108 {dimension_numbers = #tpu.dot_dimension_numbers<[1], [0], [0], [1], [0, 0, 1, 1], [], []>} : vector<64x32xbf16>, vector<32x32xbf16>, vector<64x32xf32> -> vector<64x32xf32>
    %c1_109 = arith.constant 1 : index
    %c0_110 = arith.constant 0 : index
    %196 = vector.load %arg9[%c1_109, %c0_110] : memref<12x32xf32, #tpu.memory_space<vmem>>, vector<1x32xf32>
    %197 = vector.broadcast %196 : vector<1x32xf32> to vector<64x32xf32>
    %198 = arith.addf %195, %197 : vector<64x32xf32>
    %c0_111 = arith.constant 0 : index
    %c0_112 = arith.constant 0 : index
    %c0_113 = arith.constant 0 : index
    %199 = vector.load %arg10[%c0_111, %c0_112, %c0_113] : memref<1x64x32xf32, #tpu.memory_space<vmem>>, vector<1x64x32xf32>
    %200 = vector.shape_cast %199 : vector<1x64x32xf32> to vector<64x32xf32>
    %201 = vector.shape_cast %198 : vector<64x32xf32> to vector<1x64x32xf32>
    tpu.vector_store %arg10[%c0_111, %c0_112, %c0_113], %201 {strides = array<i32>} : memref<1x64x32xf32, #tpu.memory_space<vmem>>, vector<1x64x32xf32>,
    return
  }
  func.func @transform_0(%arg0: i32) -> (i32, i32, i32) {
    %c0_i32 = arith.constant 0 : i32
    %c0_i32_0 = arith.constant 0 : i32
    %c0_i32_1 = arith.constant 0 : i32
    return %arg0, %c0_i32, %c0_i32_0 : i32, i32, i32
  }
  func.func @transform_1(%arg0: i32) -> (i32, i32, i32) {
    %c0_i32 = arith.constant 0 : i32
    %c0_i32_0 = arith.constant 0 : i32
    %c0_i32_1 = arith.constant 0 : i32
    return %arg0, %c0_i32, %c0_i32_0 : i32, i32, i32
  }
  func.func @transform_2(%arg0: i32) -> (i32, i32, i32) {
    %c0_i32 = arith.constant 0 : i32
    %c0_i32_0 = arith.constant 0 : i32
    %c0_i32_1 = arith.constant 0 : i32
    return %arg0, %c0_i32, %c0_i32_0 : i32, i32, i32
  }
  func.func @transform_3(%arg0: i32) -> (i32, i32, i32) {
    %c0_i32 = arith.constant 0 : i32
    %c0_i32_0 = arith.constant 0 : i32
    %c0_i32_1 = arith.constant 0 : i32
    return %arg0, %c0_i32, %c0_i32_0 : i32, i32, i32
  }
  func.func @transform_4(%arg0: i32) -> (i32, i32, i32) {
    %c0_i32 = arith.constant 0 : i32
    %c0_i32_0 = arith.constant 0 : i32
    %c0_i32_1 = arith.constant 0 : i32
    return %arg0, %c0_i32, %c0_i32_0 : i32, i32, i32
  }
  func.func @transform_5(%arg0: i32) -> (i32, i32, i32) {
    %c0_i32 = arith.constant 0 : i32
    %c0_i32_0 = arith.constant 0 : i32
    %c0_i32_1 = arith.constant 0 : i32
    return %arg0, %c0_i32, %c0_i32_0 : i32, i32, i32
  }
  func.func @transform_6(%arg0: i32) -> (i32, i32, i32, i32) {
    %c0_i32 = arith.constant 0 : i32
    %c0_i32_0 = arith.constant 0 : i32
    %c0_i32_1 = arith.constant 0 : i32
    %c0_i32_2 = arith.constant 0 : i32
    return %arg0, %c0_i32, %c0_i32_0, %c0_i32_1 : i32, i32, i32, i32
  }
  func.func @transform_7(%arg0: i32) -> (i32, i32, i32) {
    %c0_i32 = arith.constant 0 : i32
    %c0_i32_0 = arith.constant 0 : i32
    %c0_i32_1 = arith.constant 0 : i32
    %c0_i32_2 = arith.constant 0 : i32
    return %c0_i32, %c0_i32_0, %c0_i32_1 : i32, i32, i32
  }
  func.func @transform_8(%arg0: i32) -> (i32, i32) {
    %c0_i32 = arith.constant 0 : i32
    %c0_i32_0 = arith.constant 0 : i32
    %c0_i32_1 = arith.constant 0 : i32
    return %c0_i32, %c0_i32_0 : i32, i32
  }
  func.func @transform_9(%arg0: i32) -> (i32, i32, i32) {
    %c0_i32 = arith.constant 0 : i32
    %c0_i32_0 = arith.constant 0 : i32
    %c0_i32_1 = arith.constant 0 : i32
    return %arg0, %c0_i32, %c0_i32_0 : i32, i32, i32
  }
}

</mosaic_0001>

<bundles_post_ra>
// kernel: tpu_custom_call.1
= control target key start
LH: loop header
LB: loop body
LE: loop exit
PB: predicated region body
PF: predicated region fallthrough
CT: control target
= control target key end

     0   :  { %s11433_s30 = smov 0   ;;  %s17890_s0 = inlined_call_operand.vmem [shape: f32[2,64,32], index: 0, kind: input, shape index: {}]   ;;  %s17891_s1 = inlined_call_operand.vmem [shape: f32[2,64,3], index: 1, kind: input, shape index: {}]   ;;  %s17892_s2 = inlined_call_operand.vmem [shape: f32[2,128,64], index: 2, kind: input, shape index: {}]   ;;  %s17893_s3 = inlined_call_operand.vmem [shape: f32[2,128,64], index: 3, kind: input, shape index: {}]   ;;  %s17894_s4 = inlined_call_operand.vmem [shape: f32[2,64,128], index: 4, kind: input, shape index: {}]   ;;  %s17895_s5 = inlined_call_operand.vmem [shape: f32[2,64,128], index: 5, kind: input, shape index: {}]   ;;  %s17896_s6 = inlined_call_operand.vmem [shape: f32[2,2,128,32], index: 6, kind: input, shape index: {}]   ;;  %s17897_s7 = inlined_call_operand.vmem [shape: bf16[18,32,32], index: 7, kind: input, shape index: {}]   ;;  %s17898_s8 = inlined_call_operand.vmem [shape: f32[12,32], index: 8, kind: input, shape index: {}]   ;;  %s17899_s9 = inlined_call_operand.vmem [shape: f32[2,64,32], index: 9, kind: output, shape index: {}]  }
   0x1 LB: > { %s10475_s10 = sadd.s32 4294967295, %s11378_s30   ;;  %p10479_p0 = scmp.ge.s32.totalorder %s11378_s30, 1  ;;  %s11378_s30 = sphi %s11433_s30, %s19_s30  }
   0x2   : > { %p347_p1 = scmp.lt.s32.totalorder %s11378_s30, 3 }
   0x4   : > { %p348_p2 = pnand %p10479_p0, %p347_p1 }
   0x6   : > { %351 = sbr.rel (%p348_p2) target bundleno = 4043 (0xfcb), region = 56 }
   0xb   : > { %v10887_v0 = vld [vmem:[%s17897_s7 + $0x8] sm:$0xff]  ;;  %p413_p3 = scmp.lt.s32.totalorder %s10475_s10, 1  ;;  %v10886_v1 = vld [vmem:[%s17897_s7] sm:$0xff]  ;;  %vm18334_vm0 = vcmask 261120   ;;  %vm706_vm1 = vcmask 523264   ;;  %s11381_s23 = smov 127  }
   0xc   : > { %567 = vmatpush.bf16.msra.mxu0 %v10887_v0 }
   0xd   : > { %s19360_s10 = smov (!%p413_p3, %s10475_s10), 1 }
   0xe   : > { %s11450_s15 = sshll.u32 %s19360_s10, 6  ;;  %s10880_s22 = sshll.u32 %s19360_s10, 7 }
   0xf   : > { %s11456_s18 = scalar_lea.vmem %s17890_s0, %s11450_s15  ;;  %s11467_s21 = scalar_lea.vmem %s17891_s1, %s11450_s15 }
  0x10   : > { %568 = vmatpush.bf16.msra.mxu0 %v10886_v1  ;;  %v518_v2 = vld [vmem:[%s11456_s18] sm:$0xff]  ;;  %v519_v3 = vld [vmem:[%s11456_s18 + $0x8] sm:$0xff]  ;;  %v520_v5 = vld [vmem:[%s11456_s18 + $0x10] sm:$0xff]  ;;  %s11562_s25 = scalar_lea.vmem %s17892_s2, %s10880_s22  ;;  %s11567_s28 = scalar_lea.vmem %s17893_s3, %s10880_s22 }
  0x11   : > { %v526_v4 = vpack.c.bf16 %v519_v3, %v518_v2  ;;  %v521_v6 = vld [vmem:[%s11456_s18 + $0x18] sm:$0xff]  ;;  %v596_v9 = vld [vmem:[%s11467_s21 + $0x30] sm:$0xff]  ;;  %v595_v10 = vld [vmem:[%s11467_s21 + $0x28] sm:$0xff]  ;;  %s11380_s22 = smov 126   ;;  %s10884_s24 = sshll.u32 %s19360_s10, 8 }
  0x12   : > { %v527_v7 = vpack.c.bf16 %v521_v6, %v520_v5  ;;  %v597_v8 = vld [vmem:[%s11467_s21 + $0x38] sm:$0xff]  ;;  %v11475_v12 = vand.u32 4294901760, %v596_v9  ;;  %v11477_v13 = vand.u32 4294901760, %v595_v10  ;;  %v594_v14 = vld [vmem:[%s11467_s21 + $0x20] sm:$0xff]  ;;  %v592_v16 = vld [vmem:[%s11467_s21 + $0x10] sm:$0xff]  ;;  %s13698_s27 = scalar_lea.vmem %s17896_s6, %s10884_s24  ;;  %s14665_s13 = scalar_lea.vmem %s17895_s5, %s11450_s15 }
  0x13   : > { %10504 = vmatmul.msk.bf16.vlgmr.msra.gmra.mxu0 %vm18334_vm0, %v526_v4  ;;  %v11473_v11 = vand.u32 4294901760, %v597_v8  ;;  %v593_v15 = vld [vmem:[%s11467_s21 + $0x18] sm:$0xff]  ;;  %v11482_v17 = vand.u32 4294901760, %v594_v14  ;;  %v11486_v19 = vand.u32 4294901760, %v592_v16  ;;  %v591_v20 = vld [vmem:[%s11467_s21 + $0x8] sm:$0xff]  ;;  %v590_v21 = vld [vmem:[%s11467_s21] sm:$0xff]  ;;  %s15024_s17 = scalar_lea.vmem %s17894_s4, %s11450_s15  ;;  %s452_s24 = scalar_lea.vmem %s17899_s9, %s11450_s15 }
  0x14   : > { %v11484_v18 = vand.u32 4294901760, %v593_v15  ;;  %v11494_v23 = vsub.f32 %v596_v9, %v11475_v12  ;;  %v11497_v24 = vsub.f32 %v595_v10, %v11477_v13  ;;  %v11499_v25 = vand.u32 4294901760, %v591_v20  ;;  %v522_v40 = vld [vmem:[%s11456_s18 + $0x20] sm:$0xff]  ;;  %v523_v41 = vld [vmem:[%s11456_s18 + $0x28] sm:$0xff]  ;;  %v524_v59 = vld [vmem:[%s11456_s18 + $0x30] sm:$0xff] }
  0x15   : > { %v11491_v22 = vsub.f32 %v597_v8, %v11473_v11  ;;  %v11502_v26 = vsub.f32 %v594_v14, %v11482_v17  ;;  %v11508_v28 = vsub.f32 %v592_v16, %v11486_v19  ;;  %v11513_v32 = vand.u32 4294901760, %v590_v21  ;;  %v525_v60 = vld [vmem:[%s11456_s18 + $0x38] sm:$0xff]  ;;  %v454_v62 = vld [vmem:[%s11562_s25] sm:$0xff]  ;;  %v455_v2 = vld [vmem:[%s11562_s25 + $0x8] sm:$0xff] }
  0x16   : > { %v11505_v27 = vsub.f32 %v593_v15, %v11484_v18  ;;  %v924_v30 = vand.u32 4294901760, %v11494_v23  ;;  %v17905_v31 = vand.u32 4294901760, %v11497_v24  ;;  %v11517_v34 = vsub.f32 %v591_v20, %v11499_v25  ;;  %v11573_v63 = vld [vmem:[%s11567_s28] sm:$0xff]  ;;  %v11585_v3 = vld [vmem:[%s11567_s28 + $0x8] sm:$0xff]  ;;  %v11597_v8 = vld [vmem:[%s11567_s28 + $0x10] sm:$0xff] }
  0x17   : > { %v918_v29 = vand.u32 4294901760, %v11491_v22  ;;  %v17904_v33 = vand.u32 4294901760, %v11502_v26  ;;  %v17902_v39 = vand.u32 4294901760, %v11508_v28  ;;  %v11536_v45 = vsub.f32 %v590_v21, %v11513_v32  ;;  %v457_v16 = vld [vmem:[%s11562_s25 + $0x18] sm:$0xff] }
  0x18   : > { %v925_v36 = vsub.f32 %v11494_v23, %v924_v30  ;;  %v931_v37 = vsub.f32 %v11497_v24, %v17905_v31  ;;  %v17903_v38 = vand.u32 4294901760, %v11505_v27  ;;  %v17901_v48 = vand.u32 4294901760, %v11517_v34  ;;  %v11613_v20 = vld [vmem:[%s11567_s28 + $0x18] sm:$0xff] }
  0x19   : > { %v919_v35 = vsub.f32 %v11491_v22, %v918_v29  ;;  %v937_v44 = vsub.f32 %v11502_v26, %v17904_v33  ;;  %v528_v49 = vpack.c.bf16 %v523_v41, %v522_v40  ;;  %v949_v51 = vsub.f32 %v11508_v28, %v17902_v39  ;;  %v10891_v40 = vld [vmem:[%s17897_s7 + $0x38] sm:$0xff]  ;;  %v458_v41 = vld [vmem:[%s11562_s25 + $0x20] sm:$0xff] }
  0x1a   : > { %v926_v43 = vand.u32 4294901760, %v925_v36  ;;  %v932_v46 = vand.u32 4294901760, %v931_v37  ;;  %v943_v47 = vsub.f32 %v11505_v27, %v17903_v38  ;;  %v17900_v52 = vand.u32 4294901760, %v11536_v45  ;;  %v10889_v37 = vld [vmem:[%s17897_s7 + $0x28] sm:$0xff]  ;;  %683 = vmatpush.bf16.msra.mxu2 %v10891_v40 }
  0x1b   : > { %v920_v42 = vand.u32 4294901760, %v919_v35  ;;  %v938_v50 = vand.u32 4294901760, %v937_v44  ;;  %v955_v54 = vsub.f32 %v11517_v34, %v17901_v48  ;;  %v950_v55 = vand.u32 4294901760, %v949_v51  ;;  %637 = vmatpush.bf16.msra.mxu1 %v10889_v37  ;;  %10918 = vmatpush.bf16.msra.mxu3 %v10889_v37  ;;  %v11649_v51 = vld [vmem:[%s11567_s28 + $0x28] sm:$0xff] }
  0x1c   : > { %v944_v53 = vand.u32 4294901760, %v943_v47  ;;  %v961_v56 = vsub.f32 %v11536_v45, %v17900_v52  ;;  %v529_v61 = vpack.c.bf16 %v525_v60, %v524_v59  ;;  %v486_v0 = vsub.f32 %v454_v62, %v11573_v63  ;;  %v10888_v47 = vld [vmem:[%s17897_s7 + $0x20] sm:$0xff]  ;;  %v11736_v37 = vld [vmem:[%s11567_s28 + $0x48] sm:$0xff] }
  0x1d   : > { %921 = vmatpush.msrb.mxu0 %v920_v42  ;;  %v956_v57 = vand.u32 4294901760, %v955_v54  ;;  %v487_v5 = vsub.f32 %v455_v2, %v11585_v3  ;;  %v489_v21 = vsub.f32 %v457_v16, %v11613_v20  ;;  %v11631_v42 = vld [vmem:[%s11567_s28 + $0x20] sm:$0xff] }
  0x1e   : > { %v962_v58 = vand.u32 4294901760, %v961_v56  ;;  %v11580_v1 = vsel %vm706_vm1, %v486_v0, 0  ;;  %v462_v60 = vld [vmem:[%s11562_s25 + $0x40] sm:$0xff] }
  0x1f   : > { %927 = vmatpush.msrb.mxu0 %v926_v43  ;;  %v11588_v4 = vand.u32 4294901760, %v11580_v1  ;;  %v11593_v6 = vsel %vm706_vm1, %v487_v5, 0  ;;  %v11617_v35 = vsel %vm706_vm1, %v489_v21, 0  ;;  %v490_v43 = vsub.f32 %v458_v41, %v11631_v42  ;;  %638 = vmatpush.bf16.msra.mxu1 %v10888_v47  ;;  %v11715_v62 = vld [vmem:[%s17898_s8] ss:$0 sm:$0xff]  ;;  %v463_v21 = vld [vmem:[%s11562_s25 + $0x48] sm:$0xff] }
  0x20   : > { %v11600_v9 = vand.u32 4294901760, %v11593_v6  ;;  %v11620_v36 = vand.u32 4294901760, %v11617_v35  ;;  %10919 = vmatpush.bf16.msra.mxu3 %v10888_v47  ;;  %v495_v40 = vsub.f32 %v463_v21, %v11736_v37 }
  0x21   : > { %933 = vmatpush.msrb.mxu0 %v932_v46  ;;  %18335 = vst [vmem:[#allocation2_spill] sm:$0xff] %v11588_v4  ;;  %v11635_v44 = vsel %vm706_vm1, %v490_v43, 0  ;;  %v11811_v33 = vsub.f32 %v11580_v1, %v11588_v4 }
  0x22   : > { %18336 = vst [vmem:[#allocation3_spill] sm:$0xff] %v11600_v9  ;;  %v11638_v46 = vand.u32 4294901760, %v11635_v44  ;;  %v11744_v41 = vsel %vm706_vm1, %v495_v40, 0  ;;  %v466_v40 = vld [vmem:[%s11562_s25 + $0x60] sm:$0xff] }
  0x23   : > { %10505 = vmatmul.msk.bf16.gmra.mxu0 %vm18334_vm0, %v527_v7  ;;  %v456_v7 = vld [vmem:[%s11562_s25 + $0x10] sm:$0xff]  ;;  %18338 = vst [vmem:[#allocation5_spill] sm:$0xff] %v11620_v36  ;;  %1039 = vmatpush.msrb.mxu1 %v11491_v22  ;;  %v11747_v43 = vand.u32 4294901760, %v11744_v41  ;;  %v11835_v22 = vsub.f32 %v11593_v6, %v11600_v9 }
  0x24   : > { %939 = vmatpush.msrb.mxu0 %v938_v50  ;;  %v488_v10 = vsub.f32 %v456_v7, %v11597_v8  ;;  %18339 = vst [vmem:[#allocation6_spill] sm:$0xff] %v11638_v46  ;;  %v459_v50 = vld [vmem:[%s11562_s25 + $0x28] sm:$0xff]  ;;  %764 = vmatpush.msrb.mxu3 %v11473_v11 }
  0x25   : > { %1042 = vmatpush.msrb.mxu1 %v11494_v23  ;;  %18347 = vst [vmem:[#allocation14_spill] sm:$0xff] %v11747_v43 }
  0x26   : > { %945 = vmatpush.msrb.mxu0 %v944_v53  ;;  %v11605_v14 = vsel %vm706_vm1, %v488_v10, 0  ;;  %v491_v53 = vsub.f32 %v459_v50, %v11649_v51  ;;  %766 = vmatpush.msrb.mxu3 %v11475_v12  ;;  %v11752_v50 = vld [vmem:[%s11567_s28 + $0x50] sm:$0xff]  ;;  %18359 = vst [vmem:[#allocation26_spill] sm:$0xff] %v11811_v33 }
  0x27   : > { %v11608_v15 = vand.u32 4294901760, %v11605_v14  ;;  %1045 = vmatpush.msrb.mxu1 %v11497_v24  ;;  %18348 = vst [vmem:[#allocation15_spill] sm:$0xff] %v11752_v50 }
  0x28   : > { %951 = vmatpush.msrb.mxu0 %v950_v55  ;;  %v11657_v54 = vsel %vm706_vm1, %v491_v53, 0  ;;  %768 = vmatpush.msrb.mxu3 %v11477_v13  ;;  %18362 = vst [vmem:[#allocation28_spill] sm:$0xff] %v11835_v22 }
  0x29   : > { %18337 = vst [vmem:[#allocation4_spill] sm:$0xff] %v11608_v15  ;;  %v11662_v55 = vand.u32 4294901760, %v11657_v54  ;;  %1048 = vmatpush.msrb.mxu1 %v11502_v26 }
  0x2a   : > { %957 = vmatpush.msrb.mxu0 %v956_v57  ;;  %770 = vmatpush.msrb.mxu3 %v11482_v17 }
  0x2b   : > { %18340 = vst [vmem:[#allocation7_spill] sm:$0xff] %v11662_v55  ;;  %1051 = vmatpush.msrb.mxu1 %v11505_v27 }
  0x2c   : > { %963 = vmatpush.msrb.mxu0 %v962_v58  ;;  %772 = vmatpush.msrb.mxu3 %v11484_v18 }
  0x2d   : > { %1054 = vmatpush.msrb.mxu1 %v11508_v28 }
  0x2e   : > { %1377 = vmatpush.msra.mxu0 %v11473_v11  ;;  %774 = vmatpush.msrb.mxu3 %v11486_v19 }
  0x2f   : > { %1057 = vmatpush.msrb.mxu1 %v11517_v34 }
  0x30   : > { %1379 = vmatpush.msra.mxu0 %v11475_v12  ;;  %776 = vmatpush.msrb.mxu3 %v11499_v25 }
  0x31   : > { %1060 = vmatpush.msrb.mxu1 %v11536_v45 }
  0x32   : > { %1381 = vmatpush.msra.mxu0 %v11477_v13  ;;  %778 = vmatpush.msrb.mxu3 %v11513_v32 }
  0x33   : > { %10506 = vmatmul.msk.bf16.gmra.mxu0 %vm18334_vm0, %v528_v49  ;;  %v10890_v49 = vld [vmem:[%s17897_s7 + $0x30] sm:$0xff] }
  0x34   : > { %1383 = vmatpush.msra.mxu0 %v11482_v17  ;;  %684 = vmatpush.bf16.msra.mxu2 %v10890_v49  ;;  %v464_v49 = vld [vmem:[%s11562_s25 + $0x50] sm:$0xff] }
  0x35   : > { %v496_v53 = vsub.f32 %v464_v49, %v11752_v50 }
  0x36   : > { %1385 = vmatpush.msra.mxu0 %v11484_v18 }
  0x38   : > { %1387 = vmatpush.msra.mxu0 %v11486_v19  ;;  %1151 = vmatpush.msrb.mxu2 %v11473_v11  ;;  %v460_v11 = vld [vmem:[%s11562_s25 + $0x30] sm:$0xff] }
  0x3a   : > { %1389 = vmatpush.msra.mxu0 %v11499_v25  ;;  %1153 = vmatpush.msrb.mxu2 %v11475_v12  ;;  %v11673_v12 = vld [vmem:[%s11567_s28 + $0x30] sm:$0xff] }
  0x3b   : > { %v492_v56 = vsub.f32 %v460_v11, %v11673_v12  ;;  %v11756_v11 = vsel %vm706_vm1, %v496_v53, 0 }
  0x3c   : > { %1391 = vmatpush.msra.mxu0 %v11513_v32  ;;  %1155 = vmatpush.msrb.mxu2 %v11477_v13 }
  0x3d   : > { %v11681_v13 = vsel %vm706_vm1, %v492_v56, 0  ;;  %v11759_v56 = vand.u32 4294901760, %v11756_v11 }
  0x3e   : > { %1157 = vmatpush.msrb.mxu2 %v11482_v17  ;;  %v11686_v17 = vand.u32 4294901760, %v11681_v13 }
  0x3f   : > { %18349 = vst [vmem:[#allocation16_spill] sm:$0xff] %v11759_v56 }
  0x40   : > { %1159 = vmatpush.msrb.mxu2 %v11484_v18  ;;  %18341 = vst [vmem:[#allocation8_spill] sm:$0xff] %v11686_v17  ;;  %v461_v18 = vld [vmem:[%s11562_s25 + $0x38] sm:$0xff] }
  0x42   : > { %1161 = vmatpush.msrb.mxu2 %v11486_v19  ;;  %v11697_v19 = vld [vmem:[%s11567_s28 + $0x38] sm:$0xff] }
  0x43   : > { %10507 = vmatmul.msk.bf16.gmra.mxu0 %vm18334_vm0, %v529_v61  ;;  %v493_v57 = vsub.f32 %v461_v18, %v11697_v19 }
  0x44   : > { %1163 = vmatpush.msrb.mxu2 %v11499_v25 }
  0x45   : > { %v11701_v58 = vsel %vm706_vm1, %v493_v57, 0 }
  0x46   : > { %1165 = vmatpush.msrb.mxu2 %v11513_v32  ;;  %v11704_v25 = vand.u32 4294901760, %v11701_v58  ;;  %v11709_v32 = vld [vmem:[%s11567_s28 + $0x40] sm:$0xff] }
  0x47   : > { %v494_v61 = vsub.f32 %v462_v60, %v11709_v32 }
  0x48   : > { %18342 = vst [vmem:[#allocation9_spill] sm:$0xff] %v11704_v25 }
  0x49   : > { %v11718_v0 = vsel %vm706_vm1, %v494_v61, 0  ;;  %v465_v61 = vld [vmem:[%s11562_s25 + $0x58] sm:$0xff] }
  0x4a   : > { %v11721_v2 = vand.u32 4294901760, %v11718_v0 }
  0x4c   : > { %18343 = vst [vmem:[#allocation10_spill] sm:$0xff] %v11721_v2 }
  0x53   : > { %965 = vmatmul.f32.vlgmr.msrb.gmra.mxu0 %v11588_v4 }
  0x5b   : > { %969 = vmatmul.f32.gmra.mxu0 %v11600_v9 }
  0x63   : > { %973 = vmatmul.f32.gmra.mxu0 %v11608_v15 }
  0x6b   : > { %977 = vmatmul.f32.gmra.mxu0 %v11620_v36 }
  0x73   : > { %981 = vmatmul.f32.gmra.mxu0 %v11638_v46 }
  0x7b   : > { %985 = vmatmul.f32.gmra.mxu0 %v11662_v55 }
  0x83   : > { %989 = vmatmul.f32.gmra.mxu0 %v11686_v17 }
  0x8b   : > { %993 = vmatmul.f32.gmra.mxu0 %v11704_v25 }
  0x90   : > { %v570_v59 = vpop.f32.mrf.mxu0 }
  0x91   : > { %v11724_v7 = vadd.f32 %v11715_v62, %v570_v59 }
  0x93   : > { %18344 = vst [vmem:[#allocation11_spill] sm:$0xff] %v11724_v7  ;;  %997 = vmatmul.f32.gmra.mxu0 %v11721_v2 }
  0x98   : > { %v572_v5 = vpop.f32.mrf.mxu0 }
  0x99   : > { %v11727_v10 = vadd.f32 %v11715_v62, %v572_v5  ;;  %v11774_v5 = vld [vmem:[%s11567_s28 + $0x58] sm:$0xff] }
  0x9a   : > { %18353 = vst [vmem:[#allocation20_spill] sm:$0xff] %v11774_v5  ;;  %v497_v21 = vsub.f32 %v465_v61, %v11774_v5 }
  0x9b   : > { %18345 = vst [vmem:[#allocation12_spill] sm:$0xff] %v11727_v10  ;;  %v11732_v16 = vpack.c.bf16 %v11727_v10, %v11724_v7  ;;  %1001 = vmatmul.f32.gmra.mxu0 %v11747_v43 }
  0x9c   : > { %v11784_v49 = vsel %vm706_vm1, %v497_v21, 0 }
  0x9d   : > { %18346 = vst [vmem:[#allocation13_spill] sm:$0xff] %v11732_v16  ;;  %10520 = vmatmul.msk.bf16.vlgmr.msra.gmra.mxu1 %vm18334_vm0, %v11732_v16  ;;  %10536 = vmatmul.msk.bf16.vlgmr.msra.gmra.mxu2 %vm18334_vm0, %v11732_v16 }
  0xa0   : > { %v575_v47 = vpop.f32.mrf.mxu0 }
  0xa1   : > { %v11762_v57 = vadd.f32 %v11715_v62, %v575_v47  ;;  %v482_v47 = vld [vmem:[%s11567_s28 + $0x60] sm:$0xff] }
  0xa2   : > { %v498_v53 = vsub.f32 %v466_v40, %v482_v47  ;;  %v467_v47 = vld [vmem:[%s11562_s25 + $0x68] sm:$0xff] }
  0xa3   : > { %18350 = vst [vmem:[#allocation17_spill] sm:$0xff] %v11762_v57  ;;  %1005 = vmatmul.f32.gmra.mxu0 %v11759_v56 }
  0xa4   : > { %v11791_v61 = vsel %vm706_vm1, %v498_v53, 0  ;;  %v483_v53 = vld [vmem:[%s11567_s28 + $0x68] sm:$0xff] }
  0xa5   : > { %v11794_v48 = vand.u32 4294901760, %v11791_v61  ;;  %v499_v31 = vsub.f32 %v467_v47, %v483_v53  ;;  %v18361_v47 = vand.u32 4294901760, %v11497_v24  ;;  %v468_v53 = vld [vmem:[%s11562_s25 + $0x70] sm:$0xff]  ;;  %v18364_v24 = vand.u32 4294901760, %v11505_v27 }
  0xa7   : > { %18355 = vst [vmem:[#allocation22_spill] sm:$0xff] %v11794_v48 }
  0xa8   : > { %v577_v18 = vpop.f32.mrf.mxu0 }
  0xa9   : > { %v11765_v59 = vadd.f32 %v11715_v62, %v577_v18  ;;  %v11787_v18 = vand.u32 4294901760, %v11784_v49 }
  0xab   : > { %18351 = vst [vmem:[#allocation18_spill] sm:$0xff] %v11765_v59  ;;  %v11770_v60 = vpack.c.bf16 %v11765_v59, %v11762_v57  ;;  %1009 = vmatmul.f32.gmra.mxu0 %v11787_v18 }
  0xac   : > { %18354 = vst [vmem:[#allocation21_spill] sm:$0xff] %v11787_v18 }
  0xad   : > { %18352 = vst [vmem:[#allocation19_spill] sm:$0xff] %v11770_v60  ;;  %10521 = vmatmul.msk.bf16.gmra.mxu1 %vm18334_vm0, %v11770_v60  ;;  %10537 = vmatmul.msk.bf16.gmra.mxu2 %vm18334_vm0, %v11770_v60 }
  0xb0   : > { %v580_v52 = vpop.f32.mrf.mxu0 }
  0xb1   : > { %v11797_v38 = vadd.f32 %v11715_v62, %v580_v52 }
  0xb3   : > { %18356 = vst [vmem:[#allocation23_spill] sm:$0xff] %v11797_v38  ;;  %1013 = vmatmul.f32.gmra.mxu0 %v11794_v48 }
  0xb8   : > { %v582_v39 = vpop.f32.mrf.mxu0 }
  0xb9   : > { %v11800_v21 = vadd.f32 %v11715_v62, %v582_v39  ;;  %v11818_v39 = vsel %vm706_vm1, %v499_v31, 0  ;;  %v484_v31 = vld [vmem:[%s11567_s28 + $0x70] sm:$0xff] }
  0xba   : > { %v11824_v52 = vand.u32 4294901760, %v11818_v39 }
  0xbb   : > { %18357 = vst [vmem:[#allocation24_spill] sm:$0xff] %v11800_v21  ;;  %v11805_v40 = vpack.c.bf16 %v11800_v21, %v11797_v38  ;;  %v18363_v21 = vand.u32 4294901760, %v11502_v26  ;;  %v18366_v38 = vand.u32 4294901760, %v11508_v28  ;;  %v11869_v28 = vsub.f32 %v11605_v14, %v11608_v15 }
  0xbc   : > { %18360 = vst [vmem:[#allocation27_spill] sm:$0xff] %v11824_v52  ;;  %1017 = vmatmul.f32.gmra.mxu0 %v11824_v52  ;;  %v11886_v14 = vand.u32 4294901760, %v11811_v33 }
  0xbd   : > { %18358 = vst [vmem:[#allocation25_spill] sm:$0xff] %v11805_v40  ;;  %10522 = vmatmul.msk.bf16.vlgmr.msra.gmra.mxu3 %vm18334_vm0, %v11805_v40  ;;  %10538 = vmatmul.msk.bf16.gmra.mxu2 %vm18334_vm0, %v11805_v40 }
  0xbe   : > { %1063 = vmatmul.f32.vlgmr.msrb.gmra.mxu1 %v11811_v33  ;;  %1274 = vmatpush.msra.mxu3 %v918_v29  ;;  %v500_v29 = vsub.f32 %v468_v53, %v484_v31  ;;  %v469_v53 = vld [vmem:[%s11562_s25 + $0x78] sm:$0xff]  ;;  %18372 = vst [vmem:[#allocation34_spill] sm:$0xff] %v11869_v28 }
  0xbf   : > { %v11865_v31 = vld [vmem:[%s11567_s28 + $0x78] sm:$0xff]  ;;  %18375 = vst [vmem:[#allocation36_spill] sm:$0xff] %v11886_v14 }
  0xc0   : > { %v585_v1 = vpop.f32.mrf.mxu0  ;;  %1278 = vmatpush.msra.mxu3 %v924_v30  ;;  %v11840_v23 = vsel %vm706_vm1, %v500_v29, 0  ;;  %18371 = vst [vmem:[#allocation33_spill] sm:$0xff] %v11865_v31  ;;  %v782_v29 = vsub.f32 %v11811_v33, %v11886_v14 }
  0xc1   : > { %v11846_v30 = vand.u32 4294901760, %v11840_v23  ;;  %v11851_v6 = vadd.f32 %v11715_v62, %v585_v1 }
  0xc2   : > { %1282 = vmatpush.msra.mxu3 %v18361_v47 }
  0xc3   : > { %18365 = vst [vmem:[#allocation29_spill] sm:$0xff] %v11846_v30 }
  0xc4   : > { %1286 = vmatpush.msra.mxu3 %v18363_v21  ;;  %18367 = vst [vmem:[#allocation30_spill] sm:$0xff] %v11851_v6  ;;  %1021 = vmatmul.f32.gmra.mxu0 %v11846_v30  ;;  %v18369_v21 = vand.u32 4294901760, %v11517_v34 }
  0xc6   : > { %1068 = vmatmul.f32.gmra.mxu1 %v11835_v22  ;;  %1290 = vmatpush.msra.mxu3 %v18364_v24  ;;  %v11896_v24 = vand.u32 4294901760, %v782_v29 }
  0xc8   : > { %v587_v47 = vpop.f32.mrf.mxu0  ;;  %1294 = vmatpush.msra.mxu3 %v18366_v38  ;;  %v501_v38 = vsub.f32 %v469_v53, %v11865_v31  ;;  %18377 = vst [vmem:[#allocation38_spill] sm:$0xff] %v11896_v24 }
  0xc9   : > { %v11854_v26 = vadd.f32 %v11715_v62, %v587_v47  ;;  %v18373_v62 = vand.u32 4294901760, %v11536_v45  ;;  %v11891_v45 = vsub.f32 %v11617_v35, %v11620_v36  ;;  %v11899_v47 = vand.u32 4294901760, %v11835_v22 }
  0xca   : > { %1298 = vmatpush.msra.mxu3 %v18369_v21  ;;  %v11879_v34 = vsel %vm706_vm1, %v501_v38, 0  ;;  %v11904_v21 = vsub.f32 %v11635_v44, %v11638_v46  ;;  %v11914_v38 = vand.u32 4294901760, %v11869_v28  ;;  %v11919_v44 = vsub.f32 %v11657_v54, %v11662_v55 }
  0xcb   : > { %18368 = vst [vmem:[#allocation31_spill] sm:$0xff] %v11854_v26  ;;  %v11861_v27 = vpack.c.bf16 %v11854_v26, %v11851_v6  ;;  %v11883_v1 = vand.u32 4294901760, %v11879_v34  ;;  %v790_v35 = vsub.f32 %v11835_v22, %v11899_v47  ;;  %v11934_v54 = vsub.f32 %v11681_v13, %v11686_v17 }
  0xcc   : > { %1302 = vmatpush.msra.mxu3 %v18373_v62  ;;  %18376 = vst [vmem:[#allocation37_spill] sm:$0xff] %v11891_v45  ;;  %v798_v62 = vsub.f32 %v11869_v28, %v11914_v38  ;;  %v11949_v13 = vsub.f32 %v11701_v58, %v11704_v25  ;;  %v11964_v58 = vsub.f32 %v11718_v0, %v11721_v2 }
  0xcd   : > { %18370 = vst [vmem:[#allocation32_spill] sm:$0xff] %v11861_v27  ;;  %10523 = vmatmul.msk.bf16.gmra.mxu3 %vm18334_vm0, %v11861_v27  ;;  %10539 = vmatmul.msk.bf16.gmra.mxu2 %vm18334_vm0, %v11861_v27  ;;  %v11911_v53 = vand.u32 4294901760, %v790_v35  ;;  %v11929_v35 = vand.u32 4294901760, %v11891_v45  ;;  %v11979_v0 = vsub.f32 %v11744_v41, %v11747_v43  ;;  %v11994_v41 = vsub.f32 %v11756_v11, %v11759_v56 }
  0xce   : > { %1073 = vmatmul.f32.gmra.mxu1 %v11869_v28  ;;  %18374 = vst [vmem:[#allocation35_spill] sm:$0xff] %v11883_v1  ;;  %1025 = vmatmul.f32.gmra.mxu0 %v11883_v1  ;;  %v11926_v29 = vand.u32 4294901760, %v798_v62  ;;  %v12009_v11 = vsub.f32 %v11784_v49, %v11787_v18  ;;  %v12026_v49 = vsub.f32 %v11791_v61, %v11794_v48 }
  0xcf   : > { %18378 = vst [vmem:[#allocation39_spill] sm:$0xff] %v11899_v47  ;;  %v806_v28 = vsub.f32 %v11891_v45, %v11929_v35  ;;  %v12087_v7 = vsub.f32 %v11879_v34, %v11883_v1 }
  0xd0   : > { %18379 = vst [vmem:[#allocation40_spill] sm:$0xff] %v11904_v21  ;;  %v12021_v22 = vpop.f32.mrf.mxu0  ;;  %v12059_v6 = vand.u32 4294901760, %v12009_v11  ;;  %v12080_v10 = vand.u32 4294901760, %v12026_v49 }
  0xd1   : > { %18380 = vst [vmem:[#allocation41_spill] sm:$0xff] %v11911_v53  ;;  %v11941_v62 = vand.u32 4294901760, %v806_v28 }
  0xd2   : > { %18381 = vst [vmem:[#allocation42_spill] sm:$0xff] %v11914_v38 }
  0xd3   : > { %18382 = vst [vmem:[#allocation43_spill] sm:$0xff] %v11919_v44 }
  0xd4   : > { %18383 = vst [vmem:[#allocation44_spill] sm:$0xff] %v11926_v29 }
  0xd5   : > { %18384 = vst [vmem:[#allocation45_spill] sm:$0xff] %v11929_v35 }
  0xd6   : > { %1078 = vmatmul.f32.gmra.mxu1 %v11891_v45  ;;  %1393 = vmatmul.f32.vlgmr.msra.gmra.mxu0 %v11588_v4  ;;  %18385 = vst [vmem:[#allocation46_spill] sm:$0xff] %v11934_v54 }
  0xd7   : > { %18386 = vst [vmem:[#allocation47_spill] sm:$0xff] %v11941_v62 }
  0xd8   : > { %18388 = vst [vmem:[#allocation49_spill] sm:$0xff] %v11949_v13  ;;  %v12040_v33 = vpop.f32.mrf.mxu0 }
  0xd9   : > { %18391 = vst [vmem:[#allocation52_spill] sm:$0xff] %v11964_v58 }
  0xda   : > { %18394 = vst [vmem:[#allocation55_spill] sm:$0xff] %v11979_v0 }
  0xdb   : > { %18397 = vst [vmem:[#allocation58_spill] sm:$0xff] %v11994_v41 }
  0xdc   : > { %18400 = vst [vmem:[#allocation61_spill] sm:$0xff] %v12009_v11 }
  0xdd   : > { %784 = vmatmul.f32.vlgmr.msrb.gmra.mxu3 %v11896_v24  ;;  %1169 = vmatmul.f32.vlgmr.msrb.gmra.mxu2 %v11886_v14  ;;  %18403 = vst [vmem:[#allocation64_spill] sm:$0xff] %v12021_v22  ;;  %v12038_v14 = vand.u32 4294901760, %v11994_v41 }
  0xde   : > { %1083 = vmatmul.f32.gmra.mxu1 %v11904_v21  ;;  %1397 = vmatmul.f32.gmra.mxu0 %v11600_v9  ;;  %18404 = vst [vmem:[#allocation65_spill] sm:$0xff] %v12026_v49 }
  0xdf   : > { %18406 = vst [vmem:[#allocation67_spill] sm:$0xff] %v12038_v14 }
  0xe0   : > { %18407 = vst [vmem:[#allocation68_spill] sm:$0xff] %v12040_v33  ;;  %v12061_v59 = vpop.f32.mrf.mxu0 }
  0xe1   : > { %18410 = vst [vmem:[#allocation71_spill] sm:$0xff] %v12059_v6 }
  0xe2   : > { %18411 = vst [vmem:[#allocation72_spill] sm:$0xff] %v12061_v59 }
  0xe3   : > { %18414 = vst [vmem:[#allocation75_spill] sm:$0xff] %v12080_v10 }
  0xe4   : > { %18416 = vst [vmem:[#allocation77_spill] sm:$0xff] %v12087_v7 }
  0xe5   : > { %792 = vmatmul.f32.gmra.mxu3 %v11911_v53  ;;  %1175 = vmatmul.f32.gmra.mxu2 %v11899_v47  ;;  %v11944_v47 = vand.u32 4294901760, %v11904_v21 }
  0xe6   : > { %1088 = vmatmul.f32.gmra.mxu1 %v11919_v44  ;;  %1401 = vmatmul.f32.gmra.mxu0 %v11608_v15 }
  0xe7   : > { %18387 = vst [vmem:[#allocation48_spill] sm:$0xff] %v11944_v47  ;;  %v814_v45 = vsub.f32 %v11904_v21, %v11944_v47 }
  0xe9   : > { %v11956_v28 = vand.u32 4294901760, %v814_v45 }
  0xeb   : > { %18389 = vst [vmem:[#allocation50_spill] sm:$0xff] %v11956_v28 }
  0xed   : > { %800 = vmatmul.f32.gmra.mxu3 %v11926_v29  ;;  %1181 = vmatmul.f32.gmra.mxu2 %v11914_v38  ;;  %v11959_v38 = vand.u32 4294901760, %v11919_v44 }
  0xee   : > { %1093 = vmatmul.f32.gmra.mxu1 %v11934_v54  ;;  %1405 = vmatmul.f32.gmra.mxu0 %v11620_v36 }
  0xef   : > { %18390 = vst [vmem:[#allocation51_spill] sm:$0xff] %v11959_v38  ;;  %v822_v21 = vsub.f32 %v11919_v44, %v11959_v38 }
  0xf1   : > { %v11971_v45 = vand.u32 4294901760, %v822_v21 }
  0xf3   : > { %18392 = vst [vmem:[#allocation53_spill] sm:$0xff] %v11971_v45 }
  0xf5   : > { %808 = vmatmul.f32.gmra.mxu3 %v11941_v62  ;;  %1187 = vmatmul.f32.gmra.mxu2 %v11929_v35  ;;  %v11974_v35 = vand.u32 4294901760, %v11934_v54 }
  0xf6   : > { %1098 = vmatmul.f32.gmra.mxu1 %v11949_v13  ;;  %1409 = vmatmul.f32.gmra.mxu0 %v11638_v46 }
  0xf7   : > { %18393 = vst [vmem:[#allocation54_spill] sm:$0xff] %v11974_v35  ;;  %v830_v44 = vsub.f32 %v11934_v54, %v11974_v35 }
  0xf9   : > { %v11986_v21 = vand.u32 4294901760, %v830_v44 }
  0xfb   : > { %18395 = vst [vmem:[#allocation56_spill] sm:$0xff] %v11986_v21 }
  0xfd   : > { %816 = vmatmul.f32.gmra.mxu3 %v11956_v28  ;;  %1193 = vmatmul.f32.gmra.mxu2 %v11944_v47  ;;  %v11989_v47 = vand.u32 4294901760, %v11949_v13 }
  0xfe   : > { %1103 = vmatmul.f32.gmra.mxu1 %v11964_v58  ;;  %1413 = vmatmul.f32.gmra.mxu0 %v11662_v55 }
  0xff   : > { %18396 = vst [vmem:[#allocation57_spill] sm:$0xff] %v11989_v47  ;;  %v838_v54 = vsub.f32 %v11949_v13, %v11989_v47 }
 0x101   : > { %v12001_v44 = vand.u32 4294901760, %v838_v54 }
 0x103   : > { %18398 = vst [vmem:[#allocation59_spill] sm:$0xff] %v12001_v44 }
 0x105   : > { %824 = vmatmul.f32.gmra.mxu3 %v11971_v45  ;;  %1199 = vmatmul.f32.gmra.mxu2 %v11959_v38  ;;  %v12004_v38 = vand.u32 4294901760, %v11964_v58 }
 0x106   : > { %1108 = vmatmul.f32.gmra.mxu1 %v11979_v0  ;;  %1417 = vmatmul.f32.gmra.mxu0 %v11686_v17 }
 0x107   : > { %18399 = vst [vmem:[#allocation60_spill] sm:$0xff] %v12004_v38  ;;  %v846_v13 = vsub.f32 %v11964_v58, %v12004_v38 }
 0x109   : > { %v12016_v54 = vand.u32 4294901760, %v846_v13 }
 0x10b   : > { %18401 = vst [vmem:[#allocation62_spill] sm:$0xff] %v12016_v54 }
 0x10d   : > { %832 = vmatmul.f32.gmra.mxu3 %v11986_v21  ;;  %1205 = vmatmul.f32.gmra.mxu2 %v11974_v35  ;;  %v12019_v35 = vand.u32 4294901760, %v11979_v0 }
 0x10e   : > { %1113 = vmatmul.f32.gmra.mxu1 %v11994_v41  ;;  %1421 = vmatmul.f32.gmra.mxu0 %v11704_v25 }
 0x10f   : > { %18402 = vst [vmem:[#allocation63_spill] sm:$0xff] %v12019_v35  ;;  %v854_v58 = vsub.f32 %v11979_v0, %v12019_v35 }
 0x115   : > { %840 = vmatmul.f32.gmra.mxu3 %v12001_v44  ;;  %1211 = vmatmul.f32.gmra.mxu2 %v11989_v47  ;;  %v12035_v47 = vand.u32 4294901760, %v854_v58  ;;  %v862_v58 = vsub.f32 %v11994_v41, %v12038_v14 }
 0x116   : > { %1118 = vmatmul.f32.gmra.mxu1 %v12009_v11  ;;  %1425 = vmatmul.f32.gmra.mxu0 %v11721_v2 }
 0x117   : > { %18405 = vst [vmem:[#allocation66_spill] sm:$0xff] %v12035_v47  ;;  %v12056_v26 = vand.u32 4294901760, %v862_v58  ;;  %v870_v58 = vsub.f32 %v12009_v11, %v12059_v6  ;;  %v878_v11 = vsub.f32 %v12026_v49, %v12080_v10 }
 0x119   : > { %18409 = vst [vmem:[#allocation70_spill] sm:$0xff] %v12056_v26  ;;  %v12077_v57 = vand.u32 4294901760, %v870_v58 }
 0x11a   : > { %v12043_v61 = vpop.f32.mrf.mxu1 }
 0x11b   : > { %18413 = vst [vmem:[#allocation74_spill] sm:$0xff] %v12077_v57 }
 0x11d   : > { %848 = vmatmul.f32.gmra.mxu3 %v12016_v54  ;;  %1217 = vmatmul.f32.gmra.mxu2 %v12004_v38  ;;  %v12047_v38 = vsub.f32 %v11818_v39, %v11824_v52  ;;  %v12066_v39 = vsub.f32 %v11840_v23, %v11846_v30  ;;  %v12082_v23 = vpop.f32.mrf.mxu0 }
 0x11e   : > { %1123 = vmatmul.f32.gmra.mxu1 %v12026_v49  ;;  %1429 = vmatmul.f32.gmra.mxu0 %v11747_v43  ;;  %18415 = vst [vmem:[#allocation76_spill] sm:$0xff] %v12082_v23  ;;  %v1621_v23 = vsel %vm706_vm1, %v11585_v3, 0 }
 0x11f   : > { %18408 = vst [vmem:[#allocation69_spill] sm:$0xff] %v12047_v38  ;;  %v12117_v44 = vand.u32 4294901760, %v12066_v39 }
 0x120   : > { %v12033_v13 = vpop.f32.mrf.mxu2  ;;  %18412 = vst [vmem:[#allocation73_spill] sm:$0xff] %v12066_v39 }
 0x121   : > { %18421 = vst [vmem:[#allocation82_spill] sm:$0xff] %v12117_v44 }
 0x125   : > { %856 = vmatmul.f32.gmra.mxu3 %v12035_v47  ;;  %1223 = vmatmul.f32.gmra.mxu2 %v12019_v35  ;;  %v12068_v35 = vpop.f32.mrf.mxu1  ;;  %v12101_v47 = vand.u32 4294901760, %v12047_v38  ;;  %v12103_v34 = vpop.f32.mrf.mxu0 }
 0x126   : > { %1128 = vmatmul.f32.gmra.mxu1 %v12047_v38  ;;  %1433 = vmatmul.f32.gmra.mxu0 %v11759_v56  ;;  %18419 = vst [vmem:[#allocation80_spill] sm:$0xff] %v12103_v34 }
 0x127   : > { %18418 = vst [vmem:[#allocation79_spill] sm:$0xff] %v12101_v47  ;;  %v886_v49 = vsub.f32 %v12047_v38, %v12101_v47  ;;  %v894_v38 = vsub.f32 %v12066_v39, %v12117_v44 }
 0x128   : > { %v12054_v0 = vpop.f32.mrf.mxu2 }
 0x129   : > { %v12128_v45 = vand.u32 4294901760, %v894_v38  ;;  %v12219_v59 = vand.u32 4294901760, %v12054_v0 }
 0x12b   : > { %18423 = vst [vmem:[#allocation84_spill] sm:$0xff] %v12128_v45  ;;  %v12263_v31 = vsub.f32 %v12054_v0, %v12219_v59 }
 0x12d   : > { %864 = vmatmul.f32.gmra.mxu3 %v12056_v26  ;;  %1229 = vmatmul.f32.gmra.mxu2 %v12038_v14  ;;  %v12094_v58 = vpop.f32.mrf.mxu1  ;;  %v12098_v26 = vand.u32 4294901760, %v878_v11  ;;  %v12114_v11 = vand.u32 4294901760, %v886_v49  ;;  %v12119_v21 = vpop.f32.mrf.mxu0  ;;  %v12131_v49 = vand.u32 4294901760, %v12087_v7 }
 0x12e   : > { %1133 = vmatmul.f32.gmra.mxu1 %v12066_v39  ;;  %1437 = vmatmul.f32.gmra.mxu0 %v11787_v18  ;;  %18422 = vst [vmem:[#allocation83_spill] sm:$0xff] %v12119_v21 }
 0x12f   : > { %18417 = vst [vmem:[#allocation78_spill] sm:$0xff] %v12098_v26  ;;  %v902_v39 = vsub.f32 %v12087_v7, %v12131_v49 }
 0x130   : > { %v12075_v41 = vpop.f32.mrf.mxu2  ;;  %18420 = vst [vmem:[#allocation81_spill] sm:$0xff] %v12114_v11 }
 0x131   : > { %18424 = vst [vmem:[#allocation85_spill] sm:$0xff] %v12131_v49  ;;  %v12142_v38 = vand.u32 4294901760, %v902_v39 }
 0x133   : > { %18427 = vst [vmem:[#allocation88_spill] sm:$0xff] %v12142_v38 }
 0x135   : > { %872 = vmatmul.f32.gmra.mxu3 %v12077_v57  ;;  %1235 = vmatmul.f32.gmra.mxu2 %v12059_v6  ;;  %v12112_v54 = vpop.f32.mrf.mxu1  ;;  %v12135_v62 = vpop.f32.mrf.mxu0 }
 0x136   : > { %1138 = vmatmul.f32.gmra.mxu1 %v12087_v7  ;;  %1441 = vmatmul.f32.gmra.mxu0 %v11794_v48  ;;  %18426 = vst [vmem:[#allocation87_spill] sm:$0xff] %v12135_v62 }
 0x138   : > { %v12096_v14 = vpop.f32.mrf.mxu2 }
 0x13d   : > { %880 = vmatmul.f32.gmra.mxu3 %v12098_v26  ;;  %1241 = vmatmul.f32.gmra.mxu2 %v12080_v10  ;;  %v12133_v28 = vpop.f32.mrf.mxu1  ;;  %v12146_v53 = vpop.f32.mrf.mxu0 }
 0x13e   : > { %1445 = vmatmul.f32.gmra.mxu0 %v11824_v52  ;;  %18425 = vst [vmem:[#allocation86_spill] sm:$0xff] %v12133_v28 }
 0x13f   : > { %18429 = vst [vmem:[#allocation90_spill] sm:$0xff] %v12146_v53 }
 0x140   : > { %v12110_v6 = vpop.f32.mrf.mxu3  ;;  %v696_v57 = vpop.f32.mrf.mxu2 }
 0x141   : > { %v12159_v39 = vand.u32 4294901760, %v696_v57  ;;  %v12234_v28 = vand.u32 4294901760, %v12110_v6 }
 0x143   : > { %v12183_v62 = vsub.f32 %v696_v57, %v12159_v39 }
 0x145   : > { %888 = vmatmul.f32.gmra.mxu3 %v12114_v11  ;;  %1247 = vmatmul.f32.gmra.mxu2 %v12101_v47  ;;  %v12144_v29 = vpop.f32.mrf.mxu1 }
 0x146   : > { %1449 = vmatmul.f32.gmra.mxu0 %v11846_v30  ;;  %18428 = vst [vmem:[#allocation89_spill] sm:$0xff] %v12144_v29 }
 0x148   : > { %v12126_v10 = vpop.f32.mrf.mxu3  ;;  %v698_v26 = vpop.f32.mrf.mxu2 }
 0x149   : > { %v12155_v7 = vand.u32 4294901760, %v698_v26 }
 0x14b   : > { %v12167_v53 = vsub.f32 %v698_v26, %v12155_v7 }
 0x14d   : > { %896 = vmatmul.f32.gmra.mxu3 %v12128_v45  ;;  %1253 = vmatmul.f32.gmra.mxu2 %v12117_v44  ;;  %v1618_v45 = vsel %vm706_vm1, %v11573_v63, 0 }
 0x14e   : > { %1453 = vmatmul.f32.gmra.mxu0 %v11883_v1  ;;  %v12157_v44 = vand.u32 4294901760, %v1618_v45  ;;  %v12231_v1 = vand.u32 4294901760, %v1621_v23 }
 0x150   : > { %v655_v47 = vpop.f32.mrf.mxu3  ;;  %v701_v11 = vpop.f32.mrf.mxu2  ;;  %18430 = vst [vmem:[#allocation91_spill] sm:$0xff] %v12157_v44 }
 0x151   : > { %v12149_v24 = vand.u32 4294901760, %v701_v11  ;;  %v12186_v21 = vand.u32 4294901760, %v655_v47  ;;  %18438 = vst [vmem:[#allocation97_spill] sm:$0xff] %v12231_v1 }
 0x153   : > { %v12162_v27 = vsub.f32 %v701_v11, %v12149_v24  ;;  %v12180_v11 = vsub.f32 %v1618_v45, %v12157_v44  ;;  %v12196_v45 = vand.u32 4294901760, %v12075_v41  ;;  %v12237_v22 = vsub.f32 %v655_v47, %v12186_v21 }
 0x155   : > { %904 = vmatmul.f32.gmra.mxu3 %v12142_v38  ;;  %1259 = vmatmul.f32.gmra.mxu2 %v12131_v49  ;;  %v12172_v49 = vand.u32 4294901760, %v12096_v14  ;;  %18431 = vst [vmem:[#allocation92_spill] sm:$0xff] %v12180_v11  ;;  %v18437_v29 = vand.u32 4294901760, %v12162_v27 }
 0x157   : > { %v12206_v34 = vsub.f32 %v12096_v14, %v12172_v49  ;;  %v1835_v33 = vsub.f32 %v12162_v27, %v18437_v29  ;;  %v12278_v29 = vsub.f32 %v12110_v6, %v12234_v28 }
 0x158   : > { %v657_v40 = vpop.f32.mrf.mxu3  ;;  %v703_v60 = vpop.f32.mrf.mxu2 }
 0x159   : > { %v12164_v16 = vand.u32 4294901760, %v703_v60  ;;  %v12169_v63 = vand.u32 4294901760, %v657_v40 }
 0x15b   : > { %v12175_v38 = vsub.f32 %v703_v60, %v12164_v16  ;;  %1674 = vmatpush.msra.mxu1 %v12164_v16  ;;  %2061 = vmatpush.msrb.mxu0 %v12164_v16  ;;  %v12191_v60 = vpop.f32.mrf.mxu1  ;;  %v12199_v57 = vsub.f32 %v657_v40, %v12169_v63 }
 0x15c   : > { %18432 = vst [vmem:[#allocation93_spill] sm:$0xff] %v12191_v60  ;;  %v12216_v60 = vand.u32 4294901760, %v12180_v11 }
 0x15d   : > { %1304 = vmatmul.f32.vlgmr.msra.gmra.mxu3 %v11588_v4  ;;  %1676 = vmatpush.msra.mxu1 %v12149_v24  ;;  %v12209_v4 = vand.u32 4294901760, %v12126_v10  ;;  %v18433_v3 = vand.u32 4294901760, %v12175_v38  ;;  %v18453_v2 = vand.u32 4294901760, %v12175_v38 }
 0x15e   : > { %1949 = vmatpush.msrb.mxu3 %v12175_v38  ;;  %2063 = vmatpush.msrb.mxu0 %v12149_v24  ;;  %18434 = vst [vmem:[#allocation94_spill] sm:$0xff] %v12216_v60 }
 0x15f   : > { %1678 = vmatpush.msra.mxu1 %v12155_v7  ;;  %v1829_v40 = vsub.f32 %v12175_v38, %v18433_v3  ;;  %v18439_v3 = vand.u32 4294901760, %v12167_v53 }
 0x160   : > { %1952 = vmatpush.msrb.mxu3 %v12162_v27  ;;  %2065 = vmatpush.msrb.mxu0 %v12155_v7  ;;  %v12223_v14 = vpop.f32.mrf.mxu3  ;;  %v12225_v26 = vpop.f32.mrf.mxu2 }
 0x161   : > { %18435 = vst [vmem:[#allocation95_spill] sm:$0xff] %v12223_v14  ;;  %1680 = vmatpush.msra.mxu1 %v12159_v39  ;;  %v1830_v30 = vand.u32 4294901760, %v1829_v40  ;;  %v12241_v14 = vand.u32 4294901760, %v12033_v13  ;;  %v1841_v47 = vsub.f32 %v12167_v53, %v18439_v3  ;;  %v12255_v40 = vsub.f32 %v12126_v10, %v12209_v4 }
 0x162   : > { %18436 = vst [vmem:[#allocation96_spill] sm:$0xff] %v12225_v26  ;;  %v12245_v26 = vsub.f32 %v12075_v41, %v12196_v45  ;;  %1955 = vmatpush.msrb.mxu3 %v12167_v53  ;;  %2067 = vmatpush.msrb.mxu0 %v12159_v39  ;;  %v1692_v41 = vsub.f32 %v12180_v11, %v12216_v60  ;;  %v1836_v3 = vand.u32 4294901760, %v1835_v33  ;;  %v18440_v10 = vand.u32 4294901760, %v12183_v62 }
 0x163   : > { %1682 = vmatpush.msra.mxu1 %v12172_v49  ;;  %1831 = vmatpush.msra.mxu2 %v1830_v30  ;;  %v12271_v30 = vsub.f32 %v1621_v23, %v12231_v1  ;;  %v12274_v11 = vand.u32 4294901760, %v12112_v54  ;;  %v12285_v0 = vsub.f32 %v12033_v13, %v12241_v14  ;;  %v1842_v23 = vand.u32 4294901760, %v1841_v47  ;;  %v12303_v18 = vpop.f32.mrf.mxu1 }
 0x164   : > { %1958 = vmatpush.msrb.mxu3 %v12183_v62  ;;  %2069 = vmatpush.msrb.mxu0 %v12172_v49  ;;  %v1847_v52 = vsub.f32 %v12183_v62, %v18440_v10  ;;  %v18442_v10 = vand.u32 4294901760, %v12199_v57  ;;  %v12297_v33 = vand.u32 4294901760, %v1692_v41  ;;  %v18444_v13 = vand.u32 4294901760, %v12206_v34  ;;  %18445 = vst [vmem:[#allocation100_spill] sm:$0xff] %v12303_v18 }
 0x165   : > { %18441 = vst [vmem:[#allocation98_spill] sm:$0xff] %v12271_v30  ;;  %1308 = vmatmul.f32.gmra.mxu3 %v11600_v9  ;;  %1684 = vmatpush.msra.mxu1 %v12196_v45  ;;  %v12293_v9 = vand.u32 4294901760, %v12094_v58  ;;  %v12312_v41 = vand.u32 4294901760, %v12271_v30  ;;  %v12317_v47 = vand.u32 4294901760, %v12068_v35 }
 0x166   : > { %1837 = vmatpush.msra.mxu2 %v1836_v3  ;;  %1961 = vmatpush.msrb.mxu3 %v12206_v34  ;;  %v2579_v48 = vsub.f32 %v12199_v57, %v18442_v10  ;;  %18443 = vst [vmem:[#allocation99_spill] sm:$0xff] %v12297_v33  ;;  %v1853_v3 = vsub.f32 %v12206_v34, %v18444_v13  ;;  %v1848_v6 = vand.u32 4294901760, %v1847_v52  ;;  %v1624_v13 = vsel %vm706_vm1, %v11597_v8, 0 }
 0x167   : > { %2071 = vmatpush.msrb.mxu0 %v12196_v45  ;;  %1686 = vmatpush.msra.mxu1 %v12219_v59  ;;  %18448 = vst [vmem:[#allocation103_spill] sm:$0xff] %v12312_v41  ;;  %v18449_v52 = vand.u32 4294901760, %v12237_v22  ;;  %v12339_v50 = vsub.f32 %v12094_v58, %v12293_v9  ;;  %v1700_v43 = vsub.f32 %v12271_v30, %v12312_v41  ;;  %v18457_v30 = vand.u32 4294901760, %v12285_v0 }
 0x168   : > { %1843 = vmatpush.msra.mxu2 %v1842_v23  ;;  %1964 = vmatpush.msrb.mxu3 %v12245_v26  ;;  %v12306_v10 = vpop.f32.mrf.mxu3  ;;  %v12308_v56 = vpop.f32.mrf.mxu2  ;;  %v12321_v23 = vsub.f32 %v12112_v54, %v12274_v11  ;;  %v2580_v8 = vand.u32 4294901760, %v2579_v48  ;;  %v18450_v54 = vand.u32 4294901760, %v12245_v26  ;;  %v12346_v48 = vand.u32 4294901760, %v1624_v13 }
 0x169   : > { %18446 = vst [vmem:[#allocation101_spill] sm:$0xff] %v12306_v10  ;;  %2073 = vmatpush.msrb.mxu0 %v12219_v59  ;;  %1688 = vmatpush.msra.mxu1 %v12241_v14  ;;  %v2585_v5 = vsub.f32 %v12237_v22, %v18449_v52  ;;  %v1854_v52 = vand.u32 4294901760, %v1853_v3  ;;  %v12357_v3 = vsub.f32 %v12068_v35, %v12317_v47 }
 0x16a   : > { %18447 = vst [vmem:[#allocation102_spill] sm:$0xff] %v12308_v56  ;;  %v12330_v56 = vand.u32 4294901760, %v12043_v61  ;;  %1849 = vmatpush.msra.mxu2 %v1848_v6  ;;  %1967 = vmatpush.msrb.mxu3 %v12263_v31  ;;  %v1859_v10 = vsub.f32 %v12245_v26, %v18450_v54  ;;  %v18451_v6 = vand.u32 4294901760, %v12255_v40  ;;  %v18454_v54 = vand.u32 4294901760, %v12263_v31 }
 0x16b   : > { %2075 = vmatpush.msrb.mxu0 %v12241_v14  ;;  %1694 = vmatmul.f32.vlgmr.msra.gmra.mxu1 %v12297_v33  ;;  %18452 = vst [vmem:[#allocation104_spill] sm:$0xff] %v12346_v48  ;;  %v18455_v33 = vand.u32 4294901760, %v12278_v29  ;;  %v1871_v35 = vsub.f32 %v12285_v0, %v18457_v30  ;;  %v12383_v30 = vand.u32 4294901760, %v1700_v43  ;;  %v1627_v43 = vsel %vm706_vm1, %v11613_v20, 0 }
 0x16c   : > { %v2591_v18 = vsub.f32 %v12255_v40, %v18451_v6  ;;  %2184 = vmatpush.msrb.mxu1 %v18453_v2  ;;  %v1865_v58 = vsub.f32 %v12263_v31, %v18454_v54  ;;  %1855 = vmatpush.msra.mxu2 %v1854_v52  ;;  %v2586_v6 = vand.u32 4294901760, %v2585_v5  ;;  %v1860_v54 = vand.u32 4294901760, %v1859_v10 }
 0x16d   : > { %2581 = vmatpush.msra.mxu0 %v2580_v8  ;;  %1970 = vmatpush.msrb.mxu3 %v12285_v0  ;;  %v2597_v2 = vsub.f32 %v12278_v29, %v18455_v33  ;;  %v18456_v8 = vand.u32 4294901760, %v12162_v27  ;;  %v12372_v52 = vsub.f32 %v12043_v61, %v12330_v56  ;;  %v17996_v33 = vand.u32 4294901760, %v12339_v50  ;;  %18460 = vst [vmem:[#allocation106_spill] sm:$0xff] %v12383_v30 }
 0x16e   : > { %1312 = vmatmul.f32.gmra.mxu3 %v11608_v15  ;;  %v2592_v5 = vand.u32 4294901760, %v2591_v18  ;;  %v12377_v27 = vsub.f32 %v1624_v13, %v12346_v48  ;;  %1861 = vmatpush.msra.mxu2 %v1860_v54  ;;  %v18459_v10 = vand.u32 4294901760, %v12167_v53  ;;  %v17995_v54 = vand.u32 4294901760, %v12357_v3 }
 0x16f   : > { %2188 = vmatpush.msrb.mxu1 %v18456_v8  ;;  %2424 = vmatpush.msra.mxu3 %v12169_v63  ;;  %v1866_v8 = vand.u32 4294901760, %v1865_v58  ;;  %v2598_v18 = vand.u32 4294901760, %v2597_v2  ;;  %v18462_v53 = vand.u32 4294901760, %v12183_v62  ;;  %v1872_v58 = vand.u32 4294901760, %v1871_v35 }
 0x170   : > { %2587 = vmatpush.msra.mxu0 %v2586_v6  ;;  %18458 = vst [vmem:[#allocation105_spill] sm:$0xff] %v12377_v27  ;;  %v12381_v38 = vpop.f32.mrf.mxu3  ;;  %v12385_v61 = vpop.f32.mrf.mxu2  ;;  %v18461_v6 = vand.u32 4294901760, %v12321_v23  ;;  %v2609_v2 = vsub.f32 %v12339_v50, %v17996_v33  ;;  %v18464_v62 = vand.u32 4294901760, %v12206_v34  ;;  %v2615_v35 = vsub.f32 %v12357_v3, %v17995_v54 }
 0x171   : > { %2192 = vmatpush.msrb.mxu1 %v18459_v10  ;;  %2426 = vmatpush.msra.mxu3 %v12186_v21  ;;  %v12394_v10 = vpop.f32.mrf.mxu1 }
 0x172   : > { %2593 = vmatpush.msra.mxu0 %v2592_v5  ;;  %v2603_v13 = vsub.f32 %v12321_v23, %v18461_v6  ;;  %1867 = vmatpush.msra.mxu2 %v1866_v8  ;;  %v17994_v5 = vand.u32 4294901760, %v12372_v52  ;;  %v12404_v8 = vand.u32 4294901760, %v12377_v27  ;;  %v18466_v6 = vand.u32 4294901760, %v12245_v26 }
 0x173   : > { %2196 = vmatpush.msrb.mxu1 %v18462_v53  ;;  %2428 = vmatpush.msra.mxu3 %v12209_v4  ;;  %v2610_v53 = vand.u32 4294901760, %v2609_v2  ;;  %v2616_v26 = vand.u32 4294901760, %v2615_v35 }
 0x174   : > { %2599 = vmatpush.msra.mxu0 %v2598_v18  ;;  %18463 = vst [vmem:[#allocation107_spill] sm:$0xff] %v12404_v8  ;;  %1873 = vmatpush.msra.mxu2 %v1872_v58  ;;  %v2604_v20 = vand.u32 4294901760, %v2603_v13  ;;  %v12413_v18 = vand.u32 4294901760, %v1627_v43  ;;  %v2621_v34 = vsub.f32 %v12372_v52, %v17994_v5  ;;  %v1708_v13 = vsub.f32 %v12377_v27, %v12404_v8 }
 0x175   : > { %1702 = vmatmul.f32.gmra.mxu1 %v12383_v30  ;;  %1875 = vmatmul.f32.vlgmr.msra.gmra.mxu2 %v12157_v44  ;;  %v18495_v30 = vld [vmem:[#allocation10_spill] sm:$0xff] }
 0x176   : > { %2200 = vmatpush.msrb.mxu1 %v18464_v62  ;;  %18465 = vst [vmem:[#allocation108_spill] sm:$0xff] %v12413_v18  ;;  %2287 = vmatpush.msrb.mxu2 %v12164_v16  ;;  %v12432_v2 = vsub.f32 %v1627_v43, %v12413_v18  ;;  %v18468_v62 = vand.u32 4294901760, %v12263_v31  ;;  %v12445_v43 = vpop.f32.mrf.mxu0 }
 0x177   : > { %2430 = vmatpush.msra.mxu3 %v12234_v28  ;;  %2605 = vmatpush.msra.mxu0 %v2604_v20  ;;  %v2622_v20 = vand.u32 4294901760, %v2621_v34  ;;  %18471 = vst [vmem:[#allocation111_spill] sm:$0xff] %v12445_v43 }
 0x178   : > { %2204 = vmatpush.msrb.mxu1 %v18466_v6  ;;  %2289 = vmatpush.msrb.mxu2 %v12149_v24  ;;  %v12426_v58 = vpop.f32.mrf.mxu3  ;;  %v12428_v16 = vpop.f32.mrf.mxu2  ;;  %18467 = vst [vmem:[#allocation109_spill] sm:$0xff] %v12432_v2  ;;  %v1630_v24 = vsel %vm706_vm1, %v11631_v42, 0  ;;  %v12440_v6 = vand.u32 4294901760, %v1708_v13  ;;  %v12451_v42 = vand.u32 4294901760, %v12432_v2  ;;  %v1633_v13 = vsel %vm706_vm1, %v11649_v51, 0 }
 0x179   : > { %2432 = vmatpush.msra.mxu3 %v12274_v11  ;;  %2611 = vmatpush.msra.mxu0 %v2610_v53  ;;  %v18470_v53 = vand.u32 4294901760, %v12285_v0  ;;  %v12447_v31 = vpop.f32.mrf.mxu1 }
 0x17a   : > { %1316 = vmatmul.f32.gmra.mxu3 %v11620_v36  ;;  %2208 = vmatpush.msrb.mxu1 %v18468_v62  ;;  %18469 = vst [vmem:[#allocation110_spill] sm:$0xff] %v12440_v6  ;;  %v1716_v0 = vsub.f32 %v12432_v2, %v12451_v42  ;;  %v12486_v62 = vand.u32 4294901760, %v1633_v13  ;;  %v18505_v36 = vld [vmem:[#allocation14_spill] sm:$0xff] }
 0x17b   : > { %2291 = vmatpush.msrb.mxu2 %v12155_v7  ;;  %2434 = vmatpush.msra.mxu3 %v12293_v9  ;;  %18472 = vst [vmem:[#allocation112_spill] sm:$0xff] %v12451_v42  ;;  %v12453_v7 = vand.u32 4294901760, %v1630_v24 }
 0x17c   : > { %2617 = vmatpush.msra.mxu0 %v2616_v26  ;;  %2212 = vmatpush.msrb.mxu1 %v18470_v53  ;;  %18477 = vst [vmem:[#allocation117_spill] sm:$0xff] %v12486_v62 }
 0x17d   : > { %2293 = vmatpush.msrb.mxu2 %v12159_v39  ;;  %2436 = vmatpush.msra.mxu3 %v12317_v47  ;;  %18473 = vst [vmem:[#allocation113_spill] sm:$0xff] %v12453_v7  ;;  %v12468_v35 = vsub.f32 %v1630_v24, %v12453_v7  ;;  %v12502_v24 = vsub.f32 %v1633_v13, %v12486_v62 }
 0x17e   : > { %2623 = vmatpush.msra.mxu0 %v2622_v20  ;;  %2699 = vmatpush.msra.mxu1 %v12199_v57 }
 0x17f   : > { %2079 = vmatmul.f32.vlgmr.msrb.gmra.mxu0 %v12216_v60  ;;  %1710 = vmatmul.f32.gmra.mxu1 %v12440_v6  ;;  %18474 = vst [vmem:[#allocation114_spill] sm:$0xff] %v12468_v35  ;;  %v12484_v26 = vand.u32 4294901760, %v12468_v35 }
 0x180   : > { %3037 = vmatpush.msrb.mxu0 %v12169_v63  ;;  %1879 = vmatmul.f32.gmra.mxu2 %v12231_v1  ;;  %v12461_v39 = vpop.f32.mrf.mxu3  ;;  %v12472_v34 = vpop.f32.mrf.mxu2  ;;  %18478 = vst [vmem:[#allocation118_spill] sm:$0xff] %v12502_v24 }
 0x181   : > { %2438 = vmatpush.msra.mxu3 %v12330_v56  ;;  %2295 = vmatpush.msrb.mxu2 %v12172_v49  ;;  %v12481_v49 = vand.u32 4294901760, %v1716_v0  ;;  %18476 = vst [vmem:[#allocation116_spill] sm:$0xff] %v12484_v26  ;;  %v12489_v51 = vpop.f32.mrf.mxu1 }
 0x182   : > { %2702 = vmatpush.msra.mxu1 %v12237_v22  ;;  %3039 = vmatpush.msrb.mxu0 %v12186_v21 }
 0x183   : > { %1320 = vmatmul.f32.gmra.mxu3 %v11638_v46  ;;  %2297 = vmatpush.msrb.mxu2 %v12196_v45  ;;  %18475 = vst [vmem:[#allocation115_spill] sm:$0xff] %v12481_v49  ;;  %v1724_v45 = vsub.f32 %v12468_v35, %v12484_v26 }
 0x184   : > { %2705 = vmatpush.msra.mxu1 %v12255_v40  ;;  %3041 = vmatpush.msrb.mxu0 %v12209_v4 }
 0x185   : > { %2299 = vmatpush.msrb.mxu2 %v12219_v59  ;;  %v12517_v53 = vand.u32 4294901760, %v1724_v45 }
 0x186   : > { %2708 = vmatpush.msra.mxu1 %v12278_v29  ;;  %3043 = vmatpush.msrb.mxu0 %v12234_v28 }
 0x187   : > { %2301 = vmatpush.msrb.mxu2 %v12241_v14  ;;  %1718 = vmatmul.f32.gmra.mxu1 %v12481_v49  ;;  %v12510_v14 = vpop.f32.mrf.mxu0  ;;  %18480 = vst [vmem:[#allocation120_spill] sm:$0xff] %v12517_v53 }
 0x188   : > { %2711 = vmatpush.msra.mxu1 %v12321_v23  ;;  %3045 = vmatpush.msrb.mxu0 %v12274_v11  ;;  %v12495_v59 = vpop.f32.mrf.mxu3  ;;  %18479 = vst [vmem:[#allocation119_spill] sm:$0xff] %v12510_v14  ;;  %v12514_v20 = vpop.f32.mrf.mxu2  ;;  %v18548_v14 = vld [vmem:[#allocation29_spill] sm:$0xff] }
 0x189   : > { %2811 = vmatpush.msra.mxu2 %v12169_v63  ;;  %v1636_v63 = vsel %vm706_vm1, %v11673_v12, 0  ;;  %v12530_v0 = vpop.f32.mrf.mxu1  ;;  %2085 = vmatmul.f32.gmra.mxu0 %v12312_v41  ;;  %v1645_v41 = vsel %vm706_vm1, %v11736_v37, 0 }
 0x18a   : > { %1883 = vmatmul.f32.gmra.mxu2 %v12346_v48  ;;  %2714 = vmatpush.msra.mxu1 %v12339_v50  ;;  %v12522_v12 = vand.u32 4294901760, %v1636_v63 }
 0x18b   : > { %2813 = vmatpush.msra.mxu2 %v12186_v21  ;;  %3047 = vmatpush.msrb.mxu0 %v12293_v9  ;;  %v12520_v21 = vand.u32 4294901760, %v12502_v24 }
 0x18c   : > { %1324 = vmatmul.f32.gmra.mxu3 %v11662_v55  ;;  %2717 = vmatpush.msra.mxu1 %v12357_v3  ;;  %18482 = vst [vmem:[#allocation122_spill] sm:$0xff] %v12522_v12  ;;  %v12538_v45 = vsub.f32 %v1636_v63, %v12522_v12 }
 0x18d   : > { %2815 = vmatpush.msra.mxu2 %v12209_v4  ;;  %3049 = vmatpush.msrb.mxu0 %v12317_v47  ;;  %18481 = vst [vmem:[#allocation121_spill] sm:$0xff] %v12520_v21  ;;  %v1732_v13 = vsub.f32 %v12502_v24, %v12520_v21 }
 0x18e   : > { %2720 = vmatpush.msra.mxu1 %v12372_v52  ;;  %18483 = vst [vmem:[#allocation123_spill] sm:$0xff] %v12538_v45  ;;  %v12550_v54 = vand.u32 4294901760, %v12538_v45 }
 0x18f   : > { %2817 = vmatpush.msra.mxu2 %v12234_v28  ;;  %3051 = vmatpush.msrb.mxu0 %v12330_v56  ;;  %v1639_v28 = vsel %vm706_vm1, %v11697_v19, 0  ;;  %v12547_v5 = vand.u32 4294901760, %v1732_v13 }
 0x190   : > { %v12528_v4 = vpop.f32.mrf.mxu3  ;;  %1726 = vmatmul.f32.gmra.mxu1 %v12517_v53  ;;  %18486 = vst [vmem:[#allocation126_spill] sm:$0xff] %v12550_v54  ;;  %v12552_v33 = vand.u32 4294901760, %v1639_v28  ;;  %v12555_v63 = vpop.f32.mrf.mxu2  ;;  %v1740_v19 = vsub.f32 %v12538_v45, %v12550_v54 }
 0x191   : > { %2819 = vmatpush.msra.mxu2 %v12274_v11  ;;  %v12544_v11 = vpop.f32.mrf.mxu0  ;;  %18485 = vst [vmem:[#allocation125_spill] sm:$0xff] %v12547_v5  ;;  %2091 = vmatmul.f32.gmra.mxu0 %v12404_v8  ;;  %v12567_v13 = vpop.f32.mrf.mxu1 }
 0x192   : > { %1887 = vmatmul.f32.gmra.mxu2 %v12413_v18  ;;  %18484 = vst [vmem:[#allocation124_spill] sm:$0xff] %v12544_v11  ;;  %v12574_v49 = vand.u32 4294901760, %v1740_v19  ;;  %v18514_v11 = vld [vmem:[#allocation16_spill] sm:$0xff] }
 0x193   : > { %2821 = vmatpush.msra.mxu2 %v12293_v9  ;;  %18487 = vst [vmem:[#allocation127_spill] sm:$0xff] %v12552_v33 }
 0x194   : > { %1328 = vmatmul.f32.gmra.mxu3 %v11686_v17  ;;  %18489 = vst [vmem:[#allocation129_spill] sm:$0xff] %v12567_v13  ;;  %v12605_v17 = vand.u32 4294901760, %v1645_v41 }
 0x195   : > { %2823 = vmatpush.msra.mxu2 %v12317_v47  ;;  %v12565_v47 = vsub.f32 %v1639_v28, %v12552_v33  ;;  %18491 = vst [vmem:[#allocation131_spill] sm:$0xff] %v12574_v49 }
 0x196   : > { %18500 = vst [vmem:[#allocation139_spill] sm:$0xff] %v12605_v17 }
 0x197   : > { %2825 = vmatpush.msra.mxu2 %v12330_v56  ;;  %18488 = vst [vmem:[#allocation128_spill] sm:$0xff] %v12565_v47  ;;  %v1642_v56 = vsel %vm706_vm1, %v11709_v32, 0 }
 0x198   : > { %v12557_v9 = vpop.f32.mrf.mxu3  ;;  %1734 = vmatmul.f32.gmra.mxu1 %v12547_v5  ;;  %v12577_v5 = vand.u32 4294901760, %v12565_v47  ;;  %v12579_v8 = vand.u32 4294901760, %v1642_v56  ;;  %v12581_v6 = vpop.f32.mrf.mxu2 }
 0x199   : > { %v12572_v53 = vpop.f32.mrf.mxu0  ;;  %2097 = vmatmul.f32.gmra.mxu0 %v12451_v42 }
 0x19a   : > { %1891 = vmatmul.f32.gmra.mxu2 %v12453_v7  ;;  %18490 = vst [vmem:[#allocation130_spill] sm:$0xff] %v12572_v53  ;;  %v1748_v32 = vsub.f32 %v12565_v47, %v12577_v5  ;;  %v12591_v19 = vsub.f32 %v1642_v56, %v12579_v8  ;;  %v12615_v56 = vsub.f32 %v1645_v41, %v12605_v17 }
 0x19b   : > { %18492 = vst [vmem:[#allocation132_spill] sm:$0xff] %v12577_v5 }
 0x19c   : > { %1332 = vmatmul.f32.gmra.mxu3 %v11704_v25  ;;  %18493 = vst [vmem:[#allocation133_spill] sm:$0xff] %v12579_v8  ;;  %v12598_v25 = vpop.f32.mrf.mxu1  ;;  %v12600_v42 = vand.u32 4294901760, %v1748_v32 }
 0x19d   : > { %18494 = vst [vmem:[#allocation134_spill] sm:$0xff] %v12591_v19 }
 0x19e   : > { %18497 = vst [vmem:[#allocation136_spill] sm:$0xff] %v12598_v25  ;;  %v18539_v25 = vld [vmem:[#allocation27_spill] sm:$0xff] }
 0x19f   : > { %18498 = vst [vmem:[#allocation137_spill] sm:$0xff] %v12600_v42 }
 0x1a0   : > { %v12583_v28 = vpop.f32.mrf.mxu3  ;;  %1742 = vmatmul.f32.gmra.mxu1 %v12574_v49  ;;  %v12603_v49 = vand.u32 4294901760, %v12591_v19  ;;  %18502 = vst [vmem:[#allocation141_spill] sm:$0xff] %v12615_v56  ;;  %v12617_v32 = vpop.f32.mrf.mxu2 }
 0x1a1   : > { %v12596_v60 = vpop.f32.mrf.mxu0  ;;  %2103 = vmatmul.f32.gmra.mxu0 %v12484_v26  ;;  %18503 = vst [vmem:[#allocation142_spill] sm:$0xff] %v12617_v32 }
 0x1a2   : > { %1895 = vmatmul.f32.gmra.mxu2 %v12486_v62  ;;  %18496 = vst [vmem:[#allocation135_spill] sm:$0xff] %v12596_v60  ;;  %v1756_v37 = vsub.f32 %v12591_v19, %v12603_v49  ;;  %v18558_v19 = vld [vmem:[#allocation35_spill] sm:$0xff] }
 0x1a3   : > { %18499 = vst [vmem:[#allocation138_spill] sm:$0xff] %v12603_v49 }
 0x1a4   : > { %1336 = vmatmul.f32.gmra.mxu3 %v18495_v30  ;;  %v18504_v30 = vld [vmem:[#allocation15_spill] sm:$0xff]  ;;  %v12624_v26 = vand.u32 4294901760, %v1756_v37  ;;  %v12631_v53 = vpop.f32.mrf.mxu1 }
 0x1a5   : > { %v1648_v46 = vsel %vm706_vm1, %v18504_v30, 0  ;;  %18510 = vst [vmem:[#allocation146_spill] sm:$0xff] %v12631_v53 }
 0x1a6   : > { %18507 = vst [vmem:[#allocation143_spill] sm:$0xff] %v12624_v26  ;;  %v12629_v60 = vand.u32 4294901760, %v1648_v46 }
 0x1a8   : > { %v12607_v55 = vpop.f32.mrf.mxu3  ;;  %1750 = vmatmul.f32.gmra.mxu1 %v12600_v42  ;;  %v12627_v42 = vand.u32 4294901760, %v12615_v56  ;;  %18509 = vst [vmem:[#allocation145_spill] sm:$0xff] %v12629_v60  ;;  %v12641_v37 = vsub.f32 %v1648_v46, %v12629_v60  ;;  %v12646_v53 = vpop.f32.mrf.mxu2 }
 0x1a9   : > { %18501 = vst [vmem:[#allocation140_spill] sm:$0xff] %v12607_v55  ;;  %v12622_v15 = vpop.f32.mrf.mxu0  ;;  %2109 = vmatmul.f32.gmra.mxu0 %v12520_v21  ;;  %v18554_v55 = vld [vmem:[#allocation64_spill] sm:$0xff] }
 0x1aa   : > { %1899 = vmatmul.f32.gmra.mxu2 %v12522_v12  ;;  %18506 = vst [vmem:[#allocation15_spill] sm:$0xff] %v12622_v15  ;;  %v1764_v30 = vsub.f32 %v12615_v56, %v12627_v42  ;;  %v18563_v12 = vld [vmem:[#allocation68_spill] sm:$0xff] }
 0x1ab   : > { %18508 = vst [vmem:[#allocation144_spill] sm:$0xff] %v12627_v42 }
 0x1ac   : > { %1340 = vmatmul.f32.gmra.mxu3 %v18505_v36  ;;  %18512 = vst [vmem:[#allocation148_spill] sm:$0xff] %v12641_v37  ;;  %v18513_v36 = vld [vmem:[#allocation20_spill] sm:$0xff]  ;;  %v12659_v46 = vpop.f32.mrf.mxu1 }
 0x1ad   : > { %v1651_v15 = vsel %vm706_vm1, %v18513_v36, 0  ;;  %18515 = vst [vmem:[#allocation20_spill] sm:$0xff] %v12646_v53  ;;  %v18523_v53 = vld [vmem:[#allocation21_spill] sm:$0xff] }
 0x1ae   : > { %v12653_v21 = vand.u32 4294901760, %v1651_v15  ;;  %18521 = vst [vmem:[#allocation154_spill] sm:$0xff] %v12659_v46 }
 0x1b0   : > { %v12633_v41 = vpop.f32.mrf.mxu3  ;;  %1758 = vmatmul.f32.gmra.mxu1 %v12624_v26  ;;  %v12651_v26 = vand.u32 4294901760, %v12641_v37  ;;  %18518 = vst [vmem:[#allocation151_spill] sm:$0xff] %v12653_v21  ;;  %v12679_v46 = vpop.f32.mrf.mxu2 }
 0x1b1   : > { %18511 = vst [vmem:[#allocation147_spill] sm:$0xff] %v12633_v41  ;;  %v12648_v41 = vand.u32 4294901760, %v1764_v30  ;;  %v12667_v30 = vsub.f32 %v1651_v15, %v12653_v21 }
 0x1b2   : > { %1903 = vmatmul.f32.gmra.mxu2 %v12552_v33  ;;  %18517 = vst [vmem:[#allocation150_spill] sm:$0xff] %v12651_v26  ;;  %v12655_v33 = vpop.f32.mrf.mxu0  ;;  %2115 = vmatmul.f32.gmra.mxu0 %v12550_v54  ;;  %v1772_v36 = vsub.f32 %v12641_v37, %v12651_v26 }
 0x1b3   : > { %18516 = vst [vmem:[#allocation149_spill] sm:$0xff] %v12648_v41  ;;  %v12675_v54 = vand.u32 4294901760, %v12667_v30 }
 0x1b4   : > { %1344 = vmatmul.f32.gmra.mxu3 %v18514_v11  ;;  %18519 = vst [vmem:[#allocation152_spill] sm:$0xff] %v12655_v33  ;;  %v11345_v11 = vld [vmem:[%s11567_s28 + $0x60] sm:$0xff] }
 0x1b5   : > { %18522 = vst [vmem:[#allocation155_spill] sm:$0xff] %v12667_v30  ;;  %v1654_v33 = vsel %vm706_vm1, %v11345_v11, 0  ;;  %v1780_v15 = vsub.f32 %v12667_v30, %v12675_v54 }
 0x1b6   : > { %18525 = vst [vmem:[#allocation157_spill] sm:$0xff] %v12675_v54 }
 0x1b7   : > { %18527 = vst [vmem:[#allocation159_spill] sm:$0xff] %v12679_v46  ;;  %v18532_v46 = vld [vmem:[#allocation22_spill] sm:$0xff] }
 0x1b8   : > { %v12657_v56 = vpop.f32.mrf.mxu3  ;;  %1766 = vmatmul.f32.gmra.mxu1 %v12648_v41  ;;  %v12677_v41 = vand.u32 4294901760, %v1654_v33 }
 0x1b9   : > { %18520 = vst [vmem:[#allocation153_spill] sm:$0xff] %v12657_v56  ;;  %v12672_v56 = vand.u32 4294901760, %v1772_v36  ;;  %v12693_v36 = vpop.f32.mrf.mxu1 }
 0x1ba   : > { %1907 = vmatmul.f32.gmra.mxu2 %v12579_v8  ;;  %18526 = vst [vmem:[#allocation158_spill] sm:$0xff] %v12677_v41  ;;  %v12683_v37 = vpop.f32.mrf.mxu0  ;;  %2121 = vmatmul.f32.gmra.mxu0 %v12577_v5  ;;  %v12691_v11 = vsub.f32 %v1654_v33, %v12677_v41 }
 0x1bb   : > { %18524 = vst [vmem:[#allocation156_spill] sm:$0xff] %v12672_v56 }
 0x1bc   : > { %1348 = vmatmul.f32.gmra.mxu3 %v18523_v53  ;;  %18529 = vst [vmem:[#allocation161_spill] sm:$0xff] %v12683_v37  ;;  %v11346_v53 = vld [vmem:[%s11567_s28 + $0x68] sm:$0xff]  ;;  %v12698_v37 = vand.u32 4294901760, %v1780_v15 }
 0x1bd   : > { %18530 = vst [vmem:[#allocation162_spill] sm:$0xff] %v12691_v11 }
 0x1be   : > { %18531 = vst [vmem:[#allocation163_spill] sm:$0xff] %v12693_v36 }
 0x1bf   : > { %18533 = vst [vmem:[#allocation164_spill] sm:$0xff] %v12698_v37 }
 0x1c0   : > { %v12681_v8 = vpop.f32.mrf.mxu3  ;;  %1774 = vmatmul.f32.gmra.mxu1 %v12672_v56  ;;  %v12701_v56 = vand.u32 4294901760, %v12691_v11 }
 0x1c1   : > { %18528 = vst [vmem:[#allocation160_spill] sm:$0xff] %v12681_v8  ;;  %v1657_v8 = vsel %vm706_vm1, %v11346_v53, 0 }
 0x1c2   : > { %1911 = vmatmul.f32.gmra.mxu2 %v12605_v17  ;;  %18534 = vst [vmem:[#allocation165_spill] sm:$0xff] %v12701_v56  ;;  %v12703_v5 = vand.u32 4294901760, %v1657_v8  ;;  %v12705_v17 = vpop.f32.mrf.mxu2  ;;  %v1788_v33 = vsub.f32 %v12691_v11, %v12701_v56  ;;  %v1394_v15 = vpop.f32.mrf.mxu0  ;;  %2127 = vmatmul.f32.gmra.mxu0 %v12603_v49 }
 0x1c3   : > { %18536 = vst [vmem:[#allocation167_spill] sm:$0xff] %v12705_v17  ;;  %v12720_v17 = vpop.f32.mrf.mxu1 }
 0x1c4   : > { %1352 = vmatmul.f32.gmra.mxu3 %v18532_v46  ;;  %18535 = vst [vmem:[#allocation166_spill] sm:$0xff] %v12703_v5  ;;  %v12714_v53 = vsub.f32 %v1657_v8, %v12703_v5  ;;  %v11347_v46 = vld [vmem:[%s11567_s28 + $0x70] sm:$0xff] }
 0x1c5   : > { %v1660_v36 = vsel %vm706_vm1, %v11347_v46, 0  ;;  %18540 = vst [vmem:[#allocation170_spill] sm:$0xff] %v12720_v17 }
 0x1c6   : > { %18538 = vst [vmem:[#allocation169_spill] sm:$0xff] %v12714_v53 }
 0x1c8   : > { %v12707_v30 = vpop.f32.mrf.mxu3  ;;  %1782 = vmatmul.f32.gmra.mxu1 %v12698_v37  ;;  %v12725_v37 = vand.u32 4294901760, %v12714_v53 }
 0x1c9   : > { %18537 = vst [vmem:[#allocation168_spill] sm:$0xff] %v12707_v30  ;;  %v12722_v30 = vand.u32 4294901760, %v1788_v33 }
 0x1ca   : > { %1915 = vmatmul.f32.gmra.mxu2 %v12629_v60  ;;  %18542 = vst [vmem:[#allocation172_spill] sm:$0xff] %v12725_v37  ;;  %v12727_v60 = vand.u32 4294901760, %v1660_v36  ;;  %v1796_v8 = vsub.f32 %v12714_v53, %v12725_v37  ;;  %v1398_v49 = vpop.f32.mrf.mxu0  ;;  %v12738_v33 = vpop.f32.mrf.mxu2  ;;  %2133 = vmatmul.f32.gmra.mxu0 %v12627_v42 }
 0x1cb   : > { %18541 = vst [vmem:[#allocation171_spill] sm:$0xff] %v12722_v30  ;;  %v12751_v53 = vpop.f32.mrf.mxu1 }
 0x1cc   : > { %1356 = vmatmul.f32.gmra.mxu3 %v18539_v25  ;;  %18543 = vst [vmem:[#allocation173_spill] sm:$0xff] %v12727_v60  ;;  %v12736_v46 = vsub.f32 %v1660_v36, %v12727_v60  ;;  %v18547_v25 = vld [vmem:[#allocation33_spill] sm:$0xff]  ;;  %v18553_v36 = vld [vmem:[#allocation95_spill] sm:$0xff] }
 0x1cd   : > { %18546 = vst [vmem:[#allocation176_spill] sm:$0xff] %v12738_v33  ;;  %v1663_v17 = vsel %vm706_vm1, %v18547_v25, 0  ;;  %v967_v32 = vadd.f32 %v18554_v55, %v18553_v36 }
 0x1ce   : > { %18545 = vst [vmem:[#allocation175_spill] sm:$0xff] %v12736_v46 }
 0x1cf   : > { %18552 = vst [vmem:[#allocation179_spill] sm:$0xff] %v12751_v53 }
 0x1d0   : > { %v12729_v11 = vpop.f32.mrf.mxu3  ;;  %1790 = vmatmul.f32.gmra.mxu1 %v12722_v30  ;;  %v12747_v30 = vand.u32 4294901760, %v12736_v46 }
 0x1d1   : > { %18544 = vst [vmem:[#allocation174_spill] sm:$0xff] %v12729_v11  ;;  %v12744_v11 = vand.u32 4294901760, %v1796_v8 }
 0x1d2   : > { %1919 = vmatmul.f32.gmra.mxu2 %v12653_v21  ;;  %18550 = vst [vmem:[#allocation177_spill] sm:$0xff] %v12747_v30  ;;  %v12749_v21 = vand.u32 4294901760, %v1663_v17  ;;  %v1804_v25 = vsub.f32 %v12736_v46, %v12747_v30  ;;  %v1402_v42 = vpop.f32.mrf.mxu0  ;;  %2139 = vmatmul.f32.gmra.mxu0 %v12651_v26  ;;  %v12767_v55 = vpop.f32.mrf.mxu2  ;;  %v18562_v46 = vld [vmem:[#allocation101_spill] sm:$0xff] }
 0x1d3   : > { %18549 = vst [vmem:[#allocation33_spill] sm:$0xff] %v12744_v11  ;;  %v12777_v13 = vpop.f32.mrf.mxu1  ;;  %v18564_v26 = vld [vmem:[#allocation89_spill] sm:$0xff] }
 0x1d4   : > { %1360 = vmatmul.f32.gmra.mxu3 %v18548_v14  ;;  %18551 = vst [vmem:[#allocation178_spill] sm:$0xff] %v12749_v21  ;;  %v12762_v8 = vsub.f32 %v1663_v17, %v12749_v21  ;;  %v18557_v14 = vld [vmem:[#allocation86_spill] sm:$0xff]  ;;  %v12769_v36 = vand.u32 4294901760, %v1804_v25  ;;  %v971_v17 = vadd.f32 %v18563_v12, %v18562_v46  ;;  %v18567_v46 = vand.u32 4294901760, %v12199_v57 }
 0x1d5   : > { %v1065_v53 = vadd.f32 %v18557_v14, %v967_v32  ;;  %v18571_v57 = vand.u32 4294901760, %v12255_v40 }
 0x1d6   : > { %18556 = vst [vmem:[#allocation64_spill] sm:$0xff] %v12762_v8 }
 0x1d7   : > { %18559 = vst [vmem:[#allocation86_spill] sm:$0xff] %v12769_v36 }
 0x1d8   : > { %v12755_v33 = vpop.f32.mrf.mxu3  ;;  %1798 = vmatmul.f32.gmra.mxu1 %v12744_v11  ;;  %v12772_v11 = vand.u32 4294901760, %v12762_v8 }
 0x1d9   : > { %18555 = vst [vmem:[#allocation95_spill] sm:$0xff] %v12755_v33  ;;  %v18561_v33 = vld [vmem:[#allocation96_spill] sm:$0xff] }
 0x1da   : > { %1923 = vmatmul.f32.gmra.mxu2 %v12677_v41  ;;  %18560 = vst [vmem:[#allocation180_spill] sm:$0xff] %v12772_v11  ;;  %v1171_v41 = vadd.f32 %v18561_v33, %v1065_v53  ;;  %v1812_v32 = vsub.f32 %v12762_v8, %v12772_v11  ;;  %v12783_v25 = vpop.f32.mrf.mxu0  ;;  %2145 = vmatmul.f32.gmra.mxu0 %v12675_v54  ;;  %v18565_v33 = vld [vmem:[#allocation92_spill] sm:$0xff]  ;;  %v18570_v54 = vld [vmem:[#allocation102_spill] sm:$0xff] }
 0x1db   : > { %v1070_v53 = vadd.f32 %v18564_v26, %v971_v17 }
 0x1dc   : > { %1364 = vmatmul.f32.gmra.mxu3 %v18558_v19  ;;  %v18569_v19 = vand.u32 4294901760, %v12237_v22 }
 0x1dd   : > { %v1177_v26 = vadd.f32 %v18570_v54, %v1070_v53  ;;  %v18574_v53 = vld [vmem:[#allocation98_spill] sm:$0xff] }
 0x1e0   : > { %v1305_v43 = vpop.f32.mrf.mxu3  ;;  %1806 = vmatmul.f32.gmra.mxu1 %v12769_v36 }
 0x1e1   : > { %v1306_v14 = vadd.f32 %v1305_v43, %v1171_v41  ;;  %v12796_v43 = vand.u32 4294901760, %v1812_v32  ;;  %v12798_v41 = vpop.f32.mrf.mxu2 }
 0x1e2   : > { %1927 = vmatmul.f32.gmra.mxu2 %v12703_v5  ;;  %v1410_v54 = vpop.f32.mrf.mxu0  ;;  %2151 = vmatmul.f32.gmra.mxu0 %v12701_v56 }
 0x1e3   : > { %v12788_v12 = vadd.f32 %v1394_v15, %v1306_v14  ;;  %18568 = vst [vmem:[#allocation101_spill] sm:$0xff] %v12796_v43  ;;  %v18572_v14 = vld [vmem:[#allocation72_spill] sm:$0xff] }
 0x1e4   : > { %1973 = vmatmul.f32.vlgmr.msrb.gmra.mxu3 %v18565_v33  ;;  %v975_v32 = vadd.f32 %v18572_v14, %v12381_v38 }
 0x1e5   : > { %18566 = vst [vmem:[#allocation96_spill] sm:$0xff] %v12788_v12  ;;  %2934 = vmatpush.msrb.mxu3 %v18567_v46  ;;  %v12794_v36 = vmul.f32 %v12788_v12, %v12788_v12  ;;  %v18576_v46 = vand.u32 4294901760, %v12321_v23  ;;  %v18579_v23 = vand.u32 4294901760, %v12357_v3  ;;  %v18639_v12 = vld [vmem:[#allocation158_spill] sm:$0xff] }
 0x1e7   : > { %2938 = vmatpush.msrb.mxu3 %v18569_v19  ;;  %1553 = vrot.lane.b32.xlu1 %v12794_v36, %s11380_s22  ;;  %v18573_v19 = vand.u32 4294901760, %v12278_v29 }
 0x1e8   : > { %1489 = vrot.lane.b32.xlu0 %v12794_v36, %s11381_s23  ;;  %v1695_v15 = vpop.f32.mrf.mxu1  ;;  %v1309_v17 = vpop.f32.mrf.mxu3  ;;  %1814 = vmatmul.f32.gmra.mxu1 %v12796_v43  ;;  %v18595_v43 = vld [vmem:[#allocation122_spill] sm:$0xff] }
 0x1e9   : > { %2942 = vmatpush.msrb.mxu3 %v18571_v57  ;;  %v1310_v22 = vadd.f32 %v1309_v17, %v1177_v26  ;;  %v18577_v57 = vld [vmem:[#allocation93_spill] sm:$0xff]  ;;  %v18578_v26 = vand.u32 4294901760, %v12339_v50  ;;  %v12832_v29 = vpop.f32.mrf.mxu2  ;;  %v18580_v50 = vand.u32 4294901760, %v12372_v52 }
 0x1ea   : > { %1931 = vmatmul.f32.gmra.mxu2 %v12727_v60  ;;  %v1075_v38 = vadd.f32 %v18577_v57, %v975_v32  ;;  %v1414_v17 = vpop.f32.mrf.mxu0  ;;  %2157 = vmatmul.f32.gmra.mxu0 %v12725_v37 }
 0x1eb   : > { %2946 = vmatpush.msrb.mxu3 %v18573_v19  ;;  %v12817_v40 = vadd.f32 %v1398_v49, %v1310_v22  ;;  %v18581_v19 = vld [vmem:[#allocation76_spill] sm:$0xff] }
 0x1ec   : > { %1978 = vmatmul.f32.gmra.mxu3 %v18574_v53  ;;  %v1183_v49 = vadd.f32 %v12385_v61, %v1075_v38  ;;  %v18583_v61 = vld [vmem:[#allocation100_spill] sm:$0xff] }
 0x1ed   : > { %18575 = vst [vmem:[#allocation68_spill] sm:$0xff] %v12817_v40  ;;  %2950 = vmatpush.msrb.mxu3 %v18576_v46  ;;  %v12824_v14 = vmul.f32 %v12817_v40, %v12817_v40  ;;  %v979_v46 = vadd.f32 %v18581_v19, %v12426_v58 }
 0x1ef   : > { %2954 = vmatpush.msrb.mxu3 %v18578_v26  ;;  %1555 = vrot.lane.b32.xlu1 %v12824_v14, %s11380_s22  ;;  %v1080_v38 = vadd.f32 %v18583_v61, %v979_v46 }
 0x1f0   : > { %1491 = vrot.lane.b32.xlu0 %v12824_v14, %s11381_s23  ;;  %2214 = vmatmul.f32.vlgmr.msrb.gmra.mxu1 %v12157_v44 }
 0x1f1   : > { %2958 = vmatpush.msrb.mxu3 %v18579_v23  ;;  %v1313_v22 = vpop.f32.mrf.mxu3  ;;  %v1189_v58 = vadd.f32 %v12428_v16, %v1080_v38 }
 0x1f2   : > { %1935 = vmatmul.f32.gmra.mxu2 %v12749_v21  ;;  %v1703_v32 = vpop.f32.mrf.mxu1  ;;  %v1314_v3 = vadd.f32 %v1313_v22, %v1183_v49 }
 0x1f3   : > { %2962 = vmatpush.msrb.mxu3 %v18580_v50  ;;  %v1418_v50 = vpop.f32.mrf.mxu0  ;;  %2163 = vmatmul.f32.gmra.mxu0 %v12747_v30  ;;  %v18599_v30 = vld [vmem:[#allocation119_spill] sm:$0xff] }
 0x1f4   : > { %1983 = vmatmul.f32.gmra.mxu3 %v12377_v27  ;;  %v12845_v57 = vadd.f32 %v1402_v42, %v1314_v3  ;;  %v18584_v42 = vld [vmem:[#allocation80_spill] sm:$0xff]  ;;  %v18630_v27 = vld [vmem:[#allocation170_spill] sm:$0xff] }
 0x1f5   : > { %v983_v49 = vadd.f32 %v18584_v42, %v12461_v39 }
 0x1f6   : > { %18582 = vst [vmem:[#allocation89_spill] sm:$0xff] %v12845_v57  ;;  %v12850_v26 = vmul.f32 %v12845_v57, %v12845_v57 }
 0x1f7   : > { %v1085_v3 = vadd.f32 %v12394_v10, %v983_v49  ;;  %v18586_v10 = vld [vmem:[#allocation83_spill] sm:$0xff] }
 0x1f8   : > { %v1876_v52 = vpop.f32.mrf.mxu2  ;;  %2218 = vmatmul.f32.gmra.mxu1 %v12231_v1  ;;  %1493 = vrot.lane.b32.xlu2 %v12850_v26, %s11381_s23 }
 0x1f9   : > { %v12854_v23 = vadd.f32 %v1876_v52, %v1695_v15  ;;  %1557 = vrot.lane.b32.xlu0 %v12850_v26, %s11380_s22  ;;  %v1195_v39 = vadd.f32 %v12472_v34, %v1085_v3  ;;  %v987_v52 = vadd.f32 %v18586_v10, %v12495_v59  ;;  %v18588_v59 = vld [vmem:[#allocation87_spill] sm:$0xff] }
 0x1fa   : > { %2303 = vmatmul.f32.vlgmr.msrb.gmra.mxu2 %v12157_v44  ;;  %v18632_v44 = vld [vmem:[#allocation151_spill] sm:$0xff] }
 0x1fb   : > { %v1422_v16 = vpop.f32.mrf.mxu0  ;;  %2169 = vmatmul.f32.gmra.mxu0 %v12772_v11 }
 0x1fc   : > { %1988 = vmatmul.f32.gmra.mxu3 %v12432_v2  ;;  %v1711_v22 = vpop.f32.mrf.mxu1 }
 0x1fd   : > { %v1317_v19 = vpop.f32.mrf.mxu3 }
 0x1fe   : > { %v1318_v15 = vadd.f32 %v1317_v19, %v1189_v58 }
 0x200   : > { %v12866_v46 = vadd.f32 %v12783_v25, %v1318_v15  ;;  %2222 = vmatmul.f32.gmra.mxu1 %v12346_v48  ;;  %v1090_v15 = vadd.f32 %v12447_v31, %v987_v52 }
 0x202   : > { %18585 = vst [vmem:[#allocation102_spill] sm:$0xff] %v12866_v46  ;;  %v12871_v61 = vmul.f32 %v12866_v46, %v12866_v46  ;;  %2307 = vmatmul.f32.gmra.mxu2 %v12231_v1  ;;  %v1201_v31 = vadd.f32 %v12514_v20, %v1090_v15  ;;  %v18590_v15 = vld [vmem:[#allocation90_spill] sm:$0xff] }
 0x203   : > { %v1880_v38 = vpop.f32.mrf.mxu2  ;;  %v1426_v34 = vpop.f32.mrf.mxu0 }
 0x204   : > { %1993 = vmatmul.f32.gmra.mxu3 %v12468_v35  ;;  %1495 = vrot.lane.b32.xlu2 %v12871_v61, %s11381_s23  ;;  %v12879_v25 = vadd.f32 %v1880_v38, %v1703_v32  ;;  %v1719_v42 = vpop.f32.mrf.mxu1  ;;  %v11348_v35 = vld [vmem:[%s11562_s25] sm:$0xff] }
 0x205   : > { %1559 = vrot.lane.b32.xlu1 %v12871_v61, %s11380_s22 }
 0x206   : > { %v1321_v58 = vpop.f32.mrf.mxu3 }
 0x207   : > { %v1322_v49 = vadd.f32 %v1321_v58, %v1195_v39 }
 0x208   : > { %2226 = vmatmul.f32.gmra.mxu1 %v12413_v18 }
 0x209   : > { %v12886_v19 = vadd.f32 %v1410_v54, %v1322_v49  ;;  %v991_v54 = vadd.f32 %v18588_v59, %v12528_v4 }
 0x20a   : > { %2311 = vmatmul.f32.gmra.mxu2 %v12346_v48 }
 0x20b   : > { %18587 = vst [vmem:[#allocation72_spill] sm:$0xff] %v12886_v19  ;;  %v12893_v32 = vmul.f32 %v12886_v19, %v12886_v19  ;;  %v1095_v58 = vadd.f32 %v12489_v51, %v991_v54  ;;  %v1430_v11 = vpop.f32.mrf.mxu0 }
 0x20c   : > { %1998 = vmatmul.f32.gmra.mxu3 %v12502_v24  ;;  %v18609_v24 = vld [vmem:[#allocation133_spill] sm:$0xff] }
 0x20d   : > { %v1884_v3 = vpop.f32.mrf.mxu2  ;;  %1497 = vrot.lane.b32.xlu2 %v12893_v32, %s11381_s23  ;;  %1561 = vrot.lane.b32.xlu1 %v12893_v32, %s11380_s22  ;;  %v1727_v39 = vpop.f32.mrf.mxu1 }
 0x20e   : > { %v12903_v38 = vadd.f32 %v1884_v3, %v1711_v22  ;;  %v1207_v22 = vadd.f32 %v12555_v63, %v1095_v58  ;;  %v995_v3 = vadd.f32 %v18590_v15, %v12557_v9  ;;  %v18592_v58 = vld [vmem:[#allocation111_spill] sm:$0xff] }
 0x20f   : > { %v1325_v10 = vpop.f32.mrf.mxu3 }
 0x210   : > { %v1326_v52 = vadd.f32 %v1325_v10, %v1201_v31  ;;  %2230 = vmatmul.f32.gmra.mxu1 %v12453_v7  ;;  %v1100_v54 = vadd.f32 %v12530_v0, %v995_v3  ;;  %v18593_v3 = vld [vmem:[#allocation129_spill] sm:$0xff] }
 0x212   : > { %v12906_v49 = vadd.f32 %v1414_v17, %v1326_v52  ;;  %2315 = vmatmul.f32.gmra.mxu2 %v12413_v18  ;;  %v1213_v52 = vadd.f32 %v12581_v6, %v1100_v54  ;;  %v18596_v54 = vld [vmem:[#allocation134_spill] sm:$0xff]  ;;  %v18622_v18 = vld [vmem:[#allocation163_spill] sm:$0xff] }
 0x213   : > { %v1434_v63 = vpop.f32.mrf.mxu0 }
 0x214   : > { %18589 = vst [vmem:[#allocation93_spill] sm:$0xff] %v12906_v49  ;;  %v12912_v20 = vmul.f32 %v12906_v49, %v12906_v49  ;;  %2003 = vmatmul.f32.gmra.mxu3 %v12538_v45 }
 0x215   : > { %v1888_v4 = vpop.f32.mrf.mxu2  ;;  %v1735_v17 = vpop.f32.mrf.mxu1 }
 0x216   : > { %v12918_v51 = vadd.f32 %v1888_v4, %v1719_v42  ;;  %1563 = vrot.lane.b32.xlu2 %v12912_v20, %s11380_s22  ;;  %1499 = vrot.lane.b32.xlu0 %v12912_v20, %s11381_s23  ;;  %v999_v4 = vadd.f32 %v18592_v58, %v12583_v28  ;;  %v18598_v58 = vld [vmem:[#allocation140_spill] sm:$0xff] }
 0x217   : > { %v1329_v31 = vpop.f32.mrf.mxu3  ;;  %v1003_v37 = vadd.f32 %v18599_v30, %v18598_v58  ;;  %v18605_v58 = vld [vmem:[#allocation147_spill] sm:$0xff] }
 0x218   : > { %v1330_v59 = vadd.f32 %v1329_v31, %v1207_v22  ;;  %2234 = vmatmul.f32.gmra.mxu1 %v12486_v62  ;;  %v1105_v31 = vadd.f32 %v18593_v3, %v999_v4 }
 0x21a   : > { %v12925_v10 = vadd.f32 %v1418_v50, %v1330_v59  ;;  %2319 = vmatmul.f32.gmra.mxu2 %v12453_v7 }
 0x21b   : > { %v1438_v6 = vpop.f32.mrf.mxu0 }
 0x21c   : > { %18591 = vst [vmem:[#allocation76_spill] sm:$0xff] %v12925_v10  ;;  %v12931_v9 = vmul.f32 %v12925_v10, %v12925_v10  ;;  %2008 = vmatmul.f32.gmra.mxu3 %v12565_v47  ;;  %v18602_v47 = vld [vmem:[#allocation127_spill] sm:$0xff] }
 0x21d   : > { %v1892_v42 = vpop.f32.mrf.mxu2  ;;  %v1743_v50 = vpop.f32.mrf.mxu1 }
 0x21e   : > { %v12937_v0 = vadd.f32 %v1892_v42, %v1727_v39  ;;  %1501 = vrot.lane.b32.xlu2 %v12931_v9, %s11381_s23  ;;  %v18597_v39 = vld [vmem:[#allocation142_spill] sm:$0xff] }
 0x21f   : > { %v1333_v22 = vpop.f32.mrf.mxu3  ;;  %v1219_v42 = vadd.f32 %v18597_v39, %v1105_v31  ;;  %v18603_v39 = vld [vmem:[#allocation141_spill] sm:$0xff] }
 0x220   : > { %v1334_v15 = vadd.f32 %v1333_v22, %v1213_v52  ;;  %2238 = vmatmul.f32.gmra.mxu1 %v18595_v43  ;;  %v18600_v22 = vld [vmem:[#allocation136_spill] sm:$0xff] }
 0x222   : > { %v12942_v59 = vadd.f32 %v1422_v16, %v1334_v15  ;;  %2323 = vmatmul.f32.gmra.mxu2 %v12486_v62  ;;  %v1110_v15 = vadd.f32 %v18600_v22, %v1003_v37 }
 0x223   : > { %v1442_v31 = vpop.f32.mrf.mxu0 }
 0x224   : > { %18594 = vst [vmem:[#allocation100_spill] sm:$0xff] %v12942_v59  ;;  %2013 = vmatmul.f32.gmra.mxu3 %v18596_v54  ;;  %v18606_v54 = vld [vmem:[#allocation124_spill] sm:$0xff] }
 0x225   : > { %v1896_v28 = vpop.f32.mrf.mxu2  ;;  %v1751_v16 = vpop.f32.mrf.mxu1  ;;  %v1007_v45 = vadd.f32 %v18606_v54, %v18605_v58  ;;  %v18611_v54 = vld [vmem:[#allocation159_spill] sm:$0xff]  ;;  %v18613_v58 = vld [vmem:[#allocation130_spill] sm:$0xff] }
 0x226   : > { %v12950_v56 = vadd.f32 %v1896_v28, %v1735_v17  ;;  %1565 = vrot.lane.b32.xlu2 %v12931_v9, %s11380_s22  ;;  %v18604_v17 = vld [vmem:[#allocation20_spill] sm:$0xff] }
 0x227   : > { %v1337_v52 = vpop.f32.mrf.mxu3  ;;  %v1225_v28 = vadd.f32 %v18604_v17, %v1110_v15  ;;  %v18610_v15 = vld [vmem:[#allocation148_spill] sm:$0xff] }
 0x228   : > { %v1338_v4 = vadd.f32 %v1337_v52, %v1219_v42  ;;  %2242 = vmatmul.f32.gmra.mxu1 %v18602_v47 }
 0x22a   : > { %v12955_v3 = vadd.f32 %v1426_v34, %v1338_v4  ;;  %2327 = vmatmul.f32.gmra.mxu2 %v18595_v43  ;;  %v18607_v34 = vld [vmem:[#allocation146_spill] sm:$0xff] }
 0x22b   : > { %v1115_v4 = vadd.f32 %v18607_v34, %v1007_v45 }
 0x22c   : > { %18601 = vst [vmem:[#allocation80_spill] sm:$0xff] %v12955_v3  ;;  %2018 = vmatmul.f32.gmra.mxu3 %v18603_v39  ;;  %v12970_v39 = vpop.f32.mrf.mxu0 }
 0x22d   : > { %v1900_v30 = vpop.f32.mrf.mxu2  ;;  %v1759_v42 = vpop.f32.mrf.mxu1 }
 0x22e   : > { %v12963_v62 = vadd.f32 %v1900_v30, %v1743_v50  ;;  %v1231_v50 = vadd.f32 %v18611_v54, %v1115_v4  ;;  %v18612_v30 = vld [vmem:[#allocation153_spill] sm:$0xff]  ;;  %v2368_v4 = vsel %vm706_vm1, %v11348_v35, 0  ;;  %v18617_v54 = vld [vmem:[#allocation155_spill] sm:$0xff] }
 0x22f   : > { %v1341_v52 = vpop.f32.mrf.mxu3  ;;  %v1011_v43 = vadd.f32 %v18613_v58, %v18612_v30 }
 0x230   : > { %v1342_v37 = vadd.f32 %v1341_v52, %v1225_v28  ;;  %2246 = vmatmul.f32.gmra.mxu1 %v18609_v24 }
 0x232   : > { %v12966_v22 = vadd.f32 %v1430_v11, %v1342_v37  ;;  %2331 = vmatmul.f32.gmra.mxu2 %v18602_v47  ;;  %v18614_v37 = vld [vmem:[#allocation154_spill] sm:$0xff]  ;;  %v18616_v47 = vld [vmem:[#allocation139_spill] sm:$0xff] }
 0x233   : > { %v1120_v34 = vadd.f32 %v18614_v37, %v1011_v43  ;;  %v18620_v43 = vld [vmem:[#allocation160_spill] sm:$0xff] }
 0x234   : > { %18608 = vst [vmem:[#allocation83_spill] sm:$0xff] %v12966_v22  ;;  %2023 = vmatmul.f32.gmra.mxu3 %v18610_v15  ;;  %v12983_v15 = vpop.f32.mrf.mxu0 }
 0x235   : > { %v1904_v17 = vpop.f32.mrf.mxu2  ;;  %v1767_v45 = vpop.f32.mrf.mxu1 }
 0x236   : > { %v12976_v28 = vadd.f32 %v1904_v17, %v1751_v16  ;;  %v12988_v16 = vand.u32 4294901760, %v2368_v4 }
 0x237   : > { %v1345_v11 = vpop.f32.mrf.mxu3 }
 0x238   : > { %v1346_v52 = vadd.f32 %v1345_v11, %v1231_v50  ;;  %2250 = vmatmul.f32.gmra.mxu1 %v18616_v47  ;;  %18618 = vst [vmem:[#allocation90_spill] sm:$0xff] %v12988_v16  ;;  %v18619_v50 = vld [vmem:[#allocation167_spill] sm:$0xff]  ;;  %2625 = vmatmul.f32.vlgmr.msra.gmra.mxu0 %v12988_v16 }
 0x239   : > { %v1237_v30 = vadd.f32 %v18619_v50, %v1120_v34  ;;  %v11349_v34 = vld [vmem:[%s11562_s25 + $0x8] sm:$0xff] }
 0x23a   : > { %v12979_v7 = vadd.f32 %v1434_v63, %v1346_v52  ;;  %2335 = vmatmul.f32.gmra.mxu2 %v18609_v24  ;;  %v18621_v63 = vld [vmem:[#allocation135_spill] sm:$0xff]  ;;  %v13005_v50 = vsel %vm706_vm1, %v11349_v34, 0 }
 0x23b   : > { %v1015_v58 = vadd.f32 %v18621_v63, %v18620_v43  ;;  %v11382_v43 = vmov 0   ;;  %v18629_v63 = vld [vmem:[#allocation15_spill] sm:$0xff] }
 0x23c   : > { %18615 = vst [vmem:[#allocation87_spill] sm:$0xff] %v12979_v7  ;;  %2028 = vmatmul.f32.gmra.mxu3 %v18617_v54  ;;  %v18624_v54 = vld [vmem:[#allocation145_spill] sm:$0xff]  ;;  %v13001_v48 = vpop.f32.mrf.mxu0  ;;  %10947 = vset.pattern.permute.xlu0 %v11382_v43 }
 0x23d   : > { %v1908_v17 = vpop.f32.mrf.mxu2  ;;  %v1775_v52 = vpop.f32.mrf.mxu1  ;;  %v1125_v35 = vadd.f32 %v18622_v18, %v1015_v58  ;;  %10948 = vset.pattern.permute.xlu1 %v11382_v43  ;;  %v18627_v18 = vld [vmem:[#allocation176_spill] sm:$0xff]  ;;  %10949 = vset.pattern.permute.xlu2 %v11382_v43 }
 0x23e   : > { %v12993_v11 = vadd.f32 %v1908_v17, %v1759_v42  ;;  %v18625_v42 = vld [vmem:[#allocation162_spill] sm:$0xff]  ;;  %v13009_v17 = vand.u32 4294901760, %v13005_v50 }
 0x23f   : > { %v1349_v37 = vpop.f32.mrf.mxu3 }
 0x240   : > { %v1350_v24 = vadd.f32 %v1349_v37, %v1237_v30  ;;  %2254 = vmatmul.f32.gmra.mxu1 %v18624_v54  ;;  %18626 = vst [vmem:[#allocation129_spill] sm:$0xff] %v13009_v17  ;;  %2629 = vmatmul.f32.gmra.mxu0 %v13009_v17 }
 0x242   : > { %v12997_v2 = vadd.f32 %v1438_v6, %v1350_v24  ;;  %2339 = vmatmul.f32.gmra.mxu2 %v18616_v47  ;;  %v1243_v24 = vadd.f32 %v18627_v18, %v1125_v35  ;;  %v18628_v6 = vld [vmem:[#allocation168_spill] sm:$0xff] }
 0x243   : > { %v1019_v58 = vadd.f32 %v18629_v63, %v18628_v6  ;;  %v11350_v18 = vld [vmem:[%s11562_s25 + $0x10] sm:$0xff] }
 0x244   : > { %18623 = vst [vmem:[#allocation111_spill] sm:$0xff] %v12997_v2  ;;  %2033 = vmatmul.f32.gmra.mxu3 %v18625_v42  ;;  %v13022_v35 = vpop.f32.mrf.mxu0 }
 0x245   : > { %v1912_v30 = vpop.f32.mrf.mxu2  ;;  %v1783_v34 = vpop.f32.mrf.mxu1  ;;  %v1130_v1 = vadd.f32 %v18630_v27, %v1019_v58 }
 0x246   : > { %v13014_v37 = vadd.f32 %v1912_v30, %v1767_v45  ;;  %v13026_v45 = vsel %vm706_vm1, %v11350_v18, 0  ;;  %v18633_v30 = vld [vmem:[#allocation169_spill] sm:$0xff] }
 0x247   : > { %v1353_v42 = vpop.f32.mrf.mxu3  ;;  %v13030_v43 = vand.u32 4294901760, %v13026_v45  ;;  %v1249_v27 = vadd.f32 %v12767_v55, %v1130_v1  ;;  %v11351_v55 = vld [vmem:[%s11562_s25 + $0x18] sm:$0xff] }
 0x248   : > { %v1354_v47 = vadd.f32 %v1353_v42, %v1243_v24  ;;  %2258 = vmatmul.f32.gmra.mxu1 %v18632_v44 }
 0x249   : > { %18634 = vst [vmem:[#allocation140_spill] sm:$0xff] %v13030_v43  ;;  %2633 = vmatmul.f32.gmra.mxu0 %v13030_v43 }
 0x24a   : > { %v13018_v53 = vadd.f32 %v1442_v31, %v1354_v47  ;;  %2343 = vmatmul.f32.gmra.mxu2 %v18624_v54  ;;  %v18635_v47 = vld [vmem:[#allocation174_spill] sm:$0xff]  ;;  %v18636_v31 = vld [vmem:[#allocation152_spill] sm:$0xff]  ;;  %v18637_v54 = vld [vmem:[#allocation179_spill] sm:$0xff] }
 0x24b   : > { %v1023_v24 = vadd.f32 %v18636_v31, %v18635_v47  ;;  %v13052_v47 = vsub.f32 %v2368_v4, %v12988_v16  ;;  %v18643_v31 = vld [vmem:[#allocation95_spill] sm:$0xff] }
 0x24c   : > { %18631 = vst [vmem:[#allocation142_spill] sm:$0xff] %v13018_v53  ;;  %2038 = vmatmul.f32.gmra.mxu3 %v18633_v30  ;;  %v13044_v1 = vpop.f32.mrf.mxu0 }
 0x24d   : > { %v1916_v42 = vpop.f32.mrf.mxu2  ;;  %v1791_v63 = vpop.f32.mrf.mxu1  ;;  %v1135_v33 = vadd.f32 %v18637_v54, %v1023_v24  ;;  %18641 = vst [vmem:[#allocation136_spill] sm:$0xff] %v13052_v47  ;;  %v18644_v24 = vld [vmem:[#allocation161_spill] sm:$0xff]  ;;  %v13064_v4 = vand.u32 4294901760, %v13052_v47 }
 0x24e   : > { %v13035_v6 = vadd.f32 %v1916_v42, %v1775_v52  ;;  %v13048_v52 = vsel %vm706_vm1, %v11351_v55, 0  ;;  %v18640_v42 = vld [vmem:[#allocation175_spill] sm:$0xff] }
 0x24f   : > { %v1357_v58 = vpop.f32.mrf.mxu3  ;;  %v13055_v54 = vand.u32 4294901760, %v13048_v52  ;;  %18645 = vst [vmem:[#allocation147_spill] sm:$0xff] %v13064_v4 }
 0x250   : > { %v1358_v18 = vadd.f32 %v1357_v58, %v1249_v27  ;;  %2262 = vmatmul.f32.gmra.mxu1 %v18639_v12  ;;  %v1255_v27 = vadd.f32 %v12798_v41, %v1135_v33  ;;  %v1027_v58 = vadd.f32 %v18644_v24, %v18643_v31  ;;  %v11352_v31 = vld [vmem:[%s11562_s25 + $0x20] sm:$0xff] }
 0x251   : > { %18642 = vst [vmem:[#allocation20_spill] sm:$0xff] %v13055_v54  ;;  %2637 = vmatmul.f32.gmra.mxu0 %v13055_v54 }
 0x252   : > { %v13040_v30 = vadd.f32 %v12970_v39, %v1358_v18  ;;  %2347 = vmatmul.f32.gmra.mxu2 %v18632_v44  ;;  %v1140_v46 = vadd.f32 %v12777_v13, %v1027_v58  ;;  %v2442_v13 = vsub.f32 %v13052_v47, %v13064_v4 }
 0x254   : > { %18638 = vst [vmem:[#allocation119_spill] sm:$0xff] %v13040_v30  ;;  %2043 = vmatmul.f32.gmra.mxu3 %v18640_v42  ;;  %v1261_v24 = vadd.f32 %v12832_v29, %v1140_v46  ;;  %v13093_v10 = vand.u32 4294901760, %v2442_v13 }
 0x255   : > { %v1920_v39 = vpop.f32.mrf.mxu2  ;;  %v1799_v55 = vpop.f32.mrf.mxu1 }
 0x256   : > { %v13060_v18 = vadd.f32 %v1920_v39, %v1783_v34  ;;  %v13073_v39 = vpop.f32.mrf.mxu0  ;;  %18649 = vst [vmem:[#allocation153_spill] sm:$0xff] %v13093_v10 }
 0x257   : > { %v1361_v44 = vpop.f32.mrf.mxu3 }
 0x258   : > { %v1362_v42 = vadd.f32 %v1361_v44, %v1255_v27  ;;  %2266 = vmatmul.f32.gmra.mxu1 %v12703_v5  ;;  %v13077_v44 = vsel %vm706_vm1, %v11352_v31, 0 }
 0x259   : > { %v1554_v33 = vpop.permute.xlu1 %1553 }
 0x25a   : > { %v13068_v40 = vadd.f32 %v12983_v15, %v1362_v42  ;;  %2351 = vmatmul.f32.gmra.mxu2 %v18639_v12  ;;  %v1490_v41 = vpop.permute.xlu0 %1489  ;;  %v13084_v15 = vsub.f32 %v13005_v50, %v13009_v17  ;;  %v13087_v42 = vand.u32 4294901760, %v13077_v44 }
 0x25b   : > { %v1537_v34 = vadd.f32 %v1490_v41, %v12794_v36 }
 0x25c   : > { %18646 = vst [vmem:[#allocation124_spill] sm:$0xff] %v13068_v40  ;;  %2048 = vmatmul.f32.gmra.mxu3 %v12762_v8  ;;  %2641 = vmatmul.f32.gmra.mxu0 %v13087_v42  ;;  %v1494_v8 = vpop.permute.xlu2 %1493  ;;  %v13096_v50 = vand.u32 4294901760, %v13084_v15 }
 0x25d   : > { %18647 = vst [vmem:[#allocation146_spill] sm:$0xff] %v13084_v15  ;;  %v1924_v27 = vpop.f32.mrf.mxu2  ;;  %v1601_v36 = vadd.f32 %v1554_v33, %v1537_v34  ;;  %v1807_v41 = vpop.f32.mrf.mxu1  ;;  %v11353_v33 = vld [vmem:[%s11562_s25 + $0x28] sm:$0xff] }
 0x25e   : > { %18648 = vst [vmem:[#allocation159_spill] sm:$0xff] %v13087_v42  ;;  %v13090_v58 = vadd.f32 %v1924_v27, %v1791_v63  ;;  %v13104_v63 = vpop.f32.mrf.mxu0  ;;  %v13108_v34 = vsel %vm706_vm1, %v11353_v33, 0 }
 0x25f   : > { %v1365_v31 = vpop.f32.mrf.mxu3  ;;  %3120 = vperm.xlu0 %10947, %v1601_v36   ;;  %18650 = vst [vmem:[#allocation130_spill] sm:$0xff] %v13096_v50  ;;  %v13118_v27 = vand.u32 4294901760, %v13108_v34 }
 0x260   : > { %v1366_v12 = vadd.f32 %v1365_v31, %v1261_v24  ;;  %2270 = vmatmul.f32.gmra.mxu1 %v12727_v60 }
 0x261   : > { %v1556_v13 = vpop.permute.xlu1 %1555  ;;  %18653 = vst [vmem:[#allocation160_spill] sm:$0xff] %v13118_v27 }
 0x262   : > { %v13099_v57 = vadd.f32 %v13001_v48, %v1366_v12  ;;  %2355 = vmatmul.f32.gmra.mxu2 %v12703_v5  ;;  %v1492_v29 = vpop.permute.xlu0 %1491  ;;  %v2450_v48 = vsub.f32 %v13084_v15, %v13096_v50  ;;  %v13115_v12 = vsub.f32 %v13026_v45, %v13030_v43 }
 0x263   : > { %v1538_v46 = vadd.f32 %v1492_v29, %v12824_v14  ;;  %v13122_v14 = vmul.f32 %v12942_v59, %v12942_v59 }
 0x264   : > { %18651 = vst [vmem:[#allocation154_spill] sm:$0xff] %v13099_v57  ;;  %2444 = vmatmul.f32.vlgmr.msra.gmra.mxu3 %v13093_v10  ;;  %2645 = vmatmul.f32.gmra.mxu0 %v13118_v27  ;;  %v13130_v10 = vand.u32 4294901760, %v2450_v48  ;;  %v13133_v5 = vand.u32 4294901760, %v13115_v12  ;;  %v1496_v19 = vpop.permute.xlu2 %1495  ;;  %v13149_v48 = vsub.f32 %v13048_v52, %v13055_v54 }
 0x265   : > { %18652 = vst [vmem:[#allocation167_spill] sm:$0xff] %v13115_v12  ;;  %v1928_v36 = vpop.f32.mrf.mxu2  ;;  %v1602_v24 = vadd.f32 %v1556_v13, %v1538_v46  ;;  %v1815_v29 = vpop.f32.mrf.mxu1  ;;  %v11354_v13 = vld [vmem:[%s11562_s25 + $0x30] sm:$0xff] }
 0x266   : > { %18654 = vst [vmem:[#allocation135_spill] sm:$0xff] %v13122_v14  ;;  %v13124_v31 = vadd.f32 %v1928_v36, %v1799_v55  ;;  %v13138_v55 = vpop.f32.mrf.mxu0  ;;  %v13142_v36 = vsel %vm706_vm1, %v11354_v13, 0  ;;  %v13169_v49 = vand.u32 4294901760, %v13149_v48 }
 0x267   : > { %v1974_v33 = vpop.f32.mrf.mxu3  ;;  %1567 = vrot.lane.b32.xlu0 %v13122_v14, %s11380_s22  ;;  %3125 = vperm.xlu1 %10948, %v1602_v24   ;;  %18655 = vst [vmem:[#allocation163_spill] sm:$0xff] %v13130_v10  ;;  %v13156_v24 = vmul.f32 %v12955_v3, %v12955_v3 }
 0x268   : > { %v1975_v45 = vadd.f32 %v1974_v33, %v12854_v23  ;;  %18656 = vst [vmem:[#allocation176_spill] sm:$0xff] %v13133_v5  ;;  %2274 = vmatmul.f32.gmra.mxu1 %v12749_v21  ;;  %v2458_v23 = vsub.f32 %v13115_v12, %v13133_v5 }
 0x269   : > { %18657 = vst [vmem:[#allocation168_spill] sm:$0xff] %v13149_v48 }
 0x26a   : > { %v2081_v46 = vadd.f32 %v13022_v35, %v1975_v45  ;;  %2359 = vmatmul.f32.gmra.mxu2 %v12727_v60  ;;  %v13152_v35 = vand.u32 4294901760, %v13142_v36  ;;  %v13166_v60 = vand.u32 4294901760, %v2458_v23  ;;  %18661 = vst [vmem:[#allocation152_spill] sm:$0xff] %v13169_v49 }
 0x26b   : > { %v1558_v59 = vpop.permute.xlu0 %1557 }
 0x26c   : > { %2452 = vmatmul.f32.gmra.mxu3 %v13130_v10  ;;  %18658 = vst [vmem:[#allocation15_spill] sm:$0xff] %v13152_v35  ;;  %2649 = vmatmul.f32.gmra.mxu0 %v13152_v35 }
 0x26d   : > { %v1932_v33 = vpop.f32.mrf.mxu2  ;;  %v2215_v13 = vpop.f32.mrf.mxu1  ;;  %18660 = vst [vmem:[#allocation174_spill] sm:$0xff] %v13166_v60 }
 0x26e   : > { %v13158_v45 = vadd.f32 %v1932_v33, %v1807_v41  ;;  %v1539_v33 = vadd.f32 %v1494_v8, %v12850_v26  ;;  %v13175_v3 = vpop.f32.mrf.mxu0  ;;  %v13193_v8 = vmul.f32 %v12966_v22, %v12966_v22 }
 0x26f   : > { %v1979_v10 = vpop.f32.mrf.mxu3  ;;  %1505 = vrot.lane.b32.xlu0 %v13156_v24, %s11381_s23  ;;  %1503 = vrot.lane.b32.xlu1 %v13122_v14, %s11381_s23 }
 0x270   : > { %18659 = vst [vmem:[#allocation170_spill] sm:$0xff] %v13158_v45  ;;  %v1980_v52 = vadd.f32 %v1979_v10, %v12879_v25  ;;  %2723 = vmatmul.f32.vlgmr.msra.gmra.mxu1 %v13052_v47  ;;  %v11355_v45 = vld [vmem:[%s11562_s25 + $0x38] sm:$0xff]  ;;  %v1498_v25 = vpop.permute.xlu2 %1497  ;;  %v2466_v10 = vsub.f32 %v13149_v48, %v13169_v49  ;;  %v1603_v26 = vadd.f32 %v1558_v59, %v1539_v33 }
 0x271   : > { %v13179_v14 = vsel %vm706_vm1, %v11355_v45, 0  ;;  %v1540_v47 = vadd.f32 %v1496_v19, %v12871_v61  ;;  %v11356_v19 = vld [vmem:[%s11562_s25 + $0x40] sm:$0xff] }
 0x272   : > { %v2087_v41 = vadd.f32 %v13044_v1, %v1980_v52  ;;  %2363 = vmatmul.f32.gmra.mxu2 %v12749_v21  ;;  %v13186_v1 = vsub.f32 %v13077_v44, %v13087_v42  ;;  %v13189_v23 = vand.u32 4294901760, %v13179_v14  ;;  %v13202_v22 = vand.u32 4294901760, %v2466_v10 }
 0x274   : > { %2460 = vmatmul.f32.gmra.mxu3 %v13166_v60  ;;  %18662 = vst [vmem:[#allocation179_spill] sm:$0xff] %v13186_v1  ;;  %2653 = vmatmul.f32.gmra.mxu0 %v13189_v23  ;;  %v13205_v59 = vand.u32 4294901760, %v13186_v1 }
 0x275   : > { %18663 = vst [vmem:[#allocation95_spill] sm:$0xff] %v13189_v23  ;;  %v1936_v45 = vpop.f32.mrf.mxu2  ;;  %v2219_v60 = vpop.f32.mrf.mxu1 }
 0x276   : > { %v13195_v52 = vadd.f32 %v1936_v45, %v1815_v29  ;;  %18664 = vst [vmem:[#allocation161_spill] sm:$0xff] %v13202_v22  ;;  %v13210_v61 = vpop.f32.mrf.mxu0 }
 0x277   : > { %v1984_v21 = vpop.f32.mrf.mxu3  ;;  %1571 = vrot.lane.b32.xlu0 %v13193_v8, %s11380_s22  ;;  %3130 = vperm.xlu1 %10948, %v1603_v26   ;;  %v1560_v42 = vpop.permute.xlu1 %1559  ;;  %18665 = vst [vmem:[#allocation181_spill] sm:$0xff] %v13205_v59  ;;  %v13214_v26 = vsel %vm706_vm1, %v11356_v19, 0 }
 0x278   : > { %v1985_v44 = vadd.f32 %v1984_v21, %v12903_v38  ;;  %v1604_v29 = vadd.f32 %v1560_v42, %v1540_v47  ;;  %2728 = vmatmul.f32.gmra.mxu1 %v13084_v15  ;;  %v2216_v21 = vadd.f32 %v2215_v13, %v2081_v46  ;;  %v2474_v38 = vsub.f32 %v13186_v1, %v13205_v59  ;;  %v1564_v45 = vpop.permute.xlu2 %1563 }
 0x279   : > { %v13221_v47 = vsub.f32 %v13108_v34, %v13118_v27  ;;  %v13228_v42 = vmul.f32 %v12979_v7, %v12979_v7 }
 0x27a   : > { %v2093_v33 = vadd.f32 %v13073_v39, %v1985_v44  ;;  %2829 = vmatmul.f32.vlgmr.msra.gmra.mxu2 %v13064_v4  ;;  %3135 = vperm.xlu2 %10949, %v1604_v29   ;;  %v13224_v39 = vand.u32 4294901760, %v13214_v26  ;;  %v13238_v29 = vand.u32 4294901760, %v2474_v38  ;;  %v1541_v4 = vadd.f32 %v1498_v25, %v12893_v32 }
 0x27b   : > { %18666 = vst [vmem:[#allocation182_spill] sm:$0xff] %v13221_v47  ;;  %v13241_v19 = vand.u32 4294901760, %v13221_v47  ;;  %v13267_v25 = vmul.f32 %v12997_v2, %v12997_v2 }
 0x27c   : > { %2468 = vmatmul.f32.gmra.mxu3 %v13202_v22  ;;  %18667 = vst [vmem:[#allocation183_spill] sm:$0xff] %v13224_v39  ;;  %2657 = vmatmul.f32.gmra.mxu0 %v13224_v39 }
 0x27d   : > { %v2304_v10 = vpop.f32.mrf.mxu2  ;;  %v2223_v46 = vpop.f32.mrf.mxu1  ;;  %18668 = vst [vmem:[#allocation184_spill] sm:$0xff] %v13238_v29 }
 0x27e   : > { %v13230_v44 = vadd.f32 %v2304_v10, %v2216_v21  ;;  %18669 = vst [vmem:[#allocation185_spill] sm:$0xff] %v13241_v19  ;;  %v13249_v15 = vpop.f32.mrf.mxu0 }
 0x27f   : > { %v1989_v13 = vpop.f32.mrf.mxu3  ;;  %1509 = vrot.lane.b32.xlu0 %v13228_v42, %s11381_s23  ;;  %1507 = vrot.lane.b32.xlu1 %v13193_v8, %s11381_s23  ;;  %v1562_v21 = vpop.permute.xlu1 %1561 }
 0x280   : > { %v1990_v34 = vadd.f32 %v1989_v13, %v12918_v51  ;;  %2733 = vmatmul.f32.gmra.mxu1 %v13115_v12  ;;  %v11357_v51 = vld [vmem:[%s11562_s25 + $0x48] sm:$0xff]  ;;  %v2220_v13 = vadd.f32 %v2219_v60, %v2087_v41 }
 0x281   : > { %v13253_v38 = vsel %vm706_vm1, %v11357_v51, 0 }
 0x282   : > { %v2099_v10 = vadd.f32 %v13104_v63, %v1990_v34  ;;  %2835 = vmatmul.f32.gmra.mxu2 %v13096_v50  ;;  %1569 = vrot.lane.b32.xlu2 %v13156_v24, %s11380_s22  ;;  %v2482_v63 = vsub.f32 %v13221_v47, %v13241_v19  ;;  %v13260_v34 = vsub.f32 %v13142_v36, %v13152_v35  ;;  %v13263_v32 = vand.u32 4294901760, %v13253_v38  ;;  %v1502_v36 = vpop.permute.xlu2 %1501 }
 0x283   : > { %v1605_v50 = vadd.f32 %v1562_v21, %v1541_v4 }
 0x284   : > { %2476 = vmatmul.f32.gmra.mxu3 %v13238_v29  ;;  %18670 = vst [vmem:[#allocation186_spill] sm:$0xff] %v13260_v34  ;;  %2661 = vmatmul.f32.gmra.mxu0 %v13263_v32  ;;  %v13275_v7 = vand.u32 4294901760, %v2482_v63  ;;  %v13278_v4 = vand.u32 4294901760, %v13260_v34  ;;  %v2224_v63 = vadd.f32 %v2223_v46, %v2093_v33 }
 0x285   : > { %18671 = vst [vmem:[#allocation187_spill] sm:$0xff] %v13263_v32  ;;  %v2308_v51 = vpop.f32.mrf.mxu2  ;;  %v2227_v60 = vpop.f32.mrf.mxu1 }
 0x286   : > { %v13269_v12 = vadd.f32 %v2308_v51, %v2220_v13  ;;  %18672 = vst [vmem:[#allocation188_spill] sm:$0xff] %v13275_v7  ;;  %v13284_v2 = vpop.f32.mrf.mxu0 }
 0x287   : > { %v1994_v41 = vpop.f32.mrf.mxu3  ;;  %1575 = vrot.lane.b32.xlu0 %v13267_v25, %s11380_s22  ;;  %3140 = vperm.xlu1 %10948, %v1605_v50   ;;  %18673 = vst [vmem:[#allocation189_spill] sm:$0xff] %v13278_v4  ;;  %v11358_v50 = vld [vmem:[%s11562_s25 + $0x50] sm:$0xff] }
 0x288   : > { %v1995_v29 = vadd.f32 %v1994_v41, %v12937_v0  ;;  %v1500_v22 = vpop.permute.xlu0 %1499  ;;  %2738 = vmatmul.f32.gmra.mxu1 %v13149_v48  ;;  %v13288_v0 = vsel %vm706_vm1, %v11358_v50, 0  ;;  %v2490_v41 = vsub.f32 %v13260_v34, %v13278_v4  ;;  %v11359_v48 = vld [vmem:[%s11562_s25 + $0x58] sm:$0xff] }
 0x289   : > { %v1542_v21 = vadd.f32 %v1500_v22, %v12912_v20  ;;  %v13295_v20 = vsub.f32 %v13179_v14, %v13189_v23  ;;  %v13298_v22 = vand.u32 4294901760, %v13288_v0 }
 0x28a   : > { %v2105_v13 = vadd.f32 %v13138_v55, %v1995_v29  ;;  %2841 = vmatmul.f32.gmra.mxu2 %v13133_v5  ;;  %v13302_v55 = vmul.f32 %v13018_v53, %v13018_v53 }
 0x28b   : > { %v1606_v51 = vadd.f32 %v1564_v45, %v1542_v21  ;;  %18674 = vst [vmem:[#allocation190_spill] sm:$0xff] %v13295_v20  ;;  %v13312_v21 = vand.u32 4294901760, %v2490_v41  ;;  %v13315_v50 = vand.u32 4294901760, %v13295_v20 }
 0x28c   : > { %2484 = vmatmul.f32.gmra.mxu3 %v13275_v7  ;;  %18675 = vst [vmem:[#allocation191_spill] sm:$0xff] %v13298_v22  ;;  %2665 = vmatmul.f32.gmra.mxu0 %v13298_v22  ;;  %v13325_v7 = vsel %vm706_vm1, %v11359_v48, 0 }
 0x28d   : > { %v2312_v45 = vpop.f32.mrf.mxu2  ;;  %3145 = vperm.xlu2 %10949, %v1606_v51   ;;  %v2231_v46 = vpop.f32.mrf.mxu1  ;;  %18676 = vst [vmem:[#allocation192_spill] sm:$0xff] %v13312_v21  ;;  %v2498_v41 = vsub.f32 %v13295_v20, %v13315_v50 }
 0x28e   : > { %v13304_v33 = vadd.f32 %v2312_v45, %v2224_v63  ;;  %18677 = vst [vmem:[#allocation193_spill] sm:$0xff] %v13315_v50  ;;  %v1566_v51 = vpop.permute.xlu2 %1565  ;;  %v1543_v45 = vadd.f32 %v1502_v36, %v12931_v9  ;;  %v13321_v5 = vpop.f32.mrf.mxu0  ;;  %v13339_v9 = vmul.f32 %v13040_v30, %v13040_v30 }
 0x28f   : > { %v1999_v29 = vpop.f32.mrf.mxu3  ;;  %1513 = vrot.lane.b32.xlu0 %v13302_v55, %s11381_s23  ;;  %1511 = vrot.lane.b32.xlu1 %v13267_v25, %s11381_s23 }
 0x290   : > { %v2000_v14 = vadd.f32 %v1999_v29, %v12950_v56  ;;  %2743 = vmatmul.f32.gmra.mxu1 %v13186_v1  ;;  %v2228_v56 = vadd.f32 %v2227_v60, %v2099_v10  ;;  %v13335_v29 = vand.u32 4294901760, %v13325_v7  ;;  %v1607_v36 = vadd.f32 %v1566_v51, %v1543_v45 }
 0x292   : > { %v2111_v63 = vadd.f32 %v13175_v3, %v2000_v14  ;;  %2847 = vmatmul.f32.gmra.mxu2 %v13169_v49  ;;  %v13332_v3 = vsub.f32 %v13214_v26, %v13224_v39  ;;  %18679 = vst [vmem:[#allocation195_spill] sm:$0xff] %v13335_v29  ;;  %v13349_v49 = vand.u32 4294901760, %v2498_v41  ;;  %v13368_v41 = vsub.f32 %v13253_v38, %v13263_v32 }
 0x294   : > { %2492 = vmatmul.f32.gmra.mxu3 %v13312_v21  ;;  %18678 = vst [vmem:[#allocation194_spill] sm:$0xff] %v13332_v3  ;;  %2669 = vmatmul.f32.gmra.mxu0 %v13335_v29  ;;  %v13352_v51 = vand.u32 4294901760, %v13332_v3 }
 0x295   : > { %v2316_v48 = vpop.f32.mrf.mxu2  ;;  %1573 = vrot.lane.b32.xlu2 %v13228_v42, %s11380_s22  ;;  %v2235_v60 = vpop.f32.mrf.mxu1  ;;  %18680 = vst [vmem:[#allocation196_spill] sm:$0xff] %v13349_v49 }
 0x296   : > { %v13343_v10 = vadd.f32 %v2316_v48, %v2228_v56  ;;  %18681 = vst [vmem:[#allocation197_spill] sm:$0xff] %v13352_v51  ;;  %v13357_v56 = vpop.f32.mrf.mxu0  ;;  %v11360_v48 = vld [vmem:[%s11562_s25 + $0x60] sm:$0xff]  ;;  %v2236_v53 = vadd.f32 %v2235_v60, %v2111_v63 }
 0x297   : > { %v2004_v26 = vpop.f32.mrf.mxu3  ;;  %1579 = vrot.lane.b32.xlu0 %v13339_v9, %s11380_s22  ;;  %3150 = vperm.xlu1 %10948, %v1607_v36   ;;  %v13361_v1 = vsel %vm706_vm1, %v11360_v48, 0  ;;  %v2232_v36 = vadd.f32 %v2231_v46, %v2105_v13  ;;  %18682 = vst [vmem:[#allocation198_spill] sm:$0xff] %v13368_v41 }
 0x298   : > { %v2005_v14 = vadd.f32 %v2004_v26, %v12963_v62  ;;  %2748 = vmatmul.f32.gmra.mxu1 %v13221_v47  ;;  %v2506_v62 = vsub.f32 %v13332_v3, %v13352_v51  ;;  %v13375_v26 = vmul.f32 %v13068_v40, %v13068_v40  ;;  %v13388_v47 = vand.u32 4294901760, %v13368_v41 }
 0x29a   : > { %v2117_v45 = vadd.f32 %v13210_v61, %v2005_v14  ;;  %2853 = vmatmul.f32.gmra.mxu2 %v13205_v59  ;;  %v13371_v61 = vand.u32 4294901760, %v13361_v1  ;;  %v13385_v59 = vand.u32 4294901760, %v2506_v62  ;;  %18685 = vst [vmem:[#allocation201_spill] sm:$0xff] %v13388_v47  ;;  %v13402_v62 = vsub.f32 %v13288_v0, %v13298_v22 }
 0x29c   : > { %2500 = vmatmul.f32.gmra.mxu3 %v13349_v49  ;;  %18683 = vst [vmem:[#allocation199_spill] sm:$0xff] %v13371_v61  ;;  %2673 = vmatmul.f32.gmra.mxu0 %v13371_v61  ;;  %v11361_v49 = vld [vmem:[%s11562_s25 + $0x68] sm:$0xff] }
 0x29d   : > { %v2320_v14 = vpop.f32.mrf.mxu2  ;;  %v2239_v13 = vpop.f32.mrf.mxu1  ;;  %18684 = vst [vmem:[#allocation200_spill] sm:$0xff] %v13385_v59  ;;  %v2407_v21 = vsel %vm706_vm1, %v11361_v49, 0 }
 0x29e   : > { %v13377_v48 = vadd.f32 %v2320_v14, %v2232_v36  ;;  %v13393_v14 = vpop.f32.mrf.mxu0  ;;  %18686 = vst [vmem:[#allocation202_spill] sm:$0xff] %v13402_v62  ;;  %v2240_v30 = vadd.f32 %v2239_v13, %v2117_v45 }
 0x29f   : > { %v2009_v46 = vpop.f32.mrf.mxu3  ;;  %1517 = vrot.lane.b32.xlu0 %v13375_v26, %s11381_s23  ;;  %1515 = vrot.lane.b32.xlu1 %v13339_v9, %s11381_s23 }
 0x2a0   : > { %v2010_v38 = vadd.f32 %v2009_v46, %v12976_v28  ;;  %2753 = vmatmul.f32.gmra.mxu1 %v13260_v34  ;;  %v2514_v28 = vsub.f32 %v13368_v41, %v13388_v47  ;;  %v13408_v46 = vmul.f32 %v13099_v57, %v13099_v57  ;;  %v13419_v34 = vand.u32 4294901760, %v13402_v62 }
 0x2a2   : > { %v2123_v36 = vadd.f32 %v13249_v15, %v2010_v38  ;;  %2859 = vmatmul.f32.gmra.mxu2 %v13241_v19  ;;  %v13404_v15 = vand.u32 4294901760, %v2407_v21  ;;  %v13416_v60 = vand.u32 4294901760, %v2514_v28  ;;  %18689 = vst [vmem:[#allocation205_spill] sm:$0xff] %v13419_v34  ;;  %v13433_v28 = vsub.f32 %v13325_v7, %v13335_v29 }
 0x2a4   : > { %2508 = vmatmul.f32.gmra.mxu3 %v13385_v59  ;;  %18687 = vst [vmem:[#allocation203_spill] sm:$0xff] %v13404_v15  ;;  %2677 = vmatmul.f32.gmra.mxu0 %v13404_v15 }
 0x2a5   : > { %v2324_v38 = vpop.f32.mrf.mxu2  ;;  %v2243_v49 = vpop.f32.mrf.mxu1  ;;  %18688 = vst [vmem:[#allocation204_spill] sm:$0xff] %v13416_v60 }
 0x2a6   : > { %v13410_v19 = vadd.f32 %v2324_v38, %v2236_v53  ;;  %v13424_v53 = vpop.f32.mrf.mxu0  ;;  %v11362_v38 = vld [vmem:[%s11562_s25 + $0x70] sm:$0xff]  ;;  %18690 = vst [vmem:[#allocation206_spill] sm:$0xff] %v13433_v28 }
 0x2a7   : > { %v2014_v63 = vpop.f32.mrf.mxu3  ;;  %1583 = vrot.lane.b32.xlu0 %v13408_v46, %s11380_s22  ;;  %v2410_v57 = vsel %vm706_vm1, %v11362_v38, 0 }
 0x2a8   : > { %v2015_v0 = vadd.f32 %v2014_v63, %v12993_v11  ;;  %2758 = vmatmul.f32.gmra.mxu1 %v13295_v20  ;;  %v2522_v11 = vsub.f32 %v13402_v62, %v13419_v34 }
 0x2aa   : > { %v2129_v59 = vadd.f32 %v13284_v2, %v2015_v0  ;;  %2865 = vmatmul.f32.gmra.mxu2 %v13278_v4  ;;  %v13435_v2 = vand.u32 4294901760, %v2410_v57  ;;  %v13441_v20 = vand.u32 4294901760, %v2522_v11 }
 0x2ac   : > { %2516 = vmatmul.f32.gmra.mxu3 %v13416_v60  ;;  %18691 = vst [vmem:[#allocation207_spill] sm:$0xff] %v13435_v2  ;;  %2681 = vmatmul.f32.gmra.mxu0 %v13435_v2  ;;  %v13444_v60 = vand.u32 4294901760, %v13433_v28 }
 0x2ad   : > { %v2328_v63 = vpop.f32.mrf.mxu2  ;;  %v2247_v4 = vpop.f32.mrf.mxu1  ;;  %18692 = vst [vmem:[#allocation208_spill] sm:$0xff] %v13441_v20 }
 0x2ae   : > { %v13437_v0 = vadd.f32 %v2328_v63, %v2240_v30  ;;  %v2248_v45 = vadd.f32 %v2247_v4, %v2129_v59  ;;  %18693 = vst [vmem:[#allocation209_spill] sm:$0xff] %v13444_v60  ;;  %v13451_v30 = vpop.f32.mrf.mxu0  ;;  %v11363_v63 = vld [vmem:[%s11562_s25 + $0x78] sm:$0xff]  ;;  %v2244_v59 = vadd.f32 %v2243_v49, %v2123_v36  ;;  %v13460_v4 = vsub.f32 %v13361_v1, %v13371_v61 }
 0x2af   : > { %v2019_v38 = vpop.f32.mrf.mxu3  ;;  %v2413_v40 = vsel %vm706_vm1, %v11363_v63, 0 }
 0x2b0   : > { %v2020_v13 = vadd.f32 %v2019_v38, %v13014_v37  ;;  %2763 = vmatmul.f32.gmra.mxu1 %v13332_v3  ;;  %v2530_v37 = vsub.f32 %v13433_v28, %v13444_v60  ;;  %18695 = vst [vmem:[#allocation211_spill] sm:$0xff] %v13460_v4  ;;  %v13482_v3 = vsub.f32 %v2407_v21, %v13404_v15 }
 0x2b2   : > { %v13447_v7 = vadd.f32 %v13321_v5, %v2020_v13  ;;  %2871 = vmatmul.f32.gmra.mxu2 %v13315_v50  ;;  %v13462_v5 = vand.u32 4294901760, %v2413_v40  ;;  %v13470_v49 = vand.u32 4294901760, %v2530_v37  ;;  %v13473_v50 = vand.u32 4294901760, %v13460_v4  ;;  %18700 = vst [vmem:[#allocation216_spill] sm:$0xff] %v13482_v3 }
 0x2b4   : > { %18694 = vst [vmem:[#allocation210_spill] sm:$0xff] %v13447_v7  ;;  %2524 = vmatmul.f32.gmra.mxu3 %v13441_v20  ;;  %2685 = vmatmul.f32.gmra.mxu0 %v13462_v5 }
 0x2b5   : > { %18696 = vst [vmem:[#allocation212_spill] sm:$0xff] %v13462_v5  ;;  %v2332_v11 = vpop.f32.mrf.mxu2  ;;  %v13467_v13 = vpop.f32.mrf.mxu1 }
 0x2b6   : > { %v13464_v38 = vadd.f32 %v2332_v11, %v2244_v59  ;;  %18697 = vst [vmem:[#allocation213_spill] sm:$0xff] %v13467_v13  ;;  %v2164_v59 = vpop.f32.mrf.mxu0  ;;  %v2538_v11 = vsub.f32 %v13460_v4, %v13473_v50 }
 0x2b7   : > { %v2024_v63 = vpop.f32.mrf.mxu3  ;;  %18698 = vst [vmem:[#allocation214_spill] sm:$0xff] %v13470_v49 }
 0x2b8   : > { %v2025_v36 = vadd.f32 %v2024_v63, %v13035_v6  ;;  %18699 = vst [vmem:[#allocation215_spill] sm:$0xff] %v13473_v50  ;;  %2768 = vmatmul.f32.gmra.mxu1 %v13368_v41 }
 0x2ba   : > { %v2141_v1 = vadd.f32 %v13357_v56, %v2025_v36  ;;  %2877 = vmatmul.f32.gmra.mxu2 %v13352_v51  ;;  %v13488_v51 = vand.u32 4294901760, %v2538_v11 }
 0x2bc   : > { %2532 = vmatmul.f32.gmra.mxu3 %v13470_v49  ;;  %3053 = vmatmul.f32.vlgmr.msrb.gmra.mxu0 %v12988_v16  ;;  %18701 = vst [vmem:[#allocation217_spill] sm:$0xff] %v13488_v51  ;;  %v13491_v49 = vand.u32 4294901760, %v13482_v3 }
 0x2bd   : > { %v2336_v6 = vpop.f32.mrf.mxu2  ;;  %v2255_v63 = vpop.f32.mrf.mxu1 }
 0x2be   : > { %v13484_v37 = vadd.f32 %v2336_v6, %v2248_v45  ;;  %v2256_v36 = vadd.f32 %v2255_v63, %v2141_v1  ;;  %18702 = vst [vmem:[#allocation218_spill] sm:$0xff] %v13491_v49  ;;  %v2170_v21 = vpop.f32.mrf.mxu0  ;;  %v2546_v45 = vsub.f32 %v13482_v3, %v13491_v49 }
 0x2bf   : > { %v2029_v56 = vpop.f32.mrf.mxu3 }
 0x2c0   : > { %v2030_v41 = vadd.f32 %v2029_v56, %v13060_v18  ;;  %2773 = vmatmul.f32.gmra.mxu1 %v13402_v62  ;;  %v13502_v18 = vsub.f32 %v2410_v57, %v13435_v2  ;;  %v13510_v6 = vand.u32 4294901760, %v2546_v45  ;;  %v13522_v62 = vsub.f32 %v2413_v40, %v13462_v5 }
 0x2c2   : > { %v13494_v20 = vadd.f32 %v13393_v14, %v2030_v41  ;;  %2883 = vmatmul.f32.gmra.mxu2 %v13388_v47  ;;  %18704 = vst [vmem:[#allocation220_spill] sm:$0xff] %v13502_v18  ;;  %v13513_v63 = vand.u32 4294901760, %v13502_v18 }
 0x2c3   : > { %18707 = vst [vmem:[#allocation223_spill] sm:$0xff] %v13510_v6 }
 0x2c4   : > { %18703 = vst [vmem:[#allocation219_spill] sm:$0xff] %v13494_v20  ;;  %2540 = vmatmul.f32.gmra.mxu3 %v13488_v51  ;;  %3057 = vmatmul.f32.gmra.mxu0 %v13009_v17  ;;  %v2554_v47 = vsub.f32 %v13502_v18, %v13513_v63 }
 0x2c5   : > { %v13504_v1 = vpop.f32.mrf.mxu2  ;;  %v13507_v11 = vpop.f32.mrf.mxu1  ;;  %18708 = vst [vmem:[#allocation224_spill] sm:$0xff] %v13513_v63 }
 0x2c6   : > { %18705 = vst [vmem:[#allocation221_spill] sm:$0xff] %v13504_v1  ;;  %v2626_v57 = vpop.f32.mrf.mxu0 }
 0x2c7   : > { %18706 = vst [vmem:[#allocation222_spill] sm:$0xff] %v13507_v11  ;;  %v2034_v41 = vpop.f32.mrf.mxu3 }
 0x2c8   : > { %v2035_v14 = vadd.f32 %v2034_v41, %v13090_v58  ;;  %2778 = vmatmul.f32.gmra.mxu1 %v13433_v28  ;;  %18709 = vst [vmem:[#allocation225_spill] sm:$0xff] %v13522_v62 }
 0x2ca   : > { %v2153_v56 = vadd.f32 %v13424_v53, %v2035_v14  ;;  %2889 = vmatmul.f32.gmra.mxu2 %v13419_v34  ;;  %v13528_v34 = vand.u32 4294901760, %v2554_v47 }
 0x2cc   : > { %2548 = vmatmul.f32.gmra.mxu3 %v13510_v6  ;;  %3061 = vmatmul.f32.gmra.mxu0 %v13030_v43  ;;  %18710 = vst [vmem:[#allocation226_spill] sm:$0xff] %v13528_v34  ;;  %v13531_v6 = vand.u32 4294901760, %v13522_v62 }
 0x2cd   : > { %v2344_v58 = vpop.f32.mrf.mxu2  ;;  %v2263_v41 = vpop.f32.mrf.mxu1 }
 0x2ce   : > { %v13524_v45 = vadd.f32 %v2344_v58, %v2256_v36  ;;  %v2264_v14 = vadd.f32 %v2263_v41, %v2153_v56  ;;  %18711 = vst [vmem:[#allocation227_spill] sm:$0xff] %v13531_v6  ;;  %v2630_v36 = vpop.f32.mrf.mxu0 }
 0x2cf   : > { %v2039_v53 = vpop.f32.mrf.mxu3 }
 0x2d0   : > { %v2040_v28 = vadd.f32 %v2039_v53, %v13124_v31  ;;  %2783 = vmatmul.f32.gmra.mxu1 %v13460_v4  ;;  %v2562_v31 = vsub.f32 %v13522_v62, %v13531_v6 }
 0x2d1   : > { %v13533_v51 = vpop.permute.xlu0 %3120 }
 0x2d2   : > { %v13536_v40 = vadd.f32 %v13451_v30, %v2040_v28  ;;  %2895 = vmatmul.f32.gmra.mxu2 %v13444_v60  ;;  %v18715_v30 = vld [vmem:[#allocation170_spill] sm:$0xff]  ;;  %v13551_v53 = vand.u32 4294901760, %v2562_v31 }
 0x2d4   : > { %18712 = vst [vmem:[#allocation228_spill] sm:$0xff] %v13536_v40  ;;  %2556 = vmatmul.f32.gmra.mxu3 %v13528_v34  ;;  %v13545_v56 = vpop.permute.xlu2 %3135  ;;  %3065 = vmatmul.f32.gmra.mxu0 %v13055_v54 }
 0x2d5   : > { %v13543_v47 = vpop.f32.mrf.mxu2  ;;  %v13548_v58 = vpop.f32.mrf.mxu1  ;;  %18716 = vst [vmem:[#allocation170_spill] sm:$0xff] %v13551_v53 }
 0x2d6   : > { %18713 = vst [vmem:[#allocation229_spill] sm:$0xff] %v13543_v47  ;;  %v2634_v40 = vpop.f32.mrf.mxu0 }
 0x2d7   : > { %18714 = vst [vmem:[#allocation230_spill] sm:$0xff] %v13548_v58  ;;  %v2044_v28 = vpop.f32.mrf.mxu3  ;;  %v18717_v58 = vld [vmem:[#allocation159_spill] sm:$0xff] }
 0x2d8   : > { %v2045_v41 = vadd.f32 %v2044_v28, %v18715_v30  ;;  %2788 = vmatmul.f32.gmra.mxu1 %v13482_v3 }
 0x2d9   : > { %v13553_v60 = vpop.permute.xlu1 %3125  ;;  %v1568_v4 = vpop.permute.xlu0 %1567 }
 0x2da   : > { %v2165_v34 = vadd.f32 %v2164_v59, %v2045_v41  ;;  %2901 = vmatmul.f32.gmra.mxu2 %v13473_v50  ;;  %v18718_v50 = vld [vmem:[#allocation135_spill] sm:$0xff] }
 0x2dc   : > { %2564 = vmatmul.f32.gmra.mxu3 %v13551_v53  ;;  %3069 = vmatmul.f32.gmra.mxu0 %v18717_v58  ;;  %v1570_v31 = vpop.permute.xlu2 %1569 }
 0x2dd   : > { %v2352_v47 = vpop.f32.mrf.mxu2  ;;  %v2271_v20 = vpop.f32.mrf.mxu1 }
 0x2de   : > { %v13558_v11 = vadd.f32 %v2352_v47, %v2264_v14  ;;  %v2272_v30 = vadd.f32 %v2271_v20, %v2165_v34  ;;  %v2638_v47 = vpop.f32.mrf.mxu0 }
 0x2df   : > { %v2049_v28 = vpop.f32.mrf.mxu3 }
 0x2e0   : > { %v2050_v1 = vadd.f32 %v2049_v28, %v13195_v52  ;;  %2793 = vmatmul.f32.gmra.mxu1 %v13502_v18 }
 0x2e1   : > { %v1504_v13 = vpop.permute.xlu1 %1503  ;;  %v1506_v59 = vpop.permute.xlu0 %1505 }
 0x2e2   : > { %v13562_v41 = vadd.f32 %v2170_v21, %v2050_v1  ;;  %2907 = vmatmul.f32.gmra.mxu2 %v13491_v49  ;;  %v1544_v3 = vadd.f32 %v1504_v13, %v18718_v50  ;;  %v1545_v14 = vadd.f32 %v1506_v59, %v13156_v24 }
 0x2e4   : > { %2964 = vmatmul.f32.vlgmr.msrb.gmra.mxu3 %v12988_v16  ;;  %v1608_v53 = vadd.f32 %v1568_v4, %v1544_v3  ;;  %v1609_v7 = vadd.f32 %v1570_v31, %v1545_v14  ;;  %3073 = vmatmul.f32.gmra.mxu0 %v13118_v27 }
 0x2e5   : > { %v13569_v34 = vpop.f32.mrf.mxu2 }
 0x2e6   : > { %3155 = vperm.xlu2 %10949, %v1608_v53   ;;  %3160 = vperm.xlu1 %10948, %v1609_v7   ;;  %v2642_v3 = vpop.f32.mrf.mxu0 }
 0x2e7   : > { %v2445_v52 = vpop.f32.mrf.mxu3  ;;  %v13573_v21 = vpop.permute.xlu2 %3145 }
 0x2e8   : > { %v2446_v20 = vadd.f32 %v2445_v52, %v13230_v44  ;;  %2798 = vmatmul.f32.gmra.mxu1 %v13522_v62 }
 0x2e9   : > { %v13575_v1 = vpop.permute.xlu1 %3130  ;;  %v1572_v50 = vpop.permute.xlu0 %1571 }
 0x2ea   : > { %v13577_v24 = vadd.f32 %v2626_v57, %v2446_v20  ;;  %2913 = vmatmul.f32.gmra.mxu2 %v13513_v63 }
 0x2ec   : > { %2968 = vmatmul.f32.gmra.mxu3 %v13009_v17  ;;  %3077 = vmatmul.f32.gmra.mxu0 %v13152_v35 }
 0x2ed   : > { %v2360_v7 = vpop.f32.mrf.mxu2 }
 0x2ee   : > { %v13582_v4 = vadd.f32 %v2360_v7, %v2272_v30  ;;  %1577 = vrot.lane.b32.xlu2 %v13302_v55, %s11380_s22  ;;  %1519 = vrot.lane.b32.xlu1 %v13408_v46, %s11381_s23  ;;  %v2646_v14 = vpop.f32.mrf.mxu0 }
 0x2ef   : > { %v2453_v44 = vpop.f32.mrf.mxu3  ;;  %v1574_v59 = vpop.permute.xlu2 %1573 }
 0x2f0   : > { %v2454_v13 = vadd.f32 %v2453_v44, %v13269_v12 }
 0x2f1   : > { %v1508_v57 = vpop.permute.xlu1 %1507  ;;  %v1510_v53 = vpop.permute.xlu0 %1509 }
 0x2f2   : > { %v13590_v28 = vadd.f32 %v2630_v36, %v2454_v13  ;;  %2919 = vmatmul.f32.gmra.mxu2 %v13531_v6  ;;  %v1546_v31 = vadd.f32 %v1508_v57, %v13193_v8  ;;  %v1547_v30 = vadd.f32 %v1510_v53, %v13228_v42 }
 0x2f4   : > { %2972 = vmatmul.f32.gmra.mxu3 %v13030_v43  ;;  %v1610_v52 = vadd.f32 %v1572_v50, %v1546_v31  ;;  %v1611_v20 = vadd.f32 %v1574_v59, %v1547_v30  ;;  %3081 = vmatmul.f32.gmra.mxu0 %v13189_v23 }
 0x2f6   : > { %3165 = vperm.xlu2 %10949, %v1610_v52   ;;  %3170 = vperm.xlu1 %10948, %v1611_v20   ;;  %v2650_v8 = vpop.f32.mrf.mxu0 }
 0x2f7   : > { %v2461_v7 = vpop.f32.mrf.mxu3 }
 0x2f8   : > { %v2462_v12 = vadd.f32 %v2461_v7, %v13304_v33 }
 0x2f9   : > { %v13598_v36 = vpop.permute.xlu1 %3140  ;;  %v1576_v50 = vpop.permute.xlu0 %1575 }
 0x2fa   : > { %v13600_v44 = vadd.f32 %v2634_v40, %v2462_v12 }
 0x2fc   : > { %2976 = vmatmul.f32.gmra.mxu3 %v13055_v54  ;;  %3085 = vmatmul.f32.gmra.mxu0 %v13224_v39 }
 0x2fe   : > { %1581 = vrot.lane.b32.xlu2 %v13375_v26, %s11380_s22  ;;  %v2654_v31 = vpop.f32.mrf.mxu0 }
 0x2ff   : > { %v2469_v42 = vpop.f32.mrf.mxu3 }
 0x300   : > { %v2470_v13 = vadd.f32 %v2469_v42, %v13343_v10 }
 0x301   : > { %v1512_v57 = vpop.permute.xlu1 %1511  ;;  %v1514_v52 = vpop.permute.xlu0 %1513 }
 0x302   : > { %v13607_v53 = vadd.f32 %v2638_v47, %v2470_v13  ;;  %v1548_v33 = vadd.f32 %v1512_v57, %v13267_v25 }
 0x304   : > { %2980 = vmatmul.f32.gmra.mxu3 %v18717_v58  ;;  %v1612_v40 = vadd.f32 %v1576_v50, %v1548_v33  ;;  %3089 = vmatmul.f32.gmra.mxu0 %v13263_v32 }
 0x306   : > { %3175 = vperm.xlu2 %10949, %v1612_v40   ;;  %v13617_v10 = vpop.f32.mrf.mxu0 }
 0x307   : > { %v2477_v30 = vpop.f32.mrf.mxu3 }
 0x308   : > { %v2478_v59 = vadd.f32 %v2477_v30, %v13377_v48 }
 0x309   : > { %v13613_v20 = vpop.permute.xlu1 %3150  ;;  %v1580_v48 = vpop.permute.xlu0 %1579 }
 0x30a   : > { %v13615_v7 = vadd.f32 %v2642_v3, %v2478_v59 }
 0x30c   : > { %2984 = vmatmul.f32.gmra.mxu3 %v13118_v27  ;;  %3093 = vmatmul.f32.gmra.mxu0 %v13298_v22 }
 0x30e   : > { %v13625_v13 = vpop.f32.mrf.mxu0 }
 0x30f   : > { %v2485_v25 = vpop.f32.mrf.mxu3 }
 0x310   : > { %v2486_v47 = vadd.f32 %v2485_v25, %v13410_v19 }
 0x311   : > { %v1516_v12 = vpop.permute.xlu1 %1515 }
 0x312   : > { %v13622_v42 = vadd.f32 %v2646_v14, %v2486_v47  ;;  %v1550_v50 = vadd.f32 %v1516_v12, %v13339_v9 }
 0x314   : > { %2988 = vmatmul.f32.gmra.mxu3 %v13152_v35  ;;  %v1614_v3 = vadd.f32 %v1580_v48, %v1550_v50  ;;  %3097 = vmatmul.f32.gmra.mxu0 %v13335_v29  ;;  %v13663_v48 = vpop.f32.mrf.mxu2 }
 0x316   : > { %3185 = vperm.xlu1 %10948, %v1614_v3   ;;  %v13632_v19 = vpop.f32.mrf.mxu0 }
 0x317   : > { %v2493_v57 = vpop.f32.mrf.mxu3 }
 0x318   : > { %v2494_v33 = vadd.f32 %v2493_v57, %v13437_v0 }
 0x31a   : > { %v13630_v40 = vadd.f32 %v2650_v8, %v2494_v33 }
 0x31c   : > { %2992 = vmatmul.f32.gmra.mxu3 %v13189_v23  ;;  %3101 = vmatmul.f32.gmra.mxu0 %v13371_v61 }
 0x31e   : > { %v13639_v59 = vpop.f32.mrf.mxu0 }
 0x31f   : > { %v2501_v14 = vpop.f32.mrf.mxu3 }
 0x320   : > { %v2502_v9 = vadd.f32 %v2501_v14, %v13464_v38 }
 0x322   : > { %v13637_v30 = vadd.f32 %v2654_v31, %v2502_v9  ;;  %v2830_v9 = vpop.f32.mrf.mxu2 }
 0x324   : > { %2996 = vmatmul.f32.gmra.mxu3 %v13224_v39  ;;  %3105 = vmatmul.f32.gmra.mxu0 %v13404_v15 }
 0x326   : > { %v13646_v8 = vpop.f32.mrf.mxu0 }
 0x327   : > { %v2509_v25 = vpop.f32.mrf.mxu3 }
 0x328   : > { %v13644_v0 = vadd.f32 %v2509_v25, %v13484_v37  ;;  %v13659_v37 = vpop.f32.mrf.mxu1 }
 0x32c   : > { %3000 = vmatmul.f32.gmra.mxu3 %v13263_v32  ;;  %3109 = vmatmul.f32.gmra.mxu0 %v13435_v2 }
 0x32e   : > { %v13652_v38 = vpop.f32.mrf.mxu0 }
 0x32f   : > { %v13649_v47 = vpop.f32.mrf.mxu3 }
 0x330   : > { %v2724_v33 = vpop.f32.mrf.mxu1 }
 0x334   : > { %3004 = vmatmul.f32.gmra.mxu3 %v13298_v22  ;;  %3113 = vmatmul.f32.gmra.mxu0 %v13462_v5 }
 0x336   : > { %v13661_v50 = vpop.f32.mrf.mxu0 }
 0x337   : > { %v2525_v31 = vpop.f32.mrf.mxu3 }
 0x338   : > { %v13657_v12 = vadd.f32 %v2525_v31, %v13524_v45  ;;  %v1549_v45 = vadd.f32 %v1514_v52, %v13302_v55  ;;  %v2729_v49 = vpop.f32.mrf.mxu1 }
 0x33c   : > { %3008 = vmatmul.f32.gmra.mxu3 %v13335_v29  ;;  %v2836_v29 = vpop.f32.mrf.mxu2 }
 0x33e   : > { %v13670_v14 = vpop.f32.mrf.mxu0 }
 0x33f   : > { %v13666_v3 = vpop.f32.mrf.mxu3  ;;  %18719 = vst [vmem:[#allocation135_spill] sm:$0xff] %v13670_v14 }
 0x340   : > { %v13668_v57 = vpop.permute.xlu2 %3155  ;;  %v2734_v52 = vpop.f32.mrf.mxu1 }
 0x344   : > { %3012 = vmatmul.f32.gmra.mxu3 %v13371_v61  ;;  %v1518_v61 = vpop.permute.xlu0 %1517  ;;  %v2842_v32 = vpop.f32.mrf.mxu2 }
 0x346   : > { %v3054_v62 = vpop.f32.mrf.mxu0 }
 0x347   : > { %v2541_v25 = vpop.f32.mrf.mxu3 }
 0x348   : > { %v13675_v31 = vadd.f32 %v2541_v25, %v13558_v11  ;;  %v1578_v6 = vpop.permute.xlu2 %1577  ;;  %v1551_v11 = vadd.f32 %v1518_v61, %v13375_v26  ;;  %v2739_v61 = vpop.f32.mrf.mxu1 }
 0x349   : > { %v1613_v63 = vadd.f32 %v1578_v6, %v1549_v45 }
 0x34b   : > { %3180 = vperm.xlu0 %10947, %v1613_v63  }
 0x34c   : > { %3016 = vmatmul.f32.gmra.mxu3 %v13404_v15  ;;  %v1584_v26 = vpop.permute.xlu0 %1583 }
 0x34e   : > { %v3058_v55 = vpop.f32.mrf.mxu0 }
 0x34f   : > { %v13678_v18 = vpop.f32.mrf.mxu3 }
 0x350   : > { %v13680_v22 = vpop.permute.xlu2 %3165 }
 0x354   : > { %3020 = vmatmul.f32.gmra.mxu3 %v13435_v2 }
 0x356   : > { %v3062_v23 = vpop.f32.mrf.mxu0 }
 0x357   : > { %v2557_v25 = vpop.f32.mrf.mxu3 }
 0x358   : > { %v13685_v6 = vadd.f32 %v2557_v25, %v13582_v4  ;;  %v13687_v63 = vpop.permute.xlu1 %3160  ;;  %v1582_v45 = vpop.permute.xlu2 %1581  ;;  %v2725_v4 = vadd.f32 %v2724_v33, %v13577_v24  ;;  %v3231_v24 = vld [vmem:[%s13698_s27] sm:$0xff]  ;;  %v2730_v33 = vadd.f32 %v2729_v49, %v13590_v28  ;;  %v3232_v49 = vld [vmem:[%s13698_s27 + $0x8] sm:$0xff] }
 0x359   : > { %v1615_v15 = vadd.f32 %v1582_v45, %v1551_v11  ;;  %v2848_v25 = vpop.f32.mrf.mxu2 }
 0x35a   : > { %v2831_v58 = vadd.f32 %v2830_v9, %v2725_v4  ;;  %v2744_v9 = vpop.f32.mrf.mxu1 }
 0x35b   : > { %3190 = vperm.xlu2 %10949, %v1615_v15   ;;  %v13703_v15 = vld [vmem:[%s17898_s8 + $0x2] ss:$0 sm:$0xff] }
 0x35c   : > { %3024 = vmatmul.f32.gmra.mxu3 %v13462_v5 }
 0x35f   : > { %v13690_v39 = vpop.f32.mrf.mxu3 }
 0x360   : > { %18720 = vst [vmem:[#allocation231_spill] sm:$0xff] %v13690_v39  ;;  %v1520_v2 = vpop.permute.xlu1 %1519 }
 0x361   : > { %v1552_v35 = vadd.f32 %v1520_v2, %v13408_v46  ;;  %v2854_v4 = vpop.f32.mrf.mxu2 }
 0x363   : > { %v1616_v27 = vadd.f32 %v1584_v26, %v1552_v35  ;;  %v3199_v35 = vmul.f32 %v13703_v15, %v13533_v51  ;;  %v2837_v26 = vadd.f32 %v2836_v29, %v2730_v33  ;;  %v10893_v51 = vld [vmem:[%s17897_s7 + $0x48] sm:$0xff]  ;;  %v2735_v29 = vadd.f32 %v2734_v52, %v13600_v44  ;;  %v3233_v52 = vld [vmem:[%s13698_s27 + $0x10] sm:$0xff] }
 0x364   : > { %3640 = vmatpush.bf16.msrb.mxu1 %v10893_v51 }
 0x365   : > { %3195 = vperm.xlu0 %10947, %v1616_v27   ;;  %v3066_v27 = vpop.f32.mrf.mxu0 }
 0x367   : > { %v2965_v11 = vpop.f32.mrf.mxu3 }
 0x368   : > { %v2966_v46 = vadd.f32 %v2965_v11, %v2831_v58 }
 0x36a   : > { %v3055_v2 = vadd.f32 %v3054_v62, %v2966_v46  ;;  %v3200_v62 = vmul.f32 %v13703_v15, %v13553_v60  ;;  %v2843_v46 = vadd.f32 %v2842_v32, %v2735_v29  ;;  %v13724_v60 = vpop.f32.mrf.mxu2  ;;  %v3201_v32 = vmul.f32 %v13703_v15, %v13575_v1 }
 0x36c   : > { %v3215_v45 = vadd.f32 %v3199_v35, %v3055_v2  ;;  %v2749_v35 = vpop.f32.mrf.mxu1 }
 0x36d   : > { %v3070_v11 = vpop.f32.mrf.mxu0 }
 0x36e   : > { %v13709_v5 = vadd.f32 %v3231_v24, %v3215_v45  ;;  %v10892_v24 = vld [vmem:[%s17897_s7 + $0x40] sm:$0xff]  ;;  %v2740_v45 = vadd.f32 %v2739_v61, %v13607_v53 }
 0x36f   : > { %v2969_v54 = vpop.f32.mrf.mxu3  ;;  %3641 = vmatpush.bf16.msrb.mxu1 %v10892_v24  ;;  %v3202_v24 = vmul.f32 %v13703_v15, %v13545_v56 }
 0x370   : > { %v10540_v43 = vmul.f32 -1.442695, %v13709_v5  ;;  %v2970_v17 = vadd.f32 %v2969_v54, %v2837_v26  ;;  %v2849_v51 = vadd.f32 %v2848_v25, %v2740_v45 }
 0x372   : > { %10961 = vpow2.f32 %v10540_v43  ;;  %v3059_v58 = vadd.f32 %v3058_v55, %v2970_v17  ;;  %v13743_v53 = vpop.f32.mrf.mxu2 }
 0x374   : > { %v3216_v28 = vadd.f32 %v3200_v62, %v3059_v58 }
 0x375   : > { %v13736_v58 = vpop.f32.mrf.mxu0 }
 0x376   : > { %v13719_v2 = vadd.f32 %v3232_v49, %v3216_v28  ;;  %v13738_v28 = vpop.f32.mrf.mxu1 }
 0x377   : > { %v2973_v54 = vpop.f32.mrf.mxu3 }
 0x378   : > { %v10962_v33 = vpop.eup %10961  ;;  %v10541_v17 = vmul.f32 -1.442695, %v13719_v2  ;;  %v2974_v43 = vadd.f32 %v2973_v54, %v2843_v46 }
 0x379   : > { %v13727_v55 = vadd.f32 1.0, %v10962_v33  ;;  %v3234_v33 = vld [vmem:[%s13698_s27 + $0x18] sm:$0xff] }
 0x37a   : > { %10963 = vpow2.f32 %v10541_v17  ;;  %v3063_v44 = vadd.f32 %v3062_v23, %v2974_v43  ;;  %v2745_v17 = vadd.f32 %v2744_v9, %v13615_v7  ;;  %v3203_v9 = vmul.f32 %v13703_v15, %v13598_v36 }
 0x37b   : > { %10965 = vrcp.f32 %v13727_v55  ;;  %vm3332_vm3 = vweird.f32 %v13727_v55 }
 0x37c   : > { %v3217_v26 = vadd.f32 %v3201_v32, %v3063_v44  ;;  %v2855_v44 = vadd.f32 %v2854_v4, %v2745_v17  ;;  %v3338_v4 = vand.u32 2147483648, %v13727_v55  ;;  %v2750_v17 = vadd.f32 %v2749_v35, %v13622_v42 }
 0x37e   : > { %v13734_v62 = vadd.f32 %v3233_v52, %v3217_v26 }
 0x37f   : > { %v2977_v49 = vpop.f32.mrf.mxu3 }
 0x380   : > { %v10964_v29 = vpop.eup %10963  ;;  %v10542_v1 = vmul.f32 -1.442695, %v13734_v62  ;;  %v2978_v46 = vadd.f32 %v2977_v49, %v2849_v51 }
 0x381   : > { %v10966_v23 = vpop.eup %10965  ;;  %v3312_v54 = vadd.f32 1.0, %v10964_v29  ;;  %v13751_v29 = vpop.f32.mrf.mxu0 }
 0x382   : > { %v3328_v61 = vmul.f32 %v10966_v23, %v13727_v55  ;;  %10967 = vpow2.f32 %v10542_v1  ;;  %v3067_v25 = vadd.f32 %v3066_v27, %v2978_v46  ;;  %v13755_v27 = vpop.f32.mrf.mxu1  ;;  %vm3333_vm2 = vweird.f32 %v10966_v23 }
 0x383   : > { %10969 = vrcp.f32 %v3312_v54  ;;  %vm13766_vm4 = vmor %vm3332_vm3, %vm3333_vm2  ;;  %v3353_v36 = vand.u32 2147483648, %v3312_v54  ;;  %vm3347_vm7 = vweird.f32 %v3312_v54 }
 0x384   : > { %v3329_v43 = vsub.f32 1.0, %v3328_v61  ;;  %v3218_v32 = vadd.f32 %v3202_v24, %v3067_v25  ;;  %v13761_v24 = vpop.f32.mrf.mxu2  ;;  %v3336_v61 = vand.u32 2147483647, %v13727_v55  ;;  %v3339_v55 = vor.u32 1.1754944e-38, %v3338_v4 }
 0x385   : > { %v3354_v39 = vor.u32 1.1754944e-38, %v3353_v36 }
 0x386   : > { %v3330_v52 = vmul.f32 %v10966_v23, %v3329_v43  ;;  %v13748_v45 = vadd.f32 %v3234_v33, %v3218_v32  ;;  %v3351_v32 = vand.u32 2147483647, %v3312_v54  ;;  %vm3337_vm6 = vcmp.eq.f32.partialorder %v3336_v61, 8.507059e+37 }
 0x387   : > { %v2981_v26 = vpop.f32.mrf.mxu3 }
 0x388   : > { %v10968_v51 = vpop.eup %10967  ;;  %v10543_v56 = vmul.f32 -1.442695, %v13748_v45  ;;  %v2982_v49 = vadd.f32 %v2981_v26, %v2855_v44  ;;  %v3331_v46 = vadd.f32 %v10966_v23, %v3330_v52  ;;  %v3235_v44 = vld [vmem:[%s13698_s27 + $0x20] sm:$0xff]  ;;  %vm3352_vm9 = vcmp.eq.f32.partialorder %v3351_v32, 8.507059e+37 }
 0x389   : > { %v10970_v16 = vpop.eup %10969  ;;  %v13753_v1 = vadd.f32 1.0, %v10968_v51  ;;  %v13783_v4 = vpop.f32.mrf.mxu0  ;;  %v3204_v32 = vmul.f32 %v13703_v15, %v13573_v21  ;;  %v3205_v21 = vmul.f32 %v13703_v15, %v13613_v20 }
 0x38a   : > { %v3343_v7 = vmul.f32 %v10970_v16, %v3312_v54  ;;  %10971 = vpow2.f32 %v10543_v56  ;;  %v3071_v33 = vadd.f32 %v3070_v11, %v2982_v49  ;;  %v3335_v52 = vsel %vm13766_vm4, %v10966_v23, %v3331_v46 }
 0x38b   : > { %10973 = vrcp.f32 %v13753_v1  ;;  %vm3348_vm5 = vweird.f32 %v10970_v16  ;;  %v2861_v56 = vadd.f32 %v13724_v60, %v2750_v17  ;;  %v3340_v14 = vsel %vm3337_vm6, %v3339_v55, %v3335_v52 }
 0x38c   : > { %v3344_v25 = vsub.f32 1.0, %v3343_v7  ;;  %v3219_v51 = vadd.f32 %v3203_v9, %v3071_v33  ;;  %vm3349_vm8 = vmor %vm3347_vm7, %vm3348_vm5  ;;  %v2755_v54 = vadd.f32 %v13738_v28, %v13630_v40  ;;  %v3567_v33 = vmul.f32 %v3340_v14, %v13709_v5  ;;  %v13796_v52 = vpop.f32.mrf.mxu2  ;;  %v3236_v28 = vld [vmem:[%s13698_s27 + $0x28] sm:$0xff] }
 0x38d   : > { %vm3362_vm11 = vweird.f32 %v13753_v1  ;;  %v3368_v20 = vand.u32 2147483648, %v13753_v1 }
 0x38e   : > { %v3345_v26 = vmul.f32 %v10970_v16, %v3344_v25  ;;  %v13774_v35 = vadd.f32 %v3235_v44, %v3219_v51  ;;  %v13788_v25 = vpop.f32.mrf.mxu1  ;;  %v2867_v44 = vadd.f32 %v13743_v53, %v2755_v54 }
 0x38f   : > { %v2985_v7 = vpop.f32.mrf.mxu3 }
 0x390   : > { %v10972_v11 = vpop.eup %10971  ;;  %v3346_v42 = vadd.f32 %v10970_v16, %v3345_v26  ;;  %v2986_v23 = vadd.f32 %v2985_v7, %v2861_v56  ;;  %v10544_v9 = vmul.f32 -1.442695, %v13774_v35  ;;  %v2760_v56 = vadd.f32 %v13755_v27, %v13637_v30 }
 0x391   : > { %v13776_v49 = vpop.eup %10973  ;;  %v13778_v43 = vadd.f32 1.0, %v10972_v11  ;;  %v3237_v11 = vld [vmem:[%s13698_s27 + $0x30] sm:$0xff]  ;;  %v3086_v54 = vpop.f32.mrf.mxu0 }
 0x392   : > { %v3350_v46 = vsel %vm3349_vm8, %v10970_v16, %v3346_v42  ;;  %v3358_v60 = vmul.f32 %v13776_v49, %v13753_v1  ;;  %v3075_v36 = vadd.f32 %v13736_v58, %v2986_v23  ;;  %vm3363_vm10 = vweird.f32 %v13776_v49 }
 0x393   : > { %v3355_v61 = vsel %vm3352_vm9, %v3354_v39, %v3350_v46  ;;  %10975 = vrcp.f32 %v13778_v43  ;;  %v3366_v42 = vand.u32 2147483647, %v13753_v1  ;;  %vm13819_vm12 = vmor %vm3362_vm11, %vm3363_vm10  ;;  %v3383_v1 = vand.u32 2147483648, %v13778_v43 }
 0x394   : > { %v3568_v16 = vmul.f32 %v3355_v61, %v13719_v2  ;;  %v3359_v17 = vsub.f32 1.0, %v3358_v60  ;;  %10977 = vpow2.f32 %v10544_v9  ;;  %v3220_v26 = vadd.f32 %v3204_v32, %v3075_v36  ;;  %v18726_v32 = vld [vmem:[#allocation213_spill] sm:$0xff] }
 0x395   : > { %v2873_v60 = vadd.f32 %v13761_v24, %v2760_v56  ;;  %v3381_v61 = vand.u32 2147483647, %v13778_v43  ;;  %vm3367_vm14 = vcmp.eq.f32.partialorder %v3366_v42, 8.507059e+37  ;;  %vm3377_vm15 = vweird.f32 %v13778_v43  ;;  %v3238_v42 = vld [vmem:[%s13698_s27 + $0x38] sm:$0xff] }
 0x396   : > { %v3583_v39 = vpack.c.bf16 %v3568_v16, %v3567_v33  ;;  %v3360_v40 = vmul.f32 %v13776_v49, %v3359_v17  ;;  %v13805_v53 = vadd.f32 %v3236_v28, %v3220_v26  ;;  %v2769_v33 = vpop.f32.mrf.mxu1  ;;  %v18725_v17 = vld [vmem:[#allocation210_spill] sm:$0xff] }
 0x397   : > { %v2989_v5 = vpop.f32.mrf.mxu3  ;;  %v2252_v36 = vadd.f32 %v18726_v32, %v18725_v17  ;;  %vm3382_vm2 = vcmp.eq.f32.partialorder %v3381_v61, 8.507059e+37  ;;  %v3207_v32 = vmul.f32 %v13703_v15, %v13687_v63  ;;  %v2667_v63 = vadd.f32 %v13632_v19, %v13657_v12 }
 0x398   : > { %v2990_v14 = vadd.f32 %v2989_v5, %v2867_v44  ;;  %10568 = vmatmul.msk.bf16.vlgmr.msrb.gmra.mxu1 %vm18334_vm0, %v3583_v39  ;;  %v3361_v58 = vadd.f32 %v13776_v49, %v3360_v40  ;;  %v10545_v46 = vmul.f32 -1.442695, %v13805_v53  ;;  %v3369_v44 = vor.u32 1.1754944e-38, %v3368_v20  ;;  %v2884_v40 = vpop.f32.mrf.mxu2 }
 0x399   : > { %v10976_v2 = vpop.eup %10975  ;;  %v2659_v5 = vadd.f32 %v13617_v10, %v13644_v0 }
 0x39a   : > { %v10978_v51 = vpop.eup %10977  ;;  %v3373_v55 = vmul.f32 %v10976_v2, %v13778_v43  ;;  %v3079_v7 = vadd.f32 %v13751_v29, %v2990_v14  ;;  %v3365_v29 = vsel %vm13819_vm12, %v13776_v49, %v3361_v58  ;;  %vm3378_vm13 = vweird.f32 %v10976_v2  ;;  %v18727_v43 = vld [vmem:[#allocation221_spill] sm:$0xff] }
 0x39b   : > { %v13815_v23 = vadd.f32 1.0, %v10978_v51  ;;  %v3206_v14 = vmul.f32 %v13703_v15, %v13668_v57  ;;  %vm3379_vm1 = vmor %vm3377_vm15, %vm3378_vm13  ;;  %v3384_v58 = vor.u32 1.1754944e-38, %v3383_v1  ;;  %v2765_v10 = vadd.f32 %v13788_v25, %v2659_v5 }
 0x39c   : > { %v3374_v30 = vsub.f32 1.0, %v3373_v55  ;;  %v3221_v27 = vadd.f32 %v3205_v21, %v3079_v7  ;;  %v3370_v21 = vsel %vm3367_vm14, %v3369_v44, %v3365_v29  ;;  %v2341_v7 = vadd.f32 %v18727_v43, %v2252_v36  ;;  %v3090_v29 = vpop.f32.mrf.mxu0  ;;  %v18728_v44 = vld [vmem:[#allocation219_spill] sm:$0xff] }
 0x39d   : > { %10979 = vrcp.f32 %v13815_v23  ;;  %v3569_v0 = vmul.f32 %v3370_v21, %v13734_v62  ;;  %v2879_v9 = vadd.f32 %v13796_v52, %v2765_v10  ;;  %v18730_v21 = vld [vmem:[#allocation229_spill] sm:$0xff]  ;;  %vm3392_vm5 = vweird.f32 %v13815_v23 }
 0x39e   : > { %v3375_v16 = vmul.f32 %v10976_v2, %v3374_v30  ;;  %10981 = vpow2.f32 %v10545_v46  ;;  %v13829_v24 = vadd.f32 %v3237_v11, %v3221_v27 }
 0x39f   : > { %v2993_v39 = vpop.f32.mrf.mxu3 }
 0x3a0   : > { %v3376_v49 = vadd.f32 %v10976_v2, %v3375_v16  ;;  %v10546_v28 = vmul.f32 -1.442695, %v13829_v24  ;;  %v2994_v26 = vadd.f32 %v2993_v39, %v2873_v60  ;;  %v2890_v52 = vpop.f32.mrf.mxu2  ;;  %v18729_v39 = vld [vmem:[#allocation222_spill] sm:$0xff] }
 0x3a2   : > { %v3380_v51 = vsel %vm3379_vm1, %v10976_v2, %v3376_v49  ;;  %10983 = vpow2.f32 %v10546_v28  ;;  %v3083_v56 = vadd.f32 %v13783_v4, %v2994_v26  ;;  %v2518_v4 = vadd.f32 %v13649_v47, %v2341_v7  ;;  %v3239_v28 = vld [vmem:[%s13698_s27 + $0x40] sm:$0xff] }
 0x3a3   : > { %v13841_v55 = vpop.eup %10979  ;;  %v3385_v11 = vsel %vm3382_vm2, %v3384_v58, %v3380_v51  ;;  %v2260_v49 = vadd.f32 %v18729_v39, %v18728_v44  ;;  %v3398_v7 = vand.u32 2147483648, %v13815_v23 }
 0x3a4   : > { %v10982_v20 = vpop.eup %10981  ;;  %v3570_v57 = vmul.f32 %v3385_v11, %v13748_v45  ;;  %v3222_v46 = vadd.f32 %v3206_v14, %v3083_v56  ;;  %v3388_v2 = vmul.f32 %v13841_v55, %v13815_v23  ;;  %v2774_v45 = vpop.f32.mrf.mxu1  ;;  %v2663_v47 = vadd.f32 %v13625_v13, %v2518_v4 }
 0x3a5   : > { %v13850_v60 = vadd.f32 1.0, %v10982_v20  ;;  %v2349_v58 = vadd.f32 %v18730_v21, %v2260_v49  ;;  %vm3393_vm3 = vweird.f32 %v13841_v55  ;;  %v18734_v21 = vld [vmem:[#allocation230_spill] sm:$0xff] }
 0x3a6   : > { %v13854_v30 = vadd.f32 %v3238_v42, %v3222_v46  ;;  %v3584_v27 = vpack.c.bf16 %v3570_v57, %v3569_v0  ;;  %v3389_v16 = vsub.f32 1.0, %v3388_v2  ;;  %v2770_v26 = vadd.f32 %v2769_v33, %v2663_v47  ;;  %vm13897_vm6 = vmor %vm3392_vm5, %vm3393_vm3 }
 0x3a7   : > { %10985 = vrcp.f32 %v13850_v60  ;;  %v2997_v62 = vpop.f32.mrf.mxu3  ;;  %v3411_v19 = vand.u32 2147483647, %v13850_v60  ;;  %v3413_v12 = vand.u32 2147483648, %v13850_v60  ;;  %vm3407_vm7 = vweird.f32 %v13850_v60 }
 0x3a8   : > { %v10984_v25 = vpop.eup %10983  ;;  %v10547_v61 = vmul.f32 -1.442695, %v13854_v30  ;;  %v2998_v1 = vadd.f32 %v2997_v62, %v2879_v9  ;;  %10569 = vmatmul.msk.bf16.gmra.mxu1 %vm18334_vm0, %v3584_v27  ;;  %v3390_v51 = vmul.f32 %v13841_v55, %v3389_v16  ;;  %v2885_v13 = vadd.f32 %v2884_v40, %v2770_v26  ;;  %v13879_v40 = vpop.f32.mrf.mxu0 }
 0x3a9   : > { %v13859_v17 = vadd.f32 1.0, %v10984_v25  ;;  %v3208_v9 = vmul.f32 %v13703_v15, %v13680_v22  ;;  %v3396_v27 = vand.u32 2147483647, %v13815_v23  ;;  %v2896_v62 = vpop.f32.mrf.mxu2  ;;  %v2775_v47 = vadd.f32 %v2774_v45, %v2667_v63 }
 0x3aa   : > { %10987 = vpow2.f32 %v10547_v61  ;;  %v3087_v36 = vadd.f32 %v3086_v54, %v2998_v1  ;;  %v2534_v54 = vadd.f32 %v13666_v3, %v2349_v58  ;;  %v3391_v57 = vadd.f32 %v13841_v55, %v3390_v51 }
 0x3ab   : > { %10989 = vrcp.f32 %v13859_v17  ;;  %v3399_v23 = vor.u32 1.1754944e-38, %v3398_v7  ;;  %vm3412_vm9 = vcmp.eq.f32.partialorder %v3411_v19, 8.507059e+37  ;;  %vm3397_vm10 = vcmp.eq.f32.partialorder %v3396_v27, 8.507059e+37  ;;  %v3176_v27 = vpop.permute.xlu2 %3175 }
 0x3ac   : > { %v3223_v5 = vadd.f32 %v3207_v32, %v3087_v36  ;;  %v2779_v46 = vpop.f32.mrf.mxu1  ;;  %v3395_v22 = vsel %vm13897_vm6, %v13841_v55, %v3391_v57  ;;  %v3414_v32 = vor.u32 1.1754944e-38, %v3413_v12  ;;  %v3240_v36 = vld [vmem:[%s13698_s27 + $0x48] sm:$0xff]  ;;  %vm3422_vm12 = vweird.f32 %v13859_v17 }
 0x3ad   : > { %v10986_v14 = vpop.eup %10985  ;;  %v3400_v58 = vsel %vm3397_vm10, %v3399_v23, %v3395_v22  ;;  %v3426_v57 = vand.u32 2147483647, %v13859_v17 }
 0x3ae   : > { %v3403_v56 = vmul.f32 %v10986_v14, %v13850_v60  ;;  %v13871_v43 = vadd.f32 %v3239_v28, %v3223_v5  ;;  %vm3408_vm4 = vweird.f32 %v10986_v14  ;;  %v2671_v28 = vadd.f32 %v13639_v59, %v2534_v54  ;;  %v18733_v5 = vld [vmem:[#allocation228_spill] sm:$0xff] }
 0x3af   : > { %v3001_v11 = vpop.f32.mrf.mxu3  ;;  %vm3409_vm8 = vmor %vm3407_vm7, %vm3408_vm4  ;;  %v2891_v60 = vadd.f32 %v2890_v52, %v2775_v47  ;;  %v2268_v55 = vadd.f32 %v18734_v21, %v18733_v5  ;;  %vm3427_vm15 = vcmp.eq.f32.partialorder %v3426_v57, 8.507059e+37 }
 0x3b0   : > { %v10988_v33 = vpop.eup %10987  ;;  %v3404_v42 = vsub.f32 1.0, %v3403_v56  ;;  %v10548_v20 = vmul.f32 -1.442695, %v13871_v43  ;;  %v3002_v10 = vadd.f32 %v3001_v11, %v2885_v13  ;;  %v2780_v56 = vadd.f32 %v2779_v46, %v2671_v28  ;;  %v3171_v11 = vpop.permute.xlu1 %3170 }
 0x3b1   : > { %v13881_v0 = vpop.eup %10989  ;;  %v13886_v3 = vadd.f32 1.0, %v10988_v33  ;;  %v3098_v33 = vpop.f32.mrf.mxu0  ;;  %v3209_v12 = vmul.f32 %v13703_v15, %v3171_v11 }
 0x3b2   : > { %v3405_v2 = vmul.f32 %v10986_v14, %v3404_v42  ;;  %v3418_v4 = vmul.f32 %v13881_v0, %v13859_v17  ;;  %10991 = vpow2.f32 %v10548_v20  ;;  %v3091_v16 = vadd.f32 %v3090_v29, %v3002_v10 }
 0x3b3   : > { %10993 = vrcp.f32 %v13886_v3  ;;  %vm3423_vm11 = vweird.f32 %v13881_v0  ;;  %v2897_v42 = vadd.f32 %v2896_v62, %v2780_v56  ;;  %v3571_v20 = vmul.f32 %v3400_v58, %v13774_v35 }
 0x3b4   : > { %v3406_v61 = vadd.f32 %v10986_v14, %v3405_v2  ;;  %v3419_v1 = vsub.f32 1.0, %v3418_v4  ;;  %v3224_v49 = vadd.f32 %v3208_v9, %v3091_v16  ;;  %v3428_v10 = vand.u32 2147483648, %v13859_v17  ;;  %vm13926_vm13 = vmor %vm3422_vm12, %vm3423_vm11  ;;  %v2902_v9 = vpop.f32.mrf.mxu2 }
 0x3b5   : > { %v3443_v35 = vand.u32 2147483648, %v13886_v3  ;;  %v3441_v25 = vand.u32 2147483647, %v13886_v3  ;;  %v2675_v16 = vadd.f32 %v13646_v8, %v13675_v31  ;;  %vm3437_vm1 = vweird.f32 %v13886_v3 }
 0x3b6   : > { %v3410_v44 = vsel %vm3409_vm8, %v10986_v14, %v3406_v61  ;;  %v3420_v39 = vmul.f32 %v13881_v0, %v3419_v1  ;;  %v13911_v51 = vadd.f32 %v3240_v36, %v3224_v49  ;;  %v3241_v61 = vld [vmem:[%s13698_s27 + $0x50] sm:$0xff]  ;;  %v2357_v1 = vadd.f32 %v13569_v34, %v2268_v55 }
 0x3b7   : > { %v3415_v29 = vsel %vm3412_vm9, %v3414_v32, %v3410_v44  ;;  %v3005_v45 = vpop.f32.mrf.mxu3  ;;  %v3429_v47 = vor.u32 1.1754944e-38, %v3428_v10  ;;  %v3210_v36 = vmul.f32 %v13703_v15, %v3176_v27  ;;  %v3444_v34 = vor.u32 1.1754944e-38, %v3443_v35 }
 0x3b8   : > { %v10992_v26 = vpop.eup %10991  ;;  %v3572_v14 = vmul.f32 %v3415_v29, %v13805_v53  ;;  %v3006_v7 = vadd.f32 %v3005_v45, %v2891_v60  ;;  %v3421_v59 = vadd.f32 %v13881_v0, %v3420_v39  ;;  %v10549_v54 = vmul.f32 -1.442695, %v13911_v51  ;;  %v2784_v53 = vpop.f32.mrf.mxu1 }
 0x3b9   : > { %v10994_v13 = vpop.eup %10993  ;;  %v13914_v63 = vadd.f32 1.0, %v10992_v26  ;;  %vm3442_vm3 = vcmp.eq.f32.partialorder %v3441_v25, 8.507059e+37  ;;  %v3242_v26 = vld [vmem:[%s13698_s27 + $0x58] sm:$0xff]  ;;  %v3102_v56 = vpop.f32.mrf.mxu0  ;;  %v2683_v27 = vadd.f32 %v13661_v50, %v13685_v6  ;;  %v3245_v25 = vld [vmem:[%s13698_s27 + $0x70] sm:$0xff] }
 0x3ba   : > { %v3433_v52 = vmul.f32 %v10994_v13, %v13886_v3  ;;  %v3585_v2 = vpack.c.bf16 %v3572_v14, %v3571_v20  ;;  %v3095_v4 = vadd.f32 %v13879_v40, %v3006_v7  ;;  %v3425_v62 = vsel %vm13926_vm13, %v13881_v0, %v3421_v59 }
 0x3bb   : > { %10995 = vrcp.f32 %v13914_v63  ;;  %vm3438_vm14 = vweird.f32 %v10994_v13  ;;  %v3430_v44 = vsel %vm3427_vm15, %v3429_v47, %v3425_v62  ;;  %v2785_v3 = vadd.f32 %v2784_v53, %v2675_v16 }
 0x3bc   : > { %v3434_v19 = vsub.f32 1.0, %v3433_v52  ;;  %10997 = vpow2.f32 %v10549_v54  ;;  %10570 = vmatmul.msk.bf16.gmra.mxu1 %vm18334_vm0, %v3585_v2  ;;  %v3225_v40 = vadd.f32 %v3209_v12, %v3095_v4  ;;  %vm3439_vm2 = vmor %vm3437_vm1, %vm3438_vm14  ;;  %v3573_v5 = vmul.f32 %v3430_v44, %v13829_v24  ;;  %v3243_v12 = vld [vmem:[%s13698_s27 + $0x60] sm:$0xff] }
 0x3bd   : > { %v2903_v7 = vadd.f32 %v2902_v9, %v2785_v3  ;;  %v3181_v54 = vpop.permute.xlu0 %3180  ;;  %vm3452_vm5 = vweird.f32 %v13914_v63 }
 0x3be   : > { %v3435_v17 = vmul.f32 %v10994_v13, %v3434_v19  ;;  %v13946_v8 = vadd.f32 %v3241_v61, %v3225_v40  ;;  %v3211_v10 = vmul.f32 %v13703_v15, %v3181_v54 }
 0x3bf   : > { %v3009_v22 = vpop.f32.mrf.mxu3 }
 0x3c0   : > { %v3436_v23 = vadd.f32 %v10994_v13, %v3435_v17  ;;  %v3010_v0 = vadd.f32 %v3009_v22, %v2897_v42  ;;  %v10550_v45 = vmul.f32 -1.442695, %v13946_v8  ;;  %v2789_v14 = vpop.f32.mrf.mxu1  ;;  %v3186_v17 = vpop.permute.xlu1 %3185 }
 0x3c1   : > { %v13942_v32 = vpop.eup %10995 }
 0x3c2   : > { %v10998_v31 = vpop.eup %10997  ;;  %v3440_v39 = vsel %vm3439_vm2, %v10994_v13, %v3436_v23  ;;  %v3448_v49 = vmul.f32 %v13942_v32, %v13914_v63  ;;  %v3099_v28 = vadd.f32 %v3098_v33, %v3010_v0  ;;  %v2550_v13 = vadd.f32 %v13678_v18, %v2357_v1  ;;  %v2908_v33 = vpop.f32.mrf.mxu2 }
 0x3c3   : > { %v3445_v60 = vsel %vm3442_vm3, %v3444_v34, %v3440_v39  ;;  %v13950_v29 = vadd.f32 1.0, %v10998_v31  ;;  %v2276_v18 = vadd.f32 %v13659_v37, %v13562_v41  ;;  %vm3453_vm4 = vweird.f32 %v13942_v32  ;;  %v3106_v1 = vpop.f32.mrf.mxu0 }
 0x3c4   : > { %v3574_v21 = vmul.f32 %v3445_v60, %v13854_v30  ;;  %v3449_v55 = vsub.f32 1.0, %v3448_v49  ;;  %v3226_v58 = vadd.f32 %v3210_v36, %v3099_v28  ;;  %v2679_v20 = vadd.f32 %v13652_v38, %v2550_v13  ;;  %vm13978_vm6 = vmor %vm3452_vm5, %vm3453_vm4  ;;  %v3244_v60 = vld [vmem:[%s13698_s27 + $0x68] sm:$0xff] }
 0x3c5   : > { %10999 = vrcp.f32 %v13950_v29  ;;  %v2365_v35 = vadd.f32 %v13663_v48, %v2276_v18  ;;  %v3456_v41 = vand.u32 2147483647, %v13914_v63  ;;  %v3458_v38 = vand.u32 2147483648, %v13914_v63 }
 0x3c6   : > { %11001 = vpow2.f32 %v10550_v45  ;;  %v13958_v11 = vadd.f32 %v3242_v26, %v3226_v58  ;;  %v3586_v59 = vpack.c.bf16 %v3574_v21, %v3573_v5  ;;  %v3450_v52 = vmul.f32 %v13942_v32, %v3449_v55  ;;  %v18739_v21 = vld [vmem:[#allocation231_spill] sm:$0xff] }
 0x3c7   : > { %v3013_v24 = vpop.f32.mrf.mxu3  ;;  %v2790_v2 = vadd.f32 %v2789_v14, %v2679_v20  ;;  %v3471_v63 = vand.u32 2147483647, %v13950_v29  ;;  %v3473_v47 = vand.u32 2147483648, %v13950_v29  ;;  %v3212_v36 = vmul.f32 %v13703_v15, %v3186_v17 }
 0x3c8   : > { %v10551_v30 = vmul.f32 -1.442695, %v13958_v11  ;;  %v3014_v42 = vadd.f32 %v3013_v24, %v2903_v7  ;;  %v3451_v19 = vadd.f32 %v13942_v32, %v3450_v52  ;;  %v2794_v40 = vpop.f32.mrf.mxu1  ;;  %vm3457_vm8 = vcmp.eq.f32.partialorder %v3456_v41, 8.507059e+37  ;;  %v3191_v24 = vpop.permute.xlu2 %3190 }
 0x3c9   : > { %v2909_v62 = vadd.f32 %v2908_v33, %v2790_v2  ;;  %vm3467_vm9 = vweird.f32 %v13950_v29  ;;  %v2795_v49 = vadd.f32 %v2794_v40, %v2683_v27  ;;  %v3474_v3 = vor.u32 1.1754944e-38, %v3473_v47 }
 0x3ca   : > { %11003 = vpow2.f32 %v10551_v30  ;;  %v3103_v53 = vadd.f32 %v3102_v56, %v3014_v42  ;;  %v3455_v16 = vsel %vm13978_vm6, %v13942_v32, %v3451_v19  ;;  %v3459_v32 = vor.u32 1.1754944e-38, %v3458_v38  ;;  %v2914_v34 = vpop.f32.mrf.mxu2 }
 0x3cb   : > { %v11000_v57 = vpop.eup %10999  ;;  %vm3472_vm11 = vcmp.eq.f32.partialorder %v3471_v63, 8.507059e+37  ;;  %v2566_v55 = vadd.f32 %v18739_v21, %v2365_v35  ;;  %v2915_v58 = vadd.f32 %v2914_v34, %v2795_v49  ;;  %v3110_v18 = vpop.f32.mrf.mxu0 }
 0x3cc   : > { %v11002_v46 = vpop.eup %11001  ;;  %v3463_v4 = vmul.f32 %v11000_v57, %v13950_v29  ;;  %v3227_v9 = vadd.f32 %v3211_v10, %v3103_v53  ;;  %10571 = vmatmul.msk.bf16.gmra.mxu1 %vm18334_vm0, %v3586_v59  ;;  %vm3468_vm7 = vweird.f32 %v11000_v57  ;;  %v3460_v28 = vsel %vm3457_vm8, %v3459_v32, %v3455_v16  ;;  %v18740_v10 = vld [vmem:[#allocation135_spill] sm:$0xff] }
 0x3cd   : > { %v13974_v37 = vadd.f32 1.0, %v11002_v46  ;;  %vm3469_vm10 = vmor %vm3467_vm9, %vm3468_vm7  ;;  %v3575_v13 = vmul.f32 %v3460_v28, %v13871_v43  ;;  %v2687_v53 = vadd.f32 %v18740_v10, %v2566_v55  ;;  %v3213_v46 = vmul.f32 %v13703_v15, %v3191_v24  ;;  %v3246_v55 = vld [vmem:[%s13698_s27 + $0x78] sm:$0xff] }
 0x3ce   : > { %v3464_v48 = vsub.f32 1.0, %v3463_v4  ;;  %v13982_v61 = vadd.f32 %v3243_v12, %v3227_v9 }
 0x3cf   : > { %11005 = vrcp.f32 %v13974_v37  ;;  %v3017_v50 = vpop.f32.mrf.mxu3  ;;  %vm3482_vm13 = vweird.f32 %v13974_v37  ;;  %v3488_v12 = vand.u32 2147483648, %v13974_v37  ;;  %v3486_v4 = vand.u32 2147483647, %v13974_v37 }
 0x3d0   : > { %v11004_v6 = vpop.eup %11003  ;;  %v3465_v22 = vmul.f32 %v11000_v57, %v3464_v48  ;;  %v10552_v23 = vmul.f32 -1.442695, %v13982_v61  ;;  %v3018_v0 = vadd.f32 %v3017_v50, %v2909_v62  ;;  %v2799_v43 = vpop.f32.mrf.mxu1 }
 0x3d1   : > { %v13993_v44 = vadd.f32 1.0, %v11004_v6  ;;  %v2800_v38 = vadd.f32 %v2799_v43, %v2687_v53  ;;  %vm3487_vm1 = vcmp.eq.f32.partialorder %v3486_v4, 8.507059e+37 }
 0x3d2   : > { %v3466_v31 = vadd.f32 %v11000_v57, %v3465_v22  ;;  %11007 = vpow2.f32 %v10552_v23  ;;  %v3107_v39 = vadd.f32 %v3106_v1, %v3018_v0  ;;  %v2920_v35 = vpop.f32.mrf.mxu2 }
 0x3d3   : > { %11009 = vrcp.f32 %v13993_v44  ;;  %v3501_v62 = vand.u32 2147483647, %v13993_v44  ;;  %v3503_v17 = vand.u32 2147483648, %v13993_v44  ;;  %v2921_v63 = vadd.f32 %v2920_v35, %v2800_v38  ;;  %v3114_v28 = vpop.f32.mrf.mxu0 }
 0x3d4   : > { %v3470_v45 = vsel %vm3469_vm10, %v11000_v57, %v3466_v31  ;;  %v3228_v26 = vadd.f32 %v3212_v36, %v3107_v39  ;;  %vm3497_vm2 = vweird.f32 %v13993_v44 }
 0x3d5   : > { %v11006_v5 = vpop.eup %11005  ;;  %v3475_v56 = vsel %vm3472_vm11, %v3474_v3, %v3470_v45  ;;  %v3504_v0 = vor.u32 1.1754944e-38, %v3503_v17  ;;  %vm3502_vm4 = vcmp.eq.f32.partialorder %v3501_v62, 8.507059e+37 }
 0x3d6   : > { %v3576_v29 = vmul.f32 %v3475_v56, %v13911_v51  ;;  %v3478_v14 = vmul.f32 %v11006_v5, %v13974_v37  ;;  %v14002_v7 = vadd.f32 %v3244_v60, %v3228_v26  ;;  %vm3483_vm12 = vweird.f32 %v11006_v5 }
 0x3d7   : > { %v3021_v59 = vpop.f32.mrf.mxu3  ;;  %vm14014_vm14 = vmor %vm3482_vm13, %vm3483_vm12  ;;  %v3489_v37 = vor.u32 1.1754944e-38, %v3488_v12  ;;  %v3196_v49 = vpop.permute.xlu0 %3195 }
 0x3d8   : > { %v11008_v52 = vpop.eup %11007  ;;  %v3479_v54 = vsub.f32 1.0, %v3478_v14  ;;  %v10553_v33 = vmul.f32 -1.442695, %v14002_v7  ;;  %v3022_v30 = vadd.f32 %v3021_v59, %v2915_v58  ;;  %v3587_v42 = vpack.c.bf16 %v3576_v29, %v3575_v13 }
 0x3d9   : > { %v11010_v20 = vpop.eup %11009  ;;  %v14006_v57 = vadd.f32 1.0, %v11008_v52  ;;  %v3214_v26 = vmul.f32 %v13703_v15, %v3196_v49 }
 0x3da   : > { %v3480_v51 = vmul.f32 %v11006_v5, %v3479_v54  ;;  %v3493_v19 = vmul.f32 %v11010_v20, %v13993_v44  ;;  %11011 = vpow2.f32 %v10553_v33  ;;  %v3111_v41 = vadd.f32 %v3110_v18, %v3022_v30 }
 0x3db   : > { %11013 = vrcp.f32 %v14006_v57  ;;  %vm3498_vm15 = vweird.f32 %v11010_v20  ;;  %vm3512_vm6 = vweird.f32 %v14006_v57  ;;  %v3516_v15 = vand.u32 2147483647, %v14006_v57 }
 0x3dc   : > { %v3481_v2 = vadd.f32 %v11006_v5, %v3480_v51  ;;  %v3494_v9 = vsub.f32 1.0, %v3493_v19  ;;  %v3229_v16 = vadd.f32 %v3213_v46, %v3111_v41  ;;  %10572 = vmatmul.msk.bf16.gmra.mxu1 %vm18334_vm0, %v3587_v42  ;;  %vm3499_vm3 = vmor %vm3497_vm2, %vm3498_vm15 }
 0x3dd   : > { %vm3517_vm9 = vcmp.eq.f32.partialorder %v3516_v15, 8.507059e+37 }
 0x3de   : > { %v3485_v48 = vsel %vm14014_vm14, %v11006_v5, %v3481_v2  ;;  %v3495_v1 = vmul.f32 %v11010_v20, %v3494_v9  ;;  %v14025_v40 = vadd.f32 %v3245_v25, %v3229_v16 }
 0x3df   : > { %v3025_v47 = vpop.f32.mrf.mxu3  ;;  %v3490_v23 = vsel %vm3487_vm1, %v3489_v37, %v3485_v48 }
 0x3e0   : > { %v11012_v50 = vpop.eup %11011  ;;  %v3496_v6 = vadd.f32 %v11010_v20, %v3495_v1  ;;  %v3026_v32 = vadd.f32 %v3025_v47, %v2921_v63  ;;  %v10554_v39 = vmul.f32 -1.442695, %v14025_v40  ;;  %v3577_v44 = vmul.f32 %v3490_v23, %v13946_v8 }
 0x3e1   : > { %v11014_v22 = vpop.eup %11013  ;;  %v3324_v36 = vadd.f32 1.0, %v11012_v50  ;;  %v3518_v8 = vand.u32 2147483648, %v14006_v57 }
 0x3e2   : > { %v3500_v34 = vsel %vm3499_vm3, %v11010_v20, %v3496_v6  ;;  %v3508_v31 = vmul.f32 %v11014_v22, %v14006_v57  ;;  %v3115_v5 = vadd.f32 %v3114_v28, %v3026_v32  ;;  %vm3513_vm5 = vweird.f32 %v11014_v22 }
 0x3e3   : > { %v3505_v3 = vsel %vm3502_vm4, %v3504_v0, %v3500_v34  ;;  %11015 = vrcp.f32 %v3324_v36  ;;  %vm3514_vm7 = vmor %vm3512_vm6, %vm3513_vm5  ;;  %v3531_v33 = vand.u32 2147483647, %v3324_v36  ;;  %v3533_v30 = vand.u32 2147483648, %v3324_v36  ;;  %v14049_v34 = vld [vmem:[%s17898_s8 + $0x3] ss:$0 sm:$0xff] }
 0x3e4   : > { %v3578_v60 = vmul.f32 %v3505_v3, %v13958_v11  ;;  %v3509_v45 = vsub.f32 1.0, %v3508_v31  ;;  %11017 = vpow2.f32 %v10554_v39  ;;  %v3230_v56 = vadd.f32 %v3214_v26, %v3115_v5  ;;  %v10894_v26 = vld [vmem:[%s17897_s7 + $0x80] sm:$0xff] }
 0x3e5   : > { %v3519_v20 = vor.u32 1.1754944e-38, %v3518_v8  ;;  %vm3527_vm10 = vweird.f32 %v3324_v36  ;;  %v3534_v43 = vor.u32 1.1754944e-38, %v3533_v30  ;;  %vm3532_vm12 = vcmp.eq.f32.partialorder %v3531_v33, 8.507059e+37 }
 0x3e6   : > { %v3510_v21 = vmul.f32 %v11014_v22, %v3509_v45  ;;  %v3588_v58 = vpack.c.bf16 %v3578_v60, %v3577_v44  ;;  %v14033_v29 = vadd.f32 %v3246_v55, %v3230_v56 }
 0x3e8   : > { %v3511_v59 = vadd.f32 %v11014_v22, %v3510_v21  ;;  %v10555_v11 = vmul.f32 -1.442695, %v14033_v29 }
 0x3e9   : > { %v11016_v13 = vpop.eup %11015 }
 0x3ea   : > { %v11018_v14 = vpop.eup %11017  ;;  %v3523_v52 = vmul.f32 %v11016_v13, %v3324_v36  ;;  %v3515_v42 = vsel %vm3514_vm7, %v11014_v22, %v3511_v59  ;;  %vm3528_vm8 = vweird.f32 %v11016_v13 }
 0x3eb   : > { %v3325_v54 = vadd.f32 1.0, %v11018_v14  ;;  %v3520_v53 = vsel %vm3517_vm9, %v3519_v20, %v3515_v42  ;;  %vm3529_vm11 = vmor %vm3527_vm10, %vm3528_vm8 }
 0x3ec   : > { %v3524_v24 = vsub.f32 1.0, %v3523_v52  ;;  %10573 = vmatmul.msk.bf16.gmra.mxu1 %vm18334_vm0, %v3588_v58  ;;  %v3579_v46 = vmul.f32 %v3520_v53, %v13982_v61 }
 0x3ed   : > { %11019 = vrcp.f32 %v3325_v54  ;;  %v3548_v25 = vand.u32 2147483648, %v3325_v54  ;;  %vm3542_vm14 = vweird.f32 %v3325_v54  ;;  %v3546_v48 = vand.u32 2147483647, %v3325_v54 }
 0x3ee   : > { %v3525_v18 = vmul.f32 %v11016_v13, %v3524_v24  ;;  %11021 = vpow2.f32 %v10555_v11 }
 0x3ef   : > { %v3549_v37 = vor.u32 1.1754944e-38, %v3548_v25  ;;  %vm3547_vm2 = vcmp.eq.f32.partialorder %v3546_v48, 8.507059e+37 }
 0x3f0   : > { %v3526_v10 = vadd.f32 %v11016_v13, %v3525_v18 }
 0x3f2   : > { %v3530_v51 = vsel %vm3529_vm11, %v11016_v13, %v3526_v10 }
 0x3f3   : > { %v11020_v57 = vpop.eup %11019  ;;  %v3535_v19 = vsel %vm3532_vm12, %v3534_v43, %v3530_v51 }
 0x3f4   : > { %v11022_v12 = vpop.eup %11021  ;;  %v3580_v35 = vmul.f32 %v3535_v19, %v14002_v7  ;;  %v3538_v2 = vmul.f32 %v11020_v57, %v3325_v54  ;;  %vm3543_vm13 = vweird.f32 %v11020_v57 }
 0x3f5   : > { %v3326_v4 = vadd.f32 1.0, %v11022_v12  ;;  %vm3544_vm15 = vmor %vm3542_vm14, %vm3543_vm13 }
 0x3f6   : > { %v3539_v9 = vsub.f32 1.0, %v3538_v2  ;;  %v3589_v41 = vpack.c.bf16 %v3580_v35, %v3579_v46 }
 0x3f7   : > { %11023 = vrcp.f32 %v3326_v4  ;;  %v3563_v61 = vand.u32 2147483648, %v3326_v4  ;;  %v3561_v63 = vand.u32 2147483647, %v3326_v4  ;;  %vm3557_vm3 = vweird.f32 %v3326_v4 }
 0x3f8   : > { %v3540_v38 = vmul.f32 %v11020_v57, %v3539_v9 }
 0x3f9   : > { %v3564_v6 = vor.u32 1.1754944e-38, %v3563_v61  ;;  %vm3562_vm5 = vcmp.eq.f32.partialorder %v3561_v63, 8.507059e+37 }
 0x3fa   : > { %v3541_v62 = vadd.f32 %v11020_v57, %v3540_v38 }
 0x3fc   : > { %10574 = vmatmul.msk.bf16.gmra.mxu1 %vm18334_vm0, %v3589_v41  ;;  %v3545_v16 = vsel %vm3544_vm15, %v11020_v57, %v3541_v62 }
 0x3fd   : > { %v11024_v27 = vpop.eup %11023  ;;  %v3550_v50 = vsel %vm3547_vm2, %v3549_v37, %v3545_v16 }
 0x3fe   : > { %v3553_v17 = vmul.f32 %v11024_v27, %v3326_v4  ;;  %vm3558_vm1 = vweird.f32 %v11024_v27  ;;  %v3581_v0 = vmul.f32 %v3550_v50, %v14025_v40  ;;  %v10895_v40 = vld [vmem:[%s17897_s7 + $0x88] sm:$0xff] }
 0x3ff   : > { %vm3559_vm4 = vmor %vm3557_vm3, %vm3558_vm1  ;;  %4060 = vmatpush.bf16.msrb.mxu2 %v10895_v40 }
 0x400   : > { %v3554_v1 = vsub.f32 1.0, %v3553_v17 }
 0x402   : > { %v3555_v7 = vmul.f32 %v11024_v27, %v3554_v1 }
 0x403   : > { %4061 = vmatpush.bf16.msrb.mxu2 %v10894_v26 }
 0x404   : > { %v3556_v47 = vadd.f32 %v11024_v27, %v3555_v7 }
 0x406   : > { %v3560_v22 = vsel %vm3559_vm4, %v11024_v27, %v3556_v47 }
 0x407   : > { %v3565_v23 = vsel %vm3562_vm5, %v3564_v6, %v3560_v22 }
 0x408   : > { %v3582_v36 = vmul.f32 %v3565_v23, %v14033_v29 }
 0x40a   : > { %v3590_v32 = vpack.c.bf16 %v3582_v36, %v3581_v0 }
 0x40c   : > { %10575 = vmatmul.msk.bf16.gmra.mxu1 %vm18334_vm0, %v3590_v32 }
 0x415   : > { %v3643_v31 = vpop.f32.mrf.mxu1 }
 0x416   : > { %v3644_v39 = vadd.f32 %v14049_v34, %v3643_v31 }
 0x418   : > { %v10576_v49 = vmul.f32 -1.442695, %v3644_v39 }
 0x41a   : > { %11025 = vpow2.f32 %v10576_v49 }
 0x41d   : > { %v3645_v28 = vpop.f32.mrf.mxu1 }
 0x41e   : > { %v3646_v3 = vadd.f32 %v14049_v34, %v3645_v28 }
 0x420   : > { %v11026_v44 = vpop.eup %11025  ;;  %v10577_v60 = vmul.f32 -1.442695, %v3646_v3 }
 0x421   : > { %v3731_v45 = vadd.f32 1.0, %v11026_v44 }
 0x422   : > { %11027 = vpow2.f32 %v10577_v60 }
 0x423   : > { %11029 = vrcp.f32 %v3731_v45  ;;  %v3758_v42 = vand.u32 2147483648, %v3731_v45  ;;  %vm3752_vm7 = vweird.f32 %v3731_v45  ;;  %v3756_v18 = vand.u32 2147483647, %v3731_v45 }
 0x425   : > { %v3648_v5 = vpop.f32.mrf.mxu1  ;;  %v3759_v57 = vor.u32 1.1754944e-38, %v3758_v42  ;;  %vm3757_vm10 = vcmp.eq.f32.partialorder %v3756_v18, 8.507059e+37 }
 0x426   : > { %v14060_v21 = vadd.f32 %v14049_v34, %v3648_v5 }
 0x428   : > { %v11028_v55 = vpop.eup %11027  ;;  %v10578_v58 = vmul.f32 -1.442695, %v14060_v21 }
 0x429   : > { %v11030_v56 = vpop.eup %11029  ;;  %v3732_v13 = vadd.f32 1.0, %v11028_v55 }
 0x42a   : > { %v3748_v29 = vmul.f32 %v11030_v56, %v3731_v45  ;;  %11031 = vpow2.f32 %v10578_v58  ;;  %vm3753_vm6 = vweird.f32 %v11030_v56 }
 0x42b   : > { %11033 = vrcp.f32 %v3732_v13  ;;  %vm3754_vm8 = vmor %vm3752_vm7, %vm3753_vm6  ;;  %v3773_v10 = vand.u32 2147483648, %v3732_v13  ;;  %v3771_v51 = vand.u32 2147483647, %v3732_v13  ;;  %vm3767_vm11 = vweird.f32 %v3732_v13 }
 0x42c   : > { %v3749_v14 = vsub.f32 1.0, %v3748_v29 }
 0x42d   : > { %v3650_v59 = vpop.f32.mrf.mxu1  ;;  %v3774_v2 = vor.u32 1.1754944e-38, %v3773_v10  ;;  %vm3772_vm13 = vcmp.eq.f32.partialorder %v3771_v51, 8.507059e+37 }
 0x42e   : > { %v3750_v52 = vmul.f32 %v11030_v56, %v3749_v14  ;;  %v14064_v8 = vadd.f32 %v14049_v34, %v3650_v59 }
 0x430   : > { %v11032_v54 = vpop.eup %11031  ;;  %v10579_v11 = vmul.f32 -1.442695, %v14064_v8  ;;  %v3751_v33 = vadd.f32 %v11030_v56, %v3750_v52 }
 0x431   : > { %v11034_v15 = vpop.eup %11033  ;;  %v3733_v24 = vadd.f32 1.0, %v11032_v54 }
 0x432   : > { %v3763_v30 = vmul.f32 %v11034_v15, %v3732_v13  ;;  %11035 = vpow2.f32 %v10579_v11  ;;  %v3755_v53 = vsel %vm3754_vm8, %v11030_v56, %v3751_v33  ;;  %vm3768_vm9 = vweird.f32 %v11034_v15 }
 0x433   : > { %11037 = vrcp.f32 %v3733_v24  ;;  %v3760_v35 = vsel %vm3757_vm10, %v3759_v57, %v3755_v53  ;;  %vm3769_vm12 = vmor %vm3767_vm11, %vm3768_vm9  ;;  %v3788_v47 = vand.u32 2147483648, %v3733_v24  ;;  %vm3782_vm15 = vweird.f32 %v3733_v24 }
 0x434   : > { %v3764_v20 = vsub.f32 1.0, %v3763_v30  ;;  %v14067_v27 = vmul.f32 %v3760_v35, %v3644_v39  ;;  %v3786_v50 = vand.u32 2147483647, %v3733_v24 }
 0x435   : > { %v3789_v49 = vor.u32 1.1754944e-38, %v3788_v47 }
 0x436   : > { %v3765_v43 = vmul.f32 %v11034_v15, %v3764_v20  ;;  %vm3787_vm3 = vcmp.eq.f32.partialorder %v3786_v50, 8.507059e+37 }
 0x438   : > { %v11036_v19 = vpop.eup %11035  ;;  %v3766_v12 = vadd.f32 %v11034_v15, %v3765_v43 }
 0x439   : > { %v11038_v46 = vpop.eup %11037  ;;  %v3734_v4 = vadd.f32 1.0, %v11036_v19  ;;  %v3653_v25 = vpop.f32.mrf.mxu1 }
 0x43a   : > { %v3770_v9 = vsel %vm3769_vm12, %v11034_v15, %v3766_v12  ;;  %v3778_v41 = vmul.f32 %v11038_v46, %v3733_v24  ;;  %v14072_v48 = vadd.f32 %v14049_v34, %v3653_v25  ;;  %vm3783_vm14 = vweird.f32 %v11038_v46 }
 0x43b   : > { %v3775_v38 = vsel %vm3772_vm13, %v3774_v2, %v3770_v9  ;;  %11039 = vrcp.f32 %v3734_v4  ;;  %vm3784_vm1 = vmor %vm3782_vm15, %vm3783_vm14  ;;  %v3803_v23 = vand.u32 2147483648, %v3734_v4  ;;  %v3801_v31 = vand.u32 2147483647, %v3734_v4 }
 0x43c   : > { %v14069_v62 = vmul.f32 %v3775_v38, %v3646_v3  ;;  %v3779_v17 = vsub.f32 1.0, %v3778_v41  ;;  %v10580_v16 = vmul.f32 -1.442695, %v14072_v48  ;;  %vm3797_vm4 = vweird.f32 %v3734_v4 }
 0x43d   : > { %v3804_v60 = vor.u32 1.1754944e-38, %v3803_v23  ;;  %vm3802_vm6 = vcmp.eq.f32.partialorder %v3801_v31, 8.507059e+37 }
 0x43e   : > { %v4003_v1 = vpack.c.bf16 %v14069_v62, %v14067_v27  ;;  %v3780_v61 = vmul.f32 %v11038_v46, %v3779_v17  ;;  %11041 = vpow2.f32 %v10580_v16 }
 0x440   : > { %10604 = vmatmul.msk.bf16.vlgmr.msrb.gmra.mxu2 %vm18334_vm0, %v4003_v1  ;;  %v3781_v63 = vadd.f32 %v11038_v46, %v3780_v61 }
 0x441   : > { %v11040_v7 = vpop.eup %11039  ;;  %v3655_v22 = vpop.f32.mrf.mxu1 }
 0x442   : > { %v3793_v37 = vmul.f32 %v11040_v7, %v3734_v4  ;;  %v14079_v0 = vadd.f32 %v14049_v34, %v3655_v22  ;;  %v3785_v36 = vsel %vm3784_vm1, %v11038_v46, %v3781_v63  ;;  %vm3798_vm2 = vweird.f32 %v11040_v7 }
 0x443   : > { %v3790_v44 = vsel %vm3787_vm3, %v3789_v49, %v3785_v36  ;;  %vm3799_vm5 = vmor %vm3797_vm4, %vm3798_vm2 }
 0x444   : > { %v3794_v6 = vsub.f32 1.0, %v3793_v37  ;;  %v11042_v39 = vpop.eup %11041  ;;  %v10581_v28 = vmul.f32 -1.442695, %v14079_v0  ;;  %v14083_v5 = vmul.f32 %v3790_v44, %v14060_v21 }
 0x445   : > { %v3735_v40 = vadd.f32 1.0, %v11042_v39 }
 0x446   : > { %v3795_v32 = vmul.f32 %v11040_v7, %v3794_v6  ;;  %11043 = vpow2.f32 %v10581_v28 }
 0x447   : > { %11045 = vrcp.f32 %v3735_v40  ;;  %v3818_v10 = vand.u32 2147483648, %v3735_v40  ;;  %vm3812_vm8 = vweird.f32 %v3735_v40  ;;  %v3816_v53 = vand.u32 2147483647, %v3735_v40 }
 0x448   : > { %v3796_v3 = vadd.f32 %v11040_v7, %v3795_v32 }
 0x449   : > { %v3658_v58 = vpop.f32.mrf.mxu1  ;;  %v3819_v4 = vor.u32 1.1754944e-38, %v3818_v10  ;;  %vm3817_vm11 = vcmp.eq.f32.partialorder %v3816_v53, 8.507059e+37 }
 0x44a   : > { %v3800_v45 = vsel %vm3799_vm5, %v11040_v7, %v3796_v3  ;;  %v14089_v56 = vadd.f32 %v14049_v34, %v3658_v58 }
 0x44b   : > { %v3805_v26 = vsel %vm3802_vm6, %v3804_v60, %v3800_v45 }
 0x44c   : > { %v14086_v55 = vmul.f32 %v3805_v26, %v14064_v8  ;;  %v11044_v29 = vpop.eup %11043  ;;  %v10582_v14 = vmul.f32 -1.442695, %v14089_v56 }
 0x44d   : > { %v11046_v59 = vpop.eup %11045  ;;  %v3736_v52 = vadd.f32 1.0, %v11044_v29 }
 0x44e   : > { %v4004_v13 = vpack.c.bf16 %v14086_v55, %v14083_v5  ;;  %v3808_v54 = vmul.f32 %v11046_v59, %v3735_v40  ;;  %11047 = vpow2.f32 %v10582_v14  ;;  %vm3813_vm7 = vweird.f32 %v11046_v59 }
 0x44f   : > { %11049 = vrcp.f32 %v3736_v52  ;;  %vm14102_vm9 = vmor %vm3812_vm8, %vm3813_vm7  ;;  %v3831_v57 = vand.u32 2147483647, %v3736_v52  ;;  %v3833_v19 = vand.u32 2147483648, %v3736_v52  ;;  %vm3827_vm12 = vweird.f32 %v3736_v52 }
 0x450   : > { %10605 = vmatmul.msk.bf16.gmra.mxu2 %vm18334_vm0, %v4004_v13  ;;  %v3809_v21 = vsub.f32 1.0, %v3808_v54 }
 0x451   : > { %v3660_v8 = vpop.f32.mrf.mxu1  ;;  %v3834_v1 = vor.u32 1.1754944e-38, %v3833_v19  ;;  %vm3832_vm14 = vcmp.eq.f32.partialorder %v3831_v57, 8.507059e+37 }
 0x452   : > { %v3810_v11 = vmul.f32 %v11046_v59, %v3809_v21  ;;  %v14096_v15 = vadd.f32 %v14049_v34, %v3660_v8 }
 0x454   : > { %v11048_v24 = vpop.eup %11047  ;;  %v10583_v33 = vmul.f32 -1.442695, %v14096_v15  ;;  %v3811_v18 = vadd.f32 %v11046_v59, %v3810_v11 }
 0x455   : > { %v11050_v30 = vpop.eup %11049  ;;  %v14099_v42 = vadd.f32 1.0, %v11048_v24 }
 0x456   : > { %v3823_v20 = vmul.f32 %v11050_v30, %v3736_v52  ;;  %11051 = vpow2.f32 %v10583_v33  ;;  %v3815_v46 = vsel %vm14102_vm9, %v11046_v59, %v3811_v18  ;;  %vm3828_vm10 = vweird.f32 %v11050_v30 }
 0x457   : > { %11053 = vrcp.f32 %v14099_v42  ;;  %v3820_v25 = vsel %vm3817_vm11, %v3819_v4, %v3815_v46  ;;  %vm3829_vm13 = vmor %vm3827_vm12, %vm3828_vm10  ;;  %v3848_v28 = vand.u32 2147483648, %v14099_v42  ;;  %vm3842_vm1 = vweird.f32 %v14099_v42 }
 0x458   : > { %v3824_v43 = vsub.f32 1.0, %v3823_v20  ;;  %v14114_v37 = vmul.f32 %v3820_v25, %v14072_v48  ;;  %v3846_v3 = vand.u32 2147483647, %v14099_v42 }
 0x459   : > { %v3663_v12 = vpop.f32.mrf.mxu1  ;;  %v3849_v14 = vor.u32 1.1754944e-38, %v3848_v28 }
 0x45a   : > { %v3825_v35 = vmul.f32 %v11050_v30, %v3824_v43  ;;  %v14109_v2 = vadd.f32 %v14049_v34, %v3663_v12  ;;  %vm3847_vm4 = vcmp.eq.f32.partialorder %v3846_v3, 8.507059e+37 }
 0x45c   : > { %v11052_v9 = vpop.eup %11051  ;;  %v3826_v41 = vadd.f32 %v11050_v30, %v3825_v35  ;;  %v10584_v38 = vmul.f32 -1.442695, %v14109_v2 }
 0x45d   : > { %v11054_v17 = vpop.eup %11053  ;;  %v3738_v61 = vadd.f32 1.0, %v11052_v9 }
 0x45e   : > { %v3830_v16 = vsel %vm3829_vm13, %v11050_v30, %v3826_v41  ;;  %v3838_v7 = vmul.f32 %v11054_v17, %v14099_v42  ;;  %11055 = vpow2.f32 %v10584_v38  ;;  %vm3843_vm15 = vweird.f32 %v11054_v17 }
 0x45f   : > { %v3835_v63 = vsel %vm3832_vm14, %v3834_v1, %v3830_v16  ;;  %11057 = vrcp.f32 %v3738_v61  ;;  %vm14132_vm2 = vmor %vm3842_vm1, %vm3843_vm15  ;;  %v3861_v60 = vand.u32 2147483647, %v3738_v61  ;;  %v3863_v45 = vand.u32 2147483648, %v3738_v61 }
 0x460   : > { %v14117_v47 = vmul.f32 %v3835_v63, %v14079_v0  ;;  %v3839_v50 = vsub.f32 1.0, %v3838_v7  ;;  %vm3857_vm5 = vweird.f32 %v3738_v61 }
 0x461   : > { %v3665_v6 = vpop.f32.mrf.mxu1  ;;  %v3864_v11 = vor.u32 1.1754944e-38, %v3863_v45  ;;  %vm3862_vm7 = vcmp.eq.f32.partialorder %v3861_v60, 8.507059e+37 }
 0x462   : > { %v3840_v22 = vmul.f32 %v11054_v17, %v3839_v50  ;;  %v14120_v23 = vadd.f32 %v14049_v34, %v3665_v6  ;;  %v4005_v36 = vpack.c.bf16 %v14117_v47, %v14114_v37 }
 0x464   : > { %v11056_v32 = vpop.eup %11055  ;;  %v10585_v31 = vmul.f32 -1.442695, %v14120_v23  ;;  %10606 = vmatmul.msk.bf16.gmra.mxu2 %vm18334_vm0, %v4005_v36  ;;  %v3841_v49 = vadd.f32 %v11054_v17, %v3840_v22 }
 0x465   : > { %v11058_v39 = vpop.eup %11057  ;;  %v14126_v48 = vadd.f32 1.0, %v11056_v32 }
 0x466   : > { %v3853_v0 = vmul.f32 %v11058_v39, %v3738_v61  ;;  %11059 = vpow2.f32 %v10585_v31  ;;  %v3845_v58 = vsel %vm14132_vm2, %v11054_v17, %v3841_v49  ;;  %vm3858_vm3 = vweird.f32 %v11058_v39 }
 0x467   : > { %11061 = vrcp.f32 %v14126_v48  ;;  %v3850_v8 = vsel %vm3847_vm4, %v3849_v14, %v3845_v58  ;;  %vm3859_vm6 = vmor %vm3857_vm5, %vm3858_vm3  ;;  %v3878_v4 = vand.u32 2147483648, %v14126_v48  ;;  %vm3872_vm9 = vweird.f32 %v14126_v48 }
 0x468   : > { %v3854_v40 = vsub.f32 1.0, %v3853_v0  ;;  %v14144_v18 = vmul.f32 %v3850_v8, %v14089_v56  ;;  %v3876_v9 = vand.u32 2147483647, %v14126_v48 }
 0x469   : > { %v3668_v26 = vpop.f32.mrf.mxu1  ;;  %v3879_v63 = vor.u32 1.1754944e-38, %v3878_v4 }
 0x46a   : > { %v3855_v13 = vmul.f32 %v11058_v39, %v3854_v40  ;;  %v14139_v29 = vadd.f32 %v14049_v34, %v3668_v26  ;;  %vm3877_vm12 = vcmp.eq.f32.partialorder %v3876_v9, 8.507059e+37  ;;  %v10897_v9 = vld [vmem:[%s17897_s7 + $0x98] sm:$0xff] }
 0x46b   : > { %4478 = vmatpush.bf16.msra.mxu3 %v10897_v9 }
 0x46c   : > { %v11060_v59 = vpop.eup %11059  ;;  %v3856_v52 = vadd.f32 %v11058_v39, %v3855_v13  ;;  %v10586_v54 = vmul.f32 -1.442695, %v14139_v29 }
 0x46d   : > { %v11062_v21 = vpop.eup %11061  ;;  %v3740_v24 = vadd.f32 1.0, %v11060_v59 }
 0x46e   : > { %v3860_v33 = vsel %vm3859_vm6, %v11058_v39, %v3856_v52  ;;  %v3868_v30 = vmul.f32 %v11062_v21, %v14126_v48  ;;  %11063 = vpow2.f32 %v10586_v54  ;;  %vm3873_vm8 = vweird.f32 %v11062_v21 }
 0x46f   : > { %v3865_v42 = vsel %vm3862_vm7, %v3864_v11, %v3860_v33  ;;  %11065 = vrcp.f32 %v3740_v24  ;;  %vm14162_vm10 = vmor %vm3872_vm9, %vm3873_vm8  ;;  %v3891_v17 = vand.u32 2147483647, %v3740_v24  ;;  %v3893_v25 = vand.u32 2147483648, %v3740_v24 }
 0x470   : > { %v14147_v20 = vmul.f32 %v3865_v42, %v14096_v15  ;;  %v3869_v10 = vsub.f32 1.0, %v3868_v30  ;;  %vm3887_vm13 = vweird.f32 %v3740_v24 }
 0x471   : > { %v3670_v53 = vpop.f32.mrf.mxu1  ;;  %v3894_v31 = vor.u32 1.1754944e-38, %v3893_v25  ;;  %vm3892_vm15 = vcmp.eq.f32.partialorder %v3891_v17, 8.507059e+37 }
 0x472   : > { %v3870_v43 = vmul.f32 %v11062_v21, %v3869_v10  ;;  %v14150_v51 = vadd.f32 %v14049_v34, %v3670_v53  ;;  %v4006_v57 = vpack.c.bf16 %v14147_v20, %v14144_v18 }
 0x474   : > { %v11064_v19 = vpop.eup %11063  ;;  %v10587_v12 = vmul.f32 -1.442695, %v14150_v51  ;;  %10607 = vmatmul.msk.bf16.gmra.mxu2 %vm18334_vm0, %v4006_v57  ;;  %v3871_v35 = vadd.f32 %v11062_v21, %v3870_v43 }
 0x475   : > { %v11066_v46 = vpop.eup %11065  ;;  %v14156_v56 = vadd.f32 1.0, %v11064_v19 }
 0x476   : > { %v3883_v15 = vmul.f32 %v11066_v46, %v3740_v24  ;;  %11067 = vpow2.f32 %v10587_v12  ;;  %v3875_v61 = vsel %vm14162_vm10, %v11062_v21, %v3871_v35  ;;  %vm3888_vm11 = vweird.f32 %v11066_v46 }
 0x477   : > { %11069 = vrcp.f32 %v14156_v56  ;;  %v3880_v32 = vsel %vm3877_vm12, %v3879_v63, %v3875_v61  ;;  %vm3889_vm14 = vmor %vm3887_vm13, %vm3888_vm11  ;;  %v3908_v52 = vand.u32 2147483648, %v14156_v56  ;;  %vm3902_vm2 = vweird.f32 %v14156_v56 }
 0x478   : > { %v3884_v41 = vsub.f32 1.0, %v3883_v15  ;;  %v14174_v28 = vmul.f32 %v3880_v32, %v14109_v2  ;;  %v3906_v54 = vand.u32 2147483647, %v14156_v56 }
 0x479   : > { %v3673_v1 = vpop.f32.mrf.mxu1  ;;  %v3909_v53 = vor.u32 1.1754944e-38, %v3908_v52 }
 0x47a   : > { %v3885_v16 = vmul.f32 %v11066_v46, %v3884_v41  ;;  %v14169_v7 = vadd.f32 %v14049_v34, %v3673_v1  ;;  %vm3907_vm5 = vcmp.eq.f32.partialorder %v3906_v54, 8.507059e+37  ;;  %v10896_v1 = vld [vmem:[%s17897_s7 + $0x90] sm:$0xff] }
 0x47b   : > { %4479 = vmatpush.bf16.msra.mxu3 %v10896_v1 }
 0x47c   : > { %v11068_v50 = vpop.eup %11067  ;;  %v3886_v6 = vadd.f32 %v11066_v46, %v3885_v16  ;;  %v10588_v22 = vmul.f32 -1.442695, %v14169_v7 }
 0x47d   : > { %v11070_v36 = vpop.eup %11069  ;;  %v3742_v39 = vadd.f32 1.0, %v11068_v50 }
 0x47e   : > { %v3890_v48 = vsel %vm3889_vm14, %v11066_v46, %v3886_v6  ;;  %v3898_v49 = vmul.f32 %v11070_v36, %v14156_v56  ;;  %11071 = vpow2.f32 %v10588_v22  ;;  %vm3903_vm1 = vweird.f32 %v11070_v36 }
 0x47f   : > { %v3895_v0 = vsel %vm3892_vm15, %v3894_v31, %v3890_v48  ;;  %11073 = vrcp.f32 %v3742_v39  ;;  %vm14192_vm3 = vmor %vm3902_vm2, %vm3903_vm1  ;;  %v3921_v11 = vand.u32 2147483647, %v3742_v39  ;;  %v3923_v24 = vand.u32 2147483648, %v3742_v39 }
 0x480   : > { %v14177_v3 = vmul.f32 %v3895_v0, %v14120_v23  ;;  %v3899_v40 = vsub.f32 1.0, %v3898_v49  ;;  %vm3917_vm6 = vweird.f32 %v3742_v39 }
 0x481   : > { %v3675_v44 = vpop.f32.mrf.mxu1  ;;  %v3924_v56 = vor.u32 1.1754944e-38, %v3923_v24  ;;  %vm3922_vm8 = vcmp.eq.f32.partialorder %v3921_v11, 8.507059e+37 }
 0x482   : > { %v3900_v60 = vmul.f32 %v11070_v36, %v3899_v40  ;;  %v14180_v45 = vadd.f32 %v14049_v34, %v3675_v44  ;;  %v4007_v26 = vpack.c.bf16 %v14177_v3, %v14174_v28 }
 0x484   : > { %v11072_v58 = vpop.eup %11071  ;;  %v10589_v13 = vmul.f32 -1.442695, %v14180_v45  ;;  %10608 = vmatmul.msk.bf16.gmra.mxu2 %vm18334_vm0, %v4007_v26  ;;  %v3901_v59 = vadd.f32 %v11070_v36, %v3900_v60 }
 0x485   : > { %v11074_v14 = vpop.eup %11073  ;;  %v14186_v2 = vadd.f32 1.0, %v11072_v58 }
 0x486   : > { %v3913_v23 = vmul.f32 %v11074_v14, %v3742_v39  ;;  %11075 = vpow2.f32 %v10589_v13  ;;  %v3905_v30 = vsel %vm14192_vm3, %v11070_v36, %v3901_v59  ;;  %vm3918_vm4 = vweird.f32 %v11074_v14 }
 0x487   : > { %11077 = vrcp.f32 %v14186_v2  ;;  %v3910_v46 = vsel %vm3907_vm5, %v3909_v53, %v3905_v30  ;;  %vm3919_vm7 = vmor %vm3917_vm6, %vm3918_vm4  ;;  %v3938_v31 = vand.u32 2147483648, %v14186_v2  ;;  %vm3932_vm10 = vweird.f32 %v14186_v2 }
 0x488   : > { %v3914_v21 = vsub.f32 1.0, %v3913_v23  ;;  %v14207_v38 = vmul.f32 %v3910_v46, %v14139_v29 }
 0x489   : > { %v3678_v33 = vpop.f32.mrf.mxu1  ;;  %v3939_v44 = vor.u32 1.1754944e-38, %v3938_v31  ;;  %v14284_v31 = vand.u32 4294901760, %v14147_v20 }
 0x48a   : > { %v3915_v42 = vmul.f32 %v11074_v14, %v3914_v21  ;;  %v14199_v10 = vadd.f32 %v14049_v34, %v3678_v33 }
 0x48b   : > { %18759 = vst [vmem:[#allocation231_spill] sm:$0xff] %v14284_v31 }
 0x48c   : > { %v11076_v43 = vpop.eup %11075  ;;  %v3916_v57 = vadd.f32 %v11074_v14, %v3915_v42  ;;  %v10590_v19 = vmul.f32 -1.442695, %v14199_v10 }
 0x48d   : > { %v11078_v12 = vpop.eup %11077  ;;  %v3744_v35 = vadd.f32 1.0, %v11076_v43 }
 0x48e   : > { %v3920_v15 = vsel %vm3919_vm7, %v11074_v14, %v3916_v57  ;;  %v3928_v4 = vmul.f32 %v11078_v12, %v14186_v2  ;;  %11079 = vpow2.f32 %v10590_v19  ;;  %vm3933_vm9 = vweird.f32 %v11078_v12 }
 0x48f   : > { %v3925_v41 = vsel %vm3922_vm8, %v3924_v56, %v3920_v15  ;;  %11081 = vrcp.f32 %v3744_v35  ;;  %vm3934_vm11 = vmor %vm3932_vm10, %vm3933_vm9  ;;  %v3953_v48 = vand.u32 2147483648, %v3744_v35  ;;  %v3951_v40 = vand.u32 2147483647, %v3744_v35 }
 0x490   : > { %v14210_v17 = vmul.f32 %v3925_v41, %v14150_v51  ;;  %v3929_v25 = vsub.f32 1.0, %v3928_v4  ;;  %vm3947_vm14 = vweird.f32 %v3744_v35 }
 0x491   : > { %v3680_v61 = vpop.f32.mrf.mxu1  ;;  %v3954_v14 = vor.u32 1.1754944e-38, %v3953_v48  ;;  %vm3952_vm1 = vcmp.eq.f32.partialorder %v3951_v40, 8.507059e+37  ;;  %v14293_v48 = vand.u32 4294901760, %v14117_v47 }
 0x492   : > { %v3930_v16 = vmul.f32 %v11078_v12, %v3929_v25  ;;  %v14216_v63 = vadd.f32 %v14049_v34, %v3680_v61  ;;  %v4008_v50 = vpack.c.bf16 %v14210_v17, %v14207_v38  ;;  %v3936_v34 = vand.u32 2147483647, %v14186_v2 }
 0x493   : > { %18761 = vst [vmem:[#allocation232_spill] sm:$0xff] %v14293_v48 }
 0x494   : > { %v11080_v6 = vpop.eup %11079  ;;  %v10591_v29 = vmul.f32 -1.442695, %v14216_v63  ;;  %10609 = vmatmul.msk.bf16.gmra.mxu2 %vm18334_vm0, %v4008_v50  ;;  %v3931_v36 = vadd.f32 %v11078_v12, %v3930_v16  ;;  %vm3937_vm13 = vcmp.eq.f32.partialorder %v3936_v34, 8.507059e+37  ;;  %v14260_v50 = vand.u32 4294901760, %v14210_v17 }
 0x495   : > { %v11082_v51 = vpop.eup %11081  ;;  %v3745_v22 = vadd.f32 1.0, %v11080_v6  ;;  %v14264_v6 = vand.u32 4294901760, %v14207_v38 }
 0x496   : > { %v3943_v32 = vmul.f32 %v11082_v51, %v3744_v35  ;;  %11083 = vpow2.f32 %v10591_v29  ;;  %v3935_v49 = vsel %vm3934_vm11, %v11078_v12, %v3931_v36  ;;  %vm3948_vm12 = vweird.f32 %v11082_v51  ;;  %18755 = vst [vmem:[#allocation222_spill] sm:$0xff] %v14260_v50  ;;  %v14269_v29 = vld [vmem:[%s17898_s8 + $0x6] ss:$0 sm:$0xff] }
 0x497   : > { %11085 = vrcp.f32 %v3745_v22  ;;  %v3940_v13 = vsel %vm3937_vm13, %v3939_v44, %v3935_v49  ;;  %vm3949_vm15 = vmor %vm3947_vm14, %vm3948_vm12  ;;  %v3968_v53 = vand.u32 2147483648, %v3745_v22  ;;  %vm3962_vm3 = vweird.f32 %v3745_v22  ;;  %18756 = vst [vmem:[#allocation229_spill] sm:$0xff] %v14264_v6 }
 0x498   : > { %v3944_v39 = vsub.f32 1.0, %v3943_v32  ;;  %v14226_v54 = vmul.f32 %v3940_v13, %v14169_v7  ;;  %v3966_v43 = vand.u32 2147483647, %v3745_v22  ;;  %v14297_v49 = vand.u32 4294901760, %v14114_v37 }
 0x499   : > { %v3969_v46 = vor.u32 1.1754944e-38, %v3968_v53  ;;  %v14304_v44 = vand.u32 4294901760, %v14086_v55  ;;  %v14309_v13 = vand.u32 4294901760, %v14083_v5 }
 0x49a   : > { %v3945_v0 = vmul.f32 %v11082_v51, %v3944_v39  ;;  %vm3967_vm6 = vcmp.eq.f32.partialorder %v3966_v43, 8.507059e+37  ;;  %v14289_v39 = vand.u32 4294901760, %v14144_v18  ;;  %18762 = vst [vmem:[#allocation233_spill] sm:$0xff] %v14297_v49 }
 0x49b   : > { %18763 = vst [vmem:[#allocation234_spill] sm:$0xff] %v14304_v44 }
 0x49c   : > { %v11084_v60 = vpop.eup %11083  ;;  %v3946_v26 = vadd.f32 %v11082_v51, %v3945_v0  ;;  %18760 = vst [vmem:[#allocation135_spill] sm:$0xff] %v14289_v39 }
 0x49d   : > { %v11086_v58 = vpop.eup %11085  ;;  %v3746_v59 = vadd.f32 1.0, %v11084_v60  ;;  %18764 = vst [vmem:[#allocation235_spill] sm:$0xff] %v14309_v13 }
 0x49e   : > { %v3950_v23 = vsel %vm3949_vm15, %v11082_v51, %v3946_v26  ;;  %v3958_v2 = vmul.f32 %v11086_v58, %v3745_v22  ;;  %vm3963_vm2 = vweird.f32 %v11086_v58  ;;  %v14273_v51 = vand.u32 4294901760, %v14177_v3 }
 0x49f   : > { %v3955_v52 = vsel %vm3952_vm1, %v3954_v14, %v3950_v23  ;;  %11087 = vrcp.f32 %v3746_v59  ;;  %vm3964_vm4 = vmor %vm3962_vm3, %vm3963_vm2  ;;  %v3983_v7 = vand.u32 2147483648, %v3746_v59  ;;  %v3981_v12 = vand.u32 2147483647, %v3746_v59 }
 0x4a0   : > { %v14229_v21 = vmul.f32 %v3955_v52, %v14180_v45  ;;  %v3959_v8 = vsub.f32 1.0, %v3958_v2  ;;  %vm3977_vm7 = vweird.f32 %v3746_v59  ;;  %18757 = vst [vmem:[#allocation228_spill] sm:$0xff] %v14273_v51  ;;  %v14277_v22 = vand.u32 4294901760, %v14174_v28 }
 0x4a1   : > { %v3984_v15 = vor.u32 1.1754944e-38, %v3983_v7  ;;  %vm3982_vm9 = vcmp.eq.f32.partialorder %v3981_v12, 8.507059e+37  ;;  %v14313_v14 = vand.u32 4294901760, %v14069_v62 }
 0x4a2   : > { %v3960_v11 = vmul.f32 %v11086_v58, %v3959_v8  ;;  %v4009_v24 = vpack.c.bf16 %v14229_v21, %v14226_v54  ;;  %18758 = vst [vmem:[#allocation230_spill] sm:$0xff] %v14277_v22 }
 0x4a3   : > { %18765 = vst [vmem:[#allocation236_spill] sm:$0xff] %v14313_v14 }
 0x4a4   : > { %10610 = vmatmul.msk.bf16.gmra.mxu2 %vm18334_vm0, %v4009_v24  ;;  %v3961_v30 = vadd.f32 %v11086_v58, %v3960_v11 }
 0x4a5   : > { %v11088_v33 = vpop.eup %11087 }
 0x4a6   : > { %v3973_v42 = vmul.f32 %v11088_v33, %v3746_v59  ;;  %v3965_v19 = vsel %vm3964_vm4, %v11086_v58, %v3961_v30  ;;  %vm3978_vm5 = vweird.f32 %v11088_v33  ;;  %v14317_v59 = vand.u32 4294901760, %v14067_v27 }
 0x4a7   : > { %v3970_v35 = vsel %vm3967_vm6, %v3969_v46, %v3965_v19  ;;  %vm3979_vm8 = vmor %vm3977_vm7, %vm3978_vm5 }
 0x4a8   : > { %v3974_v57 = vsub.f32 1.0, %v3973_v42  ;;  %v14235_v41 = vmul.f32 %v3970_v35, %v14199_v10  ;;  %v14252_v10 = vand.u32 4294901760, %v14229_v21  ;;  %18766 = vst [vmem:[#allocation237_spill] sm:$0xff] %v14317_v59 }
 0x4aa   : > { %v3975_v45 = vmul.f32 %v11088_v33, %v3974_v57  ;;  %v14248_v16 = vand.u32 4294901760, %v14235_v41  ;;  %18753 = vst [vmem:[#allocation221_spill] sm:$0xff] %v14252_v10 }
 0x4ac   : > { %v3976_v56 = vadd.f32 %v11088_v33, %v3975_v45  ;;  %18752 = vst [vmem:[#allocation213_spill] sm:$0xff] %v14248_v16 }
 0x4ae   : > { %v3980_v4 = vsel %vm3979_vm8, %v11088_v33, %v3976_v56 }
 0x4af   : > { %v3985_v9 = vsel %vm3982_vm9, %v3984_v15, %v3980_v4 }
 0x4b0   : > { %v14238_v25 = vmul.f32 %v3985_v9, %v14216_v63  ;;  %v14256_v63 = vand.u32 4294901760, %v14226_v54 }
 0x4b2   : > { %v4010_v1 = vpack.c.bf16 %v14238_v25, %v14235_v41  ;;  %v14243_v61 = vand.u32 4294901760, %v14238_v25  ;;  %18754 = vst [vmem:[#allocation219_spill] sm:$0xff] %v14256_v63 }
 0x4b4   : > { %18751 = vst [vmem:[#allocation210_spill] sm:$0xff] %v14243_v61  ;;  %10611 = vmatmul.msk.bf16.gmra.mxu2 %vm18334_vm0, %v4010_v1  ;;  %5184 = vmatpush.msrb.mxu3 %v14243_v61 }
 0x4b6   : > { %5186 = vmatpush.msrb.mxu3 %v14248_v16 }
 0x4b8   : > { %5188 = vmatpush.msrb.mxu3 %v14252_v10 }
 0x4ba   : > { %5190 = vmatpush.msrb.mxu3 %v14256_v63 }
 0x4bc   : > { %5192 = vmatpush.msrb.mxu3 %v14260_v50 }
 0x4be   : > { %5194 = vmatpush.msrb.mxu3 %v14264_v6 }
 0x4c0   : > { %5196 = vmatpush.msrb.mxu3 %v14273_v51 }
 0x4c2   : > { %5198 = vmatpush.msrb.mxu3 %v14277_v22 }
 0x4c3   : > { %v4063_v36 = vpop.f32.mrf.mxu2 }
 0x4c4   : > { %v14280_v32 = vadd.f32 %v14269_v29, %v4063_v36  ;;  %5200 = vmatpush.msrb.mxu3 %v14284_v31 }
 0x4c6   : > { %v10612_v34 = vmul.f32 -1.442695, %v14280_v32  ;;  %5202 = vmatpush.msrb.mxu3 %v14289_v39 }
 0x4c8   : > { %11089 = vpow2.f32 %v10612_v34  ;;  %5204 = vmatpush.msrb.mxu3 %v14293_v48 }
 0x4ca   : > { %5206 = vmatpush.msrb.mxu3 %v14297_v49 }
 0x4cb   : > { %v4065_v0 = vpop.f32.mrf.mxu2 }
 0x4cc   : > { %v14300_v40 = vadd.f32 %v14269_v29, %v4065_v0  ;;  %5208 = vmatpush.msrb.mxu3 %v14304_v44 }
 0x4ce   : > { %v11090_v60 = vpop.eup %11089  ;;  %v10613_v26 = vmul.f32 -1.442695, %v14300_v40  ;;  %5210 = vmatpush.msrb.mxu3 %v14309_v13 }
 0x4cf   : > { %v4151_v58 = vadd.f32 1.0, %v11090_v60 }
 0x4d0   : > { %11091 = vpow2.f32 %v10613_v26  ;;  %5212 = vmatpush.msrb.mxu3 %v14313_v14 }
 0x4d1   : > { %11093 = vrcp.f32 %v4151_v58  ;;  %v4178_v56 = vand.u32 2147483648, %v4151_v58  ;;  %vm4172_vm11 = vweird.f32 %v4151_v58  ;;  %v4176_v35 = vand.u32 2147483647, %v4151_v58 }
 0x4d2   : > { %5214 = vmatpush.msrb.mxu3 %v14317_v59 }
 0x4d3   : > { %v4068_v23 = vpop.f32.mrf.mxu2  ;;  %v4179_v34 = vor.u32 1.1754944e-38, %v4178_v56  ;;  %vm4177_vm14 = vcmp.eq.f32.partialorder %v4176_v35, 8.507059e+37  ;;  %v14360_v35 = vsub.f32 %v14226_v54, %v14256_v63 }
 0x4d4   : > { %v14320_v2 = vadd.f32 %v14269_v29, %v4068_v23 }
 0x4d6   : > { %v11092_v52 = vpop.eup %11091  ;;  %v10614_v8 = vmul.f32 -1.442695, %v14320_v2 }
 0x4d7   : > { %v11094_v11 = vpop.eup %11093  ;;  %v4152_v24 = vadd.f32 1.0, %v11092_v52 }
 0x4d8   : > { %v4168_v33 = vmul.f32 %v11094_v11, %v4151_v58  ;;  %11095 = vpow2.f32 %v10614_v8  ;;  %vm4173_vm10 = vweird.f32 %v11094_v11 }
 0x4d9   : > { %11097 = vrcp.f32 %v4152_v24  ;;  %vm4174_vm12 = vmor %vm4172_vm11, %vm4173_vm10  ;;  %v4193_v4 = vand.u32 2147483648, %v4152_v24  ;;  %v4191_v36 = vand.u32 2147483647, %v4152_v24  ;;  %vm4187_vm15 = vweird.f32 %v4152_v24 }
 0x4da   : > { %v4169_v30 = vsub.f32 1.0, %v4168_v33 }
 0x4db   : > { %v4070_v42 = vpop.f32.mrf.mxu2  ;;  %v4194_v52 = vor.u32 1.1754944e-38, %v4193_v4  ;;  %vm4192_vm2 = vcmp.eq.f32.partialorder %v4191_v36, 8.507059e+37 }
 0x4dc   : > { %v4170_v53 = vmul.f32 %v11094_v11, %v4169_v30  ;;  %v14325_v43 = vadd.f32 %v14269_v29, %v4070_v42 }
 0x4de   : > { %v11096_v57 = vpop.eup %11095  ;;  %v10615_v7 = vmul.f32 -1.442695, %v14325_v43  ;;  %v4171_v12 = vadd.f32 %v11094_v11, %v4170_v53 }
 0x4df   : > { %v11098_v19 = vpop.eup %11097  ;;  %v14328_v45 = vadd.f32 1.0, %v11096_v57 }
 0x4e0   : > { %v4183_v46 = vmul.f32 %v11098_v19, %v4152_v24  ;;  %11099 = vpow2.f32 %v10615_v7  ;;  %v4175_v9 = vsel %vm4174_vm12, %v11094_v11, %v4171_v12  ;;  %vm4188_vm13 = vweird.f32 %v11098_v19 }
 0x4e1   : > { %11101 = vrcp.f32 %v14328_v45  ;;  %v4180_v23 = vsel %vm4177_vm14, %v4179_v34, %v4175_v9  ;;  %vm4189_vm1 = vmor %vm4187_vm15, %vm4188_vm13  ;;  %v14337_v11 = vsub.f32 %v14238_v25, %v14243_v61  ;;  %vm4202_vm4 = vweird.f32 %v14328_v45 }
 0x4e2   : > { %v4184_v15 = vsub.f32 1.0, %v4183_v46  ;;  %v4407_v42 = vmul.f32 %v4180_v23, %v14280_v32  ;;  %v14352_v32 = vsub.f32 %v14229_v21, %v14252_v10  ;;  %v4208_v21 = vand.u32 2147483648, %v14328_v45 }
 0x4e3   : > { %v18213_v25 = vand.u32 4294901760, %v14337_v11  ;;  %v4206_v54 = vand.u32 2147483647, %v14328_v45 }
 0x4e4   : > { %v4185_v1 = vmul.f32 %v11098_v19, %v4184_v15  ;;  %v18211_v9 = vand.u32 4294901760, %v14352_v32 }
 0x4e5   : > { %vm4207_vm7 = vcmp.eq.f32.partialorder %v4206_v54, 8.507059e+37 }
 0x4e6   : > { %v11100_v0 = vpop.eup %11099  ;;  %v4186_v60 = vadd.f32 %v11098_v19, %v4185_v1  ;;  %v14369_v1 = vsub.f32 %v14210_v17, %v14260_v50  ;;  %v18210_v17 = vand.u32 4294901760, %v14360_v35 }
 0x4e7   : > { %v11102_v26 = vpop.eup %11101  ;;  %v14331_v8 = vadd.f32 1.0, %v11100_v0  ;;  %v4073_v57 = vpop.f32.mrf.mxu2  ;;  %v14375_v0 = vsub.f32 %v14174_v28, %v14277_v22 }
 0x4e8   : > { %v4190_v33 = vsel %vm4189_vm1, %v11098_v19, %v4186_v60  ;;  %v4198_v58 = vmul.f32 %v11102_v26, %v14328_v45  ;;  %v14342_v7 = vadd.f32 %v14269_v29, %v4073_v57  ;;  %v14346_v19 = vsub.f32 %v14235_v41, %v14248_v16 }
 0x4e9   : > { %v4195_v30 = vsel %vm4192_vm2, %v4194_v52, %v4190_v33  ;;  %11103 = vrcp.f32 %v14331_v8  ;;  %vm4203_vm3 = vweird.f32 %v11102_v26  ;;  %v4223_v23 = vand.u32 2147483648, %v14331_v8 }
 0x4ea   : > { %v4408_v24 = vmul.f32 %v4195_v30, %v14300_v40  ;;  %v4199_v53 = vsub.f32 1.0, %v4198_v58  ;;  %v10616_v56 = vmul.f32 -1.442695, %v14342_v7  ;;  %v18212_v41 = vand.u32 4294901760, %v14346_v19  ;;  %vm14377_vm5 = vmor %vm4202_vm4, %vm4203_vm3 }
 0x4eb   : > { %v14390_v45 = vsub.f32 %v14207_v38, %v14264_v6  ;;  %v4221_v58 = vand.u32 2147483647, %v14331_v8  ;;  %v14401_v38 = vsub.f32 %v14177_v3, %v14273_v51  ;;  %vm4217_vm8 = vweird.f32 %v14331_v8  ;;  %v515_v51 = vld [vmem:[%s14665_s13 + $0x28] sm:$0xff] }
 0x4ec   : > { %v4423_v12 = vpack.c.bf16 %v4408_v24, %v4407_v42  ;;  %v4200_v46 = vmul.f32 %v11102_v26, %v4199_v53  ;;  %11105 = vpow2.f32 %v10616_v56  ;;  %v4209_v42 = vor.u32 1.1754944e-38, %v4208_v21 }
 0x4ed   : > { %v18208_v53 = vand.u32 4294901760, %v14369_v1  ;;  %v18207_v56 = vand.u32 4294901760, %v14390_v45  ;;  %vm4222_vm10 = vcmp.eq.f32.partialorder %v4221_v58, 8.507059e+37  ;;  %v14427_v60 = vsub.f32 %v14144_v18, %v14289_v39 }
 0x4ee   : > { %10640 = vmatmul.msk.bf16.vlgmr.msra.gmra.mxu3 %vm18334_vm0, %v4423_v12  ;;  %v4201_v15 = vadd.f32 %v11102_v26, %v4200_v46  ;;  %v4224_v46 = vor.u32 1.1754944e-38, %v4223_v23  ;;  %v14764_v10 = vand.u32 4294901760, %v515_v51 }
 0x4ef   : > { %v11104_v40 = vpop.eup %11103  ;;  %5582 = vmatpush.msra.mxu3 %v18213_v25  ;;  %v4075_v34 = vpop.f32.mrf.mxu2  ;;  %v18793_v25 = vld [vmem:[#allocation72_spill] sm:$0xff] }
 0x4f0   : > { %v4213_v4 = vmul.f32 %v11104_v40, %v14331_v8  ;;  %v14383_v52 = vadd.f32 %v14269_v29, %v4075_v34  ;;  %v4205_v28 = vsel %vm14377_vm5, %v11102_v26, %v4201_v15  ;;  %vm4218_vm6 = vweird.f32 %v11104_v40 }
 0x4f1   : > { %5586 = vmatpush.msra.mxu3 %v18212_v41  ;;  %v4210_v12 = vsel %vm4207_vm7, %v4209_v42, %v4205_v28  ;;  %vm4219_vm9 = vmor %vm4217_vm8, %vm4218_vm6  ;;  %v18205_v8 = vand.u32 4294901760, %v14401_v38  ;;  %v18204_v34 = vand.u32 4294901760, %v14375_v0  ;;  %v14446_v42 = vsub.f32 %v14114_v37, %v14297_v49 }
 0x4f2   : > { %v4214_v36 = vsub.f32 1.0, %v4213_v4  ;;  %v11106_v30 = vpop.eup %11105  ;;  %v10617_v24 = vmul.f32 -1.442695, %v14383_v52  ;;  %v14415_v4 = vsub.f32 %v14147_v20, %v14284_v31  ;;  %v4409_v21 = vmul.f32 %v4210_v12, %v14320_v2 }
 0x4f3   : > { %5590 = vmatpush.msra.mxu3 %v18211_v9  ;;  %v14404_v26 = vadd.f32 1.0, %v11106_v30  ;;  %v18202_v30 = vand.u32 4294901760, %v14427_v60  ;;  %18770 = vst [vmem:[#allocation239_spill] sm:$0xff] %v14446_v42  ;;  %v14793_v61 = vsub.f32 %v515_v51, %v14764_v10 }
 0x4f4   : > { %v4215_v33 = vmul.f32 %v11104_v40, %v4214_v36  ;;  %11107 = vpow2.f32 %v10617_v24  ;;  %v18203_v2 = vand.u32 4294901760, %v14415_v4 }
 0x4f5   : > { %5594 = vmatpush.msra.mxu3 %v18210_v17  ;;  %11109 = vrcp.f32 %v14404_v26  ;;  %vm4232_vm12 = vweird.f32 %v14404_v26 }
 0x4f6   : > { %v4216_v57 = vadd.f32 %v11104_v40, %v4215_v33 }
 0x4f7   : > { %5598 = vmatpush.msra.mxu3 %v18208_v53  ;;  %v4078_v36 = vpop.f32.mrf.mxu2 }
 0x4f8   : > { %v4220_v15 = vsel %vm4219_vm9, %v11104_v40, %v4216_v57  ;;  %v14420_v40 = vadd.f32 %v14269_v29, %v4078_v36  ;;  %v14454_v57 = vsub.f32 %v14086_v55, %v14304_v44  ;;  %v18796_v44 = vld [vmem:[#allocation76_spill] sm:$0xff] }
 0x4f9   : > { %v4225_v3 = vsel %vm4222_vm10, %v4224_v46, %v4220_v15  ;;  %5602 = vmatpush.msra.mxu3 %v18207_v56  ;;  %v14458_v46 = vsub.f32 %v14083_v5, %v14309_v13  ;;  %v14472_v5 = vsub.f32 %v14069_v62, %v14313_v14  ;;  %v4238_v62 = vand.u32 2147483648, %v14404_v26 }
 0x4fa   : > { %v4410_v54 = vmul.f32 %v4225_v3, %v14325_v43  ;;  %v11108_v20 = vpop.eup %11107  ;;  %v10618_v28 = vmul.f32 -1.442695, %v14420_v40  ;;  %v14435_v43 = vsub.f32 %v14117_v47, %v14293_v48  ;;  %18771 = vst [vmem:[#allocation240_spill] sm:$0xff] %v14454_v57  ;;  %v18199_v3 = vand.u32 4294901760, %v14446_v42  ;;  %v510_v48 = vld [vmem:[%s14665_s13] sm:$0xff] }
 0x4fb   : > { %5606 = vmatpush.msra.mxu3 %v18205_v8  ;;  %v11110_v33 = vpop.eup %11109  ;;  %v14437_v58 = vadd.f32 1.0, %v11108_v20  ;;  %18772 = vst [vmem:[#allocation241_spill] sm:$0xff] %v14458_v46  ;;  %v18198_v55 = vand.u32 4294901760, %v14454_v57  ;;  %v18201_v20 = vand.u32 4294901760, %v14458_v46  ;;  %v14722_v31 = vand.u32 4294901760, %v510_v48 }
 0x4fc   : > { %v4424_v23 = vpack.c.bf16 %v4410_v54, %v4409_v21  ;;  %18769 = vst [vmem:[#allocation238_spill] sm:$0xff] %v14435_v43  ;;  %v4228_v18 = vmul.f32 %v11110_v33, %v14404_v26  ;;  %11111 = vpow2.f32 %v10618_v28  ;;  %v18200_v24 = vand.u32 4294901760, %v14435_v43 }
 0x4fd   : > { %5610 = vmatpush.msra.mxu3 %v18204_v34  ;;  %11113 = vrcp.f32 %v14437_v58  ;;  %18773 = vst [vmem:[#allocation242_spill] sm:$0xff] %v14472_v5  ;;  %v14479_v28 = vsub.f32 %v14067_v27, %v14317_v59  ;;  %vm4233_vm11 = vweird.f32 %v11110_v33  ;;  %v18206_v27 = vand.u32 4294901760, %v14472_v5 }
 0x4fe   : > { %10641 = vmatmul.msk.bf16.gmra.mxu3 %vm18334_vm0, %v4424_v23  ;;  %v4229_v47 = vsub.f32 1.0, %v4228_v18  ;;  %vm14491_vm13 = vmor %vm4232_vm12, %vm4233_vm11  ;;  %vm4247_vm1 = vweird.f32 %v14437_v58 }
 0x4ff   : > { %5614 = vmatpush.msra.mxu3 %v18203_v2  ;;  %v4080_v12 = vpop.f32.mrf.mxu2  ;;  %18774 = vst [vmem:[#allocation243_spill] sm:$0xff] %v14479_v28 }
 0x500   : > { %v4230_v15 = vmul.f32 %v11110_v33, %v4229_v47  ;;  %v14461_v37 = vadd.f32 %v14269_v29, %v4080_v12  ;;  %v4236_v12 = vand.u32 2147483647, %v14404_v26 }
 0x501   : > { %5618 = vmatpush.msra.mxu3 %v18202_v30  ;;  %v4239_v30 = vor.u32 1.1754944e-38, %v4238_v62 }
 0x502   : > { %v11112_v21 = vpop.eup %11111  ;;  %v10619_v54 = vmul.f32 -1.442695, %v14461_v37  ;;  %v4231_v18 = vadd.f32 %v11110_v33, %v4230_v15  ;;  %vm4237_vm15 = vcmp.eq.f32.partialorder %v4236_v12, 8.507059e+37 }
 0x503   : > { %5622 = vmatpush.msra.mxu3 %v18200_v24  ;;  %v11114_v36 = vpop.eup %11113  ;;  %v14474_v23 = vadd.f32 1.0, %v11112_v21  ;;  %v18209_v24 = vand.u32 4294901760, %v14479_v28 }
 0x504   : > { %v4243_v47 = vmul.f32 %v11114_v36, %v14437_v58  ;;  %11115 = vpow2.f32 %v10619_v54  ;;  %v4251_v54 = vand.u32 2147483647, %v14437_v58  ;;  %v4235_v26 = vsel %vm14491_vm13, %v11110_v33, %v4231_v18 }
 0x505   : > { %5626 = vmatpush.msra.mxu3 %v18199_v3  ;;  %11117 = vrcp.f32 %v14474_v23  ;;  %vm4248_vm14 = vweird.f32 %v11114_v36  ;;  %v4240_v18 = vsel %vm4237_vm15, %v4239_v30, %v4235_v26  ;;  %vm4262_vm5 = vweird.f32 %v14474_v23 }
 0x506   : > { %v4244_v21 = vsub.f32 1.0, %v4243_v47  ;;  %vm4249_vm2 = vmor %vm4247_vm1, %vm4248_vm14  ;;  %vm4252_vm3 = vcmp.eq.f32.partialorder %v4251_v54, 8.507059e+37  ;;  %v4411_v12 = vmul.f32 %v4240_v18, %v14342_v7 }
 0x507   : > { %5630 = vmatpush.msra.mxu3 %v18198_v55  ;;  %v4253_v55 = vand.u32 2147483648, %v14437_v58  ;;  %v4083_v3 = vpop.f32.mrf.mxu2 }
 0x508   : > { %v4245_v47 = vmul.f32 %v11114_v36, %v4244_v21 }
 0x509   : > { %5634 = vmatpush.msra.mxu3 %v18201_v20  ;;  %v14501_v20 = vadd.f32 %v14269_v29, %v4083_v3  ;;  %v4254_v21 = vor.u32 1.1754944e-38, %v4253_v55 }
 0x50a   : > { %v11116_v2 = vpop.eup %11115  ;;  %v4246_v34 = vadd.f32 %v11114_v36, %v4245_v47 }
 0x50b   : > { %5638 = vmatpush.msra.mxu3 %v18206_v27  ;;  %v10620_v8 = vmul.f32 -1.442695, %v14501_v20  ;;  %v11118_v33 = vpop.eup %11117  ;;  %v4158_v3 = vadd.f32 1.0, %v11116_v2 }
 0x50c   : > { %v4250_v15 = vsel %vm4249_vm2, %v11114_v36, %v4246_v34  ;;  %v4258_v27 = vmul.f32 %v11118_v33, %v14474_v23  ;;  %vm4263_vm4 = vweird.f32 %v11118_v33 }
 0x50d   : > { %5642 = vmatpush.msra.mxu3 %v18209_v24  ;;  %11119 = vpow2.f32 %v10620_v8  ;;  %v4255_v62 = vsel %vm4252_vm3, %v4254_v21, %v4250_v15  ;;  %vm14523_vm6 = vmor %vm4262_vm5, %vm4263_vm4  ;;  %v4283_v26 = vand.u32 2147483648, %v4158_v3  ;;  %vm4277_vm9 = vweird.f32 %v4158_v3 }
 0x50e   : > { %11121 = vrcp.f32 %v4158_v3  ;;  %v4412_v58 = vmul.f32 %v4255_v62, %v14383_v52  ;;  %v4259_v47 = vsub.f32 1.0, %v4258_v27  ;;  %v4268_v52 = vand.u32 2147483648, %v14474_v23 }
 0x50f   : > { %v4085_v56 = vpop.f32.mrf.mxu2 }
 0x510   : > { %v4425_v53 = vpack.c.bf16 %v4412_v58, %v4411_v12  ;;  %v4260_v24 = vmul.f32 %v11118_v33, %v4259_v47  ;;  %v14513_v30 = vadd.f32 %v14269_v29, %v4085_v56  ;;  %v4266_v56 = vand.u32 2147483647, %v14474_v23 }
 0x511   : > { %v4269_v62 = vor.u32 1.1754944e-38, %v4268_v52 }
 0x512   : > { %v10621_v34 = vmul.f32 -1.442695, %v14513_v30  ;;  %10642 = vmatmul.msk.bf16.gmra.mxu3 %vm18334_vm0, %v4425_v53  ;;  %v4261_v36 = vadd.f32 %v11118_v33, %v4260_v24  ;;  %v4281_v53 = vand.u32 2147483647, %v4158_v3  ;;  %vm4267_vm8 = vcmp.eq.f32.partialorder %v4266_v56, 8.507059e+37 }
 0x513   : > { %v11120_v55 = vpop.eup %11119 }
 0x514   : > { %v11122_v2 = vpop.eup %11121  ;;  %v14517_v8 = vadd.f32 1.0, %v11120_v55  ;;  %11123 = vpow2.f32 %v10621_v34  ;;  %v4265_v24 = vsel %vm14523_vm6, %v11118_v33, %v4261_v36  ;;  %v4284_v34 = vor.u32 1.1754944e-38, %v4283_v26 }
 0x515   : > { %v4273_v7 = vmul.f32 %v11122_v2, %v4158_v3  ;;  %vm4278_vm7 = vweird.f32 %v11122_v2  ;;  %v4270_v55 = vsel %vm4267_vm8, %v4269_v62, %v4265_v24  ;;  %vm4282_vm11 = vcmp.eq.f32.partialorder %v4281_v53, 8.507059e+37 }
 0x516   : > { %11125 = vrcp.f32 %v14517_v8  ;;  %vm4279_vm10 = vmor %vm4277_vm9, %vm4278_vm7  ;;  %v4413_v52 = vmul.f32 %v4270_v55, %v14420_v40  ;;  %vm4292_vm13 = vweird.f32 %v14517_v8  ;;  %v4296_v62 = vand.u32 2147483647, %v14517_v8 }
 0x517   : > { %v4274_v27 = vsub.f32 1.0, %v4273_v7  ;;  %v4088_v18 = vpop.f32.mrf.mxu2 }
 0x518   : > { %v14530_v15 = vadd.f32 %v14269_v29, %v4088_v18  ;;  %vm4297_vm1 = vcmp.eq.f32.partialorder %v4296_v62, 8.507059e+37 }
 0x519   : > { %v4275_v21 = vmul.f32 %v11122_v2, %v4274_v27 }
 0x51a   : > { %v11124_v12 = vpop.eup %11123  ;;  %v10622_v58 = vmul.f32 -1.442695, %v14530_v15 }
 0x51b   : > { %v4276_v23 = vadd.f32 %v11122_v2, %v4275_v21  ;;  %v4160_v7 = vadd.f32 1.0, %v11124_v12 }
 0x51c   : > { %v11126_v47 = vpop.eup %11125  ;;  %11127 = vpow2.f32 %v10622_v58 }
 0x51d   : > { %v4280_v17 = vsel %vm4279_vm10, %v11122_v2, %v4276_v23  ;;  %v4288_v33 = vmul.f32 %v11126_v47, %v14517_v8  ;;  %11129 = vrcp.f32 %v4160_v7  ;;  %vm4293_vm12 = vweird.f32 %v11126_v47 }
 0x51e   : > { %v4285_v36 = vsel %vm4282_vm11, %v4284_v34, %v4280_v17  ;;  %vm14547_vm14 = vmor %vm4292_vm13, %vm4293_vm12  ;;  %v4311_v58 = vand.u32 2147483647, %v4160_v7  ;;  %v4313_v55 = vand.u32 2147483648, %v4160_v7  ;;  %vm4307_vm2 = vweird.f32 %v4160_v7 }
 0x51f   : > { %v4414_v56 = vmul.f32 %v4285_v36, %v14461_v37  ;;  %v4289_v27 = vsub.f32 1.0, %v4288_v33  ;;  %v4090_v3 = vpop.f32.mrf.mxu2  ;;  %v4298_v37 = vand.u32 2147483648, %v14517_v8 }
 0x520   : > { %v14537_v24 = vadd.f32 %v14269_v29, %v4090_v3  ;;  %vm4312_vm4 = vcmp.eq.f32.partialorder %v4311_v58, 8.507059e+37 }
 0x521   : > { %v4426_v54 = vpack.c.bf16 %v4414_v56, %v4413_v52  ;;  %v4290_v18 = vmul.f32 %v11126_v47, %v4289_v27  ;;  %v4299_v56 = vor.u32 1.1754944e-38, %v4298_v37 }
 0x522   : > { %v11128_v26 = vpop.eup %11127  ;;  %v10623_v2 = vmul.f32 -1.442695, %v14537_v24 }
 0x523   : > { %10643 = vmatmul.msk.bf16.gmra.mxu3 %vm18334_vm0, %v4426_v54  ;;  %v11130_v53 = vpop.eup %11129  ;;  %v14541_v21 = vadd.f32 1.0, %v11128_v26  ;;  %v4291_v17 = vadd.f32 %v11126_v47, %v4290_v18  ;;  %v4314_v26 = vor.u32 1.1754944e-38, %v4313_v55 }
 0x524   : > { %v4303_v40 = vmul.f32 %v11130_v53, %v4160_v7  ;;  %11131 = vpow2.f32 %v10623_v2  ;;  %vm4308_vm15 = vweird.f32 %v11130_v53 }
 0x525   : > { %11133 = vrcp.f32 %v14541_v21  ;;  %v4295_v33 = vsel %vm14547_vm14, %v11126_v47, %v4291_v17  ;;  %vm4309_vm3 = vmor %vm4307_vm2, %vm4308_vm15  ;;  %vm4322_vm6 = vweird.f32 %v14541_v21 }
 0x526   : > { %v4304_v12 = vsub.f32 1.0, %v4303_v40  ;;  %v4300_v18 = vsel %vm4297_vm1, %v4299_v56, %v4295_v33 }
 0x527   : > { %v4093_v34 = vpop.f32.mrf.mxu2  ;;  %v4415_v37 = vmul.f32 %v4300_v18, %v14501_v20 }
 0x528   : > { %v4305_v36 = vmul.f32 %v11130_v53, %v4304_v12  ;;  %v14554_v52 = vadd.f32 %v14269_v29, %v4093_v34 }
 0x52a   : > { %v11132_v27 = vpop.eup %11131  ;;  %v4306_v8 = vadd.f32 %v11130_v53, %v4305_v36  ;;  %v10624_v3 = vmul.f32 -1.442695, %v14554_v52 }
 0x52b   : > { %v11134_v54 = vpop.eup %11133  ;;  %v4162_v2 = vadd.f32 1.0, %v11132_v27  ;;  %v4326_v27 = vand.u32 2147483647, %v14541_v21 }
 0x52c   : > { %v4310_v40 = vsel %vm4309_vm3, %v11130_v53, %v4306_v8  ;;  %v4318_v47 = vmul.f32 %v11134_v54, %v14541_v21  ;;  %11135 = vpow2.f32 %v10624_v3  ;;  %vm4323_vm5 = vweird.f32 %v11134_v54 }
 0x52d   : > { %v4315_v17 = vsel %vm4312_vm4, %v4314_v26, %v4310_v40  ;;  %11137 = vrcp.f32 %v4162_v2  ;;  %vm14571_vm7 = vmor %vm4322_vm6, %vm4323_vm5  ;;  %v4341_v18 = vand.u32 2147483647, %v4162_v2  ;;  %v4343_v26 = vand.u32 2147483648, %v4162_v2 }
 0x52e   : > { %v4416_v62 = vmul.f32 %v4315_v17, %v14513_v30  ;;  %v4319_v12 = vsub.f32 1.0, %v4318_v47  ;;  %v4328_v30 = vand.u32 2147483648, %v14541_v21  ;;  %vm4327_vm9 = vcmp.eq.f32.partialorder %v4326_v27, 8.507059e+37 }
 0x52f   : > { %v4095_v7 = vpop.f32.mrf.mxu2  ;;  %vm4337_vm10 = vweird.f32 %v4162_v2  ;;  %vm4342_vm12 = vcmp.eq.f32.partialorder %v4341_v18, 8.507059e+37 }
 0x530   : > { %v4427_v23 = vpack.c.bf16 %v4416_v62, %v4415_v37  ;;  %v4320_v34 = vmul.f32 %v11134_v54, %v4319_v12  ;;  %v14561_v33 = vadd.f32 %v14269_v29, %v4095_v7  ;;  %v4329_v62 = vor.u32 1.1754944e-38, %v4328_v30 }
 0x532   : > { %v11136_v55 = vpop.eup %11135  ;;  %v10625_v53 = vmul.f32 -1.442695, %v14561_v33  ;;  %v4321_v56 = vadd.f32 %v11134_v54, %v4320_v34 }
 0x533   : > { %10644 = vmatmul.msk.bf16.gmra.mxu3 %vm18334_vm0, %v4427_v23  ;;  %v11138_v58 = vpop.eup %11137  ;;  %v14565_v36 = vadd.f32 1.0, %v11136_v55  ;;  %v4344_v55 = vor.u32 1.1754944e-38, %v4343_v26 }
 0x534   : > { %v4333_v20 = vmul.f32 %v11138_v58, %v4162_v2  ;;  %11139 = vpow2.f32 %v10625_v53  ;;  %v4325_v47 = vsel %vm14571_vm7, %v11134_v54, %v4321_v56  ;;  %vm4338_vm8 = vweird.f32 %v11138_v58 }
 0x535   : > { %11141 = vrcp.f32 %v14565_v36  ;;  %v4330_v34 = vsel %vm4327_vm9, %v4329_v62, %v4325_v47  ;;  %vm4339_vm11 = vmor %vm4337_vm10, %vm4338_vm8  ;;  %vm4352_vm14 = vweird.f32 %v14565_v36 }
 0x536   : > { %v4334_v8 = vsub.f32 1.0, %v4333_v20  ;;  %v4417_v30 = vmul.f32 %v4330_v34, %v14530_v15  ;;  %v4358_v15 = vand.u32 2147483648, %v14565_v36 }
 0x537   : > { %v4098_v40 = vpop.f32.mrf.mxu2 }
 0x538   : > { %v4335_v17 = vmul.f32 %v11138_v58, %v4334_v8  ;;  %v14578_v37 = vadd.f32 %v14269_v29, %v4098_v40 }
 0x53a   : > { %v11140_v12 = vpop.eup %11139  ;;  %v4336_v21 = vadd.f32 %v11138_v58, %v4335_v17  ;;  %v10626_v7 = vmul.f32 -1.442695, %v14578_v37 }
 0x53b   : > { %v11142_v23 = vpop.eup %11141  ;;  %v4164_v53 = vadd.f32 1.0, %v11140_v12 }
 0x53c   : > { %v4340_v20 = vsel %vm4339_vm11, %v11138_v58, %v4336_v21  ;;  %v4348_v54 = vmul.f32 %v11142_v23, %v14565_v36  ;;  %11143 = vpow2.f32 %v10626_v7  ;;  %vm4353_vm13 = vweird.f32 %v11142_v23 }
 0x53d   : > { %v4345_v56 = vsel %vm4342_vm12, %v4344_v55, %v4340_v20  ;;  %11145 = vrcp.f32 %v4164_v53  ;;  %vm4354_vm15 = vmor %vm4352_vm14, %vm4353_vm13  ;;  %v4373_v21 = vand.u32 2147483648, %v4164_v53  ;;  %v4371_v55 = vand.u32 2147483647, %v4164_v53 }
 0x53e   : > { %v4418_v27 = vmul.f32 %v4345_v56, %v14537_v24  ;;  %v4349_v8 = vsub.f32 1.0, %v4348_v54  ;;  %v4356_v24 = vand.u32 2147483647, %v14565_v36  ;;  %v4359_v20 = vor.u32 1.1754944e-38, %v4358_v15 }
 0x53f   : > { %v4100_v2 = vpop.f32.mrf.mxu2  ;;  %vm4367_vm3 = vweird.f32 %v4164_v53  ;;  %vm4372_vm5 = vcmp.eq.f32.partialorder %v4371_v55, 8.507059e+37 }
 0x540   : > { %v4428_v3 = vpack.c.bf16 %v4418_v27, %v4417_v30  ;;  %v4350_v40 = vmul.f32 %v11142_v23, %v4349_v8  ;;  %v14585_v47 = vadd.f32 %v14269_v29, %v4100_v2  ;;  %vm4357_vm2 = vcmp.eq.f32.partialorder %v4356_v24, 8.507059e+37 }
 0x541   : > { %v4374_v8 = vor.u32 1.1754944e-38, %v4373_v21 }
 0x542   : > { %v11144_v26 = vpop.eup %11143  ;;  %v10627_v58 = vmul.f32 -1.442695, %v14585_v47  ;;  %v4351_v62 = vadd.f32 %v11142_v23, %v4350_v40 }
 0x543   : > { %10645 = vmatmul.msk.bf16.gmra.mxu3 %vm18334_vm0, %v4428_v3  ;;  %v11146_v18 = vpop.eup %11145  ;;  %v4165_v17 = vadd.f32 1.0, %v11144_v26 }
 0x544   : > { %v4363_v12 = vmul.f32 %v11146_v18, %v4164_v53  ;;  %11147 = vpow2.f32 %v10627_v58  ;;  %v4355_v7 = vsel %vm4354_vm15, %v11142_v23, %v4351_v62  ;;  %vm4368_vm1 = vweird.f32 %v11146_v18 }
 0x545   : > { %11149 = vrcp.f32 %v4165_v17  ;;  %v4360_v27 = vsel %vm4357_vm2, %v4359_v20, %v4355_v7  ;;  %vm4369_vm4 = vmor %vm4367_vm3, %vm4368_vm1  ;;  %vm4382_vm7 = vweird.f32 %v4165_v17 }
 0x546   : > { %v4364_v29 = vsub.f32 1.0, %v4363_v12  ;;  %v4419_v23 = vmul.f32 %v4360_v27, %v14554_v52 }
 0x548   : > { %v4365_v34 = vmul.f32 %v11146_v18, %v4364_v29  ;;  %v4388_v29 = vand.u32 2147483648, %v4165_v17 }
 0x54a   : > { %v11148_v54 = vpop.eup %11147  ;;  %v4366_v56 = vadd.f32 %v11146_v18, %v4365_v34 }
 0x54b   : > { %v11150_v30 = vpop.eup %11149  ;;  %v4166_v2 = vadd.f32 1.0, %v11148_v54 }
 0x54c   : > { %v4370_v3 = vsel %vm4369_vm4, %v11146_v18, %v4366_v56  ;;  %v4378_v36 = vmul.f32 %v11150_v30, %v4165_v17  ;;  %vm4383_vm6 = vweird.f32 %v11150_v30  ;;  %v4386_v18 = vand.u32 2147483647, %v4165_v17 }
 0x54d   : > { %v4375_v40 = vsel %vm4372_vm5, %v4374_v8, %v4370_v3  ;;  %11151 = vrcp.f32 %v4166_v2  ;;  %vm4384_vm8 = vmor %vm4382_vm7, %vm4383_vm6  ;;  %v4403_v7 = vand.u32 2147483648, %v4166_v2  ;;  %v4401_v52 = vand.u32 2147483647, %v4166_v2 }
 0x54e   : > { %v4420_v26 = vmul.f32 %v4375_v40, %v14561_v33  ;;  %v4379_v58 = vsub.f32 1.0, %v4378_v36  ;;  %v4389_v33 = vor.u32 1.1754944e-38, %v4388_v29  ;;  %vm4387_vm10 = vcmp.eq.f32.partialorder %v4386_v18, 8.507059e+37 }
 0x54f   : > { %vm4397_vm11 = vweird.f32 %v4166_v2  ;;  %v4404_v56 = vor.u32 1.1754944e-38, %v4403_v7  ;;  %vm4402_vm13 = vcmp.eq.f32.partialorder %v4401_v52, 8.507059e+37 }
 0x550   : > { %v4429_v62 = vpack.c.bf16 %v4420_v26, %v4419_v23  ;;  %v4380_v12 = vmul.f32 %v11150_v30, %v4379_v58 }
 0x552   : > { %v4381_v15 = vadd.f32 %v11150_v30, %v4380_v12 }
 0x553   : > { %10646 = vmatmul.msk.bf16.gmra.mxu3 %vm18334_vm0, %v4429_v62  ;;  %v11152_v53 = vpop.eup %11151 }
 0x554   : > { %v4393_v24 = vmul.f32 %v11152_v53, %v4166_v2  ;;  %v4385_v34 = vsel %vm4384_vm8, %v11150_v30, %v4381_v15  ;;  %vm4398_vm9 = vweird.f32 %v11152_v53 }
 0x555   : > { %v4390_v54 = vsel %vm4387_vm10, %v4389_v33, %v4385_v34  ;;  %vm4399_vm12 = vmor %vm4397_vm11, %vm4398_vm9 }
 0x556   : > { %v4394_v21 = vsub.f32 1.0, %v4393_v24  ;;  %v4421_v3 = vmul.f32 %v4390_v54, %v14578_v37 }
 0x558   : > { %v4395_v55 = vmul.f32 %v11152_v53, %v4394_v21 }
 0x55a   : > { %v4396_v20 = vadd.f32 %v11152_v53, %v4395_v55 }
 0x55c   : > { %v4400_v27 = vsel %vm4399_vm12, %v11152_v53, %v4396_v20  ;;  %v18783_v20 = vld [vmem:[#allocation124_spill] sm:$0xff] }
 0x55d   : > { %v4405_v8 = vsel %vm4402_vm13, %v4404_v56, %v4400_v27  ;;  %v18784_v27 = vld [vmem:[#allocation119_spill] sm:$0xff] }
 0x55e   : > { %v4422_v17 = vmul.f32 %v4405_v8, %v14585_v47  ;;  %18805 = vst [vmem:[#allocation119_spill] sm:$0xff] %v14764_v10 }
 0x560   : > { %v4430_v36 = vpack.c.bf16 %v4422_v17, %v4421_v3 }
 0x563   : > { %10647 = vmatmul.msk.bf16.gmra.mxu3 %vm18334_vm0, %v4430_v36  ;;  %v18785_v36 = vld [vmem:[#allocation142_spill] sm:$0xff] }
 0x564   : > { %18809 = vst [vmem:[#allocation142_spill] sm:$0xff] %v14793_v61 }
 0x571   : > { %v4481_v30 = vpop.f32.mrf.mxu3 }
 0x579   : > { %v4483_v40 = vpop.f32.mrf.mxu3 }
 0x581   : > { %v4486_v23 = vpop.f32.mrf.mxu3 }
 0x589   : > { %v4488_v26 = vpop.f32.mrf.mxu3 }
 0x595   : > { %v4491_v58 = vpop.f32.mrf.mxu3 }
 0x59d   : > { %v4493_v62 = vpop.f32.mrf.mxu3 }
 0x5a6   : > { %v4496_v2 = vpop.f32.mrf.mxu3 }
 0x5ae   : > { %v4498_v12 = vpop.f32.mrf.mxu3 }
 0x5b6   : > { %v4501_v15 = vpop.f32.mrf.mxu3 }
 0x5be   : > { %v4503_v24 = vpop.f32.mrf.mxu3 }
 0x5c6   : > { %v4506_v53 = vpop.f32.mrf.mxu3 }
 0x5c7   : > { %4573 = vperm.xlu0 %10947, %v4506_v53  }
 0x5ce   : > { %v4508_v29 = vpop.f32.mrf.mxu3 }
 0x5cf   : > { %4578 = vperm.xlu2 %10949, %v4508_v29  }
 0x5d6   : > { %v4511_v37 = vpop.f32.mrf.mxu3 }
 0x5d7   : > { %4583 = vperm.xlu1 %10948, %v4511_v37  }
 0x5de   : > { %v4513_v47 = vpop.f32.mrf.mxu3 }
 0x5df   : > { %4588 = vperm.xlu0 %10947, %v4513_v47  }
 0x5e6   : > { %v4516_v18 = vpop.f32.mrf.mxu3 }
 0x5e7   : > { %4558 = vperm.xlu0 %10947, %v4498_v12   ;;  %4593 = vperm.xlu2 %10949, %v4516_v18   ;;  %v18788_v12 = vld [vmem:[#allocation87_spill] sm:$0xff] }
 0x5ee   : > { %v4518_v21 = vpop.f32.mrf.mxu3 }
 0x5ef   : > { %4543 = vperm.xlu0 %10947, %v4491_v58   ;;  %4563 = vperm.xlu2 %10949, %v4501_v15   ;;  %v18786_v58 = vld [vmem:[#allocation111_spill] sm:$0xff] }
 0x5f0   : > { %4598 = vperm.xlu1 %10948, %v4518_v21   ;;  %v18789_v21 = vld [vmem:[#allocation80_spill] sm:$0xff] }
 0x5f7   : > { %4528 = vperm.xlu0 %10947, %v4483_v40   ;;  %4548 = vperm.xlu2 %10949, %v4493_v62  }
 0x5f8   : > { %4568 = vperm.xlu1 %10948, %v4503_v24  }
 0x5ff   : > { %4533 = vperm.xlu2 %10949, %v4486_v23  }
 0x600   : > { %4553 = vperm.xlu1 %10948, %v4496_v2  }
 0x608   : > { %4538 = vperm.xlu1 %10948, %v4488_v26   ;;  %v18787_v26 = vld [vmem:[#allocation154_spill] sm:$0xff] }
 0x610   : > { %4523 = vperm.xlu1 %10948, %v4481_v30  }
 0x629   : > { %v4579_v7 = vpop.permute.xlu2 %4578 }
 0x62a   : > { %v4612_v23 = vmul.f32 %v4579_v7, %v18786_v58 }
 0x62c   : > { %v14613_v29 = vand.u32 4294901760, %v4612_v23 }
 0x639   : > { %v4574_v34 = vpop.permute.xlu0 %4573 }
 0x63a   : > { %v4611_v15 = vmul.f32 %v4574_v34, %v18788_v12 }
 0x63c   : > { %v14626_v34 = vand.u32 4294901760, %v4611_v15 }
 0x641   : > { %v4594_v55 = vpop.permute.xlu2 %4593 }
 0x642   : > { %v4615_v54 = vmul.f32 %v4594_v55, %v18783_v20  ;;  %v14633_v20 = vsub.f32 %v4612_v23, %v14613_v29 }
 0x644   : > { %v14600_v17 = vand.u32 4294901760, %v4615_v54 }
 0x646   : > { %v14609_v24 = vsub.f32 %v4615_v54, %v14600_v17 }
 0x649   : > { %v4584_v33 = vpop.permute.xlu1 %4583  ;;  %v4564_v56 = vpop.permute.xlu2 %4563 }
 0x64a   : > { %v4613_v40 = vmul.f32 %v4584_v33, %v18785_v36  ;;  %v4609_v7 = vmul.f32 %v4564_v56, %v18789_v21  ;;  %v18214_v33 = vand.u32 4294901760, %v14609_v24  ;;  %v18792_v21 = vld [vmem:[#allocation93_spill] sm:$0xff] }
 0x64c   : > { %v14611_v53 = vand.u32 4294901760, %v4613_v40 }
 0x651   : > { %v4589_v52 = vpop.permute.xlu0 %4588  ;;  %v4549_v47 = vpop.permute.xlu2 %4548 }
 0x652   : > { %v4614_v8 = vmul.f32 %v4589_v52, %v18784_v27  ;;  %v14629_v52 = vsub.f32 %v4613_v40, %v14611_v53  ;;  %v18790_v27 = vld [vmem:[#allocation100_spill] sm:$0xff]  ;;  %v14640_v40 = vand.u32 4294901760, %v4609_v7 }
 0x654   : > { %v14604_v62 = vand.u32 4294901760, %v4614_v8  ;;  %v18219_v12 = vand.u32 4294901760, %v14629_v52 }
 0x656   : > { %v14618_v18 = vsub.f32 %v4614_v8, %v14604_v62 }
 0x658   : > { %v18216_v58 = vand.u32 4294901760, %v14618_v18 }
 0x659   : > { %v4559_v3 = vpop.permute.xlu0 %4558 }
 0x65a   : > { %v4608_v8 = vmul.f32 %v4559_v3, %v18790_v27  ;;  %v4723_v3 = vsub.f32 %v14609_v24, %v18214_v33  ;;  %v4606_v27 = vmul.f32 %v4549_v47, %v18792_v21  ;;  %v4729_v47 = vsub.f32 %v14618_v18, %v18216_v58  ;;  %v18795_v58 = vld [vmem:[#allocation89_spill] sm:$0xff] }
 0x65b   : > { %v14673_v21 = vsub.f32 %v4609_v7, %v14640_v40 }
 0x65c   : > { %v14685_v7 = vand.u32 4294901760, %v4606_v27 }
 0x661   : > { %v4544_v56 = vpop.permute.xlu0 %4543 }
 0x662   : > { %v4599_v30 = vpop.permute.xlu1 %4598  ;;  %v4605_v33 = vmul.f32 %v4544_v56, %v18793_v25  ;;  %v514_v25 = vld [vmem:[%s14665_s13 + $0x20] sm:$0xff] }
 0x663   : > { %v4616_v2 = vmul.f32 %v4599_v30, %v18787_v26  ;;  %v18791_v30 = vld [vmem:[#allocation83_spill] sm:$0xff] }
 0x664   : > { %v14703_v39 = vand.u32 4294901760, %v4605_v33 }
 0x665   : > { %v14615_v37 = vand.u32 4294901760, %v4616_v2 }
 0x667   : > { %v14622_v55 = vsub.f32 %v4616_v2, %v14615_v37  ;;  %4618 = vmatpush.msra.mxu0 %v14615_v37  ;;  %10920 = vmatpush.msra.mxu2 %v14615_v37  ;;  %v14649_v2 = vsub.f32 %v4611_v15, %v14626_v34  ;;  %v14667_v15 = vand.u32 4294901760, %v4608_v8 }
 0x669   : > { %v18215_v54 = vand.u32 4294901760, %v14622_v55  ;;  %4620 = vmatpush.msra.mxu0 %v14600_v17  ;;  %10921 = vmatpush.msra.mxu2 %v14600_v17  ;;  %v14694_v56 = vsub.f32 %v4608_v8, %v14667_v15  ;;  %v4529_v13 = vpop.permute.xlu0 %4528  ;;  %v18797_v8 = vand.u32 4294901760, %v14649_v2 }
 0x66a   : > { %v4569_v36 = vpop.permute.xlu1 %4568 }
 0x66b   : > { %v4717_v23 = vsub.f32 %v14622_v55, %v18215_v54  ;;  %v4610_v26 = vmul.f32 %v4569_v36, %v18791_v30  ;;  %4622 = vmatpush.msra.mxu0 %v14604_v62  ;;  %10922 = vmatpush.msra.mxu2 %v14604_v62  ;;  %v4724_v54 = vand.u32 4294901760, %v4723_v3  ;;  %v4735_v30 = vsub.f32 %v14629_v52, %v18219_v12 }
 0x66c   : > { %v14708_v12 = vand.u32 4294901760, %v514_v25 }
 0x66d   : > { %v14656_v9 = vand.u32 4294901760, %v4610_v26  ;;  %4624 = vmatpush.msra.mxu0 %v14611_v53  ;;  %10923 = vmatpush.msra.mxu2 %v14611_v53  ;;  %v4718_v36 = vand.u32 4294901760, %v4717_v23  ;;  %v4534_v23 = vpop.permute.xlu2 %4533 }
 0x66e   : > { %v4603_v14 = vmul.f32 %v4534_v23, %v18795_v58  ;;  %v14711_v58 = vsub.f32 %v4606_v27, %v14685_v7 }
 0x66f   : > { %v14676_v41 = vsub.f32 %v4610_v26, %v14656_v9  ;;  %4626 = vmatpush.msra.mxu0 %v14613_v29  ;;  %10924 = vmatpush.msra.mxu2 %v14613_v29  ;;  %v18794_v26 = vand.u32 4294901760, %v14633_v20 }
 0x670   : > { %4719 = vmatpush.msra.mxu1 %v4718_v36  ;;  %v4730_v36 = vand.u32 4294901760, %v4729_v47  ;;  %v4747_v47 = vsub.f32 %v14649_v2, %v18797_v8  ;;  %v14724_v27 = vand.u32 4294901760, %v4603_v14 }
 0x671   : > { %4628 = vmatpush.msra.mxu0 %v14626_v34  ;;  %10925 = vmatpush.msra.mxu2 %v14626_v34  ;;  %v4741_v59 = vsub.f32 %v14633_v20, %v18794_v26 }
 0x672   : > { %4725 = vmatpush.msra.mxu1 %v4724_v54  ;;  %v4554_v3 = vpop.permute.xlu1 %4553  ;;  %v4736_v54 = vand.u32 4294901760, %v4735_v30  ;;  %v18799_v30 = vand.u32 4294901760, %v14676_v41  ;;  %v14754_v50 = vsub.f32 %v4603_v14, %v14724_v27  ;;  %v511_v14 = vld [vmem:[%s14665_s13 + $0x8] sm:$0xff] }
 0x673   : > { %v4607_v49 = vmul.f32 %v4554_v3, %v18796_v44  ;;  %4630 = vmatpush.msra.mxu0 %v14656_v9  ;;  %10926 = vmatpush.msra.mxu2 %v14656_v9  ;;  %v4742_v23 = vand.u32 4294901760, %v4741_v59  ;;  %v18798_v3 = vld [vmem:[#allocation68_spill] sm:$0xff] }
 0x674   : > { %4731 = vmatpush.msra.mxu1 %v4730_v36  ;;  %v4602_v26 = vmul.f32 %v4529_v13, %v18798_v3  ;;  %v4753_v36 = vsub.f32 %v14676_v41, %v18799_v30  ;;  %v18800_v13 = vand.u32 4294901760, %v14673_v21  ;;  %v4748_v3 = vand.u32 4294901760, %v4747_v47 }
 0x675   : > { %v14713_v44 = vand.u32 4294901760, %v4607_v49  ;;  %4632 = vmatpush.msra.mxu0 %v14640_v40  ;;  %10927 = vmatpush.msra.mxu2 %v14640_v40  ;;  %v14738_v30 = vsub.f32 %v514_v25, %v14708_v12  ;;  %v18802_v47 = vand.u32 4294901760, %v14694_v56  ;;  %v18812_v57 = vand.u32 4294901760, %v14754_v50 }
 0x676   : > { %4737 = vmatpush.msra.mxu1 %v4736_v54  ;;  %v4759_v59 = vsub.f32 %v14673_v21, %v18800_v13  ;;  %v14735_v54 = vsub.f32 %v4605_v33, %v14703_v39  ;;  %v14745_v6 = vand.u32 4294901760, %v4602_v26  ;;  %v4754_v13 = vand.u32 4294901760, %v4753_v36 }
 0x677   : > { %v14727_v22 = vsub.f32 %v4607_v49, %v14713_v44  ;;  %4634 = vmatpush.msra.mxu0 %v14667_v15  ;;  %10928 = vmatpush.msra.mxu2 %v14667_v15  ;;  %18801 = vst [vmem:[#allocation124_spill] sm:$0xff] %v14738_v30  ;;  %v4765_v25 = vsub.f32 %v14694_v56, %v18802_v47  ;;  %v18803_v49 = vld [vmem:[#allocation102_spill] sm:$0xff] }
 0x678   : > { %4743 = vmatpush.msra.mxu1 %v4742_v23  ;;  %v14751_v23 = vsub.f32 %v510_v48, %v14722_v31  ;;  %v4760_v8 = vand.u32 4294901760, %v4759_v59  ;;  %v14772_v59 = vsub.f32 %v4602_v26, %v14745_v6  ;;  %v14784_v26 = vand.u32 4294901760, %v511_v14 }
 0x679   : > { %4636 = vmatpush.msra.mxu0 %v14713_v44  ;;  %10929 = vmatpush.msra.mxu2 %v14713_v44  ;;  %v18804_v36 = vand.u32 4294901760, %v14727_v22 }
 0x67a   : > { %4749 = vmatpush.msra.mxu1 %v4748_v3  ;;  %v4539_v33 = vpop.permute.xlu1 %4538  ;;  %v14810_v46 = vsub.f32 %v511_v14, %v14784_v26 }
 0x67b   : > { %v4604_v63 = vmul.f32 %v4539_v33, %v18803_v49  ;;  %4638 = vmatpush.msra.mxu0 %v14685_v7  ;;  %10930 = vmatpush.msra.mxu2 %v14685_v7  ;;  %v4771_v3 = vsub.f32 %v14727_v22, %v18804_v36  ;;  %v4766_v49 = vand.u32 4294901760, %v4765_v25  ;;  %v18806_v33 = vand.u32 4294901760, %v14711_v58 }
 0x67c   : > { %4755 = vmatpush.msra.mxu1 %v4754_v13  ;;  %v18807_v25 = vand.u32 4294901760, %v14735_v54  ;;  %v18808_v36 = vand.u32 4294901760, %v14738_v30 }
 0x67d   : > { %v14767_v16 = vand.u32 4294901760, %v4604_v63  ;;  %4640 = vmatpush.msra.mxu0 %v14703_v39  ;;  %10931 = vmatpush.msra.mxu2 %v14703_v39  ;;  %v4777_v13 = vsub.f32 %v14711_v58, %v18806_v33 }
 0x67e   : > { %4761 = vmatpush.msra.mxu1 %v4760_v8  ;;  %v4772_v8 = vand.u32 4294901760, %v4771_v3  ;;  %v4783_v33 = vsub.f32 %v14735_v54, %v18807_v25  ;;  %v18810_v25 = vand.u32 4294901760, %v14751_v23 }
 0x67f   : > { %v14779_v48 = vsub.f32 %v4604_v63, %v14767_v16  ;;  %4642 = vmatpush.msra.mxu0 %v14767_v16  ;;  %10932 = vmatpush.msra.mxu2 %v14767_v16  ;;  %v4684_v63 = vsub.f32 %v14738_v30, %v18808_v36  ;;  %v516_v36 = vld [vmem:[%s14665_s13 + $0x30] sm:$0xff] }
 0x680   : > { %4767 = vmatpush.msra.mxu1 %v4766_v49  ;;  %v4778_v49 = vand.u32 4294901760, %v4777_v13  ;;  %v4652_v5 = vsub.f32 %v14751_v23, %v18810_v25  ;;  %v18811_v30 = vld [vmem:[#allocation96_spill] sm:$0xff]  ;;  %v4784_v13 = vand.u32 4294901760, %v4783_v33  ;;  %v4795_v25 = vsub.f32 %v14754_v50, %v18812_v57 }
 0x681   : > { %4644 = vmatpush.msra.mxu0 %v14724_v27  ;;  %10933 = vmatpush.msra.mxu2 %v14724_v27  ;;  %v18266_v47 = vand.u32 4294901760, %v14779_v48  ;;  %v4685_v28 = vand.u32 4294901760, %v4684_v63  ;;  %v14819_v43 = vand.u32 4294901760, %v516_v36  ;;  %v18270_v57 = vand.u32 4294901760, %v14810_v46 }
 0x682   : > { %4773 = vmatpush.msra.mxu1 %v4772_v8  ;;  %v4524_v3 = vpop.permute.xlu1 %4523 }
 0x683   : > { %v4601_v51 = vmul.f32 %v4524_v3, %v18811_v30  ;;  %4646 = vmatpush.msra.mxu0 %v14745_v6  ;;  %10934 = vmatpush.msra.mxu2 %v14745_v6  ;;  %v4789_v8 = vsub.f32 %v14779_v48, %v18266_v47  ;;  %v18267_v30 = vand.u32 4294901760, %v14793_v61  ;;  %v512_v3 = vld [vmem:[%s14665_s13 + $0x10] sm:$0xff]  ;;  %v18813_v47 = vand.u32 4294901760, %v14772_v59 }
 0x684   : > { %4779 = vmatpush.msra.mxu1 %v4778_v49  ;;  %v4653_v49 = vand.u32 4294901760, %v4652_v5  ;;  %v14830_v63 = vand.u32 4294901760, %v512_v3 }
 0x685   : > { %v14817_v42 = vand.u32 4294901760, %v4601_v51  ;;  %v4790_v10 = vand.u32 4294901760, %v4789_v8  ;;  %v4801_v14 = vsub.f32 %v14772_v59, %v18813_v47  ;;  %v4796_v8 = vand.u32 4294901760, %v4795_v25 }
 0x686   : > { %4785 = vmatpush.msra.mxu1 %v4784_v13  ;;  %v4692_v47 = vsub.f32 %v14793_v61, %v18267_v30  ;;  %v4660_v25 = vsub.f32 %v14810_v46, %v18270_v57  ;;  %v513_v61 = vld [vmem:[%s14665_s13 + $0x18] sm:$0xff] }
 0x687   : > { %v14825_v33 = vsub.f32 %v4601_v51, %v14817_v42  ;;  %4648 = vmatpush.msra.mxu0 %v14817_v42  ;;  %10935 = vmatpush.msra.mxu2 %v14817_v42  ;;  %v14839_v51 = vsub.f32 %v516_v36, %v14819_v43  ;;  %v4802_v13 = vand.u32 4294901760, %v4801_v14  ;;  %v14851_v36 = vsub.f32 %v512_v3, %v14830_v63 }
 0x688   : > { %4791 = vmatpush.msra.mxu1 %v4790_v10  ;;  %4686 = vmatmul.f32.vlgmr.msra.gmra.mxu2 %v4685_v28  ;;  %v517_v10 = vld [vmem:[%s14665_s13 + $0x38] sm:$0xff]  ;;  %v4661_v57 = vand.u32 4294901760, %v4660_v25  ;;  %v18814_v25 = vand.u32 4294901760, %v14622_v55 }
 0x689   : > { %4845 = vmatpush.msrb.mxu2 %v14622_v55  ;;  %4933 = vmatpush.msrb.mxu0 %v14615_v37  ;;  %v4806_v5 = vand.u32 4294901760, %v14825_v33  ;;  %v14856_v30 = vand.u32 4294901760, %v517_v10  ;;  %v4667_v3 = vand.u32 4294901760, %v14851_v36 }
 0x68a   : > { %4797 = vmatpush.msra.mxu1 %v4796_v8  ;;  %4654 = vmatmul.f32.vlgmr.msra.gmra.mxu0 %v4653_v49  ;;  %v4693_v8 = vand.u32 4294901760, %v4692_v47  ;;  %v18271_v49 = vand.u32 4294901760, %v14839_v51  ;;  %v14862_v47 = vand.u32 4294901760, %v513_v61 }
 0x68b   : > { %4848 = vmatpush.msrb.mxu2 %v14609_v24  ;;  %4935 = vmatpush.msrb.mxu0 %v14600_v17  ;;  %v4807_v28 = vsub.f32 %v14825_v33, %v4806_v5 }
 0x68c   : > { %4803 = vmatpush.msra.mxu1 %v4802_v13  ;;  %v4700_v13 = vsub.f32 %v14839_v51, %v18271_v49 }
 0x68d   : > { %4851 = vmatpush.msrb.mxu2 %v14618_v18  ;;  %4937 = vmatpush.msrb.mxu0 %v14604_v62  ;;  %v4808_v14 = vand.u32 4294901760, %v4807_v28  ;;  %v14870_v28 = vsub.f32 %v517_v10, %v14856_v30  ;;  %v14883_v10 = vsub.f32 %v513_v61, %v14862_v47 }
 0x68e   : > { %v4701_v49 = vand.u32 4294901760, %v4700_v13 }
 0x68f   : > { %4854 = vmatpush.msrb.mxu2 %v14629_v52  ;;  %4939 = vmatpush.msrb.mxu0 %v14611_v53  ;;  %v4707_v55 = vand.u32 4294901760, %v14870_v28  ;;  %v4675_v61 = vand.u32 4294901760, %v14883_v10 }
 0x690   : > { %4809 = vmatpush.msra.mxu1 %v4808_v14  ;;  %4694 = vmatmul.f32.gmra.mxu2 %v4693_v8  ;;  %v4668_v8 = vsub.f32 %v14851_v36, %v4667_v3  ;;  %v18815_v14 = vand.u32 4294901760, %v14609_v24  ;;  %v18817_v24 = vand.u32 4294901760, %v14629_v52 }
 0x691   : > { %4811 = vmatmul.f32.vlgmr.msra.gmra.mxu1 %v14722_v31  ;;  %4857 = vmatpush.msrb.mxu2 %v14633_v20  ;;  %v4708_v13 = vsub.f32 %v14870_v28, %v4707_v55  ;;  %v4676_v52 = vsub.f32 %v14883_v10, %v4675_v61 }
 0x692   : > { %4941 = vmatpush.msrb.mxu0 %v14613_v29  ;;  %5016 = vmatpush.msrb.mxu1 %v18814_v25  ;;  %v4669_v25 = vand.u32 4294901760, %v4668_v8 }
 0x693   : > { %4860 = vmatpush.msrb.mxu2 %v14649_v2  ;;  %4662 = vmatmul.f32.gmra.mxu0 %v4661_v57  ;;  %v18816_v57 = vand.u32 4294901760, %v14618_v18  ;;  %v18818_v18 = vand.u32 4294901760, %v14633_v20  ;;  %v4709_v8 = vand.u32 4294901760, %v4708_v13  ;;  %v18820_v20 = vand.u32 4294901760, %v14676_v41 }
 0x694   : > { %4943 = vmatpush.msrb.mxu0 %v14626_v34  ;;  %5020 = vmatpush.msrb.mxu1 %v18815_v14  ;;  %v4677_v14 = vand.u32 4294901760, %v4676_v52  ;;  %v18827_v52 = vand.u32 4294901760, %v14735_v54 }
 0x695   : > { %4863 = vmatpush.msrb.mxu2 %v14676_v41  ;;  %v18823_v41 = vand.u32 4294901760, %v14337_v11 }
 0x696   : > { %4945 = vmatpush.msrb.mxu0 %v14656_v9  ;;  %5024 = vmatpush.msrb.mxu1 %v18816_v57  ;;  %v18821_v57 = vand.u32 4294901760, %v14673_v21 }
 0x697   : > { %4866 = vmatpush.msrb.mxu2 %v14673_v21  ;;  %v18824_v21 = vand.u32 4294901760, %v14727_v22 }
 0x698   : > { %4947 = vmatpush.msrb.mxu0 %v14640_v40  ;;  %5028 = vmatpush.msrb.mxu1 %v18817_v24  ;;  %v18825_v24 = vand.u32 4294901760, %v14711_v58 }
 0x699   : > { %4702 = vmatmul.f32.gmra.mxu2 %v4701_v49  ;;  %4815 = vmatmul.f32.gmra.mxu1 %v14784_v26  ;;  %v18819_v49 = vand.u32 4294901760, %v14649_v2  ;;  %v18822_v2 = vand.u32 4294901760, %v14694_v56 }
 0x69a   : > { %4869 = vmatpush.msrb.mxu2 %v14694_v56  ;;  %4949 = vmatpush.msrb.mxu0 %v14667_v15  ;;  %v18826_v56 = vand.u32 4294901760, %v14346_v19 }
 0x69b   : > { %5032 = vmatpush.msrb.mxu1 %v18818_v18  ;;  %4670 = vmatmul.f32.gmra.mxu0 %v4669_v25  ;;  %v5283_v25 = vsub.f32 %v14337_v11, %v18823_v41 }
 0x69c   : > { %4872 = vmatpush.msrb.mxu2 %v14727_v22  ;;  %4951 = vmatpush.msrb.mxu0 %v14713_v44  ;;  %v5289_v13 = vsub.f32 %v14346_v19, %v18826_v56  ;;  %v18828_v22 = vand.u32 4294901760, %v14352_v32 }
 0x69d   : > { %5036 = vmatpush.msrb.mxu1 %v18819_v49  ;;  %v5284_v18 = vand.u32 4294901760, %v5283_v25  ;;  %v18833_v25 = vand.u32 4294901760, %v14772_v59 }
 0x69e   : > { %4875 = vmatpush.msrb.mxu2 %v14711_v58  ;;  %4953 = vmatpush.msrb.mxu0 %v14685_v7  ;;  %v5295_v49 = vsub.f32 %v14352_v32, %v18828_v22  ;;  %v5290_v58 = vand.u32 4294901760, %v5289_v13  ;;  %v18840_v13 = vld [vmem:[#allocation238_spill] sm:$0xff] }
 0x69f   : > { %5040 = vmatpush.msrb.mxu1 %v18820_v20 }
 0x6a0   : > { %4878 = vmatpush.msrb.mxu2 %v14735_v54  ;;  %4955 = vmatpush.msrb.mxu0 %v14703_v39  ;;  %v5296_v54 = vand.u32 4294901760, %v5295_v49 }
 0x6a1   : > { %5044 = vmatpush.msrb.mxu1 %v18821_v57  ;;  %4710 = vmatmul.f32.gmra.mxu2 %v4709_v8  ;;  %v18829_v8 = vand.u32 4294901760, %v14360_v35  ;;  %v18831_v57 = vand.u32 4294901760, %v14369_v1 }
 0x6a2   : > { %4819 = vmatmul.f32.gmra.mxu1 %v14830_v63  ;;  %4881 = vmatpush.msrb.mxu2 %v14779_v48 }
 0x6a3   : > { %4957 = vmatpush.msrb.mxu0 %v14767_v16  ;;  %5048 = vmatpush.msrb.mxu1 %v18822_v2  ;;  %v5301_v20 = vsub.f32 %v14360_v35, %v18829_v8  ;;  %v18832_v2 = vand.u32 4294901760, %v14754_v50 }
 0x6a4   : > { %4884 = vmatpush.msrb.mxu2 %v14754_v50  ;;  %4678 = vmatmul.f32.gmra.mxu0 %v4677_v14  ;;  %v18830_v14 = vand.u32 4294901760, %v14779_v48  ;;  %v18835_v50 = vand.u32 4294901760, %v14401_v38 }
 0x6a5   : > { %4959 = vmatpush.msrb.mxu0 %v14724_v27  ;;  %5052 = vmatpush.msrb.mxu1 %v18824_v21  ;;  %v5302_v41 = vand.u32 4294901760, %v5301_v20 }
 0x6a6   : > { %4887 = vmatpush.msrb.mxu2 %v14772_v59  ;;  %v18836_v59 = vand.u32 4294901760, %v14375_v0 }
 0x6a7   : > { %4961 = vmatpush.msrb.mxu0 %v14745_v6  ;;  %5056 = vmatpush.msrb.mxu1 %v18825_v24 }
 0x6a8   : > { %4890 = vmatpush.msrb.mxu2 %v14825_v33  ;;  %v5325_v24 = vsub.f32 %v14375_v0, %v18836_v59  ;;  %v18837_v33 = vand.u32 4294901760, %v14751_v23 }
 0x6a9   : > { %4963 = vmatpush.msrb.mxu0 %v14817_v42  ;;  %5060 = vmatpush.msrb.mxu1 %v18827_v52  ;;  %v18843_v52 = vld [vmem:[#allocation239_spill] sm:$0xff] }
 0x6aa   : > { %5111 = vmatpush.msra.mxu2 %v14615_v37  ;;  %4823 = vmatmul.f32.gmra.mxu1 %v14862_v47  ;;  %v5307_v37 = vsub.f32 %v14369_v1, %v18831_v57  ;;  %v5326_v56 = vand.u32 4294901760, %v5325_v24  ;;  %v18844_v22 = vand.u32 4294901760, %v18843_v52  ;;  %v18869_v24 = vld [vmem:[#allocation229_spill] sm:$0xff] }
 0x6ab   : > { %5285 = vmatpush.msra.mxu0 %v5284_v18  ;;  %4893 = vmatmul.f32.vlgmr.msrb.gmra.mxu2 %v14751_v23  ;;  %v18839_v23 = vand.u32 4294901760, %v14427_v60  ;;  %v18841_v18 = vand.u32 4294901760, %v18840_v13 }
 0x6ac   : > { %5064 = vmatpush.msrb.mxu1 %v18830_v14  ;;  %5113 = vmatpush.msra.mxu2 %v14600_v17  ;;  %v18834_v17 = vand.u32 4294901760, %v14390_v45  ;;  %v5308_v21 = vand.u32 4294901760, %v5307_v37  ;;  %v5349_v49 = vsub.f32 %v18843_v52, %v18844_v22  ;;  %v502_v37 = vld [vmem:[%s15024_s17] sm:$0xff] }
 0x6ad   : > { %5291 = vmatpush.msra.mxu0 %v5290_v58 }
 0x6ae   : > { %5068 = vmatpush.msrb.mxu1 %v18832_v2  ;;  %5115 = vmatpush.msra.mxu2 %v14604_v62  ;;  %v5313_v48 = vsub.f32 %v14390_v45, %v18834_v17  ;;  %v5319_v62 = vsub.f32 %v14401_v38, %v18835_v50  ;;  %v5350_v20 = vand.u32 4294901760, %v5349_v49  ;;  %v18860_v17 = vld [vmem:[#allocation221_spill] sm:$0xff]  ;;  %v18865_v50 = vld [vmem:[#allocation222_spill] sm:$0xff] }
 0x6af   : > { %5297 = vmatpush.msra.mxu0 %v5296_v54  ;;  %v18850_v54 = vld [vmem:[#allocation242_spill] sm:$0xff] }
 0x6b0   : > { %5072 = vmatpush.msrb.mxu1 %v18833_v25  ;;  %5117 = vmatpush.msra.mxu2 %v14611_v53  ;;  %v5314_v53 = vand.u32 4294901760, %v5313_v48  ;;  %v18851_v57 = vand.u32 4294901760, %v18850_v54  ;;  %v503_v25 = vld [vmem:[%s15024_s17 + $0x8] sm:$0xff] }
 0x6b1   : > { %5303 = vmatpush.msra.mxu0 %v5302_v41  ;;  %v15038_v41 = vand.u32 4294901760, %v502_v37 }
 0x6b2   : > { %5076 = vmatpush.msrb.mxu1 %v4806_v5  ;;  %5119 = vmatpush.msra.mxu2 %v14613_v29  ;;  %v5320_v29 = vand.u32 4294901760, %v5319_v62 }
 0x6b3   : > { %5309 = vmatpush.msra.mxu0 %v5308_v21  ;;  %4827 = vmatmul.f32.gmra.mxu1 %v14708_v12  ;;  %18854 = vst [vmem:[#allocation111_spill] sm:$0xff] %v15038_v41  ;;  %v15065_v21 = vand.u32 4294901760, %v503_v25 }
 0x6b4   : > { %5411 = vmatpush.msra.mxu1 %v14337_v11  ;;  %4898 = vmatmul.f32.gmra.mxu2 %v14810_v46  ;;  %v18838_v11 = vand.u32 4294901760, %v14415_v4 }
 0x6b5   : > { %4967 = vmatmul.f32.vlgmr.msrb.gmra.mxu0 %v18837_v33  ;;  %5121 = vmatpush.msra.mxu2 %v14626_v34  ;;  %v5337_v34 = vsub.f32 %v14427_v60, %v18839_v23  ;;  %18862 = vst [vmem:[#allocation100_spill] sm:$0xff] %v15065_v21  ;;  %v18873_v23 = vld [vmem:[#allocation230_spill] sm:$0xff] }
 0x6b6   : > { %5315 = vmatpush.msra.mxu0 %v5314_v53  ;;  %5414 = vmatpush.msra.mxu1 %v14346_v19  ;;  %v5331_v5 = vsub.f32 %v14415_v4, %v18838_v11  ;;  %v18867_v53 = vld [vmem:[#allocation142_spill] sm:$0xff]  ;;  %v18870_v11 = vld [vmem:[#allocation228_spill] sm:$0xff] }
 0x6b7   : > { %5123 = vmatpush.msra.mxu2 %v14656_v9  ;;  %v5343_v9 = vsub.f32 %v18840_v13, %v18841_v18  ;;  %v18877_v18 = vand.u32 4294901760, %v18867_v53 }
 0x6b8   : > { %5321 = vmatpush.msra.mxu0 %v5320_v29  ;;  %5417 = vmatpush.msra.mxu1 %v14352_v32  ;;  %v5332_v19 = vand.u32 4294901760, %v5331_v5  ;;  %v18842_v32 = vld [vmem:[#allocation119_spill] sm:$0xff]  ;;  %v504_v29 = vld [vmem:[%s15024_s17 + $0x10] sm:$0xff] }
 0x6b9   : > { %5125 = vmatpush.msra.mxu2 %v14640_v40  ;;  %v5338_v40 = vand.u32 4294901760, %v5337_v34 }
 0x6ba   : > { %5327 = vmatpush.msra.mxu0 %v5326_v56  ;;  %5420 = vmatpush.msra.mxu1 %v14360_v35  ;;  %v18845_v35 = vand.u32 4294901760, %v14810_v46  ;;  %v18848_v46 = vld [vmem:[#allocation241_spill] sm:$0xff]  ;;  %v15092_v56 = vand.u32 4294901760, %v504_v29 }
 0x6bb   : > { %5127 = vmatpush.msra.mxu2 %v14667_v15  ;;  %4831 = vmatmul.f32.gmra.mxu1 %v18842_v32  ;;  %v5344_v15 = vand.u32 4294901760, %v5343_v9  ;;  %v18849_v14 = vand.u32 4294901760, %v18848_v46 }
 0x6bc   : > { %5333 = vmatpush.msra.mxu0 %v5332_v19  ;;  %5423 = vmatpush.msra.mxu1 %v14369_v1  ;;  %v18846_v1 = vld [vmem:[#allocation240_spill] sm:$0xff]  ;;  %18872 = vst [vmem:[#allocation89_spill] sm:$0xff] %v15092_v56  ;;  %v15097_v34 = vsub.f32 %v504_v29, %v15092_v56  ;;  %v18875_v19 = vld [vmem:[#allocation231_spill] sm:$0xff] }
 0x6bd   : > { %4903 = vmatmul.f32.gmra.mxu2 %v14851_v36  ;;  %4973 = vmatmul.f32.gmra.mxu0 %v18845_v35  ;;  %v18847_v58 = vand.u32 4294901760, %v18846_v1  ;;  %v18881_v35 = vld [vmem:[#allocation232_spill] sm:$0xff] }
 0x6be   : > { %5129 = vmatpush.msra.mxu2 %v14713_v44  ;;  %5339 = vmatpush.msra.mxu0 %v5338_v40  ;;  %v5361_v44 = vsub.f32 %v18848_v46, %v18849_v14  ;;  %18874 = vst [vmem:[#allocation76_spill] sm:$0xff] %v15097_v34  ;;  %v18878_v40 = vld [vmem:[#allocation135_spill] sm:$0xff] }
 0x6bf   : > { %5426 = vmatpush.msra.mxu1 %v14390_v45  ;;  %v5355_v8 = vsub.f32 %v18846_v1, %v18847_v58  ;;  %v18887_v14 = vld [vmem:[#allocation235_spill] sm:$0xff] }
 0x6c0   : > { %5131 = vmatpush.msra.mxu2 %v14685_v7  ;;  %5345 = vmatpush.msra.mxu0 %v5344_v15  ;;  %v5367_v7 = vsub.f32 %v18850_v54, %v18851_v57  ;;  %v18890_v57 = vld [vmem:[#allocation236_spill] sm:$0xff] }
 0x6c1   : > { %5429 = vmatpush.msra.mxu1 %v14401_v38  ;;  %v5356_v45 = vand.u32 4294901760, %v5355_v8  ;;  %v18885_v8 = vld [vmem:[#allocation234_spill] sm:$0xff] }
 0x6c2   : > { %5133 = vmatpush.msra.mxu2 %v14703_v39  ;;  %5351 = vmatpush.msra.mxu0 %v5350_v20  ;;  %v5362_v39 = vand.u32 4294901760, %v5361_v44  ;;  %v18886_v20 = vand.u32 4294901760, %v14839_v51  ;;  %v506_v44 = vld [vmem:[%s15024_s17 + $0x20] sm:$0xff] }
 0x6c3   : > { %5432 = vmatpush.msra.mxu1 %v14375_v0  ;;  %v18852_v0 = vld [vmem:[#allocation243_spill] sm:$0xff] }
 0x6c4   : > { %5135 = vmatpush.msra.mxu2 %v14767_v16  ;;  %5357 = vmatpush.msra.mxu0 %v5356_v45  ;;  %v18853_v16 = vand.u32 4294901760, %v18852_v0 }
 0x6c5   : > { %5435 = vmatpush.msra.mxu1 %v14415_v4  ;;  %4908 = vmatmul.f32.gmra.mxu2 %v14883_v10  ;;  %v5368_v4 = vand.u32 4294901760, %v5367_v7  ;;  %v18863_v10 = vld [vmem:[#allocation219_spill] sm:$0xff]  ;;  %v18892_v7 = vld [vmem:[#allocation237_spill] sm:$0xff] }
 0x6c6   : > { %4835 = vmatmul.f32.gmra.mxu1 %v14819_v43  ;;  %v5373_v38 = vsub.f32 %v18852_v0, %v18853_v16  ;;  %4979 = vmatmul.f32.gmra.mxu0 %v4667_v3  ;;  %v507_v16 = vld [vmem:[%s15024_s17 + $0x28] sm:$0xff] }
 0x6c7   : > { %5137 = vmatpush.msra.mxu2 %v14724_v27  ;;  %5363 = vmatpush.msra.mxu0 %v5362_v39  ;;  %v15043_v27 = vsub.f32 %v502_v37, %v15038_v41 }
 0x6c8   : > { %5438 = vmatpush.msra.mxu1 %v14427_v60  ;;  %v5374_v2 = vand.u32 4294901760, %v5373_v38  ;;  %v18856_v60 = vld [vmem:[#allocation210_spill] sm:$0xff] }
 0x6c9   : > { %5139 = vmatpush.msra.mxu2 %v14745_v6  ;;  %5369 = vmatpush.msra.mxu0 %v5368_v4  ;;  %18855 = vst [vmem:[#allocation154_spill] sm:$0xff] %v15043_v27  ;;  %v18857_v6 = vld [vmem:[#allocation124_spill] sm:$0xff]  ;;  %v15050_v36 = vand.u32 4294901760, %v15043_v27  ;;  %v15165_v4 = vand.u32 4294901760, %v507_v16 }
 0x6ca   : > { %5441 = vmatpush.msra.mxu1 %v18840_v13  ;;  %v18868_v59 = vand.u32 4294901760, %v18857_v6  ;;  %v15103_v13 = vand.u32 4294901760, %v15097_v34 }
 0x6cb   : > { %5141 = vmatpush.msra.mxu2 %v14817_v42  ;;  %5375 = vmatpush.msra.mxu0 %v5374_v2  ;;  %18858 = vst [vmem:[#allocation87_spill] sm:$0xff] %v15050_v36  ;;  %v18859_v42 = vld [vmem:[#allocation213_spill] sm:$0xff]  ;;  %v5218_v3 = vsub.f32 %v15043_v27, %v15050_v36  ;;  %v15168_v37 = vsub.f32 %v507_v16, %v15165_v4 }
 0x6cc   : > { %5444 = vmatpush.msra.mxu1 %v18843_v52  ;;  %18876 = vst [vmem:[#allocation68_spill] sm:$0xff] %v15103_v13  ;;  %v5234_v9 = vsub.f32 %v15097_v34, %v15103_v13  ;;  %v505_v52 = vld [vmem:[%s15024_s17 + $0x18] sm:$0xff] }
 0x6cd   : > { %5499 = vmatpush.msrb.mxu2 %v18856_v60  ;;  %5677 = vmatpush.msrb.mxu0 %v18856_v60  ;;  %v15063_v48 = vand.u32 4294901760, %v5218_v3  ;;  %v15117_v49 = vand.u32 4294901760, %v505_v52  ;;  %18895 = vst [vmem:[#allocation210_spill] sm:$0xff] %v15165_v4  ;;  %v509_v3 = vld [vmem:[%s15024_s17 + $0x38] sm:$0xff] }
 0x6ce   : > { %5447 = vmatpush.msra.mxu1 %v18846_v1  ;;  %4913 = vmatmul.f32.gmra.mxu2 %v18857_v6  ;;  %v15115_v22 = vand.u32 4294901760, %v5234_v9  ;;  %v18883_v1 = vld [vmem:[#allocation233_spill] sm:$0xff]  ;;  %18896 = vst [vmem:[#allocation124_spill] sm:$0xff] %v15168_v37 }
 0x6cf   : > { %4839 = vmatmul.f32.gmra.mxu1 %v14856_v30  ;;  %4985 = vmatmul.f32.gmra.mxu0 %v4675_v61  ;;  %18861 = vst [vmem:[#allocation80_spill] sm:$0xff] %v15063_v48  ;;  %v15071_v61 = vsub.f32 %v503_v25, %v15065_v21  ;;  %v15122_v15 = vsub.f32 %v505_v52, %v15117_v49 }
 0x6d0   : > { %5501 = vmatpush.msrb.mxu2 %v18859_v42  ;;  %5679 = vmatpush.msrb.mxu0 %v18859_v42  ;;  %18879 = vst [vmem:[#allocation102_spill] sm:$0xff] %v15115_v22 }
 0x6d1   : > { %5450 = vmatpush.msra.mxu1 %v18848_v46  ;;  %18864 = vst [vmem:[#allocation83_spill] sm:$0xff] %v15071_v61  ;;  %5220 = vmatmul.f32.vlgmr.msrb.gmra.mxu3 %v15063_v48  ;;  %v15078_v62 = vand.u32 4294901760, %v15071_v61  ;;  %v15128_v58 = vand.u32 4294901760, %v15122_v15 }
 0x6d2   : > { %5503 = vmatpush.msrb.mxu2 %v18860_v17  ;;  %5681 = vmatpush.msrb.mxu0 %v18860_v17  ;;  %18880 = vst [vmem:[#allocation96_spill] sm:$0xff] %v15117_v49  ;;  %v15199_v17 = vand.u32 4294901760, %v509_v3 }
 0x6d3   : > { %5453 = vmatpush.msra.mxu1 %v18850_v54  ;;  %18866 = vst [vmem:[#allocation93_spill] sm:$0xff] %v15078_v62  ;;  %v5226_v33 = vsub.f32 %v15071_v61, %v15078_v62  ;;  %v5242_v46 = vsub.f32 %v15122_v15, %v15128_v58  ;;  %v15143_v54 = vand.u32 4294901760, %v506_v44 }
 0x6d4   : > { %5505 = vmatpush.msrb.mxu2 %v18863_v10  ;;  %5683 = vmatpush.msrb.mxu0 %v18863_v10  ;;  %18882 = vst [vmem:[#allocation238_spill] sm:$0xff] %v15122_v15  ;;  %v15202_v10 = vsub.f32 %v509_v3, %v15199_v17 }
 0x6d5   : > { %5456 = vmatpush.msra.mxu1 %v18852_v0  ;;  %v15090_v5 = vand.u32 4294901760, %v5226_v33  ;;  %18884 = vst [vmem:[#allocation119_spill] sm:$0xff] %v15128_v58  ;;  %v15141_v45 = vand.u32 4294901760, %v5242_v46 }
 0x6d6   : > { %5507 = vmatpush.msrb.mxu2 %v18865_v50  ;;  %5685 = vmatpush.msrb.mxu0 %v18865_v50  ;;  %18889 = vst [vmem:[#allocation240_spill] sm:$0xff] %v15143_v54  ;;  %v15206_v50 = vand.u32 4294901760, %v15202_v10 }
 0x6d7   : > { %4918 = vmatmul.f32.gmra.mxu2 %v18867_v53  ;;  %4991 = vmatmul.f32.gmra.mxu0 %v18868_v59  ;;  %18871 = vst [vmem:[#allocation72_spill] sm:$0xff] %v15090_v5 }
 0x6d8   : > { %5078 = vmatmul.f32.vlgmr.msrb.gmra.mxu1 %v14722_v31  ;;  %5509 = vmatpush.msrb.mxu2 %v18869_v24  ;;  %18888 = vst [vmem:[#allocation239_spill] sm:$0xff] %v15141_v45 }
 0x6d9   : > { %5687 = vmatpush.msrb.mxu0 %v18869_v24  ;;  %5228 = vmatmul.f32.gmra.mxu3 %v15090_v5  ;;  %18903 = vst [vmem:[#allocation228_spill] sm:$0xff] %v15199_v17 }
 0x6da   : > { %5511 = vmatpush.msrb.mxu2 %v18870_v11  ;;  %18904 = vst [vmem:[#allocation230_spill] sm:$0xff] %v15202_v10 }
 0x6db   : > { %5689 = vmatpush.msrb.mxu0 %v18870_v11  ;;  %18905 = vst [vmem:[#allocation231_spill] sm:$0xff] %v15206_v50 }
 0x6dc   : > { %5513 = vmatpush.msrb.mxu2 %v18873_v23 }
 0x6dd   : > { %5691 = vmatpush.msrb.mxu0 %v18873_v23 }
 0x6de   : > { %5515 = vmatpush.msrb.mxu2 %v18875_v19 }
 0x6df   : > { %5693 = vmatpush.msrb.mxu0 %v18875_v19  ;;  %4923 = vmatmul.f32.gmra.mxu2 %v14839_v51  ;;  %v15148_v51 = vsub.f32 %v506_v44, %v15143_v54 }
 0x6e0   : > { %4997 = vmatmul.f32.gmra.mxu0 %v18877_v18  ;;  %5082 = vmatmul.f32.gmra.mxu1 %v14784_v26 }
 0x6e1   : > { %5517 = vmatpush.msrb.mxu2 %v18878_v40  ;;  %5695 = vmatpush.msrb.mxu0 %v18878_v40  ;;  %18891 = vst [vmem:[#allocation241_spill] sm:$0xff] %v15148_v51  ;;  %v15154_v39 = vand.u32 4294901760, %v15148_v51 }
 0x6e2   : > { %5236 = vmatmul.f32.gmra.mxu3 %v15115_v22 }
 0x6e3   : > { %5519 = vmatpush.msrb.mxu2 %v18881_v35  ;;  %5697 = vmatpush.msrb.mxu0 %v18881_v35  ;;  %18893 = vst [vmem:[#allocation242_spill] sm:$0xff] %v15154_v39  ;;  %v5250_v0 = vsub.f32 %v15148_v51, %v15154_v39 }
 0x6e5   : > { %5521 = vmatpush.msrb.mxu2 %v18883_v1  ;;  %5699 = vmatpush.msrb.mxu0 %v18883_v1  ;;  %v15163_v38 = vand.u32 4294901760, %v5250_v0 }
 0x6e7   : > { %5523 = vmatpush.msrb.mxu2 %v18885_v8  ;;  %5701 = vmatpush.msrb.mxu0 %v18885_v8  ;;  %18894 = vst [vmem:[#allocation243_spill] sm:$0xff] %v15163_v38 }
 0x6e8   : > { %4928 = vmatmul.f32.gmra.mxu2 %v14870_v28  ;;  %5003 = vmatmul.f32.gmra.mxu0 %v18886_v20  ;;  %v15172_v28 = vand.u32 4294901760, %v15168_v37 }
 0x6e9   : > { %5086 = vmatmul.f32.gmra.mxu1 %v14830_v63  ;;  %5525 = vmatpush.msrb.mxu2 %v18887_v14 }
 0x6ea   : > { %5703 = vmatpush.msrb.mxu0 %v18887_v14  ;;  %5244 = vmatmul.f32.gmra.mxu3 %v15141_v45  ;;  %18897 = vst [vmem:[#allocation213_spill] sm:$0xff] %v15172_v28  ;;  %v18910_v45 = vld [vmem:[#allocation32_spill] sm:$0xff] }
 0x6eb   : > { %5527 = vmatpush.msrb.mxu2 %v18890_v57 }
 0x6ec   : > { %5705 = vmatpush.msrb.mxu0 %v18890_v57 }
 0x6ed   : > { %5529 = vmatpush.msrb.mxu2 %v18892_v7 }
 0x6ee   : > { %5707 = vmatpush.msrb.mxu0 %v18892_v7 }
 0x6f0   : > { %5009 = vmatmul.f32.gmra.mxu0 %v4707_v55  ;;  %5143 = vmatmul.f32.vlgmr.msra.gmra.mxu2 %v14722_v31  ;;  %v5258_v31 = vsub.f32 %v15168_v37, %v15172_v28  ;;  %v508_v55 = vld [vmem:[%s15024_s17 + $0x30] sm:$0xff] }
 0x6f1   : > { %5090 = vmatmul.f32.gmra.mxu1 %v14862_v47  ;;  %v15182_v60 = vand.u32 4294901760, %v508_v55 }
 0x6f2   : > { %5252 = vmatmul.f32.gmra.mxu3 %v15163_v38  ;;  %v15180_v2 = vand.u32 4294901760, %v5258_v31 }
 0x6f3   : > { %18899 = vst [vmem:[#allocation219_spill] sm:$0xff] %v15182_v60  ;;  %v15185_v6 = vsub.f32 %v508_v55, %v15182_v60 }
 0x6f4   : > { %18898 = vst [vmem:[#allocation221_spill] sm:$0xff] %v15180_v2 }
 0x6f5   : > { %18900 = vst [vmem:[#allocation222_spill] sm:$0xff] %v15185_v6  ;;  %v15189_v42 = vand.u32 4294901760, %v15185_v6 }
 0x6f7   : > { %18901 = vst [vmem:[#allocation142_spill] sm:$0xff] %v15189_v42 }
 0x6f8   : > { %5147 = vmatmul.f32.gmra.mxu2 %v14784_v26  ;;  %5377 = vmatmul.f32.vlgmr.msra.gmra.mxu0 %v15038_v41  ;;  %v5266_v26 = vsub.f32 %v15185_v6, %v15189_v42 }
 0x6f9   : > { %5094 = vmatmul.f32.gmra.mxu1 %v14708_v12 }
 0x6fa   : > { %5260 = vmatmul.f32.gmra.mxu3 %v15180_v2  ;;  %v15197_v25 = vand.u32 4294901760, %v5266_v26  ;;  %v10899_v26 = vld [vmem:[%s17897_s7 + $0x58] sm:$0xff]  ;;  %v10904_v2 = vld [vmem:[%s17897_s7 + $0xa0] sm:$0xff] }
 0x6fb   : > { %5826 = vmatpush.bf16.msra.mxu2 %v10899_v26 }
 0x6fc   : > { %18902 = vst [vmem:[#allocation229_spill] sm:$0xff] %v15197_v25 }
 0x700   : > { %5151 = vmatmul.f32.gmra.mxu2 %v14830_v63  ;;  %5381 = vmatmul.f32.gmra.mxu0 %v15065_v21  ;;  %v5274_v63 = vsub.f32 %v15202_v10, %v15206_v50 }
 0x701   : > { %5098 = vmatmul.f32.gmra.mxu1 %v18842_v32 }
 0x702   : > { %5268 = vmatmul.f32.gmra.mxu3 %v15197_v25  ;;  %v15213_v59 = vand.u32 4294901760, %v5274_v63 }
 0x704   : > { %18906 = vst [vmem:[#allocation135_spill] sm:$0xff] %v15213_v59 }
 0x707   : > { %v4655_v53 = vpop.f32.mrf.mxu0 }
 0x708   : > { %5155 = vmatmul.f32.gmra.mxu2 %v14862_v47  ;;  %5385 = vmatmul.f32.gmra.mxu0 %v15092_v56 }
 0x709   : > { %5102 = vmatmul.f32.gmra.mxu1 %v14819_v43 }
 0x70a   : > { %5276 = vmatmul.f32.gmra.mxu3 %v15213_v59 }
 0x70b   : > { %v4687_v24 = vpop.f32.mrf.mxu2 }
 0x70e   : > { %v4812_v33 = vpop.f32.mrf.mxu1 }
 0x70f   : > { %v4813_v40 = vadd.f32 %v4812_v33, %v4655_v53 }
 0x710   : > { %5159 = vmatmul.f32.gmra.mxu2 %v14708_v12  ;;  %5389 = vmatmul.f32.gmra.mxu0 %v15117_v49  ;;  %v15221_v29 = vpop.f32.mrf.mxu0 }
 0x711   : > { %5106 = vmatmul.f32.gmra.mxu1 %v14856_v30 }
 0x712   : > { %5644 = vmatmul.f32.vlgmr.msra.gmra.mxu3 %v15038_v41 }
 0x713   : > { %v15219_v47 = vpop.f32.mrf.mxu2 }
 0x716   : > { %v15223_v11 = vpop.f32.mrf.mxu1 }
 0x718   : > { %5163 = vmatmul.f32.gmra.mxu2 %v18842_v32  ;;  %5393 = vmatmul.f32.gmra.mxu0 %v15143_v54  ;;  %v4671_v12 = vpop.f32.mrf.mxu0 }
 0x719   : > { %5459 = vmatmul.f32.vlgmr.msra.gmra.mxu1 %v15043_v27 }
 0x71a   : > { %5648 = vmatmul.f32.gmra.mxu3 %v15065_v21 }
 0x71c   : > { %v4703_v23 = vpop.f32.mrf.mxu2 }
 0x71f   : > { %v4820_v19 = vpop.f32.mrf.mxu1 }
 0x720   : > { %5167 = vmatmul.f32.gmra.mxu2 %v14819_v43  ;;  %5397 = vmatmul.f32.gmra.mxu0 %v15165_v4  ;;  %v4821_v44 = vadd.f32 %v4820_v19, %v4671_v12 }
 0x721   : > { %5464 = vmatmul.f32.gmra.mxu1 %v15071_v61  ;;  %v15238_v32 = vpop.f32.mrf.mxu0 }
 0x722   : > { %5652 = vmatmul.f32.gmra.mxu3 %v15092_v56 }
 0x724   : > { %v15233_v18 = vpop.f32.mrf.mxu2 }
 0x727   : > { %v15240_v9 = vpop.f32.mrf.mxu1 }
 0x728   : > { %5171 = vmatmul.f32.gmra.mxu2 %v14856_v30  ;;  %5401 = vmatmul.f32.gmra.mxu0 %v15182_v60 }
 0x729   : > { %5469 = vmatmul.f32.gmra.mxu1 %v15097_v34 }
 0x72a   : > { %5656 = vmatmul.f32.gmra.mxu3 %v15117_v49 }
 0x72e   : > { %v4894_v43 = vpop.f32.mrf.mxu2 }
 0x72f   : > { %v4895_v52 = vadd.f32 %v4894_v43, %v4813_v40 }
 0x730   : > { %5405 = vmatmul.f32.gmra.mxu0 %v15199_v17  ;;  %5533 = vmatmul.f32.vlgmr.msrb.gmra.mxu2 %v15050_v36  ;;  %v4828_v30 = vpop.f32.mrf.mxu1 }
 0x731   : > { %5474 = vmatmul.f32.gmra.mxu1 %v15122_v15  ;;  %v4829_v35 = vadd.f32 %v4828_v30, %v4687_v24  ;;  %v10898_v24 = vld [vmem:[%s17897_s7 + $0x50] sm:$0xff] }
 0x732   : > { %v4968_v1 = vpop.f32.mrf.mxu0  ;;  %5660 = vmatmul.f32.gmra.mxu3 %v15143_v54  ;;  %5827 = vmatpush.bf16.msra.mxu2 %v10898_v24 }
 0x733   : > { %v4969_v8 = vadd.f32 %v4968_v1, %v4895_v52 }
 0x737   : > { %v15248_v20 = vpop.f32.mrf.mxu2 }
 0x738   : > { %5539 = vmatmul.f32.gmra.mxu2 %v15078_v62  ;;  %5709 = vmatmul.f32.vlgmr.msrb.gmra.mxu0 %v15038_v41  ;;  %v4832_v46 = vpop.f32.mrf.mxu1 }
 0x739   : > { %5479 = vmatmul.f32.gmra.mxu1 %v15148_v51  ;;  %v4833_v30 = vadd.f32 %v4832_v46, %v15219_v47 }
 0x73a   : > { %v15253_v14 = vpop.f32.mrf.mxu0  ;;  %5664 = vmatmul.f32.gmra.mxu3 %v15165_v4 }
 0x740   : > { %5545 = vmatmul.f32.gmra.mxu2 %v15103_v13  ;;  %5713 = vmatmul.f32.gmra.mxu0 %v15065_v21  ;;  %v4904_v57 = vpop.f32.mrf.mxu2 }
 0x741   : > { %5484 = vmatmul.f32.gmra.mxu1 %v15168_v37  ;;  %v4905_v7 = vadd.f32 %v4904_v57, %v4821_v44 }
 0x742   : > { %5668 = vmatmul.f32.gmra.mxu3 %v15182_v60 }
 0x743   : > { %v4836_v0 = vpop.f32.mrf.mxu1  ;;  %v4980_v31 = vpop.f32.mrf.mxu0 }
 0x744   : > { %v4837_v16 = vadd.f32 %v4836_v0, %v4703_v23  ;;  %v15259_v55 = vadd.f32 %v4980_v31, %v4905_v7 }
 0x748   : > { %5551 = vmatmul.f32.gmra.mxu2 %v15128_v58  ;;  %5717 = vmatmul.f32.gmra.mxu0 %v15092_v56  ;;  %v15268_v3 = vpop.f32.mrf.mxu2  ;;  %v10907_v58 = vld [vmem:[%s17897_s7 + $0xb8] sm:$0xff] }
 0x749   : > { %5489 = vmatmul.f32.gmra.mxu1 %v15185_v6 }
 0x74a   : > { %5672 = vmatmul.f32.gmra.mxu3 %v15199_v17 }
 0x74c   : > { %v15270_v63 = vpop.f32.mrf.mxu1  ;;  %v15272_v53 = vpop.f32.mrf.mxu0 }
 0x750   : > { %5557 = vmatmul.f32.gmra.mxu2 %v15154_v39  ;;  %5721 = vmatmul.f32.gmra.mxu0 %v15117_v49 }
 0x751   : > { %5494 = vmatmul.f32.gmra.mxu1 %v15202_v10  ;;  %v4914_v33 = vpop.f32.mrf.mxu2  ;;  %v18908_v10 = vld [vmem:[#allocation19_spill] sm:$0xff] }
 0x752   : > { %v4915_v23 = vadd.f32 %v4914_v33, %v4829_v35 }
 0x754   : > { %v4992_v12 = vpop.f32.mrf.mxu0  ;;  %v15287_v52 = vpop.f32.mrf.mxu3 }
 0x755   : > { %v15281_v19 = vadd.f32 %v4992_v12, %v4915_v23  ;;  %v5079_v40 = vpop.f32.mrf.mxu1  ;;  %v18907_v12 = vld [vmem:[#allocation13_spill] sm:$0xff] }
 0x756   : > { %v15283_v43 = vadd.f32 %v5079_v40, %v4969_v8 }
 0x758   : > { %5563 = vmatmul.f32.gmra.mxu2 %v15172_v28  ;;  %5725 = vmatmul.f32.gmra.mxu0 %v15143_v54  ;;  %v10903_v54 = vld [vmem:[%s17897_s7 + $0x78] sm:$0xff] }
 0x759   : > { %6058 = vmatpush.bf16.msrb.mxu3 %v10903_v54  ;;  %v10900_v54 = vld [vmem:[%s17897_s7 + $0x60] sm:$0xff] }
 0x75a   : > { %v4919_v1 = vpop.f32.mrf.mxu2 }
 0x75b   : > { %v4920_v44 = vadd.f32 %v4919_v1, %v4833_v30 }
 0x75c   : > { %v15294_v35 = vpop.f32.mrf.mxu3 }
 0x75d   : > { %v4998_v57 = vpop.f32.mrf.mxu0  ;;  %v15290_v7 = vpop.f32.mrf.mxu1 }
 0x760   : > { %5569 = vmatmul.f32.gmra.mxu2 %v15189_v42  ;;  %5729 = vmatmul.f32.gmra.mxu0 %v15165_v4  ;;  %v10905_v42 = vld [vmem:[%s17897_s7 + $0xa8] sm:$0xff]  ;;  %v18909_v4 = vld [vmem:[#allocation25_spill] sm:$0xff] }
 0x761   : > { %6138 = vmatpush.bf16.msra.mxu0 %v10905_v42  ;;  %v10901_v42 = vld [vmem:[%s17897_s7 + $0x68] sm:$0xff] }
 0x762   : > { %v4924_v8 = vpop.f32.mrf.mxu2  ;;  %5785 = vmatpush.bf16.msrb.mxu1 %v10901_v42  ;;  %v4999_v42 = vadd.f32 %v4998_v57, %v4920_v44 }
 0x763   : > { %v4925_v0 = vadd.f32 %v4924_v8, %v4837_v16 }
 0x765   : > { %v5004_v31 = vpop.f32.mrf.mxu0  ;;  %v15300_v47 = vpop.f32.mrf.mxu3  ;;  %6139 = vmatpush.bf16.msra.mxu0 %v10904_v2  ;;  %v4825_v2 = vadd.f32 %v15240_v9, %v15238_v32  ;;  %v4817_v32 = vadd.f32 %v15223_v11, %v15221_v29 }
 0x766   : > { %v5005_v26 = vadd.f32 %v5004_v31, %v4925_v0  ;;  %v15296_v24 = vpop.f32.mrf.mxu1  ;;  %5786 = vmatpush.bf16.msrb.mxu1 %v10900_v54 }
 0x767   : > { %v4910_v15 = vadd.f32 %v15268_v3, %v4825_v2  ;;  %v4900_v56 = vadd.f32 %v15248_v20, %v4817_v32 }
 0x768   : > { %5575 = vmatmul.f32.gmra.mxu2 %v15206_v50  ;;  %5733 = vmatmul.f32.gmra.mxu0 %v15182_v60 }
 0x769   : > { %v4987_v44 = vadd.f32 %v15272_v53, %v4910_v15  ;;  %v11364_v15 = vld [vmem:[%s11467_s21 + $0x30] sm:$0xff]  ;;  %v5088_v53 = vadd.f32 %v15296_v24, %v15259_v55  ;;  %v11367_v24 = vld [vmem:[%s11467_s21 + $0x18] sm:$0xff] }
 0x76a   : > { %6184 = vmatpush.bf16.msra.mxu1 %v10907_v58 }
 0x76b   : > { %v4929_v46 = vpop.f32.mrf.mxu2 }
 0x76d   : > { %v15302_v33 = vpop.f32.mrf.mxu0  ;;  %v15309_v40 = vpop.f32.mrf.mxu3 }
 0x76e   : > { %v5091_v23 = vpop.f32.mrf.mxu1 }
 0x770   : > { %10676 = vmatmul.msk.bf16.vlgmr.msra.gmra.mxu2 %vm18334_vm0, %v18907_v12  ;;  %5737 = vmatmul.f32.gmra.mxu0 %v15199_v17 }
 0x773   : > { %v15307_v16 = vpop.f32.mrf.mxu2 }
 0x775   : > { %v15311_v30 = vpop.f32.mrf.mxu0  ;;  %v15317_v31 = vpop.f32.mrf.mxu3 }
 0x776   : > { %v5095_v1 = vpop.f32.mrf.mxu1 }
 0x777   : > { %v5096_v11 = vadd.f32 %v5095_v1, %v15281_v19 }
 0x77b   : > { %v15313_v8 = vpop.f32.mrf.mxu2 }
 0x77d   : > { %v15315_v0 = vpop.f32.mrf.mxu0  ;;  %v15323_v17 = vpop.f32.mrf.mxu3 }
 0x77e   : > { %v5099_v59 = vpop.f32.mrf.mxu1 }
 0x77f   : > { %v5100_v3 = vadd.f32 %v5099_v59, %v4999_v42 }
 0x780   : > { %10677 = vmatmul.msk.bf16.gmra.mxu2 %vm18334_vm0, %v18908_v10 }
 0x783   : > { %v5152_v12 = vpop.f32.mrf.mxu2 }
 0x784   : > { %v5153_v42 = vadd.f32 %v5152_v12, %v5088_v53 }
 0x785   : > { %v15321_v50 = vpop.f32.mrf.mxu0  ;;  %v15332_v37 = vpop.f32.mrf.mxu3 }
 0x786   : > { %v5103_v6 = vpop.f32.mrf.mxu1 }
 0x787   : > { %v5104_v2 = vadd.f32 %v5103_v6, %v5005_v26  ;;  %v5092_v6 = vadd.f32 %v5091_v23, %v4987_v44  ;;  %v11365_v26 = vld [vmem:[%s11467_s21 + $0x28] sm:$0xff]  ;;  %v11366_v23 = vld [vmem:[%s11467_s21 + $0x20] sm:$0xff] }
 0x78b   : > { %v5156_v60 = vpop.f32.mrf.mxu2 }
 0x78d   : > { %v15325_v25 = vpop.f32.mrf.mxu0  ;;  %v15348_v39 = vpop.f32.mrf.mxu3 }
 0x78e   : > { %v5107_v51 = vpop.f32.mrf.mxu1 }
 0x790   : > { %10678 = vmatmul.msk.bf16.gmra.mxu2 %vm18334_vm0, %v18909_v4  ;;  %v10902_v4 = vld [vmem:[%s17897_s7 + $0x70] sm:$0xff] }
 0x791   : > { %6059 = vmatpush.bf16.msrb.mxu3 %v10902_v4  ;;  %v4841_v4 = vadd.f32 %v15270_v63, %v15233_v18  ;;  %v4975_v63 = vadd.f32 %v15253_v14, %v4900_v56 }
 0x793   : > { %v5160_v10 = vpop.f32.mrf.mxu2  ;;  %v4930_v29 = vadd.f32 %v4929_v46, %v4841_v4  ;;  %v5084_v1 = vadd.f32 %v15290_v7, %v4975_v63  ;;  %v5145_v7 = vadd.f32 %v15307_v16, %v15283_v43  ;;  %v11371_v16 = vld [vmem:[%s11467_s21] sm:$0xff] }
 0x794   : > { %v5161_v18 = vadd.f32 %v5160_v10, %v5096_v11 }
 0x795   : > { %v15337_v28 = vpop.f32.mrf.mxu0  ;;  %v15377_v59 = vpop.f32.mrf.mxu3  ;;  %v5011_v19 = vadd.f32 %v15302_v33, %v4930_v29  ;;  %v5149_v56 = vadd.f32 %v15313_v8, %v5084_v1  ;;  %v11370_v29 = vld [vmem:[%s11467_s21 + $0x8] sm:$0xff] }
 0x796   : > { %v15365_v9 = vpop.f32.mrf.mxu1  ;;  %v5179_v10 = vadd.f32 %v11366_v23, %v5161_v18  ;;  %v5175_v18 = vadd.f32 %v11371_v16, %v5145_v7 }
 0x797   : > { %v5108_v32 = vadd.f32 %v5107_v51, %v5011_v19  ;;  %v11368_v51 = vld [vmem:[%s11467_s21 + $0x10] sm:$0xff]  ;;  %v5176_v11 = vadd.f32 %v11370_v29, %v5149_v56 }
 0x798   : > { %v5177_v12 = vadd.f32 %v11368_v51, %v5153_v42  ;;  %v15398_v44 = vand.u32 4294901760, %v5179_v10 }
 0x799   : > { %v15423_v19 = vand.u32 4294901760, %v5176_v11 }
 0x79b   : > { %v5164_v38 = vpop.f32.mrf.mxu2 }
 0x79c   : > { %v5165_v58 = vadd.f32 %v5164_v38, %v5100_v3  ;;  %v5157_v38 = vadd.f32 %v5156_v60, %v5092_v6 }
 0x79d   : > { %v15352_v49 = vpop.f32.mrf.mxu0 }
 0x79e   : > { %v5180_v46 = vadd.f32 %v11365_v26, %v5165_v58  ;;  %v5465_v14 = vpop.f32.mrf.mxu1  ;;  %v5178_v33 = vadd.f32 %v11367_v24, %v5157_v38  ;;  %v5649_v58 = vpop.f32.mrf.mxu3  ;;  %v5379_v26 = vadd.f32 %v15311_v30, %v15287_v52 }
 0x7a0   : > { %10679 = vmatmul.msk.bf16.gmra.mxu2 %vm18334_vm0, %v18910_v45  ;;  %v10906_v45 = vld [vmem:[%s17897_s7 + $0xb0] sm:$0xff]  ;;  %v15391_v60 = vand.u32 4294901760, %v5180_v46  ;;  %v5461_v52 = vadd.f32 %v15365_v9, %v5379_v26 }
 0x7a1   : > { %6185 = vmatpush.bf16.msra.mxu1 %v10906_v45 }
 0x7a2   : > { %v15410_v43 = vsub.f32 %v5180_v46, %v15391_v60 }
 0x7a3   : > { %v5168_v57 = vpop.f32.mrf.mxu2 }
 0x7a4   : > { %v5169_v54 = vadd.f32 %v5168_v57, %v5104_v2  ;;  %v11369_v57 = vld [vmem:[%s11467_s21 + $0x38] sm:$0xff]  ;;  %v6382_v42 = vand.u32 4294901760, %v15410_v43 }
 0x7a5   : > { %v15375_v34 = vpop.f32.mrf.mxu0 }
 0x7a6   : > { %v5181_v20 = vadd.f32 %v11364_v15, %v5169_v54  ;;  %v15405_v54 = vand.u32 4294901760, %v5178_v33  ;;  %v15413_v15 = vand.u32 4294901760, %v5177_v12  ;;  %v15436_v23 = vpop.f32.mrf.mxu1  ;;  %v6383_v51 = vsub.f32 %v15410_v43, %v6382_v42 }
 0x7a8   : > { %v15387_v4 = vand.u32 4294901760, %v5181_v20  ;;  %v15431_v1 = vsub.f32 %v5178_v33, %v15405_v54  ;;  %v15439_v56 = vsub.f32 %v5177_v12, %v15413_v15  ;;  %v5383_v33 = vadd.f32 %v15315_v0, %v15294_v35 }
 0x7aa   : > { %v15402_v8 = vsub.f32 %v5181_v20, %v15387_v4  ;;  %v15420_v20 = vsub.f32 %v5179_v10, %v15398_v44  ;;  %v6394_v12 = vand.u32 4294901760, %v15431_v1  ;;  %v5466_v35 = vadd.f32 %v5465_v14, %v5383_v33 }
 0x7ab   : > { %v5172_v55 = vpop.f32.mrf.mxu2  ;;  %v6384_v14 = vand.u32 4294901760, %v6383_v51 }
 0x7ac   : > { %v5173_v3 = vadd.f32 %v5172_v55, %v5108_v32  ;;  %v6376_v53 = vand.u32 4294901760, %v15402_v8  ;;  %v15434_v32 = vand.u32 4294901760, %v5175_v18  ;;  %v6388_v24 = vand.u32 4294901760, %v15420_v20 }
 0x7ad   : > { %v15396_v2 = vpop.f32.mrf.mxu0  ;;  %v6395_v26 = vsub.f32 %v15431_v1, %v6394_v12 }
 0x7ae   : > { %v5182_v45 = vadd.f32 %v11369_v57, %v5173_v3  ;;  %v6377_v55 = vsub.f32 %v15402_v8, %v6376_v53  ;;  %v15452_v3 = vsub.f32 %v5176_v11, %v15423_v19  ;;  %v15461_v57 = vsub.f32 %v5175_v18, %v15434_v32 }
 0x7af   : > { %v6389_v29 = vsub.f32 %v15420_v20, %v6388_v24  ;;  %v6400_v11 = vand.u32 4294901760, %v15439_v56  ;;  %v6396_v51 = vand.u32 4294901760, %v6395_v26 }
 0x7b0   : > { %v15407_v6 = vand.u32 4294901760, %v5182_v45  ;;  %v6378_v0 = vand.u32 4294901760, %v6377_v55 }
 0x7b1   : > { %v6390_v55 = vand.u32 4294901760, %v6389_v29  ;;  %v6401_v33 = vsub.f32 %v15439_v56, %v6400_v11 }
 0x7b2   : > { %v15416_v63 = vsub.f32 %v5182_v45, %v15407_v6  ;;  %6216 = vmatpush.msrb.mxu2 %v15407_v6  ;;  %v15463_v45 = vpop.f32.mrf.mxu3 }
 0x7b3   : > { %v5534_v38 = vpop.f32.mrf.mxu2 }
 0x7b4   : > { %6218 = vmatpush.msrb.mxu2 %v15387_v4  ;;  %6491 = vmatpush.msrb.mxu0 %v15416_v63  ;;  %v6370_v46 = vand.u32 4294901760, %v15416_v63  ;;  %v5535_v7 = vadd.f32 %v5534_v38, %v5461_v52 }
 0x7b5   : > { %v5710_v10 = vpop.f32.mrf.mxu0 }
 0x7b6   : > { %6220 = vmatpush.msrb.mxu2 %v15391_v60  ;;  %6494 = vmatpush.msrb.mxu0 %v15402_v8  ;;  %v6371_v30 = vsub.f32 %v15416_v63, %v6370_v46  ;;  %v6406_v63 = vand.u32 4294901760, %v15452_v3  ;;  %v5646_v18 = vadd.f32 %v15377_v59, %v5535_v7  ;;  %v5475_v59 = vpop.f32.mrf.mxu1 }
 0x7b8   : > { %6222 = vmatpush.msrb.mxu2 %v15398_v44  ;;  %6497 = vmatpush.msrb.mxu0 %v15410_v43  ;;  %v6372_v9 = vand.u32 4294901760, %v6371_v30  ;;  %v5711_v7 = vadd.f32 %v5710_v10, %v5646_v18  ;;  %v5387_v18 = vadd.f32 %v15321_v50, %v15300_v47  ;;  %v5391_v50 = vadd.f32 %v15325_v25, %v15309_v40 }
 0x7ba   : > { %6224 = vmatpush.msrb.mxu2 %v15405_v54  ;;  %6373 = vmatpush.msra.mxu3 %v6372_v9  ;;  %v6412_v9 = vand.u32 4294901760, %v15461_v57  ;;  %v5476_v43 = vadd.f32 %v5475_v59, %v5391_v50 }
 0x7bb   : > { %6500 = vmatpush.msrb.mxu0 %v15420_v20  ;;  %v5540_v16 = vpop.f32.mrf.mxu2 }
 0x7bc   : > { %v5541_v38 = vadd.f32 %v5540_v16, %v5466_v35  ;;  %6226 = vmatpush.msrb.mxu2 %v15413_v15  ;;  %6379 = vmatpush.msra.mxu3 %v6378_v0  ;;  %v6402_v0 = vand.u32 4294901760, %v6401_v33  ;;  %v6413_v29 = vsub.f32 %v15461_v57, %v6412_v9  ;;  %v18911_v16 = vld [vmem:[#allocation38_spill] sm:$0xff] }
 0x7bd   : > { %6503 = vmatpush.msrb.mxu0 %v15431_v1  ;;  %v5714_v52 = vpop.f32.mrf.mxu0  ;;  %v6407_v1 = vsub.f32 %v15452_v3, %v6406_v63 }
 0x7be   : > { %v5650_v30 = vadd.f32 %v5649_v58, %v5541_v38  ;;  %6228 = vmatpush.msrb.mxu2 %v15423_v19  ;;  %6385 = vmatpush.msra.mxu3 %v6384_v14  ;;  %v6414_v38 = vand.u32 4294901760, %v6413_v29  ;;  %v5480_v8 = vpop.f32.mrf.mxu1 }
 0x7bf   : > { %6506 = vmatpush.msrb.mxu0 %v15439_v56  ;;  %v5657_v56 = vpop.f32.mrf.mxu3 }
 0x7c0   : > { %v5715_v35 = vadd.f32 %v5714_v52, %v5650_v30  ;;  %6230 = vmatpush.msrb.mxu2 %v15434_v32  ;;  %6391 = vmatpush.msra.mxu3 %v6390_v55  ;;  %v18913_v52 = vld [vmem:[#allocation44_spill] sm:$0xff] }
 0x7c1   : > { %6509 = vmatpush.msrb.mxu0 %v15452_v3  ;;  %6236 = vmatmul.f32.vlgmr.msrb.gmra.mxu2 %v18911_v16 }
 0x7c2   : > { %6726 = vmatpush.msra.mxu2 %v6370_v46  ;;  %v5746_v58 = vpack.c.bf16 %v5715_v35, %v5711_v7  ;;  %6397 = vmatpush.msra.mxu3 %v6396_v51  ;;  %v6408_v46 = vand.u32 4294901760, %v6407_v1  ;;  %v18914_v35 = vld [vmem:[#allocation47_spill] sm:$0xff] }
 0x7c3   : > { %6512 = vmatpush.msrb.mxu0 %v15461_v57  ;;  %v5546_v10 = vpop.f32.mrf.mxu2  ;;  %v5471_v57 = vadd.f32 %v15436_v23, %v5387_v18  ;;  %v18915_v18 = vld [vmem:[#allocation50_spill] sm:$0xff] }
 0x7c4   : > { %6730 = vmatpush.msra.mxu2 %v6376_v53  ;;  %10664 = vmatmul.msk.bf16.vlgmr.msrb.gmra.mxu1 %vm18334_vm0, %v5746_v58  ;;  %v18912_v53 = vld [vmem:[#allocation41_spill] sm:$0xff] }
 0x7c5   : > { %6403 = vmatpush.msra.mxu3 %v6402_v0  ;;  %6603 = vmatpush.msrb.mxu1 %v15407_v6  ;;  %v5718_v3 = vpop.f32.mrf.mxu0  ;;  %v5547_v47 = vadd.f32 %v5546_v10, %v5471_v57 }
 0x7c6   : > { %6734 = vmatpush.msra.mxu2 %v6382_v42 }
 0x7c7   : > { %6409 = vmatpush.msra.mxu3 %v6408_v46  ;;  %6605 = vmatpush.msrb.mxu1 %v15387_v4  ;;  %v5654_v23 = vadd.f32 %v15463_v45, %v5547_v47  ;;  %v5661_v40 = vpop.f32.mrf.mxu3 }
 0x7c8   : > { %6738 = vmatpush.msra.mxu2 %v6388_v24 }
 0x7c9   : > { %6415 = vmatpush.msra.mxu3 %v6414_v38  ;;  %6607 = vmatpush.msrb.mxu1 %v15391_v60  ;;  %v5407_v38 = vadd.f32 %v15396_v2, %v15348_v39  ;;  %v18919_v39 = vld [vmem:[#allocation62_spill] sm:$0xff] }
 0x7ca   : > { %6742 = vmatpush.msra.mxu2 %v6394_v12  ;;  %v5719_v12 = vadd.f32 %v5718_v3, %v5654_v23  ;;  %v18920_v2 = vld [vmem:[#allocation66_spill] sm:$0xff] }
 0x7cb   : > { %6244 = vmatmul.f32.gmra.mxu2 %v18912_v53  ;;  %6609 = vmatpush.msrb.mxu1 %v15398_v44  ;;  %v5552_v42 = vpop.f32.mrf.mxu2 }
 0x7cc   : > { %6746 = vmatpush.msra.mxu2 %v6400_v11  ;;  %v5553_v20 = vadd.f32 %v5552_v42, %v5476_v43  ;;  %v5485_v11 = vpop.f32.mrf.mxu1 }
 0x7cd   : > { %6611 = vmatpush.msrb.mxu1 %v15405_v54  ;;  %v5722_v25 = vpop.f32.mrf.mxu0 }
 0x7ce   : > { %6750 = vmatpush.msra.mxu2 %v6406_v63  ;;  %v5658_v24 = vadd.f32 %v5657_v56, %v5553_v20  ;;  %v5395_v63 = vadd.f32 %v15337_v28, %v15317_v31 }
 0x7cf   : > { %6613 = vmatpush.msrb.mxu1 %v15413_v15  ;;  %v5665_v33 = vpop.f32.mrf.mxu3 }
 0x7d0   : > { %6754 = vmatpush.msra.mxu2 %v6412_v9  ;;  %v5723_v14 = vadd.f32 %v5722_v25, %v5658_v24  ;;  %v5481_v55 = vadd.f32 %v5480_v8, %v5395_v63  ;;  %v5399_v9 = vadd.f32 %v15352_v49, %v15323_v17  ;;  %v5403_v49 = vadd.f32 %v15375_v34, %v15332_v37  ;;  %v18916_v8 = vld [vmem:[#allocation53_spill] sm:$0xff]  ;;  %v18917_v24 = vld [vmem:[#allocation56_spill] sm:$0xff] }
 0x7d1   : > { %6615 = vmatpush.msrb.mxu1 %v15423_v19 }
 0x7d2   : > { %v5747_v26 = vpack.c.bf16 %v5723_v14, %v5719_v12  ;;  %v5486_v7 = vadd.f32 %v5485_v11, %v5399_v9  ;;  %v18918_v12 = vld [vmem:[#allocation59_spill] sm:$0xff]  ;;  %v18921_v14 = vld [vmem:[#allocation70_spill] sm:$0xff]  ;;  %v18924_v11 = vld [vmem:[#allocation81_spill] sm:$0xff] }
 0x7d3   : > { %6252 = vmatmul.f32.gmra.mxu2 %v18913_v52  ;;  %6617 = vmatpush.msrb.mxu1 %v15434_v32  ;;  %v5558_v45 = vpop.f32.mrf.mxu2  ;;  %v18923_v52 = vld [vmem:[#allocation78_spill] sm:$0xff] }
 0x7d4   : > { %10665 = vmatmul.msk.bf16.gmra.mxu1 %vm18334_vm0, %v5747_v26  ;;  %v5559_v59 = vadd.f32 %v5558_v45, %v5481_v55  ;;  %v5490_v0 = vpop.f32.mrf.mxu1  ;;  %v18922_v26 = vld [vmem:[#allocation74_spill] sm:$0xff]  ;;  %v18925_v45 = vld [vmem:[#allocation84_spill] sm:$0xff] }
 0x7d5   : > { %v5726_v30 = vpop.f32.mrf.mxu0  ;;  %v5491_v3 = vadd.f32 %v5490_v0, %v5403_v49  ;;  %v18929_v49 = vld [vmem:[#allocation4_spill] sm:$0xff] }
 0x7d6   : > { %v5662_v1 = vadd.f32 %v5661_v40, %v5559_v59 }
 0x7d7   : > { %v5669_v31 = vpop.f32.mrf.mxu3 }
 0x7d8   : > { %v5727_v10 = vadd.f32 %v5726_v30, %v5662_v1  ;;  %v18926_v30 = vld [vmem:[#allocation88_spill] sm:$0xff] }
 0x7db   : > { %6260 = vmatmul.f32.gmra.mxu2 %v18914_v35  ;;  %v5564_v51 = vpop.f32.mrf.mxu2 }
 0x7dc   : > { %v5565_v58 = vadd.f32 %v5564_v51, %v5486_v7  ;;  %v5495_v57 = vpop.f32.mrf.mxu1  ;;  %v18927_v7 = vld [vmem:[#allocation2_spill] sm:$0xff] }
 0x7dd   : > { %v5730_v29 = vpop.f32.mrf.mxu0  ;;  %v5496_v47 = vadd.f32 %v5495_v57, %v5407_v38 }
 0x7de   : > { %v5666_v16 = vadd.f32 %v5665_v33, %v5565_v58  ;;  %v15536_v33 = vld [vmem:[%s17898_s8 + $0x4] ss:$0 sm:$0xff] }
 0x7df   : > { %v5673_v53 = vpop.f32.mrf.mxu3 }
 0x7e0   : > { %v5731_v28 = vadd.f32 %v5730_v29, %v5666_v16  ;;  %v18928_v29 = vld [vmem:[#allocation3_spill] sm:$0xff] }
 0x7e2   : > { %v5748_v56 = vpack.c.bf16 %v5731_v28, %v5727_v10 }
 0x7e3   : > { %6268 = vmatmul.f32.gmra.mxu2 %v18915_v18  ;;  %v5570_v46 = vpop.f32.mrf.mxu2 }
 0x7e4   : > { %10666 = vmatmul.msk.bf16.gmra.mxu1 %vm18334_vm0, %v5748_v56  ;;  %v5571_v50 = vadd.f32 %v5570_v46, %v5491_v3 }
 0x7e5   : > { %v5734_v17 = vpop.f32.mrf.mxu0 }
 0x7e6   : > { %v5670_v42 = vadd.f32 %v5669_v31, %v5571_v50 }
 0x7e8   : > { %v5735_v40 = vadd.f32 %v5734_v17, %v5670_v42  ;;  %v18930_v42 = vld [vmem:[#allocation5_spill] sm:$0xff] }
 0x7eb   : > { %6276 = vmatmul.f32.gmra.mxu2 %v18916_v8  ;;  %v5576_v43 = vpop.f32.mrf.mxu2 }
 0x7ec   : > { %v5577_v23 = vadd.f32 %v5576_v43, %v5496_v47 }
 0x7ed   : > { %v5738_v20 = vpop.f32.mrf.mxu0 }
 0x7ee   : > { %v5674_v25 = vadd.f32 %v5673_v53, %v5577_v23 }
 0x7f0   : > { %v5739_v34 = vadd.f32 %v5738_v20, %v5674_v25 }
 0x7f2   : > { %v5749_v37 = vpack.c.bf16 %v5739_v34, %v5735_v40 }
 0x7f3   : > { %6284 = vmatmul.f32.gmra.mxu2 %v18917_v24  ;;  %v5829_v63 = vpop.f32.mrf.mxu2 }
 0x7f4   : > { %10667 = vmatmul.msk.bf16.gmra.mxu1 %vm18334_vm0, %v5749_v37 }
 0x7fb   : > { %6292 = vmatmul.f32.gmra.mxu2 %v18918_v12  ;;  %v5831_v55 = vpop.f32.mrf.mxu2 }
 0x803   : > { %6300 = vmatmul.f32.gmra.mxu2 %v18919_v39  ;;  %v5834_v1 = vpop.f32.mrf.mxu2 }
 0x80b   : > { %6308 = vmatmul.f32.gmra.mxu2 %v18920_v2  ;;  %v5836_v56 = vpop.f32.mrf.mxu2 }
 0x813   : > { %6316 = vmatmul.f32.gmra.mxu2 %v18921_v14  ;;  %v5839_v23 = vpop.f32.mrf.mxu2 }
 0x81b   : > { %6324 = vmatmul.f32.gmra.mxu2 %v18922_v26 }
 0x823   : > { %6332 = vmatmul.f32.gmra.mxu2 %v18923_v52 }
 0x82b   : > { %6340 = vmatmul.f32.gmra.mxu2 %v18924_v11 }
 0x833   : > { %6348 = vmatmul.f32.gmra.mxu2 %v18925_v45  ;;  %v18931_v45 = vld [vmem:[#allocation6_spill] sm:$0xff] }
 0x83b   : > { %6356 = vmatmul.f32.gmra.mxu2 %v18926_v30 }
 0x841   : > { %v5788_v9 = vpop.f32.mrf.mxu1 }
 0x842   : > { %v5830_v59 = vadd.f32 %v5829_v63, %v5788_v9 }
 0x843   : > { %6756 = vmatmul.f32.vlgmr.msra.gmra.mxu2 %v18927_v7 }
 0x844   : > { %v15540_v35 = vadd.f32 %v15536_v33, %v5830_v59 }
 0x846   : > { %v10680_v51 = vmul.f32 -1.442695, %v15540_v35 }
 0x848   : > { %11153 = vpow2.f32 %v10680_v51 }
 0x849   : > { %v5790_v58 = vpop.f32.mrf.mxu1 }
 0x84a   : > { %v5832_v0 = vadd.f32 %v5831_v55, %v5790_v58 }
 0x84b   : > { %6760 = vmatmul.f32.gmra.mxu2 %v18928_v29 }
 0x84c   : > { %v15545_v16 = vadd.f32 %v15536_v33, %v5832_v0 }
 0x84e   : > { %v11154_v10 = vpop.eup %11153  ;;  %v10681_v28 = vmul.f32 -1.442695, %v15545_v16 }
 0x84f   : > { %v5883_v31 = vadd.f32 1.0, %v11154_v10 }
 0x850   : > { %11155 = vpow2.f32 %v10681_v28 }
 0x851   : > { %11157 = vrcp.f32 %v5883_v31  ;;  %v5793_v18 = vpop.f32.mrf.mxu1  ;;  %v5902_v2 = vand.u32 2147483648, %v5883_v31  ;;  %vm5896_vm15 = vweird.f32 %v5883_v31  ;;  %v5900_v26 = vand.u32 2147483647, %v5883_v31 }
 0x852   : > { %v5835_v46 = vadd.f32 %v5834_v1, %v5793_v18  ;;  %v5841_v1 = vpop.f32.mrf.mxu2 }
 0x853   : > { %6764 = vmatmul.f32.gmra.mxu2 %v18929_v49  ;;  %v5903_v58 = vor.u32 1.1754944e-38, %v5902_v2  ;;  %vm5901_vm3 = vcmp.eq.f32.partialorder %v5900_v26, 8.507059e+37 }
 0x854   : > { %v15550_v17 = vadd.f32 %v15536_v33, %v5835_v46 }
 0x856   : > { %v11156_v3 = vpop.eup %11155  ;;  %v10682_v57 = vmul.f32 -1.442695, %v15550_v17 }
 0x857   : > { %v11158_v38 = vpop.eup %11157  ;;  %v5884_v50 = vadd.f32 1.0, %v11156_v3 }
 0x858   : > { %v5892_v47 = vmul.f32 %v11158_v38, %v5883_v31  ;;  %11159 = vpow2.f32 %v10682_v57  ;;  %vm5897_vm14 = vweird.f32 %v11158_v38 }
 0x859   : > { %11161 = vrcp.f32 %v5884_v50  ;;  %v5795_v8 = vpop.f32.mrf.mxu1  ;;  %vm15562_vm1 = vmor %vm5896_vm15, %vm5897_vm14  ;;  %v5915_v30 = vand.u32 2147483647, %v5884_v50  ;;  %v5917_v55 = vand.u32 2147483648, %v5884_v50  ;;  %vm5911_vm4 = vweird.f32 %v5884_v50 }
 0x85a   : > { %v5893_v43 = vsub.f32 1.0, %v5892_v47  ;;  %v5837_v53 = vadd.f32 %v5836_v56, %v5795_v8  ;;  %v5844_v2 = vpop.f32.mrf.mxu2 }
 0x85b   : > { %6768 = vmatmul.f32.gmra.mxu2 %v18930_v42  ;;  %v5918_v18 = vor.u32 1.1754944e-38, %v5917_v55  ;;  %vm5916_vm6 = vcmp.eq.f32.partialorder %v5915_v30, 8.507059e+37  ;;  %v18935_v55 = vld [vmem:[#allocation8_spill] sm:$0xff] }
 0x85c   : > { %v5894_v20 = vmul.f32 %v11158_v38, %v5893_v43  ;;  %v15555_v25 = vadd.f32 %v15536_v33, %v5837_v53 }
 0x85e   : > { %v11160_v40 = vpop.eup %11159  ;;  %v10683_v34 = vmul.f32 -1.442695, %v15555_v25  ;;  %v5895_v12 = vadd.f32 %v11158_v38, %v5894_v20 }
 0x85f   : > { %v11162_v37 = vpop.eup %11161  ;;  %v15558_v24 = vadd.f32 1.0, %v11160_v40 }
 0x860   : > { %v5907_v39 = vmul.f32 %v11162_v37, %v5884_v50  ;;  %11163 = vpow2.f32 %v10683_v34  ;;  %v5899_v9 = vsel %vm15562_vm1, %v11158_v38, %v5895_v12  ;;  %vm5912_vm2 = vweird.f32 %v11162_v37 }
 0x861   : > { %11165 = vrcp.f32 %v15558_v24  ;;  %v5798_v14 = vpop.f32.mrf.mxu1  ;;  %v5904_v56 = vsel %vm5901_vm3, %v5903_v58, %v5899_v9  ;;  %vm5913_vm5 = vmor %vm5911_vm4, %vm5912_vm2  ;;  %v5932_v26 = vand.u32 2147483648, %v15558_v24  ;;  %vm5926_vm8 = vweird.f32 %v15558_v24 }
 0x862   : > { %v5908_v52 = vsub.f32 1.0, %v5907_v39  ;;  %v5840_v11 = vadd.f32 %v5839_v23, %v5798_v14  ;;  %v6011_v8 = vmul.f32 %v5904_v56, %v15540_v35  ;;  %v18934_v23 = vld [vmem:[#allocation7_spill] sm:$0xff] }
 0x863   : > { %6772 = vmatmul.f32.gmra.mxu2 %v18931_v45 }
 0x864   : > { %v5909_v59 = vmul.f32 %v11162_v37, %v5908_v52  ;;  %v15569_v51 = vadd.f32 %v15536_v33, %v5840_v11  ;;  %v5930_v11 = vand.u32 2147483647, %v15558_v24 }
 0x866   : > { %v11164_v0 = vpop.eup %11163  ;;  %v5910_v10 = vadd.f32 %v11162_v37, %v5909_v59  ;;  %v10684_v28 = vmul.f32 -1.442695, %v15569_v51  ;;  %vm5931_vm11 = vcmp.eq.f32.partialorder %v5930_v11, 8.507059e+37 }
 0x867   : > { %v11166_v31 = vpop.eup %11165  ;;  %v5886_v46 = vadd.f32 1.0, %v11164_v0 }
 0x868   : > { %v5914_v3 = vsel %vm5913_vm5, %v11162_v37, %v5910_v10  ;;  %v5922_v57 = vmul.f32 %v11166_v31, %v15558_v24  ;;  %11167 = vpow2.f32 %v10684_v28  ;;  %vm5927_vm7 = vweird.f32 %v11166_v31 }
 0x869   : > { %v5919_v38 = vsel %vm5916_vm6, %v5918_v18, %v5914_v3  ;;  %11169 = vrcp.f32 %v5886_v46  ;;  %v5800_v47 = vpop.f32.mrf.mxu1  ;;  %vm15590_vm9 = vmor %vm5926_vm8, %vm5927_vm7  ;;  %v5945_v9 = vand.u32 2147483647, %v5886_v46  ;;  %v5947_v59 = vand.u32 2147483648, %v5886_v46 }
 0x86a   : > { %v6012_v43 = vmul.f32 %v5919_v38, %v15545_v16  ;;  %v5923_v50 = vsub.f32 1.0, %v5922_v57  ;;  %v5842_v53 = vadd.f32 %v5841_v1, %v5800_v47  ;;  %v5933_v24 = vor.u32 1.1754944e-38, %v5932_v26  ;;  %v5846_v38 = vpop.f32.mrf.mxu2 }
 0x86b   : > { %6776 = vmatmul.f32.gmra.mxu2 %v18934_v23  ;;  %vm5941_vm12 = vweird.f32 %v5886_v46  ;;  %vm5946_vm14 = vcmp.eq.f32.partialorder %v5945_v9, 8.507059e+37 }
 0x86c   : > { %v6019_v20 = vpack.c.bf16 %v6012_v43, %v6011_v8  ;;  %v5924_v40 = vmul.f32 %v11166_v31, %v5923_v50  ;;  %v15577_v34 = vadd.f32 %v15536_v33, %v5842_v53  ;;  %v18938_v53 = vld [vmem:[#allocation9_spill] sm:$0xff] }
 0x86e   : > { %v11168_v37 = vpop.eup %11167  ;;  %v10685_v12 = vmul.f32 -1.442695, %v15577_v34  ;;  %10700 = vmatmul.msk.bf16.vlgmr.msrb.gmra.mxu3 %vm18334_vm0, %v6019_v20  ;;  %v5925_v35 = vadd.f32 %v11166_v31, %v5924_v40 }
 0x86f   : > { %v11170_v39 = vpop.eup %11169  ;;  %v15581_v14 = vadd.f32 1.0, %v11168_v37  ;;  %6829 = vmatpush.msrb.mxu3 %v15407_v6 }
 0x870   : > { %v5937_v16 = vmul.f32 %v11170_v39, %v5886_v46  ;;  %11171 = vpow2.f32 %v10685_v12  ;;  %vm5942_vm10 = vweird.f32 %v11170_v39 }
 0x871   : > { %11173 = vrcp.f32 %v15581_v14  ;;  %6831 = vmatpush.msrb.mxu3 %v15387_v4  ;;  %v5803_v52 = vpop.f32.mrf.mxu1  ;;  %v5929_v4 = vsel %vm15590_vm9, %v11166_v31, %v5925_v35  ;;  %vm5943_vm13 = vmor %vm5941_vm12, %vm5942_vm10  ;;  %vm5956_vm1 = vweird.f32 %v15581_v14 }
 0x872   : > { %v5938_v63 = vsub.f32 1.0, %v5937_v16  ;;  %v5845_v30 = vadd.f32 %v5844_v2, %v5803_v52  ;;  %v5934_v18 = vsel %vm5931_vm11, %v5933_v24, %v5929_v4 }
 0x873   : > { %6780 = vmatmul.f32.gmra.mxu2 %v18935_v55  ;;  %6833 = vmatpush.msrb.mxu3 %v15391_v60  ;;  %v5948_v60 = vor.u32 1.1754944e-38, %v5947_v59  ;;  %v6013_v47 = vmul.f32 %v5934_v18, %v15550_v17 }
 0x874   : > { %v5939_v1 = vmul.f32 %v11170_v39, %v5938_v63  ;;  %v15598_v58 = vadd.f32 %v15536_v33, %v5845_v30 }
 0x875   : > { %6835 = vmatpush.msrb.mxu3 %v15398_v44 }
 0x876   : > { %v11172_v0 = vpop.eup %11171  ;;  %v5940_v10 = vadd.f32 %v11170_v39, %v5939_v1  ;;  %v10686_v28 = vmul.f32 -1.442695, %v15598_v58 }
 0x877   : > { %v11174_v56 = vpop.eup %11173  ;;  %v5888_v3 = vadd.f32 1.0, %v11172_v0  ;;  %6837 = vmatpush.msrb.mxu3 %v15405_v54 }
 0x878   : > { %v5944_v31 = vsel %vm5943_vm13, %v11170_v39, %v5940_v10  ;;  %v5952_v57 = vmul.f32 %v11174_v56, %v15581_v14  ;;  %11175 = vpow2.f32 %v10686_v28  ;;  %vm5957_vm15 = vweird.f32 %v11174_v56 }
 0x879   : > { %v5949_v44 = vsel %vm5946_vm14, %v5948_v60, %v5944_v31  ;;  %11177 = vrcp.f32 %v5888_v3  ;;  %6839 = vmatpush.msrb.mxu3 %v15413_v15  ;;  %v5805_v46 = vpop.f32.mrf.mxu1  ;;  %vm5958_vm2 = vmor %vm5956_vm1, %vm5957_vm15  ;;  %v5975_v26 = vand.u32 2147483647, %v5888_v3  ;;  %vm5971_vm5 = vweird.f32 %v5888_v3 }
 0x87a   : > { %v6014_v8 = vmul.f32 %v5949_v44, %v15555_v25  ;;  %v5953_v43 = vsub.f32 1.0, %v5952_v57  ;;  %v5847_v50 = vadd.f32 %v5846_v38, %v5805_v46 }
 0x87b   : > { %6784 = vmatmul.f32.gmra.mxu2 %v18938_v53  ;;  %6841 = vmatpush.msrb.mxu3 %v15423_v19  ;;  %v5962_v19 = vand.u32 2147483648, %v15581_v14  ;;  %vm5976_vm7 = vcmp.eq.f32.partialorder %v5975_v26, 8.507059e+37 }
 0x87c   : > { %v5954_v54 = vmul.f32 %v11174_v56, %v5953_v43  ;;  %v15610_v20 = vadd.f32 %v15536_v33, %v5847_v50  ;;  %v6020_v40 = vpack.c.bf16 %v6014_v8, %v6013_v47  ;;  %v5960_v33 = vand.u32 2147483647, %v15581_v14 }
 0x87d   : > { %6843 = vmatpush.msrb.mxu3 %v15434_v32  ;;  %v5977_v32 = vand.u32 2147483648, %v5888_v3  ;;  %v5963_v52 = vor.u32 1.1754944e-38, %v5962_v19  ;;  %v10955_v19 = vld [vmem:[%s17898_s8 + $0x5] ss:$0 sm:$0xff] }
 0x87e   : > { %v11176_v37 = vpop.eup %11175  ;;  %v10687_v15 = vmul.f32 -1.442695, %v15610_v20  ;;  %10701 = vmatmul.msk.bf16.gmra.mxu3 %vm18334_vm0, %v6020_v40  ;;  %v5955_v12 = vadd.f32 %v11174_v56, %v5954_v54  ;;  %vm5961_vm4 = vcmp.eq.f32.partialorder %v5960_v33, 8.507059e+37 }
 0x87f   : > { %v11178_v17 = vpop.eup %11177  ;;  %v5889_v25 = vadd.f32 1.0, %v11176_v37  ;;  %v5978_v9 = vor.u32 1.1754944e-38, %v5977_v32 }
 0x880   : > { %v5967_v39 = vmul.f32 %v11178_v17, %v5888_v3  ;;  %11179 = vpow2.f32 %v10687_v15  ;;  %v5959_v35 = vsel %vm5958_vm2, %v11174_v56, %v5955_v12  ;;  %vm5972_vm3 = vweird.f32 %v11178_v17  ;;  %v18941_v12 = vld [vmem:[#allocation11_spill] sm:$0xff] }
 0x881   : > { %11181 = vrcp.f32 %v5889_v25  ;;  %v5964_v6 = vsel %vm5961_vm4, %v5963_v52, %v5959_v35  ;;  %vm5973_vm6 = vmor %vm5971_vm5, %vm5972_vm3  ;;  %v5992_v31 = vand.u32 2147483648, %v5889_v25  ;;  %vm5986_vm9 = vweird.f32 %v5889_v25  ;;  %v18946_v52 = vld [vmem:[#allocation16_spill] sm:$0xff] }
 0x882   : > { %v5968_v2 = vsub.f32 1.0, %v5967_v39  ;;  %v6015_v24 = vmul.f32 %v5964_v6, %v15569_v51  ;;  %v5990_v57 = vand.u32 2147483647, %v5889_v25 }
 0x884   : > { %v5969_v16 = vmul.f32 %v11178_v17, %v5968_v2  ;;  %vm5991_vm12 = vcmp.eq.f32.partialorder %v5990_v57, 8.507059e+37  ;;  %v18942_v2 = vld [vmem:[#allocation12_spill] sm:$0xff] }
 0x886   : > { %v11180_v11 = vpop.eup %11179  ;;  %v5970_v63 = vadd.f32 %v11178_v17, %v5969_v16 }
 0x887   : > { %v11182_v30 = vpop.eup %11181  ;;  %v5890_v59 = vadd.f32 1.0, %v11180_v11 }
 0x888   : > { %v5974_v4 = vsel %vm5973_vm6, %v11178_v17, %v5970_v63  ;;  %v5982_v14 = vmul.f32 %v11182_v30, %v5889_v25  ;;  %vm5987_vm8 = vweird.f32 %v11182_v30  ;;  %v18940_v25 = vld [vmem:[#allocation14_spill] sm:$0xff]  ;;  %v18947_v63 = vld [vmem:[#allocation21_spill] sm:$0xff] }
 0x889   : > { %v5979_v1 = vsel %vm5976_vm7, %v5978_v9, %v5974_v4  ;;  %11183 = vrcp.f32 %v5890_v59  ;;  %vm5988_vm10 = vmor %vm5986_vm9, %vm5987_vm8  ;;  %v6007_v44 = vand.u32 2147483648, %v5890_v59  ;;  %v6005_v51 = vand.u32 2147483647, %v5890_v59 }
 0x88a   : > { %v6016_v0 = vmul.f32 %v5979_v1, %v15577_v34  ;;  %v5983_v10 = vsub.f32 1.0, %v5982_v14  ;;  %v5993_v34 = vor.u32 1.1754944e-38, %v5992_v31  ;;  %vm6001_vm13 = vweird.f32 %v5890_v59 }
 0x88b   : > { %v6008_v50 = vor.u32 1.1754944e-38, %v6007_v44  ;;  %vm6006_vm15 = vcmp.eq.f32.partialorder %v6005_v51, 8.507059e+37 }
 0x88c   : > { %v5984_v28 = vmul.f32 %v11182_v30, %v5983_v10  ;;  %v6021_v56 = vpack.c.bf16 %v6016_v0, %v6015_v24  ;;  %v18953_v0 = vld [vmem:[#allocation22_spill] sm:$0xff] }
 0x88e   : > { %10702 = vmatmul.msk.bf16.gmra.mxu3 %vm18334_vm0, %v6021_v56  ;;  %v5985_v60 = vadd.f32 %v11182_v30, %v5984_v28  ;;  %v18954_v28 = vld [vmem:[#allocation27_spill] sm:$0xff] }
 0x88f   : > { %v11184_v18 = vpop.eup %11183  ;;  %v18955_v56 = vld [vmem:[#allocation23_spill] sm:$0xff] }
 0x890   : > { %v5997_v3 = vmul.f32 %v11184_v18, %v5890_v59  ;;  %v5989_v46 = vsel %vm5988_vm10, %v11182_v30, %v5985_v60  ;;  %vm6002_vm11 = vweird.f32 %v11184_v18  ;;  %v18948_v30 = vld [vmem:[#allocation17_spill] sm:$0xff]  ;;  %v18949_v59 = vld [vmem:[#allocation18_spill] sm:$0xff] }
 0x891   : > { %v5994_v43 = vsel %vm5991_vm12, %v5993_v34, %v5989_v46  ;;  %vm6003_vm14 = vmor %vm6001_vm13, %vm6002_vm11  ;;  %v18960_v46 = vld [vmem:[#allocation29_spill] sm:$0xff]  ;;  %v18961_v34 = vld [vmem:[#allocation35_spill] sm:$0xff] }
 0x892   : > { %v5998_v38 = vsub.f32 1.0, %v5997_v3  ;;  %v6017_v37 = vmul.f32 %v5994_v43, %v15598_v58  ;;  %v18939_v58 = vld [vmem:[#allocation10_spill] sm:$0xff]  ;;  %v18956_v3 = vld [vmem:[#allocation24_spill] sm:$0xff] }
 0x894   : > { %v5999_v47 = vmul.f32 %v11184_v18, %v5998_v38 }
 0x896   : > { %v6000_v8 = vadd.f32 %v11184_v18, %v5999_v47  ;;  %v6237_v47 = vpop.f32.mrf.mxu2  ;;  %6788 = vmatmul.f32.gmra.mxu2 %v18939_v58 }
 0x898   : > { %v6004_v54 = vsel %vm6003_vm14, %v11184_v18, %v6000_v8  ;;  %v18962_v8 = vld [vmem:[#allocation30_spill] sm:$0xff] }
 0x899   : > { %v6009_v40 = vsel %vm6006_vm15, %v6008_v50, %v6004_v54 }
 0x89a   : > { %v6018_v15 = vmul.f32 %v6009_v40, %v15610_v20  ;;  %v18963_v40 = vld [vmem:[#allocation31_spill] sm:$0xff] }
 0x89c   : > { %v6022_v17 = vpack.c.bf16 %v6018_v15, %v6017_v37 }
 0x89e   : > { %10703 = vmatmul.msk.bf16.gmra.mxu3 %vm18334_vm0, %v6022_v17  ;;  %v6245_v50 = vpop.f32.mrf.mxu2  ;;  %6792 = vmatmul.f32.gmra.mxu2 %v18940_v25 }
 0x8ae   : > { %6417 = vmatmul.f32.vlgmr.msra.gmra.mxu3 %v18927_v7 }
 0x8b6   : > { %6421 = vmatmul.f32.gmra.mxu3 %v18928_v29 }
 0x8be   : > { %6425 = vmatmul.f32.gmra.mxu3 %v18929_v49 }
 0x8c6   : > { %6429 = vmatmul.f32.gmra.mxu3 %v18930_v42 }
 0x8ce   : > { %6433 = vmatmul.f32.gmra.mxu3 %v18931_v45 }
 0x8d6   : > { %6437 = vmatmul.f32.gmra.mxu3 %v18934_v23 }
 0x8de   : > { %6441 = vmatmul.f32.gmra.mxu3 %v18935_v55 }
 0x8e6   : > { %6445 = vmatmul.f32.gmra.mxu3 %v18938_v53 }
 0x8ee   : > { %6449 = vmatmul.f32.gmra.mxu3 %v18939_v58 }
 0x8f1   : > { %v6061_v20 = vpop.f32.mrf.mxu3 }
 0x8f2   : > { %v6081_v39 = vadd.f32 %v6061_v20, %v18941_v12  ;;  %v6253_v12 = vpop.f32.mrf.mxu2  ;;  %6796 = vmatmul.f32.gmra.mxu2 %v18946_v52 }
 0x8f4   : > { %v15639_v35 = vadd.f32 %v10955_v19, %v6081_v39 }
 0x8f6   : > { %6453 = vmatmul.f32.gmra.mxu3 %v18940_v25  ;;  %18943 = vst [vmem:[#allocation232_spill] sm:$0xff] %v15639_v35 }
 0x8f9   : > { %v6063_v33 = vpop.f32.mrf.mxu3 }
 0x8fa   : > { %v6082_v32 = vadd.f32 %v6063_v33, %v18942_v2 }
 0x8fc   : > { %v15641_v16 = vadd.f32 %v10955_v19, %v6082_v32 }
 0x8fe   : > { %18944 = vst [vmem:[#allocation233_spill] sm:$0xff] %v15641_v16  ;;  %v15645_v26 = vpack.c.bf16 %v15641_v16, %v15639_v35  ;;  %6457 = vmatmul.f32.gmra.mxu3 %v18946_v52 }
 0x900   : > { %18945 = vst [vmem:[#allocation234_spill] sm:$0xff] %v15645_v26  ;;  %10716 = vmatmul.msk.bf16.vlgmr.msra.gmra.mxu0 %vm18334_vm0, %v15645_v26  ;;  %10732 = vmatmul.msk.bf16.vlgmr.msra.gmra.mxu1 %vm18334_vm0, %v15645_v26  ;;  %v19006_v26 = vld [vmem:[#allocation77_spill] sm:$0xff] }
 0x901   : > { %v6066_v11 = vpop.f32.mrf.mxu3 }
 0x902   : > { %v6083_v6 = vadd.f32 %v6066_v11, %v18948_v30  ;;  %v18968_v11 = vld [vmem:[#allocation36_spill] sm:$0xff] }
 0x904   : > { %v15655_v14 = vadd.f32 %v10955_v19, %v6083_v6 }
 0x906   : > { %6461 = vmatmul.f32.gmra.mxu3 %v18947_v63  ;;  %18950 = vst [vmem:[#allocation235_spill] sm:$0xff] %v15655_v14 }
 0x909   : > { %v6068_v9 = vpop.f32.mrf.mxu3 }
 0x90a   : > { %v6084_v4 = vadd.f32 %v6068_v9, %v18949_v59  ;;  %v18970_v59 = vld [vmem:[#allocation39_spill] sm:$0xff] }
 0x90c   : > { %v15657_v1 = vadd.f32 %v10955_v19, %v6084_v4 }
 0x90e   : > { %18951 = vst [vmem:[#allocation236_spill] sm:$0xff] %v15657_v1  ;;  %v15661_v24 = vpack.c.bf16 %v15657_v1, %v15655_v14  ;;  %6465 = vmatmul.f32.gmra.mxu3 %v18953_v0 }
 0x910   : > { %18952 = vst [vmem:[#allocation237_spill] sm:$0xff] %v15661_v24  ;;  %10717 = vmatmul.msk.bf16.gmra.mxu0 %vm18334_vm0, %v15661_v24  ;;  %10733 = vmatmul.msk.bf16.gmra.mxu1 %vm18334_vm0, %v15661_v24 }
 0x911   : > { %v6071_v10 = vpop.f32.mrf.mxu3 }
 0x912   : > { %v6085_v18 = vadd.f32 %v6071_v10, %v18955_v56  ;;  %v18971_v56 = vld [vmem:[#allocation34_spill] sm:$0xff] }
 0x914   : > { %v15671_v57 = vadd.f32 %v10955_v19, %v6085_v18  ;;  %v18972_v18 = vld [vmem:[#allocation42_spill] sm:$0xff] }
 0x916   : > { %6469 = vmatmul.f32.gmra.mxu3 %v18954_v28  ;;  %18957 = vst [vmem:[#allocation13_spill] sm:$0xff] %v15671_v57 }
 0x919   : > { %v6073_v60 = vpop.f32.mrf.mxu3 }
 0x91a   : > { %v6086_v31 = vadd.f32 %v6073_v60, %v18956_v3 }
 0x91c   : > { %v15673_v38 = vadd.f32 %v10955_v19, %v6086_v31  ;;  %v18973_v31 = vld [vmem:[#allocation37_spill] sm:$0xff] }
 0x91e   : > { %18958 = vst [vmem:[#allocation19_spill] sm:$0xff] %v15673_v38  ;;  %v15677_v44 = vpack.c.bf16 %v15673_v38, %v15671_v57  ;;  %6473 = vmatmul.f32.gmra.mxu3 %v18960_v46  ;;  %v19005_v38 = vld [vmem:[#allocation82_spill] sm:$0xff] }
 0x920   : > { %18959 = vst [vmem:[#allocation25_spill] sm:$0xff] %v15677_v44  ;;  %10718 = vmatmul.msk.bf16.gmra.mxu0 %vm18334_vm0, %v15677_v44  ;;  %10734 = vmatmul.msk.bf16.gmra.mxu1 %vm18334_vm0, %v15677_v44 }
 0x921   : > { %v6076_v51 = vpop.f32.mrf.mxu3 }
 0x922   : > { %v6087_v43 = vadd.f32 %v6076_v51, %v18962_v8 }
 0x924   : > { %v15689_v15 = vadd.f32 %v10955_v19, %v6087_v43  ;;  %v18975_v43 = vld [vmem:[#allocation40_spill] sm:$0xff] }
 0x926   : > { %6477 = vmatmul.f32.gmra.mxu3 %v18961_v34  ;;  %18964 = vst [vmem:[#allocation32_spill] sm:$0xff] %v15689_v15 }
 0x929   : > { %v6078_v54 = vpop.f32.mrf.mxu3 }
 0x92a   : > { %v6088_v37 = vadd.f32 %v6078_v54, %v18963_v40 }
 0x92c   : > { %v15691_v17 = vadd.f32 %v10955_v19, %v6088_v37  ;;  %v6261_v19 = vpop.f32.mrf.mxu2  ;;  %6800 = vmatmul.f32.gmra.mxu2 %v18947_v63  ;;  %v18977_v37 = vld [vmem:[#allocation43_spill] sm:$0xff] }
 0x92e   : > { %18965 = vst [vmem:[#allocation38_spill] sm:$0xff] %v15691_v17  ;;  %v15695_v20 = vpack.c.bf16 %v15691_v17, %v15689_v15  ;;  %6845 = vmatmul.f32.vlgmr.msrb.gmra.mxu3 %v18927_v7  ;;  %v18967_v7 = vld [vmem:[#allocation26_spill] sm:$0xff] }
 0x930   : > { %18966 = vst [vmem:[#allocation41_spill] sm:$0xff] %v15695_v20  ;;  %10719 = vmatmul.msk.bf16.gmra.mxu0 %vm18334_vm0, %v15695_v20  ;;  %10735 = vmatmul.msk.bf16.gmra.mxu1 %vm18334_vm0, %v15695_v20 }
 0x931   : > { %v6418_v39 = vpop.f32.mrf.mxu3 }
 0x932   : > { %v15703_v33 = vadd.f32 %v6418_v39, %v6237_v47  ;;  %v18974_v47 = vld [vmem:[#allocation45_spill] sm:$0xff] }
 0x934   : > { %v6269_v30 = vpop.f32.mrf.mxu2  ;;  %6804 = vmatmul.f32.gmra.mxu2 %v18953_v0 }
 0x936   : > { %6849 = vmatmul.f32.gmra.mxu3 %v18928_v29  ;;  %v18969_v29 = vld [vmem:[#allocation28_spill] sm:$0xff] }
 0x939   : > { %v6422_v2 = vpop.f32.mrf.mxu3 }
 0x93a   : > { %v15707_v32 = vadd.f32 %v6422_v2, %v6245_v50  ;;  %v18976_v50 = vld [vmem:[#allocation48_spill] sm:$0xff] }
 0x93c   : > { %v6277_v4 = vpop.f32.mrf.mxu2  ;;  %6808 = vmatmul.f32.gmra.mxu2 %v18954_v28 }
 0x93e   : > { %6853 = vmatmul.f32.gmra.mxu3 %v18929_v49 }
 0x940   : > { %6515 = vmatmul.f32.vlgmr.msrb.gmra.mxu0 %v18967_v7  ;;  %6621 = vmatmul.f32.vlgmr.msrb.gmra.mxu1 %v18968_v11  ;;  %v18980_v7 = vld [vmem:[#allocation54_spill] sm:$0xff] }
 0x941   : > { %v6426_v6 = vpop.f32.mrf.mxu3 }
 0x942   : > { %v15713_v9 = vadd.f32 %v6426_v6, %v6253_v12  ;;  %v18978_v12 = vld [vmem:[#allocation51_spill] sm:$0xff]  ;;  %v18982_v6 = vld [vmem:[#allocation57_spill] sm:$0xff] }
 0x944   : > { %v6285_v60 = vpop.f32.mrf.mxu2  ;;  %6812 = vmatmul.f32.gmra.mxu2 %v18960_v46 }
 0x946   : > { %6857 = vmatmul.f32.gmra.mxu3 %v18930_v42 }
 0x948   : > { %6520 = vmatmul.f32.gmra.mxu0 %v18969_v29  ;;  %6627 = vmatmul.f32.gmra.mxu1 %v18970_v59 }
 0x949   : > { %v6430_v10 = vpop.f32.mrf.mxu3 }
 0x94a   : > { %v15719_v49 = vadd.f32 %v6430_v10, %v6261_v19  ;;  %v18983_v10 = vld [vmem:[#allocation52_spill] sm:$0xff] }
 0x94c   : > { %v6293_v51 = vpop.f32.mrf.mxu2  ;;  %6816 = vmatmul.f32.gmra.mxu2 %v18961_v34 }
 0x94e   : > { %6861 = vmatmul.f32.gmra.mxu3 %v18931_v45 }
 0x950   : > { %6525 = vmatmul.f32.gmra.mxu0 %v18971_v56  ;;  %6633 = vmatmul.f32.gmra.mxu1 %v18972_v18  ;;  %v18984_v56 = vld [vmem:[#allocation60_spill] sm:$0xff] }
 0x951   : > { %v6434_v3 = vpop.f32.mrf.mxu3 }
 0x952   : > { %v15725_v42 = vadd.f32 %v6434_v3, %v6269_v30 }
 0x954   : > { %v15736_v54 = vpop.f32.mrf.mxu2 }
 0x956   : > { %6865 = vmatmul.f32.gmra.mxu3 %v18934_v23 }
 0x958   : > { %6530 = vmatmul.f32.gmra.mxu0 %v18973_v31  ;;  %6639 = vmatmul.f32.gmra.mxu1 %v18974_v47  ;;  %v18986_v31 = vld [vmem:[#allocation55_spill] sm:$0xff] }
 0x959   : > { %v6438_v8 = vpop.f32.mrf.mxu3  ;;  %v18987_v47 = vld [vmem:[#allocation63_spill] sm:$0xff] }
 0x95a   : > { %v15731_v45 = vadd.f32 %v6438_v8, %v6277_v4 }
 0x95c   : > { %v15743_v39 = vpop.f32.mrf.mxu2 }
 0x95e   : > { %6869 = vmatmul.f32.gmra.mxu3 %v18935_v55  ;;  %v18979_v55 = vld [vmem:[#allocation46_spill] sm:$0xff] }
 0x960   : > { %6535 = vmatmul.f32.gmra.mxu0 %v18975_v43  ;;  %6645 = vmatmul.f32.gmra.mxu1 %v18976_v50  ;;  %v18990_v50 = vld [vmem:[#allocation58_spill] sm:$0xff] }
 0x961   : > { %v6442_v40 = vpop.f32.mrf.mxu3 }
 0x962   : > { %v15738_v23 = vadd.f32 %v6442_v40, %v6285_v60  ;;  %v18991_v40 = vld [vmem:[#allocation67_spill] sm:$0xff] }
 0x964   : > { %v15750_v11 = vpop.f32.mrf.mxu2 }
 0x966   : > { %6873 = vmatmul.f32.gmra.mxu3 %v18938_v53  ;;  %v18981_v53 = vld [vmem:[#allocation49_spill] sm:$0xff] }
 0x968   : > { %6540 = vmatmul.f32.gmra.mxu0 %v18977_v37  ;;  %6651 = vmatmul.f32.gmra.mxu1 %v18978_v12 }
 0x969   : > { %v6446_v19 = vpop.f32.mrf.mxu3 }
 0x96a   : > { %v15745_v2 = vadd.f32 %v6446_v19, %v6293_v51 }
 0x96c   : > { %v15757_v29 = vpop.f32.mrf.mxu2 }
 0x96e   : > { %6877 = vmatmul.f32.gmra.mxu3 %v18939_v58 }
 0x970   : > { %6545 = vmatmul.f32.gmra.mxu0 %v18979_v55  ;;  %6657 = vmatmul.f32.gmra.mxu1 %v18980_v7  ;;  %v18994_v55 = vld [vmem:[#allocation61_spill] sm:$0xff]  ;;  %v18995_v7 = vld [vmem:[#allocation71_spill] sm:$0xff] }
 0x971   : > { %v15752_v30 = vpop.f32.mrf.mxu3 }
 0x974   : > { %v15768_v18 = vpop.f32.mrf.mxu2 }
 0x975   : > { %18985 = vst [vmem:[#allocation44_spill] sm:$0xff] %v15768_v18 }
 0x976   : > { %6881 = vmatmul.f32.gmra.mxu3 %v18940_v25 }
 0x978   : > { %6550 = vmatmul.f32.gmra.mxu0 %v18981_v53  ;;  %6663 = vmatmul.f32.gmra.mxu1 %v18982_v6 }
 0x979   : > { %v15759_v59 = vpop.f32.mrf.mxu3 }
 0x97d   : > { %v15761_v4 = vpop.f32.mrf.mxu0  ;;  %v15763_v58 = vpop.f32.mrf.mxu1 }
 0x97e   : > { %6885 = vmatmul.f32.gmra.mxu3 %v18946_v52  ;;  %v15781_v52 = vpop.f32.mrf.mxu2 }
 0x97f   : > { %18989 = vst [vmem:[#allocation50_spill] sm:$0xff] %v15781_v52 }
 0x980   : > { %6555 = vmatmul.f32.gmra.mxu0 %v18983_v10  ;;  %6669 = vmatmul.f32.gmra.mxu1 %v18984_v56  ;;  %v18998_v56 = vld [vmem:[#allocation65_spill] sm:$0xff] }
 0x981   : > { %v15770_v25 = vpop.f32.mrf.mxu3 }
 0x985   : > { %v15772_v60 = vpop.f32.mrf.mxu0  ;;  %v15774_v3 = vpop.f32.mrf.mxu1 }
 0x986   : > { %6889 = vmatmul.f32.gmra.mxu3 %v18947_v63  ;;  %v15792_v63 = vpop.f32.mrf.mxu2 }
 0x987   : > { %18993 = vst [vmem:[#allocation56_spill] sm:$0xff] %v15792_v63 }
 0x988   : > { %6560 = vmatmul.f32.gmra.mxu0 %v18986_v31  ;;  %6675 = vmatmul.f32.gmra.mxu1 %v18987_v47  ;;  %v18999_v31 = vld [vmem:[#allocation75_spill] sm:$0xff] }
 0x989   : > { %v15779_v51 = vpop.f32.mrf.mxu3 }
 0x98a   : > { %18988 = vst [vmem:[#allocation47_spill] sm:$0xff] %v15779_v51 }
 0x98d   : > { %v15783_v8 = vpop.f32.mrf.mxu0  ;;  %v15785_v43 = vpop.f32.mrf.mxu1 }
 0x98e   : > { %6893 = vmatmul.f32.gmra.mxu3 %v18953_v0  ;;  %v15804_v10 = vpop.f32.mrf.mxu2 }
 0x98f   : > { %18997 = vst [vmem:[#allocation62_spill] sm:$0xff] %v15804_v10 }
 0x990   : > { %6565 = vmatmul.f32.gmra.mxu0 %v18990_v50  ;;  %6681 = vmatmul.f32.gmra.mxu1 %v18991_v40  ;;  %v19001_v40 = vld [vmem:[#allocation69_spill] sm:$0xff] }
 0x991   : > { %v15790_v37 = vpop.f32.mrf.mxu3 }
 0x992   : > { %18992 = vst [vmem:[#allocation53_spill] sm:$0xff] %v15790_v37 }
 0x995   : > { %v15794_v12 = vpop.f32.mrf.mxu0  ;;  %v6194_v19 = vpop.f32.mrf.mxu1 }
 0x996   : > { %6897 = vmatmul.f32.gmra.mxu3 %v18954_v28 }
 0x998   : > { %6570 = vmatmul.f32.gmra.mxu0 %v18994_v55  ;;  %6687 = vmatmul.f32.gmra.mxu1 %v18995_v7  ;;  %v19002_v55 = vld [vmem:[#allocation79_spill] sm:$0xff]  ;;  %v15815_v7 = vpop.f32.mrf.mxu2 }
 0x999   : > { %v15799_v53 = vpop.f32.mrf.mxu3 }
 0x99a   : > { %18996 = vst [vmem:[#allocation59_spill] sm:$0xff] %v15799_v53 }
 0x99d   : > { %v15801_v0 = vpop.f32.mrf.mxu0  ;;  %v6197_v6 = vpop.f32.mrf.mxu1 }
 0x99e   : > { %6901 = vmatmul.f32.gmra.mxu3 %v18960_v46 }
 0x9a0   : > { %6575 = vmatmul.f32.gmra.mxu0 %v18998_v56  ;;  %6693 = vmatmul.f32.gmra.mxu1 %v18999_v31  ;;  %v19004_v31 = vld [vmem:[#allocation73_spill] sm:$0xff] }
 0x9a1   : > { %v15808_v47 = vpop.f32.mrf.mxu3 }
 0x9a2   : > { %19000 = vst [vmem:[#allocation66_spill] sm:$0xff] %v15808_v47  ;;  %v15905_v47 = vand.u32 4294901760, %v15801_v0 }
 0x9a5   : > { %v15810_v28 = vpop.f32.mrf.mxu0  ;;  %v6199_v50 = vpop.f32.mrf.mxu1 }
 0x9a6   : > { %6905 = vmatmul.f32.gmra.mxu3 %v18961_v34  ;;  %v15823_v57 = vand.u32 4294901760, %v6199_v50  ;;  %v15827_v34 = vpop.f32.mrf.mxu2  ;;  %v15887_v5 = vand.u32 4294901760, %v15810_v28 }
 0x9a8   : > { %6580 = vmatmul.f32.gmra.mxu0 %v19001_v40  ;;  %6699 = vmatmul.f32.gmra.mxu1 %v19002_v55  ;;  %v15829_v40 = vand.u32 4294901760, %v6197_v6  ;;  %v15835_v14 = vsub.f32 %v6199_v50, %v15823_v57  ;;  %v19007_v50 = vld [vmem:[#allocation85_spill] sm:$0xff]  ;;  %v15922_v63 = vsub.f32 %v15810_v28, %v15887_v5  ;;  %v15935_v28 = vand.u32 4294901760, %v15794_v12 }
 0x9a9   : > { %v15817_v46 = vpop.f32.mrf.mxu3 }
 0x9aa   : > { %19003 = vst [vmem:[#allocation70_spill] sm:$0xff] %v15817_v46  ;;  %v15844_v44 = vsub.f32 %v6197_v6, %v15829_v40  ;;  %v15971_v18 = vsub.f32 %v15794_v12, %v15935_v28 }
 0x9ad   : > { %v6156_v17 = vpop.f32.mrf.mxu0  ;;  %v6202_v15 = vpop.f32.mrf.mxu1 }
 0x9ae   : > { %v15819_v56 = vand.u32 4294901760, %v6202_v15  ;;  %v15857_v21 = vand.u32 4294901760, %v6156_v17  ;;  %v15881_v62 = vpop.f32.mrf.mxu2 }
 0x9b0   : > { %6585 = vmatmul.f32.gmra.mxu0 %v19004_v31  ;;  %6705 = vmatmul.f32.gmra.mxu1 %v19005_v38  ;;  %v15832_v55 = vsub.f32 %v6202_v15, %v15819_v56  ;;  %v15841_v38 = vand.u32 4294901760, %v6194_v19 }
 0x9b1   : > { %v15825_v1 = vpop.f32.mrf.mxu3 }
 0x9b2   : > { %v18324_v15 = vand.u32 4294901760, %v15832_v55 }
 0x9b4   : > { %v7239_v13 = vsub.f32 %v15832_v55, %v18324_v15  ;;  %v15894_v15 = vsub.f32 %v6156_v17, %v15857_v21  ;;  %v15939_v17 = vsub.f32 %v15801_v0, %v15905_v47 }
 0x9b5   : > { %v6158_v16 = vpop.f32.mrf.mxu0  ;;  %v6204_v35 = vpop.f32.mrf.mxu1 }
 0x9b6   : > { %v15837_v20 = vand.u32 4294901760, %v6158_v16  ;;  %v15839_v31 = vand.u32 4294901760, %v6204_v35  ;;  %v15967_v37 = vpop.f32.mrf.mxu2 }
 0x9b8   : > { %v15847_v24 = vsub.f32 %v6204_v35, %v15839_v31  ;;  %6590 = vmatmul.f32.gmra.mxu0 %v19006_v26  ;;  %7465 = vmatpush.msra.mxu3 %v15839_v31  ;;  %v15860_v6 = vsub.f32 %v6158_v16, %v15837_v20  ;;  %v15866_v26 = vand.u32 4294901760, %v15785_v43 }
 0x9b9   : > { %7078 = vmatpush.msra.mxu0 %v15839_v31  ;;  %6711 = vmatmul.f32.gmra.mxu1 %v19007_v50  ;;  %v15855_v22 = vpop.f32.mrf.mxu3  ;;  %v15869_v50 = vsub.f32 %v6194_v19, %v15841_v38  ;;  %v15884_v19 = vand.u32 4294901760, %v15774_v3 }
 0x9ba   : > { %v18322_v35 = vand.u32 4294901760, %v15847_v24  ;;  %7353 = vmatpush.msrb.mxu2 %v15847_v24  ;;  %7467 = vmatpush.msra.mxu3 %v15819_v56  ;;  %v15902_v10 = vsub.f32 %v15785_v43, %v15866_v26 }
 0x9bb   : > { %7080 = vmatpush.msra.mxu0 %v15819_v56  ;;  %v15918_v61 = vsub.f32 %v15774_v3, %v15884_v19 }
 0x9bc   : > { %7356 = vmatpush.msrb.mxu2 %v15832_v55  ;;  %7469 = vmatpush.msra.mxu3 %v15823_v57  ;;  %v7233_v16 = vsub.f32 %v15847_v24, %v18322_v35  ;;  %v19008_v35 = vand.u32 4294901760, %v15835_v14 }
 0x9bd   : > { %7082 = vmatpush.msra.mxu0 %v15823_v57  ;;  %v6516_v41 = vpop.f32.mrf.mxu0  ;;  %v6622_v27 = vpop.f32.mrf.mxu1 }
 0x9be   : > { %v7245_v36 = vsub.f32 %v15835_v14, %v19008_v35  ;;  %v6517_v48 = vadd.f32 %v6516_v41, %v15703_v33  ;;  %7359 = vmatpush.msrb.mxu2 %v15835_v14  ;;  %7471 = vmatpush.msra.mxu3 %v15829_v40  ;;  %v7234_v46 = vand.u32 4294901760, %v7233_v16  ;;  %v15910_v35 = vand.u32 4294901760, %v15763_v58 }
 0x9bf   : > { %7084 = vmatpush.msra.mxu0 %v15829_v40  ;;  %v7240_v33 = vand.u32 4294901760, %v7239_v13  ;;  %v19009_v16 = vand.u32 4294901760, %v15844_v44 }
 0x9c0   : > { %v6623_v41 = vadd.f32 %v6622_v27, %v6517_v48  ;;  %7235 = vmatpush.msra.mxu1 %v7234_v46  ;;  %7362 = vmatpush.msrb.mxu2 %v15844_v44  ;;  %v7246_v13 = vand.u32 4294901760, %v7245_v36  ;;  %v19010_v46 = vand.u32 4294901760, %v15860_v6 }
 0x9c1   : > { %v7251_v43 = vsub.f32 %v15844_v44, %v19009_v16  ;;  %7086 = vmatpush.msra.mxu0 %v15841_v38  ;;  %7473 = vmatpush.msra.mxu3 %v15841_v38  ;;  %v15926_v27 = vpop.f32.mrf.mxu3  ;;  %v15954_v16 = vand.u32 4294901760, %v15783_v8 }
 0x9c2   : > { %v6758_v48 = vadd.f32 %v15815_v7, %v6623_v41  ;;  %7241 = vmatpush.msra.mxu1 %v7240_v33  ;;  %7365 = vmatpush.msrb.mxu2 %v15869_v50  ;;  %v7935_v3 = vsub.f32 %v15860_v6, %v19010_v46  ;;  %v19011_v7 = vand.u32 4294901760, %v15869_v50  ;;  %v15949_v33 = vsub.f32 %v15763_v58, %v15910_v35  ;;  %v19015_v58 = vld [vmem:[#allocation99_spill] sm:$0xff] }
 0x9c3   : > { %7088 = vmatpush.msra.mxu0 %v15866_v26  ;;  %7475 = vmatpush.msra.mxu3 %v15866_v26  ;;  %v7252_v0 = vand.u32 4294901760, %v7251_v43  ;;  %v19016_v41 = vand.u32 4294901760, %v15847_v24 }
 0x9c4   : > { %v7257_v36 = vsub.f32 %v15869_v50, %v19011_v7  ;;  %v6847_v46 = vadd.f32 %v15825_v1, %v6758_v48  ;;  %7247 = vmatpush.msra.mxu1 %v7246_v13  ;;  %7368 = vmatpush.msrb.mxu2 %v15902_v10  ;;  %v7936_v43 = vand.u32 4294901760, %v7935_v3  ;;  %v19013_v48 = vand.u32 4294901760, %v15894_v15 }
 0x9c5   : > { %7090 = vmatpush.msra.mxu0 %v15884_v19  ;;  %7477 = vmatpush.msra.mxu3 %v15884_v19  ;;  %v6521_v7 = vpop.f32.mrf.mxu0  ;;  %v6628_v53 = vpop.f32.mrf.mxu1  ;;  %v7274_v12 = vand.u32 4294901760, %v15949_v33 }
 0x9c6   : > { %v15960_v52 = vmul.f32 %v6847_v46, %v6847_v46  ;;  %v6522_v1 = vadd.f32 %v6521_v7, %v15707_v32  ;;  %7253 = vmatpush.msra.mxu1 %v7252_v0  ;;  %7371 = vmatpush.msrb.mxu2 %v15918_v61  ;;  %v7941_v13 = vsub.f32 %v15894_v15, %v19013_v48  ;;  %v7258_v46 = vand.u32 4294901760, %v7257_v36 }
 0x9c7   : > { %7092 = vmatpush.msra.mxu0 %v15910_v35  ;;  %7479 = vmatpush.msra.mxu3 %v15910_v35  ;;  %v19014_v32 = vand.u32 4294901760, %v15902_v10  ;;  %v15980_v7 = vand.u32 4294901760, %v15772_v60  ;;  %v19017_v36 = vand.u32 4294901760, %v15922_v63 }
 0x9c8   : > { %19012 = vst [vmem:[#allocation74_spill] sm:$0xff] %v15960_v52  ;;  %v6629_v48 = vadd.f32 %v6628_v53, %v6522_v1  ;;  %7098 = vmatmul.f32.vlgmr.msra.gmra.mxu0 %v19015_v58  ;;  %7259 = vmatpush.msra.mxu1 %v7258_v46  ;;  %v15994_v53 = vsub.f32 %v15783_v8, %v15954_v16  ;;  %v16003_v1 = vand.u32 4294901760, %v15761_v4  ;;  %v19020_v46 = vand.u32 4294901760, %v15939_v17 }
 0x9c9   : > { %v7263_v0 = vsub.f32 %v15902_v10, %v19014_v32  ;;  %7937 = vmatpush.msrb.mxu3 %v7936_v43  ;;  %7588 = vmatpush.msrb.mxu0 %v19016_v41  ;;  %v7947_v51 = vsub.f32 %v15922_v63, %v19017_v36  ;;  %v19018_v32 = vand.u32 4294901760, %v15918_v61  ;;  %v7942_v41 = vand.u32 4294901760, %v7941_v13  ;;  %v16000_v58 = vpop.f32.mrf.mxu3 }
 0x9ca   : > { %7374 = vmatpush.msrb.mxu2 %v15949_v33  ;;  %7005 = vrot.lane.b32.xlu1 %v15960_v52, %s11380_s22  ;;  %v6762_v24 = vadd.f32 %v15827_v34, %v6629_v48  ;;  %v19019_v43 = vand.u32 4294901760, %v15832_v55  ;;  %v7953_v36 = vsub.f32 %v15939_v17, %v19020_v46  ;;  %v16015_v34 = vsub.f32 %v15772_v60, %v15980_v7 }
 0x9cb   : > { %v7269_v3 = vsub.f32 %v15918_v61, %v19018_v32  ;;  %6941 = vrot.lane.b32.xlu2 %v15960_v52, %s11381_s23  ;;  %v7264_v8 = vand.u32 4294901760, %v7263_v0  ;;  %7943 = vmatpush.msrb.mxu3 %v7942_v41  ;;  %v7275_v13 = vsub.f32 %v15949_v33, %v7274_v12  ;;  %v19021_v0 = vld [vmem:[#allocation92_spill] sm:$0xff]  ;;  %v7948_v48 = vand.u32 4294901760, %v7947_v51  ;;  %v19034_v33 = vld [vmem:[#allocation97_spill] sm:$0xff] }
 0x9cc   : > { %7592 = vmatpush.msrb.mxu0 %v19019_v43  ;;  %7780 = vmatpush.msra.mxu2 %v15837_v20  ;;  %v6851_v55 = vadd.f32 %v15855_v22, %v6762_v24  ;;  %v19022_v52 = vand.u32 4294901760, %v15835_v14  ;;  %v7964_v41 = vand.u32 4294901760, %v15994_v53  ;;  %v7954_v22 = vand.u32 4294901760, %v7953_v36  ;;  %v19024_v24 = vld [vmem:[#allocation94_spill] sm:$0xff] }
 0x9cd   : > { %7265 = vmatpush.msra.mxu1 %v7264_v8  ;;  %7377 = vmatmul.f32.vlgmr.msrb.gmra.mxu2 %v19021_v0  ;;  %v7270_v43 = vand.u32 4294901760, %v7269_v3  ;;  %v6526_v46 = vpop.f32.mrf.mxu0  ;;  %v6634_v32 = vpop.f32.mrf.mxu1  ;;  %v16030_v8 = vsub.f32 %v15761_v4, %v16003_v1  ;;  %v19023_v51 = vand.u32 4294901760, %v15971_v18  ;;  %v19025_v14 = vand.u32 4294901760, %v15844_v44  ;;  %v19026_v36 = vld [vmem:[#allocation106_spill] sm:$0xff]  ;;  %v19027_v44 = vld [vmem:[#allocation91_spill] sm:$0xff] }
 0x9ce   : > { %7596 = vmatpush.msrb.mxu0 %v19022_v52  ;;  %7782 = vmatpush.msra.mxu2 %v15857_v21  ;;  %v6527_v60 = vadd.f32 %v6526_v46, %v15713_v9  ;;  %v7276_v52 = vand.u32 4294901760, %v7275_v13  ;;  %v7970_v9 = vand.u32 4294901760, %v16015_v34  ;;  %v16039_v0 = vpop.f32.mrf.mxu2  ;;  %v16041_v46 = vmul.f32 %v6851_v55, %v6851_v55 }
 0x9cf   : > { %7949 = vmatpush.msrb.mxu3 %v7948_v48  ;;  %7271 = vmatpush.msra.mxu1 %v7270_v43  ;;  %v7959_v3 = vsub.f32 %v15971_v18, %v19023_v51  ;;  %v7965_v48 = vsub.f32 %v15994_v53, %v7964_v41  ;;  %v19028_v13 = vand.u32 4294901760, %v15869_v50  ;;  %v7976_v55 = vand.u32 4294901760, %v16030_v8 }
 0x9d0   : > { %7483 = vmatmul.f32.vlgmr.msra.gmra.mxu3 %v19024_v24  ;;  %7600 = vmatpush.msrb.mxu0 %v19025_v14  ;;  %v6635_v4 = vadd.f32 %v6634_v32, %v6527_v60  ;;  %v7971_v32 = vsub.f32 %v16015_v34, %v7970_v9  ;;  %v19030_v14 = vld [vmem:[#allocation98_spill] sm:$0xff] }
 0x9d1   : > { %7784 = vmatpush.msra.mxu2 %v15887_v5  ;;  %7955 = vmatpush.msrb.mxu3 %v7954_v22  ;;  %v7960_v43 = vand.u32 4294901760, %v7959_v3  ;;  %v16057_v60 = vpop.f32.mrf.mxu3  ;;  %v7966_v3 = vand.u32 4294901760, %v7965_v48  ;;  %v7977_v24 = vsub.f32 %v16030_v8, %v7976_v55 }
 0x9d2   : > { %7277 = vmatpush.msra.mxu1 %v7276_v52  ;;  %7106 = vmatmul.f32.gmra.mxu0 %v19026_v36  ;;  %v6766_v51 = vadd.f32 %v15881_v62, %v6635_v4  ;;  %v7972_v52 = vand.u32 4294901760, %v7971_v32  ;;  %v19031_v36 = vand.u32 4294901760, %v15918_v61  ;;  %v19032_v4 = vld [vmem:[#allocation103_spill] sm:$0xff] }
 0x9d3   : > { %7279 = vmatmul.f32.vlgmr.msra.gmra.mxu1 %v19027_v44  ;;  %7604 = vmatpush.msrb.mxu0 %v19028_v13  ;;  %v7978_v48 = vand.u32 4294901760, %v7977_v24  ;;  %v19033_v13 = vld [vmem:[#allocation110_spill] sm:$0xff]  ;;  %v19040_v24 = vand.u32 4294901760, %v15939_v17 }
 0x9d4   : > { %7691 = vmatpush.msrb.mxu1 %v15839_v31  ;;  %7786 = vmatpush.msra.mxu2 %v15905_v47  ;;  %v19029_v31 = vand.u32 4294901760, %v15902_v10  ;;  %v6855_v10 = vadd.f32 %v15926_v27, %v6766_v51 }
 0x9d5   : > { %7961 = vmatpush.msrb.mxu3 %v7960_v43  ;;  %6943 = vrot.lane.b32.xlu0 %v16041_v46, %s11381_s23  ;;  %v6531_v22 = vpop.f32.mrf.mxu0  ;;  %v6640_v50 = vpop.f32.mrf.mxu1 }
 0x9d6   : > { %7007 = vrot.lane.b32.xlu2 %v16041_v46, %s11380_s22  ;;  %7608 = vmatpush.msrb.mxu0 %v19029_v31  ;;  %v6532_v62 = vadd.f32 %v6531_v22, %v15719_v49  ;;  %v16084_v27 = vmul.f32 %v6855_v10, %v6855_v10  ;;  %v19039_v31 = vld [vmem:[#allocation107_spill] sm:$0xff]  ;;  %v19046_v10 = vld [vmem:[#allocation120_spill] sm:$0xff] }
 0x9d7   : > { %7693 = vmatpush.msrb.mxu1 %v15819_v56  ;;  %7788 = vmatpush.msra.mxu2 %v15935_v28  ;;  %v6777_v56 = vpop.f32.mrf.mxu2 }
 0x9d8   : > { %7967 = vmatpush.msrb.mxu3 %v7966_v3  ;;  %7382 = vmatmul.f32.gmra.mxu2 %v19030_v14  ;;  %v6641_v61 = vadd.f32 %v6640_v50, %v6532_v62 }
 0x9d9   : > { %7612 = vmatpush.msrb.mxu0 %v19031_v36  ;;  %7695 = vmatpush.msrb.mxu1 %v15823_v57  ;;  %v6866_v43 = vpop.f32.mrf.mxu3 }
 0x9da   : > { %7790 = vmatpush.msra.mxu2 %v15954_v16  ;;  %7973 = vmatpush.msrb.mxu3 %v7972_v52  ;;  %v19043_v52 = vand.u32 4294901760, %v15971_v18 }
 0x9db   : > { %7489 = vmatmul.f32.gmra.mxu3 %v19032_v4  ;;  %7616 = vmatpush.msrb.mxu0 %v7274_v12  ;;  %v6770_v12 = vadd.f32 %v15967_v37, %v6641_v61  ;;  %v19049_v4 = vld [vmem:[#allocation116_spill] sm:$0xff]  ;;  %v19051_v61 = vld [vmem:[#allocation113_spill] sm:$0xff] }
 0x9dc   : > { %7697 = vmatpush.msrb.mxu1 %v15829_v40  ;;  %7792 = vmatpush.msra.mxu2 %v15980_v7  ;;  %v19035_v40 = vand.u32 4294901760, %v15860_v6 }
 0x9dd   : > { %7979 = vmatpush.msrb.mxu3 %v7978_v48  ;;  %8055 = vmatpush.msra.mxu0 %v15860_v6  ;;  %v6536_v57 = vpop.f32.mrf.mxu0  ;;  %v6646_v49 = vpop.f32.mrf.mxu1  ;;  %v6859_v37 = vadd.f32 %v16000_v58, %v6770_v12 }
 0x9de   : > { %7114 = vmatmul.f32.gmra.mxu0 %v19033_v13  ;;  %7283 = vmatmul.f32.gmra.mxu1 %v19034_v33  ;;  %v6537_v32 = vadd.f32 %v6536_v57, %v15725_v42  ;;  %v19037_v42 = vld [vmem:[#allocation105_spill] sm:$0xff] }
 0x9df   : > { %8393 = vmatpush.msra.mxu3 %v15837_v20  ;;  %7794 = vmatpush.msra.mxu2 %v16003_v1  ;;  %v16106_v6 = vpop.f32.mrf.mxu2  ;;  %v16119_v3 = vmul.f32 %v6859_v37, %v6859_v37  ;;  %v19055_v37 = vld [vmem:[#allocation117_spill] sm:$0xff] }
 0x9e0   : > { %7699 = vmatpush.msrb.mxu1 %v15841_v38  ;;  %8058 = vmatpush.msra.mxu0 %v15894_v15  ;;  %v19036_v38 = vand.u32 4294901760, %v15894_v15  ;;  %v6647_v22 = vadd.f32 %v6646_v49, %v6537_v32 }
 0x9e1   : > { %8290 = vmatpush.msrb.mxu2 %v19035_v40  ;;  %8395 = vmatpush.msra.mxu3 %v15857_v21 }
 0x9e2   : > { %6945 = vrot.lane.b32.xlu0 %v16084_v27, %s11381_s23  ;;  %7009 = vrot.lane.b32.xlu2 %v16084_v27, %s11380_s22 }
 0x9e3   : > { %7701 = vmatpush.msrb.mxu1 %v15866_v26  ;;  %8061 = vmatpush.msra.mxu0 %v15922_v63  ;;  %v19038_v26 = vand.u32 4294901760, %v15922_v63  ;;  %v6774_v63 = vadd.f32 %v16039_v0, %v6647_v22 }
 0x9e4   : > { %8294 = vmatpush.msrb.mxu2 %v19036_v38  ;;  %8397 = vmatpush.msra.mxu3 %v15887_v5  ;;  %v19053_v38 = vld [vmem:[#allocation121_spill] sm:$0xff] }
 0x9e5   : > { %7387 = vmatmul.f32.gmra.mxu2 %v19037_v42  ;;  %7703 = vmatpush.msrb.mxu1 %v15884_v19  ;;  %v6541_v50 = vpop.f32.mrf.mxu0  ;;  %v6652_v51 = vpop.f32.mrf.mxu1 }
 0x9e6   : > { %8064 = vmatpush.msra.mxu0 %v15939_v17  ;;  %8298 = vmatpush.msrb.mxu2 %v19038_v26  ;;  %v6542_v15 = vadd.f32 %v6541_v50, %v15731_v45  ;;  %v6870_v19 = vpop.f32.mrf.mxu3  ;;  %v19041_v45 = vld [vmem:[#allocation115_spill] sm:$0xff] }
 0x9e7   : > { %8399 = vmatpush.msra.mxu3 %v15905_v47  ;;  %7705 = vmatpush.msrb.mxu1 %v15910_v35  ;;  %v19042_v35 = vld [vmem:[#allocation104_spill] sm:$0xff]  ;;  %v6785_v36 = vpop.f32.mrf.mxu2  ;;  %v19056_v26 = vld [vmem:[#allocation123_spill] sm:$0xff] }
 0x9e8   : > { %7495 = vmatmul.f32.gmra.mxu3 %v19039_v31  ;;  %8067 = vmatpush.msra.mxu0 %v15971_v18  ;;  %v6653_v58 = vadd.f32 %v6652_v51, %v6542_v15  ;;  %v19044_v18 = vld [vmem:[#allocation109_spill] sm:$0xff]  ;;  %v6455_v51 = vadd.f32 %v15759_v59, %v15743_v39  ;;  %v6459_v59 = vadd.f32 %v15770_v25, %v15750_v11 }
 0x9e9   : > { %8167 = vmatpush.msra.mxu1 %v15837_v20  ;;  %8302 = vmatpush.msrb.mxu2 %v19040_v24  ;;  %v6863_v20 = vadd.f32 %v16057_v60, %v6774_v63  ;;  %v19058_v24 = vld [vmem:[#allocation137_spill] sm:$0xff] }
 0x9ea   : > { %8401 = vmatpush.msra.mxu3 %v15935_v28  ;;  %7122 = vmatmul.f32.gmra.mxu0 %v19041_v45  ;;  %v6778_v14 = vadd.f32 %v6777_v56, %v6653_v58  ;;  %v19059_v45 = vld [vmem:[#allocation122_spill] sm:$0xff] }
 0x9eb   : > { %7287 = vmatmul.f32.gmra.mxu1 %v19042_v35  ;;  %8070 = vmatpush.msra.mxu0 %v15994_v53  ;;  %v16144_v62 = vmul.f32 %v6863_v20, %v6863_v20 }
 0x9ec   : > { %8169 = vmatpush.msra.mxu1 %v15857_v21  ;;  %8306 = vmatpush.msrb.mxu2 %v19043_v52  ;;  %v6867_v21 = vadd.f32 %v6866_v43, %v6778_v14  ;;  %v19052_v43 = vld [vmem:[#allocation118_spill] sm:$0xff] }
 0x9ed   : > { %8403 = vmatpush.msra.mxu3 %v15954_v16  ;;  %7011 = vrot.lane.b32.xlu0 %v16119_v3, %s11380_s22  ;;  %v6546_v17 = vpop.f32.mrf.mxu0  ;;  %v6658_v0 = vpop.f32.mrf.mxu1 }
 0x9ee   : > { %6947 = vrot.lane.b32.xlu1 %v16119_v3, %s11381_s23  ;;  %8073 = vmatpush.msra.mxu0 %v16015_v34  ;;  %v6874_v53 = vpop.f32.mrf.mxu3  ;;  %v16154_v60 = vmul.f32 %v6867_v21, %v6867_v21 }
 0x9ef   : > { %8171 = vmatpush.msra.mxu1 %v15887_v5  ;;  %8310 = vmatpush.msrb.mxu2 %v7964_v41  ;;  %v6547_v5 = vadd.f32 %v6546_v17, %v15738_v23  ;;  %v19045_v41 = vld [vmem:[#allocation112_spill] sm:$0xff] }
 0x9f0   : > { %8405 = vmatpush.msra.mxu3 %v15980_v7  ;;  %7392 = vmatmul.f32.gmra.mxu2 %v19044_v18  ;;  %v19060_v17 = vld [vmem:[#allocation128_spill] sm:$0xff] }
 0x9f1   : > { %8076 = vmatpush.msra.mxu0 %v16030_v8  ;;  %8173 = vmatpush.msra.mxu1 %v15905_v47  ;;  %v19047_v47 = vld [vmem:[#allocation108_spill] sm:$0xff]  ;;  %v6659_v23 = vadd.f32 %v6658_v0, %v6547_v5  ;;  %v6789_v8 = vpop.f32.mrf.mxu2 }
 0x9f2   : > { %8314 = vmatpush.msrb.mxu2 %v7970_v9  ;;  %8407 = vmatpush.msra.mxu3 %v16003_v1  ;;  %v19061_v5 = vld [vmem:[#allocation132_spill] sm:$0xff] }
 0x9f3   : > { %7501 = vmatmul.f32.gmra.mxu3 %v19045_v41  ;;  %8175 = vmatpush.msra.mxu1 %v15935_v28  ;;  %v19048_v28 = vld [vmem:[#allocation114_spill] sm:$0xff]  ;;  %v19063_v41 = vld [vmem:[#allocation127_spill] sm:$0xff] }
 0x9f4   : > { %8318 = vmatpush.msrb.mxu2 %v7976_v55  ;;  %7130 = vmatmul.f32.gmra.mxu0 %v19046_v10  ;;  %v6782_v55 = vadd.f32 %v16106_v6, %v6659_v23  ;;  %v19054_v6 = vld [vmem:[#allocation131_spill] sm:$0xff] }
 0x9f5   : > { %7291 = vmatmul.f32.gmra.mxu1 %v19047_v47  ;;  %7013 = vrot.lane.b32.xlu0 %v16144_v62, %s11380_s22  ;;  %v6551_v34 = vpop.f32.mrf.mxu0  ;;  %v6664_v9 = vpop.f32.mrf.mxu1  ;;  %v19064_v23 = vld [vmem:[#allocation47_spill] sm:$0xff] }
 0x9f6   : > { %8177 = vmatpush.msra.mxu1 %v15954_v16  ;;  %6949 = vrot.lane.b32.xlu1 %v16144_v62, %s11381_s23  ;;  %v6552_v56 = vadd.f32 %v6551_v34, %v15745_v2  ;;  %v19050_v16 = vld [vmem:[#allocation125_spill] sm:$0xff]  ;;  %v6878_v48 = vpop.f32.mrf.mxu3 }
 0x9f7   : > { %6951 = vrot.lane.b32.xlu2 %v16154_v60, %s11381_s23 }
 0x9f8   : > { %8179 = vmatpush.msra.mxu1 %v15980_v7  ;;  %7397 = vmatmul.f32.gmra.mxu2 %v19048_v28  ;;  %v6871_v7 = vadd.f32 %v6870_v19, %v6782_v55  ;;  %v6665_v13 = vadd.f32 %v6664_v9, %v6552_v56  ;;  %v19057_v19 = vld [vmem:[#allocation126_spill] sm:$0xff]  ;;  %v6463_v28 = vadd.f32 %v19064_v23, %v15757_v29  ;;  %v19083_v23 = vld [vmem:[#allocation155_spill] sm:$0xff] }
 0x9f9   : > { %v6793_v32 = vpop.f32.mrf.mxu2 }
 0x9fa   : > { %8181 = vmatpush.msra.mxu1 %v16003_v1  ;;  %v6451_v1 = vadd.f32 %v15752_v30, %v15736_v54  ;;  %v16180_v2 = vmul.f32 %v6871_v7, %v6871_v7  ;;  %v6786_v40 = vadd.f32 %v6785_v36, %v6665_v13 }
 0x9fb   : > { %7507 = vmatmul.f32.gmra.mxu3 %v19049_v4 }
 0x9fc   : > { %7138 = vmatmul.f32.gmra.mxu0 %v19050_v16  ;;  %v6875_v50 = vadd.f32 %v6874_v53, %v6786_v40  ;;  %v19062_v53 = vld [vmem:[#allocation143_spill] sm:$0xff]  ;;  %v19066_v16 = vld [vmem:[#allocation138_spill] sm:$0xff]  ;;  %v19070_v40 = vld [vmem:[#allocation53_spill] sm:$0xff] }
 0x9fd   : > { %7295 = vmatmul.f32.gmra.mxu1 %v19051_v61  ;;  %v6556_v57 = vpop.f32.mrf.mxu0  ;;  %v6670_v49 = vpop.f32.mrf.mxu1 }
 0x9fe   : > { %7015 = vrot.lane.b32.xlu1 %v16154_v60, %s11380_s22  ;;  %v6557_v12 = vadd.f32 %v6556_v57, %v6451_v1  ;;  %v6882_v30 = vpop.f32.mrf.mxu3  ;;  %v16190_v15 = vmul.f32 %v6875_v50, %v6875_v50  ;;  %v19067_v57 = vld [vmem:[#allocation149_spill] sm:$0xff]  ;;  %v19072_v50 = vld [vmem:[#allocation144_spill] sm:$0xff] }
 0xa00   : > { %7402 = vmatmul.f32.gmra.mxu2 %v19052_v43  ;;  %v6671_v54 = vadd.f32 %v6670_v49, %v6557_v12  ;;  %v19068_v49 = vld [vmem:[#allocation133_spill] sm:$0xff]  ;;  %v19069_v43 = vld [vmem:[#allocation44_spill] sm:$0xff] }
 0xa01   : > { %v6797_v63 = vpop.f32.mrf.mxu2  ;;  %v6467_v12 = vadd.f32 %v19070_v40, %v19069_v43  ;;  %v19087_v43 = vld [vmem:[#allocation62_spill] sm:$0xff] }
 0xa02   : > { %v6790_v31 = vadd.f32 %v6789_v8, %v6671_v54  ;;  %v19065_v8 = vld [vmem:[#allocation134_spill] sm:$0xff]  ;;  %v19073_v54 = vld [vmem:[#allocation156_spill] sm:$0xff] }
 0xa03   : > { %7513 = vmatmul.f32.gmra.mxu3 %v19053_v38  ;;  %v19088_v40 = vld [vmem:[#allocation70_spill] sm:$0xff] }
 0xa04   : > { %7146 = vmatmul.f32.gmra.mxu0 %v19054_v6  ;;  %v6879_v20 = vadd.f32 %v6878_v48, %v6790_v31 }
 0xa05   : > { %7299 = vmatmul.f32.gmra.mxu1 %v19055_v37  ;;  %v6561_v42 = vpop.f32.mrf.mxu0  ;;  %v6676_v22 = vpop.f32.mrf.mxu1 }
 0xa06   : > { %6953 = vrot.lane.b32.xlu1 %v16180_v2, %s11381_s23  ;;  %v6562_v58 = vadd.f32 %v6561_v42, %v6455_v51  ;;  %v6886_v0 = vpop.f32.mrf.mxu3  ;;  %v16200_v36 = vmul.f32 %v6879_v20, %v6879_v20 }
 0xa08   : > { %7407 = vmatmul.f32.gmra.mxu2 %v19056_v26  ;;  %v6677_v39 = vadd.f32 %v6676_v22, %v6562_v58 }
 0xa09   : > { %v6801_v25 = vpop.f32.mrf.mxu2 }
 0xa0a   : > { %v6794_v21 = vadd.f32 %v6793_v32, %v6677_v39  ;;  %v19071_v32 = vld [vmem:[#allocation141_spill] sm:$0xff] }
 0xa0b   : > { %7519 = vmatmul.f32.gmra.mxu3 %v19057_v19 }
 0xa0c   : > { %7154 = vmatmul.f32.gmra.mxu0 %v19058_v24  ;;  %v6883_v9 = vadd.f32 %v6882_v30, %v6794_v21  ;;  %v19074_v30 = vld [vmem:[#allocation139_spill] sm:$0xff]  ;;  %v19075_v24 = vld [vmem:[#allocation50_spill] sm:$0xff]  ;;  %v19079_v21 = vld [vmem:[#allocation164_spill] sm:$0xff] }
 0xa0d   : > { %7303 = vmatmul.f32.gmra.mxu1 %v19059_v45  ;;  %v6566_v14 = vpop.f32.mrf.mxu0  ;;  %v6682_v52 = vpop.f32.mrf.mxu1 }
 0xa0e   : > { %7019 = vrot.lane.b32.xlu1 %v16190_v15, %s11380_s22  ;;  %v6567_v18 = vadd.f32 %v6566_v14, %v6459_v59  ;;  %v16210_v55 = vmul.f32 %v6883_v9, %v6883_v9  ;;  %v6890_v48 = vpop.f32.mrf.mxu3  ;;  %v19081_v9 = vld [vmem:[#allocation56_spill] sm:$0xff] }
 0xa10   : > { %7412 = vmatmul.f32.gmra.mxu2 %v19060_v17  ;;  %v6683_v11 = vadd.f32 %v6682_v52, %v6567_v18  ;;  %v19077_v52 = vld [vmem:[#allocation148_spill] sm:$0xff]  ;;  %v19078_v17 = vld [vmem:[#allocation150_spill] sm:$0xff]  ;;  %v19080_v18 = vld [vmem:[#allocation145_spill] sm:$0xff] }
 0xa11   : > { %v6805_v38 = vpop.f32.mrf.mxu2 }
 0xa12   : > { %v6798_v56 = vadd.f32 %v6797_v63, %v6683_v11  ;;  %v19076_v63 = vld [vmem:[#allocation59_spill] sm:$0xff]  ;;  %v19082_v11 = vld [vmem:[#allocation66_spill] sm:$0xff] }
 0xa13   : > { %7525 = vmatmul.f32.gmra.mxu3 %v19061_v5  ;;  %v6471_v14 = vadd.f32 %v19076_v63, %v19075_v24  ;;  %v19093_v63 = vld [vmem:[#allocation158_spill] sm:$0xff] }
 0xa14   : > { %7162 = vmatmul.f32.gmra.mxu0 %v19062_v53  ;;  %v6887_v1 = vadd.f32 %v6886_v0, %v6798_v56 }
 0xa15   : > { %7307 = vmatmul.f32.gmra.mxu1 %v19063_v41  ;;  %v6571_v10 = vpop.f32.mrf.mxu0  ;;  %v6688_v34 = vpop.f32.mrf.mxu1 }
 0xa16   : > { %6957 = vrot.lane.b32.xlu1 %v16200_v36, %s11381_s23  ;;  %v6572_v4 = vadd.f32 %v6571_v10, %v6463_v28  ;;  %v16220_v6 = vmul.f32 %v6887_v1, %v6887_v1  ;;  %v6894_v51 = vpop.f32.mrf.mxu3 }
 0xa18   : > { %7417 = vmatmul.f32.gmra.mxu2 %v19065_v8  ;;  %v6689_v29 = vadd.f32 %v6688_v34, %v6572_v4 }
 0xa19   : > { %v6809_v0 = vpop.f32.mrf.mxu2 }
 0xa1a   : > { %v6802_v42 = vadd.f32 %v6801_v25, %v6689_v29  ;;  %v6475_v25 = vadd.f32 %v19082_v11, %v19081_v9 }
 0xa1b   : > { %7531 = vmatmul.f32.gmra.mxu3 %v19066_v16  ;;  %v19084_v16 = vld [vmem:[#allocation157_spill] sm:$0xff] }
 0xa1c   : > { %7170 = vmatmul.f32.gmra.mxu0 %v19067_v57  ;;  %v6891_v31 = vadd.f32 %v6890_v48, %v6802_v42  ;;  %v19085_v48 = vld [vmem:[#allocation171_spill] sm:$0xff] }
 0xa1d   : > { %7311 = vmatmul.f32.gmra.mxu1 %v19068_v49  ;;  %v6576_v7 = vpop.f32.mrf.mxu0  ;;  %v6694_v13 = vpop.f32.mrf.mxu1  ;;  %v19086_v57 = vld [vmem:[#allocation151_spill] sm:$0xff] }
 0xa1e   : > { %7023 = vrot.lane.b32.xlu1 %v16210_v55, %s11380_s22  ;;  %v6577_v22 = vadd.f32 %v6576_v7, %v6467_v12  ;;  %v16230_v20 = vmul.f32 %v6891_v31, %v6891_v31  ;;  %v6898_v34 = vpop.f32.mrf.mxu3  ;;  %v6479_v12 = vadd.f32 %v19088_v40, %v19087_v43  ;;  %v19091_v31 = vld [vmem:[#allocation165_spill] sm:$0xff] }
 0xa20   : > { %7422 = vmatmul.f32.gmra.mxu2 %v19071_v32  ;;  %v6695_v58 = vadd.f32 %v6694_v13, %v6577_v22 }
 0xa21   : > { %v6813_v7 = vpop.f32.mrf.mxu2 }
 0xa22   : > { %v6806_v39 = vadd.f32 %v6805_v38, %v6695_v58  ;;  %v19089_v38 = vld [vmem:[#allocation162_spill] sm:$0xff] }
 0xa23   : > { %7537 = vmatmul.f32.gmra.mxu3 %v19072_v50 }
 0xa24   : > { %7178 = vmatmul.f32.gmra.mxu0 %v19073_v54  ;;  %v6895_v53 = vadd.f32 %v6894_v51, %v6806_v39  ;;  %v19090_v51 = vld [vmem:[#allocation74_spill] sm:$0xff] }
 0xa25   : > { %7315 = vmatmul.f32.gmra.mxu1 %v19074_v30  ;;  %v6581_v26 = vpop.f32.mrf.mxu0  ;;  %v6700_v19 = vpop.f32.mrf.mxu1 }
 0xa26   : > { %6961 = vrot.lane.b32.xlu1 %v16220_v6, %s11381_s23  ;;  %v6582_v59 = vadd.f32 %v6581_v26, %v6471_v14  ;;  %v16240_v8 = vmul.f32 %v6895_v53, %v6895_v53  ;;  %v6942_v32 = vpop.permute.xlu2 %6941  ;;  %v6902_v42 = vpop.f32.mrf.mxu3 }
 0xa27   : > { %v6989_v26 = vadd.f32 %v6942_v32, %v19090_v51  ;;  %v19105_v51 = vld [vmem:[#allocation153_spill] sm:$0xff] }
 0xa28   : > { %7427 = vmatmul.f32.gmra.mxu2 %v19077_v52  ;;  %v6701_v10 = vadd.f32 %v6700_v19, %v6582_v59  ;;  %v19092_v19 = vld [vmem:[#allocation33_spill] sm:$0xff] }
 0xa29   : > { %v6817_v59 = vpop.f32.mrf.mxu2 }
 0xa2a   : > { %v6810_v56 = vadd.f32 %v6809_v0, %v6701_v10  ;;  %v19096_v10 = vld [vmem:[#allocation86_spill] sm:$0xff] }
 0xa2b   : > { %7543 = vmatmul.f32.gmra.mxu3 %v19078_v17  ;;  %v19094_v17 = vld [vmem:[#allocation169_spill] sm:$0xff] }
 0xa2c   : > { %7186 = vmatmul.f32.gmra.mxu0 %v19079_v21  ;;  %v6899_v13 = vadd.f32 %v6898_v34, %v6810_v56  ;;  %v19097_v34 = vld [vmem:[#allocation166_spill] sm:$0xff] }
 0xa2d   : > { %7319 = vmatmul.f32.gmra.mxu1 %v19080_v18  ;;  %v6586_v5 = vpop.f32.mrf.mxu0  ;;  %v6706_v28 = vpop.f32.mrf.mxu1 }
 0xa2e   : > { %7027 = vrot.lane.b32.xlu1 %v16230_v20, %s11380_s22  ;;  %v6587_v4 = vadd.f32 %v6586_v5, %v6475_v25  ;;  %v16250_v22 = vmul.f32 %v6899_v13, %v6899_v13  ;;  %v19095_v5 = vld [vmem:[#allocation172_spill] sm:$0xff]  ;;  %v6906_v53 = vpop.f32.mrf.mxu3  ;;  %v19098_v25 = vld [vmem:[#allocation175_spill] sm:$0xff]  ;;  %v19101_v13 = vld [vmem:[#allocation173_spill] sm:$0xff] }
 0xa30   : > { %7432 = vmatmul.f32.gmra.mxu2 %v19083_v23  ;;  %v6707_v1 = vadd.f32 %v6706_v28, %v6587_v4  ;;  %v7008_v28 = vpop.permute.xlu2 %7007 }
 0xa32   : > { %v6814_v50 = vadd.f32 %v6813_v7, %v6707_v1  ;;  %v19100_v7 = vld [vmem:[#allocation101_spill] sm:$0xff]  ;;  %v19102_v1 = vld [vmem:[#allocation64_spill] sm:$0xff] }
 0xa33   : > { %7549 = vmatmul.f32.gmra.mxu3 %v19084_v16 }
 0xa34   : > { %7194 = vmatmul.f32.gmra.mxu0 %v19085_v48  ;;  %v6903_v52 = vadd.f32 %v6902_v42, %v6814_v50  ;;  %v19099_v48 = vld [vmem:[#allocation177_spill] sm:$0xff] }
 0xa35   : > { %7323 = vmatmul.f32.gmra.mxu1 %v19086_v57  ;;  %v6591_v29 = vpop.f32.mrf.mxu0 }
 0xa36   : > { %6965 = vrot.lane.b32.xlu1 %v16240_v8, %s11381_s23  ;;  %v6592_v54 = vadd.f32 %v6591_v29, %v6479_v12  ;;  %v6712_v58 = vpop.f32.mrf.mxu1  ;;  %v16259_v0 = vmul.f32 %v6903_v52, %v6903_v52  ;;  %v19103_v29 = vld [vmem:[#allocation180_spill] sm:$0xff]  ;;  %v19104_v12 = vld [vmem:[#allocation178_spill] sm:$0xff] }
 0xa38   : > { %7437 = vmatmul.f32.gmra.mxu2 %v19089_v38  ;;  %v6713_v39 = vadd.f32 %v6712_v58, %v6592_v54 }
 0xa3a   : > { %v6818_v21 = vadd.f32 %v6817_v59, %v6713_v39 }
 0xa3b   : > { %7555 = vmatmul.f32.gmra.mxu3 %v19091_v31 }
 0xa3c   : > { %7202 = vmatmul.f32.gmra.mxu0 %v19092_v19  ;;  %v7006_v24 = vpop.permute.xlu1 %7005  ;;  %v6907_v9 = vadd.f32 %v6906_v53, %v6818_v21  ;;  %v7010_v42 = vpop.permute.xlu2 %7009 }
 0xa3d   : > { %7327 = vmatmul.f32.gmra.mxu1 %v19093_v63  ;;  %v7053_v14 = vadd.f32 %v7006_v24, %v6989_v26  ;;  %v19106_v26 = vld [vmem:[#allocation90_spill] sm:$0xff] }
 0xa3e   : > { %7031 = vrot.lane.b32.xlu1 %v16250_v22, %s11380_s22  ;;  %v16272_v4 = vmul.f32 %v6907_v9, %v6907_v9 }
 0xa3f   : > { %8476 = vperm.xlu2 %10949, %v7053_v14   ;;  %v19107_v14 = vld [vmem:[#allocation163_spill] sm:$0xff] }
 0xa40   : > { %7442 = vmatmul.f32.gmra.mxu2 %v19094_v17  ;;  %v19108_v17 = vld [vmem:[#allocation129_spill] sm:$0xff] }
 0xa43   : > { %7561 = vmatmul.f32.gmra.mxu3 %v19095_v5  ;;  %v19109_v5 = vld [vmem:[#allocation174_spill] sm:$0xff] }
 0xa44   : > { %7210 = vmatmul.f32.gmra.mxu0 %v19096_v10 }
 0xa45   : > { %7331 = vmatmul.f32.gmra.mxu1 %v19097_v34  ;;  %v16270_v56 = vpop.f32.mrf.mxu0 }
 0xa46   : > { %6969 = vrot.lane.b32.xlu1 %v16259_v0, %s11381_s23 }
 0xa47   : > { %v6944_v11 = vpop.permute.xlu0 %6943  ;;  %6955 = vrot.lane.b32.xlu2 %v16190_v15, %s11381_s23 }
 0xa48   : > { %7447 = vmatmul.f32.gmra.mxu2 %v19098_v25  ;;  %v6990_v23 = vadd.f32 %v6944_v11, %v16041_v46 }
 0xa4a   : > { %v7054_v16 = vadd.f32 %v7008_v28, %v6990_v23  ;;  %v19110_v23 = vld [vmem:[#allocation140_spill] sm:$0xff] }
 0xa4b   : > { %7567 = vmatmul.f32.gmra.mxu3 %v19099_v48 }
 0xa4c   : > { %7218 = vmatmul.f32.gmra.mxu0 %v19100_v7  ;;  %8481 = vperm.xlu0 %10947, %v7054_v16   ;;  %v19111_v7 = vld [vmem:[#allocation161_spill] sm:$0xff] }
 0xa4d   : > { %7335 = vmatmul.f32.gmra.mxu1 %v19101_v13 }
 0xa4e   : > { %7035 = vrot.lane.b32.xlu1 %v16272_v4, %s11380_s22 }
 0xa4f   : > { %v16281_v46 = vpop.f32.mrf.mxu0 }
 0xa50   : > { %7452 = vmatmul.f32.gmra.mxu2 %v19102_v1  ;;  %v16284_v40 = vpop.f32.mrf.mxu1  ;;  %v16290_v38 = vpop.f32.mrf.mxu2 }
 0xa51   : > { %v6952_v48 = vpop.permute.xlu2 %6951 }
 0xa52   : > { %v6994_v1 = vadd.f32 %v6952_v48, %v16154_v60  ;;  %v19113_v60 = vld [vmem:[#allocation184_spill] sm:$0xff] }
 0xa53   : > { %7573 = vmatmul.f32.gmra.mxu3 %v19103_v29  ;;  %v16292_v54 = vpop.f32.mrf.mxu3  ;;  %v19117_v48 = vld [vmem:[#allocation192_spill] sm:$0xff] }
 0xa54   : > { %7618 = vmatmul.f32.vlgmr.msrb.gmra.mxu0 %v19027_v44  ;;  %v6946_v43 = vpop.permute.xlu0 %6945  ;;  %7017 = vrot.lane.b32.xlu0 %v16180_v2, %s11380_s22 }
 0xa55   : > { %7339 = vmatmul.f32.gmra.mxu1 %v19104_v12  ;;  %v6991_v32 = vadd.f32 %v6946_v43, %v16084_v27 }
 0xa57   : > { %v7055_v50 = vadd.f32 %v7010_v42, %v6991_v32 }
 0xa58   : > { %7800 = vmatmul.f32.vlgmr.msra.gmra.mxu2 %v19105_v51 }
 0xa59   : > { %8486 = vperm.xlu2 %10949, %v7055_v50   ;;  %v19112_v50 = vld [vmem:[#allocation20_spill] sm:$0xff] }
 0xa5b   : > { %7981 = vmatmul.f32.vlgmr.msrb.gmra.mxu3 %v19106_v26  ;;  %v7115_v31 = vpop.f32.mrf.mxu0  ;;  %v16298_v58 = vpop.f32.mrf.mxu1 }
 0xa5c   : > { %7622 = vmatmul.f32.gmra.mxu0 %v19034_v33  ;;  %v16300_v19 = vpop.f32.mrf.mxu2 }
 0xa5d   : > { %7707 = vmatmul.f32.vlgmr.msrb.gmra.mxu1 %v19027_v44 }
 0xa5e   : > { %v16306_v39 = vpop.f32.mrf.mxu3 }
 0xa5f   : > { %v7012_v27 = vpop.permute.xlu0 %7011 }
 0xa60   : > { %v6948_v24 = vpop.permute.xlu1 %6947  ;;  %7808 = vmatmul.f32.gmra.mxu2 %v19107_v14 }
 0xa61   : > { %v6992_v52 = vadd.f32 %v6948_v24, %v16119_v3  ;;  %6959 = vrot.lane.b32.xlu2 %v16210_v55, %s11381_s23 }
 0xa63   : > { %v7056_v59 = vadd.f32 %v7012_v27, %v6992_v52  ;;  %7985 = vmatmul.f32.gmra.mxu3 %v19108_v17 }
 0xa64   : > { %7626 = vmatmul.f32.gmra.mxu0 %v19042_v35 }
 0xa65   : > { %7711 = vmatmul.f32.gmra.mxu1 %v19034_v33  ;;  %8491 = vperm.xlu0 %10947, %v7056_v59   ;;  %v19114_v59 = vld [vmem:[#allocation159_spill] sm:$0xff] }
 0xa67   : > { %v7123_v44 = vpop.f32.mrf.mxu0  ;;  %v7014_v11 = vpop.permute.xlu0 %7013 }
 0xa68   : > { %v6950_v21 = vpop.permute.xlu1 %6949  ;;  %7816 = vmatmul.f32.gmra.mxu2 %v19109_v5  ;;  %v7288_v53 = vpop.f32.mrf.mxu1 }
 0xa69   : > { %v6993_v3 = vadd.f32 %v6950_v21, %v16144_v62  ;;  %v7289_v10 = vadd.f32 %v7288_v53, %v7115_v31  ;;  %v7388_v9 = vpop.f32.mrf.mxu2  ;;  %v19115_v53 = vld [vmem:[#allocation188_spill] sm:$0xff] }
 0xa6b   : > { %v7057_v25 = vadd.f32 %v7014_v11, %v6993_v3  ;;  %7989 = vmatmul.f32.gmra.mxu3 %v19110_v23  ;;  %v7389_v28 = vadd.f32 %v7388_v9, %v7289_v10  ;;  %v7496_v16 = vpop.f32.mrf.mxu3  ;;  %v19116_v11 = vld [vmem:[#allocation160_spill] sm:$0xff] }
 0xa6c   : > { %7630 = vmatmul.f32.gmra.mxu0 %v19047_v47 }
 0xa6d   : > { %7715 = vmatmul.f32.gmra.mxu1 %v19042_v35  ;;  %7021 = vrot.lane.b32.xlu0 %v16200_v36, %s11380_s22  ;;  %v16318_v33 = vadd.f32 %v7496_v16, %v7389_v28 }
 0xa6e   : > { %8496 = vperm.xlu2 %10949, %v7057_v25  }
 0xa70   : > { %v7016_v62 = vpop.permute.xlu1 %7015  ;;  %7824 = vmatmul.f32.gmra.mxu2 %v19111_v7 }
 0xa71   : > { %v7131_v29 = vpop.f32.mrf.mxu0  ;;  %v7058_v32 = vadd.f32 %v7016_v62, %v6994_v1 }
 0xa72   : > { %v7292_v43 = vpop.f32.mrf.mxu1 }
 0xa73   : > { %v7293_v42 = vadd.f32 %v7292_v43, %v7123_v44  ;;  %7993 = vmatmul.f32.gmra.mxu3 %v19112_v50  ;;  %v7393_v51 = vpop.f32.mrf.mxu2 }
 0xa74   : > { %7634 = vmatmul.f32.gmra.mxu0 %v19051_v61 }
 0xa75   : > { %v7394_v35 = vadd.f32 %v7393_v51, %v7293_v42  ;;  %7719 = vmatmul.f32.gmra.mxu1 %v19047_v47  ;;  %8501 = vperm.xlu0 %10947, %v7058_v32  }
 0xa76   : > { %6963 = vrot.lane.b32.xlu2 %v16230_v20, %s11381_s23  ;;  %v7502_v31 = vpop.f32.mrf.mxu3 }
 0xa77   : > { %v16327_v27 = vadd.f32 %v7502_v31, %v7394_v35 }
 0xa78   : > { %7832 = vmatmul.f32.gmra.mxu2 %v19113_v60 }
 0xa79   : > { %v7139_v24 = vpop.f32.mrf.mxu0 }
 0xa7a   : > { %v7296_v14 = vpop.f32.mrf.mxu1 }
 0xa7b   : > { %v7297_v52 = vadd.f32 %v7296_v14, %v7131_v29  ;;  %7997 = vmatmul.f32.gmra.mxu3 %v19114_v59  ;;  %v7398_v44 = vpop.f32.mrf.mxu2  ;;  %v19118_v29 = vld [vmem:[#allocation15_spill] sm:$0xff] }
 0xa7c   : > { %7638 = vmatmul.f32.gmra.mxu0 %v19055_v37 }
 0xa7d   : > { %v7399_v21 = vadd.f32 %v7398_v44, %v7297_v52  ;;  %7723 = vmatmul.f32.gmra.mxu1 %v19051_v61  ;;  %7025 = vrot.lane.b32.xlu0 %v16220_v6, %s11380_s22 }
 0xa7e   : > { %v7508_v47 = vpop.f32.mrf.mxu3 }
 0xa7f   : > { %v16335_v5 = vadd.f32 %v7508_v47, %v7399_v21  ;;  %v19121_v47 = vld [vmem:[#allocation200_spill] sm:$0xff] }
 0xa80   : > { %7840 = vmatmul.f32.gmra.mxu2 %v19115_v53 }
 0xa81   : > { %v7147_v3 = vpop.f32.mrf.mxu0 }
 0xa82   : > { %v7300_v10 = vpop.f32.mrf.mxu1 }
 0xa83   : > { %v7301_v9 = vadd.f32 %v7300_v10, %v7139_v24  ;;  %8001 = vmatmul.f32.gmra.mxu3 %v19116_v11  ;;  %v7403_v25 = vpop.f32.mrf.mxu2  ;;  %v19120_v24 = vld [vmem:[#allocation95_spill] sm:$0xff] }
 0xa84   : > { %7642 = vmatmul.f32.gmra.mxu0 %v19059_v45 }
 0xa85   : > { %v7404_v28 = vadd.f32 %v7403_v25, %v7301_v9  ;;  %7727 = vmatmul.f32.gmra.mxu1 %v19055_v37  ;;  %v19119_v37 = vld [vmem:[#allocation196_spill] sm:$0xff]  ;;  %v19122_v25 = vld [vmem:[#allocation183_spill] sm:$0xff] }
 0xa86   : > { %v7514_v61 = vpop.f32.mrf.mxu3 }
 0xa87   : > { %v16341_v16 = vadd.f32 %v7514_v61, %v7404_v28 }
 0xa88   : > { %7848 = vmatmul.f32.gmra.mxu2 %v19117_v48 }
 0xa89   : > { %v7155_v62 = vpop.f32.mrf.mxu0 }
 0xa8a   : > { %v7304_v7 = vpop.f32.mrf.mxu1 }
 0xa8b   : > { %v7305_v1 = vadd.f32 %v7304_v7, %v7147_v3  ;;  %8005 = vmatmul.f32.gmra.mxu3 %v19118_v29  ;;  %v7408_v43 = vpop.f32.mrf.mxu2 }
 0xa8c   : > { %7646 = vmatmul.f32.gmra.mxu0 %v19063_v41 }
 0xa8d   : > { %v7409_v32 = vadd.f32 %v7408_v43, %v7305_v1  ;;  %7731 = vmatmul.f32.gmra.mxu1 %v19059_v45  ;;  %v16355_v45 = vpop.permute.xlu1 %6953 }
 0xa8e   : > { %v7520_v42 = vpop.f32.mrf.mxu3 }
 0xa8f   : > { %v16347_v51 = vadd.f32 %v7520_v42, %v7409_v32 }
 0xa90   : > { %7856 = vmatmul.f32.gmra.mxu2 %v19119_v37 }
 0xa91   : > { %v7163_v35 = vpop.f32.mrf.mxu0 }
 0xa92   : > { %v7308_v31 = vpop.f32.mrf.mxu1 }
 0xa93   : > { %v7309_v60 = vadd.f32 %v7308_v31, %v7155_v62  ;;  %8009 = vmatmul.f32.gmra.mxu3 %v19120_v24  ;;  %v7413_v14 = vpop.f32.mrf.mxu2  ;;  %v19123_v62 = vld [vmem:[#allocation204_spill] sm:$0xff] }
 0xa94   : > { %7650 = vmatmul.f32.gmra.mxu0 %v19068_v49 }
 0xa95   : > { %v7414_v52 = vadd.f32 %v7413_v14, %v7309_v60  ;;  %7735 = vmatmul.f32.gmra.mxu1 %v19063_v41  ;;  %v7020_v42 = vpop.permute.xlu1 %7019 }
 0xa96   : > { %v7526_v44 = vpop.f32.mrf.mxu3 }
 0xa97   : > { %v16353_v21 = vadd.f32 %v7526_v44, %v7414_v52  ;;  %v19125_v44 = vld [vmem:[#allocation208_spill] sm:$0xff] }
 0xa98   : > { %7864 = vmatmul.f32.gmra.mxu2 %v19121_v47 }
 0xa99   : > { %v7171_v53 = vpop.f32.mrf.mxu0  ;;  %v16358_v3 = vpop.permute.xlu2 %8476 }
 0xa9a   : > { %v7312_v10 = vpop.f32.mrf.mxu1 }
 0xa9b   : > { %v7313_v9 = vadd.f32 %v7312_v10, %v7163_v35  ;;  %8013 = vmatmul.f32.gmra.mxu3 %v19122_v25  ;;  %v7418_v28 = vpop.f32.mrf.mxu2  ;;  %v19124_v35 = vld [vmem:[#allocation187_spill] sm:$0xff] }
 0xa9c   : > { %7654 = vmatmul.f32.gmra.mxu0 %v19074_v30 }
 0xa9d   : > { %v7419_v61 = vadd.f32 %v7418_v28, %v7313_v9  ;;  %7739 = vmatmul.f32.gmra.mxu1 %v19068_v49  ;;  %v19126_v9 = vld [vmem:[#allocation191_spill] sm:$0xff] }
 0xa9e   : > { %v7532_v41 = vpop.f32.mrf.mxu3 }
 0xa9f   : > { %v16363_v48 = vadd.f32 %v7532_v41, %v7419_v61  ;;  %v19127_v41 = vld [vmem:[#allocation214_spill] sm:$0xff] }
 0xaa0   : > { %7872 = vmatmul.f32.gmra.mxu2 %v19123_v62 }
 0xaa1   : > { %v7179_v7 = vpop.f32.mrf.mxu0  ;;  %v6956_v1 = vpop.permute.xlu2 %6955 }
 0xaa2   : > { %v7316_v43 = vpop.f32.mrf.mxu1  ;;  %v6996_v32 = vadd.f32 %v6956_v1, %v16190_v15  ;;  %v16381_v1 = vpop.permute.xlu1 %6957 }
 0xaa3   : > { %v7317_v37 = vadd.f32 %v7316_v43, %v7171_v53  ;;  %8017 = vmatmul.f32.gmra.mxu3 %v19124_v35  ;;  %v7423_v31 = vpop.f32.mrf.mxu2 }
 0xaa4   : > { %7658 = vmatmul.f32.gmra.mxu0 %v19080_v18  ;;  %v7060_v60 = vadd.f32 %v7020_v42, %v6996_v32  ;;  %v19128_v32 = vld [vmem:[#allocation195_spill] sm:$0xff] }
 0xaa5   : > { %v7424_v14 = vadd.f32 %v7423_v31, %v7317_v37  ;;  %7743 = vmatmul.f32.gmra.mxu1 %v19074_v30 }
 0xaa6   : > { %v7538_v49 = vpop.f32.mrf.mxu3  ;;  %8511 = vperm.xlu0 %10947, %v7060_v60  }
 0xaa7   : > { %v16370_v52 = vadd.f32 %v7538_v49, %v7424_v14  ;;  %v19130_v14 = vld [vmem:[#allocation217_spill] sm:$0xff] }
 0xaa8   : > { %7880 = vmatmul.f32.gmra.mxu2 %v19125_v44 }
 0xaa9   : > { %v7187_v47 = vpop.f32.mrf.mxu0 }
 0xaaa   : > { %v7320_v10 = vpop.f32.mrf.mxu1 }
 0xaab   : > { %v7321_v15 = vadd.f32 %v7320_v10, %v7179_v7  ;;  %8021 = vmatmul.f32.gmra.mxu3 %v19126_v9  ;;  %v7428_v53 = vpop.f32.mrf.mxu2 }
 0xaac   : > { %7662 = vmatmul.f32.gmra.mxu0 %v19086_v57 }
 0xaad   : > { %v7429_v28 = vadd.f32 %v7428_v53, %v7321_v15  ;;  %7747 = vmatmul.f32.gmra.mxu1 %v19080_v18  ;;  %v19131_v15 = vld [vmem:[#allocation199_spill] sm:$0xff] }
 0xaae   : > { %v7544_v61 = vpop.f32.mrf.mxu3  ;;  %7029 = vrot.lane.b32.xlu0 %v16240_v8, %s11380_s22 }
 0xaaf   : > { %v16378_v30 = vadd.f32 %v7544_v61, %v7429_v28  ;;  %v7024_v61 = vpop.permute.xlu1 %7023 }
 0xab0   : > { %7888 = vmatmul.f32.gmra.mxu2 %v19127_v41 }
 0xab1   : > { %v7195_v62 = vpop.f32.mrf.mxu0 }
 0xab2   : > { %v7324_v7 = vpop.f32.mrf.mxu1 }
 0xab3   : > { %v7325_v43 = vadd.f32 %v7324_v7, %v7187_v47  ;;  %8025 = vmatmul.f32.gmra.mxu3 %v19128_v32  ;;  %v7433_v42 = vpop.f32.mrf.mxu2  ;;  %v16384_v37 = vpop.permute.xlu2 %8486 }
 0xab4   : > { %7666 = vmatmul.f32.gmra.mxu0 %v19093_v63 }
 0xab5   : > { %v7434_v18 = vadd.f32 %v7433_v42, %v7325_v43  ;;  %7751 = vmatmul.f32.gmra.mxu1 %v19086_v57 }
 0xab6   : > { %v7550_v31 = vpop.f32.mrf.mxu3 }
 0xab7   : > { %v16388_v60 = vadd.f32 %v7550_v31, %v7434_v18  ;;  %v19132_v18 = vld [vmem:[#allocation223_spill] sm:$0xff] }
 0xab8   : > { %7896 = vmatmul.f32.gmra.mxu2 %v19130_v14 }
 0xab9   : > { %19129 = vst [vmem:[#allocation78_spill] sm:$0xff] %v16388_v60  ;;  %v7203_v49 = vpop.f32.mrf.mxu0 }
 0xaba   : > { %v7328_v44 = vpop.f32.mrf.mxu1 }
 0xabb   : > { %v7329_v10 = vadd.f32 %v7328_v44, %v7195_v62  ;;  %8029 = vmatmul.f32.gmra.mxu3 %v19131_v15  ;;  %v7438_v47 = vpop.f32.mrf.mxu2  ;;  %v6960_v53 = vpop.permute.xlu2 %6959  ;;  %v19133_v44 = vld [vmem:[#allocation203_spill] sm:$0xff] }
 0xabc   : > { %7670 = vmatmul.f32.gmra.mxu0 %v19097_v34  ;;  %v6998_v28 = vadd.f32 %v6960_v53, %v16210_v55  ;;  %v6995_v55 = vadd.f32 %v16355_v45, %v16180_v2 }
 0xabd   : > { %v7439_v41 = vadd.f32 %v7438_v47, %v7329_v10  ;;  %7755 = vmatmul.f32.gmra.mxu1 %v19093_v63 }
 0xabe   : > { %v7556_v57 = vpop.f32.mrf.mxu3  ;;  %v7062_v7 = vadd.f32 %v7024_v61, %v6998_v28  ;;  %v16395_v43 = vpop.permute.xlu0 %8481 }
 0xabf   : > { %v16397_v42 = vadd.f32 %v7556_v57, %v7439_v41  ;;  %v16407_v61 = vpop.permute.xlu1 %6961 }
 0xac0   : > { %7904 = vmatmul.f32.gmra.mxu2 %v19132_v18  ;;  %8521 = vperm.xlu0 %10947, %v7062_v7  }
 0xac1   : > { %v7211_v62 = vpop.f32.mrf.mxu0 }
 0xac2   : > { %v7332_v31 = vpop.f32.mrf.mxu1 }
 0xac3   : > { %v7333_v14 = vadd.f32 %v7332_v31, %v7203_v49  ;;  %8033 = vmatmul.f32.gmra.mxu3 %v19133_v44  ;;  %v7443_v60 = vpop.f32.mrf.mxu2  ;;  %v19134_v49 = vld [vmem:[#allocation226_spill] sm:$0xff]  ;;  %v7281_v31 = vadd.f32 %v16284_v40, %v16270_v56  ;;  %v19138_v40 = vld [vmem:[#allocation136_spill] sm:$0xff] }
 0xac4   : > { %7674 = vmatmul.f32.gmra.mxu0 %v19101_v13 }
 0xac5   : > { %v7444_v63 = vadd.f32 %v7443_v60, %v7333_v14  ;;  %7759 = vmatmul.f32.gmra.mxu1 %v19097_v34  ;;  %v19135_v60 = vld [vmem:[#allocation207_spill] sm:$0xff] }
 0xac6   : > { %v7562_v10 = vpop.f32.mrf.mxu3  ;;  %v7018_v47 = vpop.permute.xlu0 %7017 }
 0xac7   : > { %v16405_v53 = vadd.f32 %v7562_v10, %v7444_v63  ;;  %v7059_v28 = vadd.f32 %v7018_v47, %v6995_v55  ;;  %v19136_v63 = vld [vmem:[#allocation170_spill] sm:$0xff]  ;;  %v7028_v47 = vpop.permute.xlu1 %7027 }
 0xac8   : > { %v16409_v41 = vpop.permute.xlu2 %8496  ;;  %7912 = vmatmul.f32.gmra.mxu2 %v19134_v49  ;;  %7033 = vrot.lane.b32.xlu0 %v16259_v0, %s11380_s22  ;;  %v7379_v49 = vadd.f32 %v16290_v38, %v7281_v31 }
 0xac9   : > { %v7219_v57 = vpop.f32.mrf.mxu0  ;;  %8506 = vperm.xlu2 %10949, %v7059_v28  }
 0xaca   : > { %v7336_v2 = vpop.f32.mrf.mxu1 }
 0xacb   : > { %v7337_v45 = vadd.f32 %v7336_v2, %v7211_v62  ;;  %8037 = vmatmul.f32.gmra.mxu3 %v19135_v60  ;;  %v7448_v34 = vpop.f32.mrf.mxu2 }
 0xacc   : > { %7678 = vmatmul.f32.gmra.mxu0 %v19104_v12 }
 0xacd   : > { %v7449_v7 = vadd.f32 %v7448_v34, %v7337_v45  ;;  %7763 = vmatmul.f32.gmra.mxu1 %v19101_v13  ;;  %v19137_v45 = vld [vmem:[#allocation212_spill] sm:$0xff] }
 0xace   : > { %v7568_v18 = vpop.f32.mrf.mxu3 }
 0xacf   : > { %v16419_v14 = vadd.f32 %v7568_v18, %v7449_v7  ;;  %v7485_v7 = vadd.f32 %v16292_v54, %v7379_v49  ;;  %v7285_v18 = vadd.f32 %v16298_v58, %v16281_v46  ;;  %v19141_v49 = vld [vmem:[#allocation147_spill] sm:$0xff]  ;;  %v6997_v46 = vadd.f32 %v16381_v1, %v16200_v36  ;;  %v19143_v1 = vld [vmem:[#allocation130_spill] sm:$0xff] }
 0xad0   : > { %v6964_v55 = vpop.permute.xlu2 %6963  ;;  %7920 = vmatmul.f32.gmra.mxu2 %v19136_v63 }
 0xad1   : > { %v7000_v10 = vadd.f32 %v6964_v55, %v16230_v20  ;;  %v7619_v62 = vpop.f32.mrf.mxu0  ;;  %6967 = vrot.lane.b32.xlu2 %v16250_v22, %s11381_s23 }
 0xad2   : > { %v7340_v28 = vpop.f32.mrf.mxu1 }
 0xad3   : > { %v7064_v13 = vadd.f32 %v7028_v47, %v7000_v10  ;;  %v7341_v2 = vadd.f32 %v7340_v28, %v7219_v57  ;;  %8041 = vmatmul.f32.gmra.mxu3 %v19137_v45  ;;  %v7453_v56 = vpop.f32.mrf.mxu2  ;;  %v7620_v57 = vadd.f32 %v7619_v62, %v7485_v7  ;;  %v7384_v10 = vadd.f32 %v16300_v19, %v7285_v18  ;;  %v19140_v28 = vld [vmem:[#allocation146_spill] sm:$0xff]  ;;  %v19142_v7 = vld [vmem:[#allocation167_spill] sm:$0xff] }
 0xad4   : > { %8079 = vmatmul.f32.vlgmr.msra.gmra.mxu0 %v19138_v40 }
 0xad5   : > { %v7454_v34 = vadd.f32 %v7453_v56, %v7341_v2  ;;  %8531 = vperm.xlu0 %10947, %v7064_v13   ;;  %7767 = vmatmul.f32.gmra.mxu1 %v19104_v12  ;;  %v7491_v13 = vadd.f32 %v16306_v39, %v7384_v10 }
 0xad6   : > { %v7574_v20 = vpop.f32.mrf.mxu3 }
 0xad7   : > { %v16432_v55 = vadd.f32 %v7574_v20, %v7454_v34  ;;  %v16434_v38 = vpop.permute.xlu0 %8491 }
 0xad8   : > { %8320 = vmatmul.f32.vlgmr.msrb.gmra.mxu2 %v19106_v26 }
 0xad9   : > { %19139 = vst [vmem:[#allocation81_spill] sm:$0xff] %v16432_v55  ;;  %v7623_v31 = vpop.f32.mrf.mxu0 }
 0xada   : > { %v7708_v63 = vpop.f32.mrf.mxu1  ;;  %v7624_v19 = vadd.f32 %v7623_v31, %v7491_v13 }
 0xadb   : > { %v7709_v47 = vadd.f32 %v7708_v63, %v7620_v57  ;;  %8409 = vmatmul.f32.vlgmr.msra.gmra.mxu3 %v19106_v26  ;;  %v7801_v12 = vpop.f32.mrf.mxu2 }
 0xadc   : > { %8084 = vmatmul.f32.gmra.mxu0 %v19140_v28 }
 0xadd   : > { %v7802_v54 = vadd.f32 %v7801_v12, %v7709_v47  ;;  %8185 = vmatmul.f32.vlgmr.msra.gmra.mxu1 %v19141_v49  ;;  %v19144_v12 = vld [vmem:[#allocation168_spill] sm:$0xff]  ;;  %v6999_v49 = vadd.f32 %v16407_v61, %v16220_v6 }
 0xade   : > { %v7982_v58 = vpop.f32.mrf.mxu3  ;;  %v19147_v6 = vld [vmem:[#allocation152_spill] sm:$0xff] }
 0xadf   : > { %v16444_v62 = vadd.f32 %v7982_v58, %v7802_v54  ;;  %v7022_v2 = vpop.permute.xlu0 %7021  ;;  %v19145_v54 = vld [vmem:[#allocation176_spill] sm:$0xff] }
 0xae0   : > { %v7061_v56 = vadd.f32 %v7022_v2, %v6997_v46  ;;  %8324 = vmatmul.f32.gmra.mxu2 %v19108_v17 }
 0xae1   : > { %v7627_v26 = vpop.f32.mrf.mxu0 }
 0xae2   : > { %v7712_v40 = vpop.f32.mrf.mxu1  ;;  %8516 = vperm.xlu2 %10949, %v7061_v56   ;;  %v7628_v31 = vadd.f32 %v7627_v26, %v16318_v33 }
 0xae3   : > { %v7713_v34 = vadd.f32 %v7712_v40, %v7624_v19  ;;  %8413 = vmatmul.f32.gmra.mxu3 %v19108_v17  ;;  %v7809_v20 = vpop.f32.mrf.mxu2  ;;  %v19146_v40 = vld [vmem:[#allocation179_spill] sm:$0xff] }
 0xae4   : > { %8089 = vmatmul.f32.gmra.mxu0 %v19142_v7 }
 0xae5   : > { %v7810_v36 = vadd.f32 %v7809_v20, %v7713_v34  ;;  %8191 = vmatmul.f32.gmra.mxu1 %v19143_v1 }
 0xae6   : > { %v7986_v39 = vpop.f32.mrf.mxu3 }
 0xae7   : > { %v16450_v18 = vadd.f32 %v7986_v39, %v7810_v36  ;;  %v16452_v57 = vpop.permute.xlu0 %8501 }
 0xae8   : > { %8328 = vmatmul.f32.gmra.mxu2 %v19110_v23 }
 0xae9   : > { %v7631_v63 = vpop.f32.mrf.mxu0 }
 0xaea   : > { %v7716_v10 = vpop.f32.mrf.mxu1  ;;  %6971 = vrot.lane.b32.xlu2 %v16272_v4, %s11381_s23  ;;  %v7632_v2 = vadd.f32 %v7631_v63, %v16327_v27  ;;  %v19149_v63 = vld [vmem:[#allocation181_spill] sm:$0xff] }
 0xaeb   : > { %v7717_v17 = vadd.f32 %v7716_v10, %v7628_v31  ;;  %8417 = vmatmul.f32.gmra.mxu3 %v19110_v23  ;;  %v7817_v47 = vpop.f32.mrf.mxu2 }
 0xaec   : > { %8094 = vmatmul.f32.gmra.mxu0 %v19144_v12 }
 0xaed   : > { %v7818_v28 = vadd.f32 %v7817_v47, %v7717_v17  ;;  %8197 = vmatmul.f32.gmra.mxu1 %v19145_v54 }
 0xaee   : > { %v7990_v46 = vpop.f32.mrf.mxu3 }
 0xaef   : > { %v16463_v58 = vadd.f32 %v7990_v46, %v7818_v28  ;;  %v7026_v33 = vpop.permute.xlu0 %7025  ;;  %v19151_v46 = vld [vmem:[#allocation185_spill] sm:$0xff] }
 0xaf0   : > { %v7063_v13 = vadd.f32 %v7026_v33, %v6999_v49  ;;  %8332 = vmatmul.f32.gmra.mxu2 %v19112_v50 }
 0xaf1   : > { %v7635_v56 = vpop.f32.mrf.mxu0 }
 0xaf2   : > { %v7720_v23 = vpop.f32.mrf.mxu1  ;;  %8526 = vperm.xlu2 %10949, %v7063_v13   ;;  %v7636_v7 = vadd.f32 %v7635_v56, %v16335_v5 }
 0xaf3   : > { %v7721_v19 = vadd.f32 %v7720_v23, %v7632_v2  ;;  %8421 = vmatmul.f32.gmra.mxu3 %v19112_v50  ;;  %v7825_v26 = vpop.f32.mrf.mxu2  ;;  %v19148_v50 = vld [vmem:[#allocation182_spill] sm:$0xff] }
 0xaf4   : > { %8099 = vmatmul.f32.gmra.mxu0 %v19146_v40  ;;  %v19153_v40 = vld [vmem:[#allocation189_spill] sm:$0xff] }
 0xaf5   : > { %v7826_v34 = vadd.f32 %v7825_v26, %v7721_v19  ;;  %8203 = vmatmul.f32.gmra.mxu1 %v19147_v6 }
 0xaf6   : > { %v7994_v61 = vpop.f32.mrf.mxu3 }
 0xaf7   : > { %v16470_v20 = vadd.f32 %v7994_v61, %v7826_v34 }
 0xaf8   : > { %8336 = vmatmul.f32.gmra.mxu2 %v19114_v59 }
 0xaf9   : > { %v7639_v27 = vpop.f32.mrf.mxu0 }
 0xafa   : > { %v7724_v36 = vpop.f32.mrf.mxu1  ;;  %v7640_v47 = vadd.f32 %v7639_v27, %v16341_v16 }
 0xafb   : > { %v7725_v1 = vadd.f32 %v7724_v36, %v7636_v7  ;;  %8425 = vmatmul.f32.gmra.mxu3 %v19114_v59  ;;  %v7833_v39 = vpop.f32.mrf.mxu2  ;;  %v19150_v59 = vld [vmem:[#allocation186_spill] sm:$0xff] }
 0xafc   : > { %8104 = vmatmul.f32.gmra.mxu0 %v19148_v50  ;;  %v19155_v50 = vld [vmem:[#allocation193_spill] sm:$0xff] }
 0xafd   : > { %v7834_v31 = vadd.f32 %v7833_v39, %v7725_v1  ;;  %8209 = vmatmul.f32.gmra.mxu1 %v19149_v63  ;;  %v19154_v1 = vld [vmem:[#allocation194_spill] sm:$0xff] }
 0xafe   : > { %v7998_v10 = vpop.f32.mrf.mxu3 }
 0xaff   : > { %v16477_v17 = vadd.f32 %v7998_v10, %v7834_v31 }
 0xb00   : > { %8340 = vmatmul.f32.gmra.mxu2 %v19116_v11 }
 0xb01   : > { %v7643_v12 = vpop.f32.mrf.mxu0 }
 0xb02   : > { %v7728_v5 = vpop.f32.mrf.mxu1  ;;  %v7644_v2 = vadd.f32 %v7643_v12, %v16347_v51  ;;  %v19156_v12 = vld [vmem:[#allocation198_spill] sm:$0xff] }
 0xb03   : > { %v7729_v28 = vadd.f32 %v7728_v5, %v7640_v47  ;;  %8429 = vmatmul.f32.gmra.mxu3 %v19116_v11  ;;  %v7841_v54 = vpop.f32.mrf.mxu2  ;;  %v19152_v11 = vld [vmem:[#allocation190_spill] sm:$0xff]  ;;  %v6966_v47 = vpop.permute.xlu1 %6965  ;;  %v19157_v5 = vld [vmem:[#allocation197_spill] sm:$0xff] }
 0xb04   : > { %8109 = vmatmul.f32.gmra.mxu0 %v19150_v59 }
 0xb05   : > { %v7842_v49 = vadd.f32 %v7841_v54, %v7729_v28  ;;  %8215 = vmatmul.f32.gmra.mxu1 %v19151_v46  ;;  %v7001_v54 = vadd.f32 %v6966_v47, %v16240_v8  ;;  %v19159_v8 = vld [vmem:[#allocation201_spill] sm:$0xff] }
 0xb06   : > { %v8002_v33 = vpop.f32.mrf.mxu3 }
 0xb07   : > { %v16484_v13 = vadd.f32 %v8002_v33, %v7842_v49 }
 0xb08   : > { %8344 = vmatmul.f32.gmra.mxu2 %v19118_v29 }
 0xb09   : > { %v7647_v56 = vpop.f32.mrf.mxu0 }
 0xb0a   : > { %v7732_v16 = vpop.f32.mrf.mxu1  ;;  %v7648_v61 = vadd.f32 %v7647_v56, %v16353_v21 }
 0xb0b   : > { %v7733_v23 = vadd.f32 %v7732_v16, %v7644_v2  ;;  %8433 = vmatmul.f32.gmra.mxu3 %v19118_v29  ;;  %v7849_v19 = vpop.f32.mrf.mxu2  ;;  %v19158_v16 = vld [vmem:[#allocation202_spill] sm:$0xff] }
 0xb0c   : > { %8114 = vmatmul.f32.gmra.mxu0 %v19152_v11 }
 0xb0d   : > { %v7850_v26 = vadd.f32 %v7849_v19, %v7733_v23  ;;  %8221 = vmatmul.f32.gmra.mxu1 %v19153_v40  ;;  %v19160_v40 = vld [vmem:[#allocation206_spill] sm:$0xff] }
 0xb0e   : > { %v8006_v34 = vpop.f32.mrf.mxu3 }
 0xb0f   : > { %v16491_v6 = vadd.f32 %v8006_v34, %v7850_v26  ;;  %v7032_v26 = vpop.permute.xlu1 %7031 }
 0xb10   : > { %8348 = vmatmul.f32.gmra.mxu2 %v19120_v24 }
 0xb11   : > { %v7651_v7 = vpop.f32.mrf.mxu0 }
 0xb12   : > { %v16496_v51 = vadd.f32 %v7651_v7, %v16363_v48  ;;  %v7736_v27 = vpop.f32.mrf.mxu1 }
 0xb13   : > { %v7737_v36 = vadd.f32 %v7736_v27, %v7648_v61  ;;  %8437 = vmatmul.f32.gmra.mxu3 %v19120_v24  ;;  %v7857_v29 = vpop.f32.mrf.mxu2  ;;  %v19161_v61 = vld [vmem:[#allocation205_spill] sm:$0xff] }
 0xb14   : > { %8119 = vmatmul.f32.gmra.mxu0 %v19154_v1 }
 0xb15   : > { %v7858_v39 = vadd.f32 %v7857_v29, %v7737_v36  ;;  %8227 = vmatmul.f32.gmra.mxu1 %v19155_v50  ;;  %v19163_v50 = vld [vmem:[#allocation209_spill] sm:$0xff] }
 0xb16   : > { %v8010_v31 = vpop.f32.mrf.mxu3 }
 0xb17   : > { %v16501_v63 = vadd.f32 %v8010_v31, %v7858_v39  ;;  %v6970_v31 = vpop.permute.xlu1 %6969 }
 0xb18   : > { %8352 = vmatmul.f32.gmra.mxu2 %v19122_v25  ;;  %v16504_v21 = vpop.permute.xlu0 %8511 }
 0xb19   : > { %v16506_v10 = vpop.f32.mrf.mxu0 }
 0xb1a   : > { %v16508_v48 = vpop.f32.mrf.mxu1 }
 0xb1b   : > { %8441 = vmatmul.f32.gmra.mxu3 %v19122_v25  ;;  %v16511_v24 = vpop.f32.mrf.mxu2 }
 0xb1c   : > { %8124 = vmatmul.f32.gmra.mxu0 %v19156_v12 }
 0xb1d   : > { %8233 = vmatmul.f32.gmra.mxu1 %v19157_v5 }
 0xb1e   : > { %v16515_v28 = vpop.f32.mrf.mxu3 }
 0xb20   : > { %8356 = vmatmul.f32.gmra.mxu2 %v19124_v35  ;;  %v7030_v59 = vpop.permute.xlu0 %7029 }
 0xb21   : > { %v7659_v49 = vpop.f32.mrf.mxu0  ;;  %v7065_v46 = vadd.f32 %v7030_v59, %v7001_v54 }
 0xb22   : > { %v16520_v33 = vadd.f32 %v7659_v49, %v16378_v30  ;;  %v16522_v25 = vpop.f32.mrf.mxu1 }
 0xb23   : > { %8445 = vmatmul.f32.gmra.mxu3 %v19124_v35  ;;  %v16525_v2 = vpop.f32.mrf.mxu2  ;;  %v16527_v56 = vpop.permute.xlu2 %8506  ;;  %8536 = vperm.xlu1 %10948, %v7065_v46   ;;  %v19164_v46 = vld [vmem:[#allocation216_spill] sm:$0xff] }
 0xb24   : > { %8129 = vmatmul.f32.gmra.mxu0 %v19158_v16  ;;  %v19165_v16 = vld [vmem:[#allocation215_spill] sm:$0xff] }
 0xb25   : > { %8239 = vmatmul.f32.gmra.mxu1 %v19159_v8 }
 0xb26   : > { %v16531_v23 = vpop.f32.mrf.mxu3 }
 0xb28   : > { %8360 = vmatmul.f32.gmra.mxu2 %v19126_v9 }
 0xb29   : > { %v16534_v19 = vpop.f32.mrf.mxu0 }
 0xb2a   : > { %v16536_v30 = vpop.f32.mrf.mxu1 }
 0xb2b   : > { %8449 = vmatmul.f32.gmra.mxu3 %v19126_v9  ;;  %v16539_v35 = vpop.f32.mrf.mxu2  ;;  %v6968_v11 = vpop.permute.xlu2 %6967 }
 0xb2c   : > { %8134 = vmatmul.f32.gmra.mxu0 %v19160_v40  ;;  %v7002_v34 = vadd.f32 %v6968_v11, %v16250_v22  ;;  %v19162_v22 = vld [vmem:[#allocation211_spill] sm:$0xff] }
 0xb2d   : > { %8245 = vmatmul.f32.gmra.mxu1 %v19161_v61 }
 0xb2e   : > { %v16544_v7 = vpop.f32.mrf.mxu3  ;;  %v7066_v27 = vadd.f32 %v7032_v26, %v7002_v34  ;;  %v19170_v34 = vld [vmem:[#allocation220_spill] sm:$0xff] }
 0xb30   : > { %8364 = vmatmul.f32.gmra.mxu2 %v19128_v32  ;;  %8541 = vperm.xlu2 %10949, %v7066_v27   ;;  %v19171_v27 = vld [vmem:[#allocation218_spill] sm:$0xff] }
 0xb31   : > { %v7667_v36 = vpop.f32.mrf.mxu0 }
 0xb32   : > { %v16548_v29 = vadd.f32 %v7667_v36, %v16397_v42  ;;  %v16550_v9 = vpop.f32.mrf.mxu1  ;;  %v16552_v1 = vpop.permute.xlu0 %8521  ;;  %v7003_v42 = vadd.f32 %v6970_v31, %v16259_v0 }
 0xb33   : > { %8453 = vmatmul.f32.gmra.mxu3 %v19128_v32  ;;  %v16555_v39 = vpop.f32.mrf.mxu2  ;;  %v7036_v36 = vpop.permute.xlu1 %7035 }
 0xb34   : > { %8139 = vmatmul.f32.gmra.mxu0 %v19162_v22 }
 0xb35   : > { %8251 = vmatmul.f32.gmra.mxu1 %v19163_v50 }
 0xb36   : > { %v16559_v47 = vpop.f32.mrf.mxu3 }
 0xb38   : > { %8368 = vmatmul.f32.gmra.mxu2 %v19131_v15 }
 0xb39   : > { %v16563_v12 = vpop.f32.mrf.mxu0 }
 0xb3a   : > { %v16565_v5 = vpop.f32.mrf.mxu1  ;;  %v7034_v54 = vpop.permute.xlu0 %7033 }
 0xb3b   : > { %8457 = vmatmul.f32.gmra.mxu3 %v19131_v15  ;;  %v16568_v32 = vpop.f32.mrf.mxu2  ;;  %v7067_v59 = vadd.f32 %v7034_v54, %v7003_v42  ;;  %v19176_v42 = vld [vmem:[#allocation225_spill] sm:$0xff] }
 0xb3c   : > { %v16570_v49 = vpop.permute.xlu2 %8516  ;;  %8144 = vmatmul.f32.gmra.mxu0 %v19164_v46 }
 0xb3d   : > { %8257 = vmatmul.f32.gmra.mxu1 %v19165_v16  ;;  %8546 = vperm.xlu0 %10947, %v7067_v59  }
 0xb3e   : > { %v16574_v8 = vpop.f32.mrf.mxu3 }
 0xb3f   : > { %19166 = vst [vmem:[#allocation84_spill] sm:$0xff] %v16574_v8 }
 0xb40   : > { %8372 = vmatmul.f32.gmra.mxu2 %v19133_v44 }
 0xb41   : > { %v7675_v0 = vpop.f32.mrf.mxu0 }
 0xb42   : > { %v16578_v11 = vadd.f32 %v7675_v0, %v16419_v14  ;;  %v16580_v26 = vpop.f32.mrf.mxu1  ;;  %v19181_v0 = vld [vmem:[#allocation227_spill] sm:$0xff] }
 0xb43   : > { %19168 = vst [vmem:[#allocation2_spill] sm:$0xff] %v16580_v26  ;;  %8461 = vmatmul.f32.gmra.mxu3 %v19133_v44  ;;  %v16583_v15 = vpop.f32.mrf.mxu2 }
 0xb44   : > { %19167 = vst [vmem:[#allocation88_spill] sm:$0xff] %v16578_v11  ;;  %v6972_v40 = vpop.permute.xlu2 %6971  ;;  %8149 = vmatmul.f32.gmra.mxu0 %v19170_v34 }
 0xb45   : > { %19169 = vst [vmem:[#allocation3_spill] sm:$0xff] %v16583_v15  ;;  %v7004_v61 = vadd.f32 %v6972_v40, %v16272_v4  ;;  %8263 = vmatmul.f32.gmra.mxu1 %v19171_v27  ;;  %v19177_v4 = vld [vmem:[#allocation224_spill] sm:$0xff]  ;;  %v16615_v27 = vld [vmem:[%s17898_s8 + $0x7] ss:$0 sm:$0xff] }
 0xb46   : > { %v16588_v22 = vpop.f32.mrf.mxu3 }
 0xb47   : > { %19172 = vst [vmem:[#allocation4_spill] sm:$0xff] %v16588_v22  ;;  %v7068_v50 = vadd.f32 %v7036_v36, %v7004_v61 }
 0xb48   : > { %8376 = vmatmul.f32.gmra.mxu2 %v19135_v60 }
 0xb49   : > { %8551 = vperm.xlu1 %10948, %v7068_v50   ;;  %v16591_v14 = vpop.f32.mrf.mxu0 }
 0xb4a   : > { %19173 = vst [vmem:[#allocation5_spill] sm:$0xff] %v16591_v14  ;;  %v16593_v31 = vpop.f32.mrf.mxu1 }
 0xb4b   : > { %19174 = vst [vmem:[#allocation6_spill] sm:$0xff] %v16593_v31  ;;  %8465 = vmatmul.f32.gmra.mxu3 %v19135_v60  ;;  %v16596_v44 = vpop.f32.mrf.mxu2 }
 0xb4c   : > { %19175 = vst [vmem:[#allocation7_spill] sm:$0xff] %v16596_v44  ;;  %8154 = vmatmul.f32.gmra.mxu0 %v19176_v42 }
 0xb4d   : > { %8269 = vmatmul.f32.gmra.mxu1 %v19177_v4 }
 0xb4e   : > { %v16600_v54 = vpop.f32.mrf.mxu3 }
 0xb4f   : > { %19178 = vst [vmem:[#allocation8_spill] sm:$0xff] %v16600_v54 }
 0xb50   : > { %8380 = vmatmul.f32.gmra.mxu2 %v19137_v45 }
 0xb51   : > { %v8080_v59 = vpop.f32.mrf.mxu0 }
 0xb52   : > { %v16603_v46 = vpop.f32.mrf.mxu1  ;;  %v8081_v40 = vadd.f32 %v8080_v59, %v16444_v62 }
 0xb53   : > { %19179 = vst [vmem:[#allocation9_spill] sm:$0xff] %v16603_v46  ;;  %8469 = vmatmul.f32.gmra.mxu3 %v19137_v45  ;;  %v16606_v16 = vpop.f32.mrf.mxu2  ;;  %v8555_v45 = vmul.f32 %v16615_v27, %v16358_v3  ;;  %v10909_v3 = vld [vmem:[%s17897_s7 + $0xc8] sm:$0xff] }
 0xb54   : > { %19180 = vst [vmem:[#allocation10_spill] sm:$0xff] %v16606_v16  ;;  %8997 = vmatpush.bf16.msrb.mxu0 %v10909_v3 }
 0xb55   : > { %8275 = vmatmul.f32.gmra.mxu1 %v19181_v0  ;;  %v10736_v0 = vld [vmem:[%s13698_s27 + $0x80] sm:$0xff] }
 0xb56   : > { %v16609_v60 = vpop.f32.mrf.mxu3 }
 0xb57   : > { %19182 = vst [vmem:[#allocation14_spill] sm:$0xff] %v16609_v60 }
 0xb59   : > { %v8085_v34 = vpop.f32.mrf.mxu0 }
 0xb5a   : > { %v8186_v61 = vpop.f32.mrf.mxu1  ;;  %v8086_v60 = vadd.f32 %v8085_v34, %v16450_v18 }
 0xb5b   : > { %v8187_v36 = vadd.f32 %v8186_v61, %v8081_v40  ;;  %v8321_v50 = vpop.f32.mrf.mxu2 }
 0xb5d   : > { %v8322_v42 = vadd.f32 %v8321_v50, %v8187_v36  ;;  %v8556_v50 = vmul.f32 %v16615_v27, %v16395_v43 }
 0xb5e   : > { %v8410_v4 = vpop.f32.mrf.mxu3 }
 0xb5f   : > { %v8411_v16 = vadd.f32 %v8410_v4, %v8322_v42 }
 0xb61   : > { %v8571_v62 = vadd.f32 %v8555_v45, %v8411_v16  ;;  %v8090_v59 = vpop.f32.mrf.mxu0  ;;  %v10737_v16 = vld [vmem:[%s13698_s27 + $0x88] sm:$0xff]  ;;  %v10908_v45 = vld [vmem:[%s17897_s7 + $0xc0] sm:$0xff] }
 0xb62   : > { %v8192_v46 = vpop.f32.mrf.mxu1  ;;  %v8091_v34 = vadd.f32 %v8090_v59, %v16463_v58  ;;  %8998 = vmatpush.bf16.msrb.mxu0 %v10908_v45  ;;  %v8557_v58 = vmul.f32 %v16615_v27, %v16384_v37 }
 0xb63   : > { %v16621_v54 = vadd.f32 %v10736_v0, %v8571_v62  ;;  %v8193_v14 = vadd.f32 %v8192_v46, %v8086_v60  ;;  %v8325_v55 = vpop.f32.mrf.mxu2 }
 0xb65   : > { %v10752_v40 = vmul.f32 -1.442695, %v16621_v54  ;;  %v8326_v61 = vadd.f32 %v8325_v55, %v8193_v14 }
 0xb66   : > { %v8414_v36 = vpop.f32.mrf.mxu3 }
 0xb67   : > { %11185 = vpow2.f32 %v10752_v40  ;;  %v8415_v18 = vadd.f32 %v8414_v36, %v8326_v61  ;;  %v10738_v36 = vld [vmem:[%s13698_s27 + $0x90] sm:$0xff] }
 0xb69   : > { %v8572_v42 = vadd.f32 %v8556_v50, %v8415_v18  ;;  %v8095_v46 = vpop.f32.mrf.mxu0 }
 0xb6a   : > { %v8198_v60 = vpop.f32.mrf.mxu1  ;;  %v8096_v3 = vadd.f32 %v8095_v46, %v16470_v20 }
 0xb6b   : > { %v16631_v4 = vadd.f32 %v10737_v16, %v8572_v42  ;;  %v8199_v55 = vadd.f32 %v8198_v60, %v8091_v34  ;;  %v8329_v14 = vpop.f32.mrf.mxu2 }
 0xb6d   : > { %v11186_v0 = vpop.eup %11185  ;;  %v10753_v43 = vmul.f32 -1.442695, %v16631_v4  ;;  %v8330_v62 = vadd.f32 %v8329_v14, %v8199_v55 }
 0xb6e   : > { %v16637_v40 = vadd.f32 1.0, %v11186_v0  ;;  %v8418_v61 = vpop.f32.mrf.mxu3 }
 0xb6f   : > { %11187 = vpow2.f32 %v10753_v43  ;;  %v8419_v59 = vadd.f32 %v8418_v61, %v8330_v62  ;;  %v8558_v62 = vmul.f32 %v16615_v27, %v16434_v38  ;;  %v10739_v61 = vld [vmem:[%s13698_s27 + $0x98] sm:$0xff] }
 0xb70   : > { %11189 = vrcp.f32 %v16637_v40  ;;  %vm8689_vm2 = vweird.f32 %v16637_v40 }
 0xb71   : > { %v8573_v50 = vadd.f32 %v8557_v58, %v8419_v59  ;;  %v8100_v18 = vpop.f32.mrf.mxu0 }
 0xb72   : > { %v8204_v16 = vpop.f32.mrf.mxu1  ;;  %v8101_v59 = vadd.f32 %v8100_v18, %v16477_v17 }
 0xb73   : > { %v16644_v34 = vadd.f32 %v10738_v36, %v8573_v50  ;;  %v8205_v42 = vadd.f32 %v8204_v16, %v8096_v3  ;;  %v8333_v60 = vpop.f32.mrf.mxu2 }
 0xb75   : > { %v11188_v55 = vpop.eup %11187  ;;  %v10754_v14 = vmul.f32 -1.442695, %v16644_v34  ;;  %v8334_v45 = vadd.f32 %v8333_v60, %v8205_v42 }
 0xb76   : > { %v11190_v37 = vpop.eup %11189  ;;  %v8669_v0 = vadd.f32 1.0, %v11188_v55  ;;  %v8422_v43 = vpop.f32.mrf.mxu3 }
 0xb77   : > { %v8685_v20 = vmul.f32 %v11190_v37, %v16637_v40  ;;  %11191 = vpow2.f32 %v10754_v14  ;;  %v8423_v46 = vadd.f32 %v8422_v43, %v8334_v45  ;;  %vm8690_vm1 = vweird.f32 %v11190_v37 }
 0xb78   : > { %11193 = vrcp.f32 %v8669_v0  ;;  %v8695_v45 = vand.u32 2147483648, %v16637_v40  ;;  %vm16663_vm3 = vmor %vm8689_vm2, %vm8690_vm1  ;;  %vm8704_vm6 = vweird.f32 %v8669_v0 }
 0xb79   : > { %v8686_v58 = vsub.f32 1.0, %v8685_v20  ;;  %v8574_v36 = vadd.f32 %v8558_v62, %v8423_v46  ;;  %v8105_v3 = vpop.f32.mrf.mxu0  ;;  %v8693_v62 = vand.u32 2147483647, %v16637_v40  ;;  %v8559_v20 = vmul.f32 %v16615_v27, %v16409_v41 }
 0xb7a   : > { %v8210_v50 = vpop.f32.mrf.mxu1  ;;  %v8710_v40 = vand.u32 2147483648, %v8669_v0 }
 0xb7b   : > { %v8687_v16 = vmul.f32 %v11190_v37, %v8686_v58  ;;  %v16652_v42 = vadd.f32 %v10739_v61, %v8574_v36  ;;  %v8211_v60 = vadd.f32 %v8210_v50, %v8101_v59  ;;  %v8337_v55 = vpop.f32.mrf.mxu2  ;;  %v8696_v50 = vor.u32 1.1754944e-38, %v8695_v45 }
 0xb7c   : > { %vm8694_vm5 = vcmp.eq.f32.partialorder %v8693_v62, 8.507059e+37 }
 0xb7d   : > { %v11192_v22 = vpop.eup %11191  ;;  %v10755_v38 = vmul.f32 -1.442695, %v16652_v42  ;;  %v8338_v44 = vadd.f32 %v8337_v55, %v8211_v60  ;;  %v8688_v14 = vadd.f32 %v11190_v37, %v8687_v16  ;;  %v8708_v16 = vand.u32 2147483647, %v8669_v0  ;;  %v10740_v60 = vld [vmem:[%s13698_s27 + $0xa0] sm:$0xff] }
 0xb7e   : > { %v11194_v15 = vpop.eup %11193  ;;  %v16656_v43 = vadd.f32 1.0, %v11192_v22  ;;  %v8426_v17 = vpop.f32.mrf.mxu3  ;;  %v8106_v22 = vadd.f32 %v8105_v3, %v16484_v13 }
 0xb7f   : > { %v8700_v18 = vmul.f32 %v11194_v15, %v8669_v0  ;;  %11195 = vpow2.f32 %v10755_v38  ;;  %v8427_v58 = vadd.f32 %v8426_v17, %v8338_v44  ;;  %v8692_v36 = vsel %vm16663_vm3, %v11190_v37, %v8688_v14 }
 0xb80   : > { %11197 = vrcp.f32 %v16656_v43  ;;  %vm8705_vm4 = vweird.f32 %v11194_v15  ;;  %v8711_v37 = vor.u32 1.1754944e-38, %v8710_v40  ;;  %vm8709_vm8 = vcmp.eq.f32.partialorder %v8708_v16, 8.507059e+37 }
 0xb81   : > { %v8701_v61 = vsub.f32 1.0, %v8700_v18  ;;  %v8110_v59 = vpop.f32.mrf.mxu0  ;;  %v8575_v41 = vadd.f32 %v8559_v20, %v8427_v58  ;;  %v8697_v18 = vsel %vm8694_vm5, %v8696_v50, %v8692_v36  ;;  %vm8706_vm7 = vmor %vm8704_vm6, %vm8705_vm4  ;;  %v7741_v58 = vadd.f32 %v16508_v48, %v16496_v51  ;;  %v10741_v50 = vld [vmem:[%s13698_s27 + $0xa8] sm:$0xff] }
 0xb82   : > { %v8216_v55 = vpop.f32.mrf.mxu1  ;;  %v8924_v0 = vmul.f32 %v8697_v18, %v16621_v54  ;;  %vm8719_vm10 = vweird.f32 %v16656_v43 }
 0xb83   : > { %v8702_v38 = vmul.f32 %v11194_v15, %v8701_v61  ;;  %v8217_v31 = vadd.f32 %v8216_v55, %v8106_v22  ;;  %v8341_v11 = vpop.f32.mrf.mxu2  ;;  %v16671_v13 = vadd.f32 %v10740_v60, %v8575_v41  ;;  %v7866_v48 = vadd.f32 %v16511_v24, %v7741_v58 }
 0xb84   : > { %v8723_v24 = vand.u32 2147483647, %v16656_v43 }
 0xb85   : > { %v11196_v26 = vpop.eup %11195  ;;  %v8703_v8 = vadd.f32 %v11194_v15, %v8702_v38  ;;  %v8342_v14 = vadd.f32 %v8341_v11, %v8217_v31  ;;  %v10756_v62 = vmul.f32 -1.442695, %v16671_v13  ;;  %v8111_v11 = vadd.f32 %v8110_v59, %v16491_v6 }
 0xb86   : > { %v16673_v44 = vpop.eup %11197  ;;  %v16675_v3 = vadd.f32 1.0, %v11196_v26  ;;  %v8430_v45 = vpop.f32.mrf.mxu3  ;;  %v8561_v38 = vmul.f32 %v16615_v27, %v16527_v56  ;;  %vm8724_vm13 = vcmp.eq.f32.partialorder %v8723_v24, 8.507059e+37 }
 0xb87   : > { %v8707_v17 = vsel %vm8706_vm7, %v11194_v15, %v8703_v8  ;;  %v8715_v20 = vmul.f32 %v16673_v44, %v16656_v43  ;;  %v8560_v8 = vmul.f32 %v16615_v27, %v16452_v57  ;;  %v8431_v15 = vadd.f32 %v8430_v45, %v8342_v14 }
 0xb88   : > { %v8712_v46 = vsel %vm8709_vm8, %v8711_v37, %v8707_v17  ;;  %11199 = vrcp.f32 %v16675_v3  ;;  %vm8720_vm9 = vweird.f32 %v16673_v44  ;;  %v8725_v37 = vand.u32 2147483648, %v16656_v43  ;;  %v10742_v17 = vld [vmem:[%s13698_s27 + $0xb0] sm:$0xff] }
 0xb89   : > { %v8925_v61 = vmul.f32 %v8712_v46, %v16631_v4  ;;  %v8716_v22 = vsub.f32 1.0, %v8715_v20  ;;  %11201 = vpow2.f32 %v10756_v62  ;;  %v8115_v26 = vpop.f32.mrf.mxu0  ;;  %v8576_v4 = vadd.f32 %v8560_v8, %v8431_v15  ;;  %vm16705_vm11 = vmor %vm8719_vm10, %vm8720_vm9 }
 0xb8a   : > { %v8222_v31 = vpop.f32.mrf.mxu1  ;;  %v8738_v56 = vand.u32 2147483647, %v16675_v3  ;;  %v8726_v58 = vor.u32 1.1754944e-38, %v8725_v37  ;;  %vm8734_vm14 = vweird.f32 %v16675_v3 }
 0xb8b   : > { %v8940_v36 = vpack.c.bf16 %v8925_v61, %v8924_v0  ;;  %v8717_v54 = vmul.f32 %v16673_v44, %v8716_v22  ;;  %v8223_v16 = vadd.f32 %v8222_v31, %v8111_v11  ;;  %v8345_v40 = vpop.f32.mrf.mxu2  ;;  %v16693_v57 = vadd.f32 %v10741_v50, %v8576_v4 }
 0xb8c   : > { %v8740_v22 = vand.u32 2147483648, %v16675_v3  ;;  %v8116_v11 = vadd.f32 %v8115_v26, %v16501_v63  ;;  %v7656_v50 = vadd.f32 %v16506_v10, %v16370_v52  ;;  %v8015_v4 = vadd.f32 %v16515_v28, %v7866_v48 }
 0xb8d   : > { %v8346_v60 = vadd.f32 %v8345_v40, %v8223_v16  ;;  %10780 = vmatmul.msk.bf16.vlgmr.msrb.gmra.mxu0 %vm18334_vm0, %v8940_v36  ;;  %v8718_v59 = vadd.f32 %v16673_v44, %v8717_v54  ;;  %v10757_v45 = vmul.f32 -1.442695, %v16693_v57  ;;  %vm8739_vm1 = vcmp.eq.f32.partialorder %v8738_v56, 8.507059e+37 }
 0xb8e   : > { %v11200_v6 = vpop.eup %11199  ;;  %v8434_v55 = vpop.f32.mrf.mxu3  ;;  %v8741_v63 = vor.u32 1.1754944e-38, %v8740_v22  ;;  %v8563_v22 = vmul.f32 %v16615_v27, %v16570_v49 }
 0xb8f   : > { %v11202_v51 = vpop.eup %11201  ;;  %v8730_v41 = vmul.f32 %v11200_v6, %v16675_v3  ;;  %v8435_v18 = vadd.f32 %v8434_v55, %v8346_v60  ;;  %v8722_v61 = vsel %vm16705_vm11, %v16673_v44, %v8718_v59  ;;  %vm8735_vm12 = vweird.f32 %v11200_v6 }
 0xb90   : > { %v16701_v14 = vadd.f32 1.0, %v11202_v51  ;;  %v8727_v16 = vsel %vm8724_vm13, %v8726_v58, %v8722_v61  ;;  %vm8736_vm15 = vmor %vm8734_vm14, %vm8735_vm12  ;;  %v7745_v3 = vadd.f32 %v16522_v25, %v7656_v50  ;;  %v8562_v55 = vmul.f32 %v16615_v27, %v16504_v21 }
 0xb91   : > { %v8731_v62 = vsub.f32 1.0, %v8730_v41  ;;  %v8577_v0 = vadd.f32 %v8561_v38, %v8435_v18  ;;  %v8120_v46 = vpop.f32.mrf.mxu0  ;;  %v8926_v38 = vmul.f32 %v8727_v16, %v16644_v34  ;;  %v7749_v21 = vadd.f32 %v16536_v30, %v16520_v33 }
 0xb92   : > { %11203 = vrcp.f32 %v16701_v14  ;;  %v8228_v8 = vpop.f32.mrf.mxu1  ;;  %v7874_v34 = vadd.f32 %v16525_v2, %v7745_v3  ;;  %vm8749_vm3 = vweird.f32 %v16701_v14  ;;  %v10746_v3 = vld [vmem:[%s13698_s27 + $0xd0] sm:$0xff] }
 0xb93   : > { %v8732_v15 = vmul.f32 %v11200_v6, %v8731_v62  ;;  %11205 = vpow2.f32 %v10757_v45  ;;  %v16717_v43 = vadd.f32 %v10742_v17, %v8577_v0  ;;  %v8349_v31 = vpop.f32.mrf.mxu2  ;;  %v8229_v36 = vadd.f32 %v8228_v8, %v8116_v11  ;;  %v10743_v45 = vld [vmem:[%s13698_s27 + $0xb8] sm:$0xff] }
 0xb94   : > { %v7882_v30 = vadd.f32 %v16539_v35, %v7749_v21  ;;  %v8019_v8 = vadd.f32 %v16531_v23, %v7874_v34  ;;  %v10745_v34 = vld [vmem:[%s13698_s27 + $0xc8] sm:$0xff] }
 0xb95   : > { %v8733_v54 = vadd.f32 %v11200_v6, %v8732_v15  ;;  %v10758_v44 = vmul.f32 -1.442695, %v16717_v43  ;;  %v8350_v26 = vadd.f32 %v8349_v31, %v8229_v36  ;;  %v10744_v15 = vld [vmem:[%s13698_s27 + $0xc0] sm:$0xff] }
 0xb96   : > { %v8438_v40 = vpop.f32.mrf.mxu3  ;;  %v8023_v16 = vadd.f32 %v16544_v7, %v7882_v30  ;;  %v8753_v7 = vand.u32 2147483647, %v16701_v14 }
 0xb97   : > { %v8737_v60 = vsel %vm8736_vm15, %v11200_v6, %v8733_v54  ;;  %11207 = vpow2.f32 %v10758_v44  ;;  %v8439_v52 = vadd.f32 %v8438_v40, %v8350_v26  ;;  %v8121_v6 = vadd.f32 %v8120_v46, %v8015_v4  ;;  %v19187_v54 = vld [vmem:[#allocation78_spill] sm:$0xff] }
 0xb98   : > { %v16724_v59 = vpop.eup %11203  ;;  %v8742_v51 = vsel %vm8739_vm1, %v8741_v63, %v8737_v60  ;;  %v7664_v44 = vadd.f32 %v16534_v19, %v19187_v54  ;;  %v8755_v4 = vand.u32 2147483648, %v16701_v14  ;;  %v8564_v60 = vmul.f32 %v16615_v27, %v16552_v1 }
 0xb99   : > { %v11206_v10 = vpop.eup %11205  ;;  %v8927_v41 = vmul.f32 %v8742_v51, %v16652_v42  ;;  %v8745_v28 = vmul.f32 %v16724_v59, %v16701_v14  ;;  %v8125_v48 = vpop.f32.mrf.mxu0  ;;  %v8578_v37 = vadd.f32 %v8562_v55, %v8439_v52  ;;  %vm8750_vm2 = vweird.f32 %v16724_v59 }
 0xb9a   : > { %v16733_v18 = vadd.f32 1.0, %v11206_v10  ;;  %v8234_v25 = vpop.f32.mrf.mxu1  ;;  %v8126_v49 = vadd.f32 %v8125_v48, %v8019_v8  ;;  %v7753_v40 = vadd.f32 %v16550_v9, %v7664_v44  ;;  %vm16766_vm4 = vmor %vm8749_vm3, %vm8750_vm2  ;;  %vm8754_vm6 = vcmp.eq.f32.partialorder %v8753_v7, 8.507059e+37 }
 0xb9b   : > { %v8746_v17 = vsub.f32 1.0, %v8745_v28  ;;  %v8235_v20 = vadd.f32 %v8234_v25, %v8121_v6  ;;  %v8353_v24 = vpop.f32.mrf.mxu2  ;;  %v8941_v62 = vpack.c.bf16 %v8927_v41, %v8926_v38  ;;  %v16740_v56 = vadd.f32 %v10743_v45, %v8578_v37 }
 0xb9c   : > { %11209 = vrcp.f32 %v16733_v18  ;;  %v8768_v10 = vand.u32 2147483647, %v16733_v18  ;;  %v8770_v38 = vand.u32 2147483648, %v16733_v18  ;;  %v7890_v48 = vadd.f32 %v16555_v39, %v7753_v40  ;;  %v19190_v40 = vld [vmem:[#allocation84_spill] sm:$0xff] }
 0xb9d   : > { %v11208_v42 = vpop.eup %11207  ;;  %v8354_v0 = vadd.f32 %v8353_v24, %v8235_v20  ;;  %10781 = vmatmul.msk.bf16.gmra.mxu0 %vm18334_vm0, %v8941_v62  ;;  %v8747_v46 = vmul.f32 %v16724_v59, %v8746_v17  ;;  %v10759_v2 = vmul.f32 -1.442695, %v16740_v56  ;;  %v8756_v37 = vor.u32 1.1754944e-38, %v8755_v4 }
 0xb9e   : > { %v16744_v61 = vadd.f32 1.0, %v11208_v42  ;;  %v8442_v33 = vpop.f32.mrf.mxu3  ;;  %vm8764_vm7 = vweird.f32 %v16733_v18  ;;  %v8771_v24 = vor.u32 1.1754944e-38, %v8770_v38  ;;  %v7757_v39 = vadd.f32 %v16565_v5, %v16548_v29 }
 0xb9f   : > { %v8443_v11 = vadd.f32 %v8442_v33, %v8354_v0  ;;  %v8748_v35 = vadd.f32 %v16724_v59, %v8747_v46  ;;  %vm8769_vm9 = vcmp.eq.f32.partialorder %v8768_v10, 8.507059e+37  ;;  %v8027_v5 = vadd.f32 %v16559_v47, %v7890_v48 }
 0xba0   : > { %11211 = vrcp.f32 %v16744_v61  ;;  %vm8779_vm11 = vweird.f32 %v16744_v61 }
 0xba1   : > { %11213 = vpow2.f32 %v10759_v2  ;;  %v8579_v31 = vadd.f32 %v8563_v22, %v8443_v11  ;;  %v8130_v58 = vpop.f32.mrf.mxu0  ;;  %v8752_v9 = vsel %vm16766_vm4, %v16724_v59, %v8748_v35  ;;  %v8527_v2 = vpop.permute.xlu2 %8526 }
 0xba2   : > { %v11210_v36 = vpop.eup %11209  ;;  %v8240_v50 = vpop.f32.mrf.mxu1  ;;  %v8757_v20 = vsel %vm8754_vm6, %v8756_v37, %v8752_v9  ;;  %v8131_v62 = vadd.f32 %v8130_v58, %v8023_v16 }
 0xba3   : > { %v8760_v23 = vmul.f32 %v11210_v36, %v16733_v18  ;;  %v16759_v63 = vadd.f32 %v10744_v15, %v8579_v31  ;;  %v8357_v26 = vpop.f32.mrf.mxu2  ;;  %v8241_v19 = vadd.f32 %v8240_v50, %v8126_v49  ;;  %vm8765_vm5 = vweird.f32 %v11210_v36 }
 0xba4   : > { %vm8766_vm8 = vmor %vm8764_vm7, %vm8765_vm5  ;;  %v8928_v11 = vmul.f32 %v8757_v20, %v16671_v13  ;;  %v7672_v13 = vadd.f32 %v16563_v12, %v16405_v53 }
 0xba5   : > { %v8761_v55 = vsub.f32 1.0, %v8760_v23  ;;  %v10760_v51 = vmul.f32 -1.442695, %v16759_v63  ;;  %v8358_v1 = vadd.f32 %v8357_v26, %v8241_v19  ;;  %v8783_v23 = vand.u32 2147483647, %v16744_v61  ;;  %v8532_v19 = vpop.permute.xlu0 %8531 }
 0xba6   : > { %v16772_v52 = vpop.eup %11211  ;;  %v8446_v41 = vpop.f32.mrf.mxu3  ;;  %v8785_v26 = vand.u32 2147483648, %v16744_v61  ;;  %v8566_v48 = vmul.f32 %v16615_v27, %v8532_v19 }
 0xba7   : > { %v11214_v28 = vpop.eup %11213  ;;  %v8762_v6 = vmul.f32 %v11210_v36, %v8761_v55  ;;  %v8775_v14 = vmul.f32 %v16772_v52, %v16744_v61  ;;  %11215 = vpow2.f32 %v10760_v51  ;;  %v8447_v59 = vadd.f32 %v8446_v41, %v8358_v1  ;;  %v19191_v51 = vld [vmem:[#allocation2_spill] sm:$0xff] }
 0xba8   : > { %v16782_v45 = vadd.f32 1.0, %v11214_v28  ;;  %vm8780_vm10 = vweird.f32 %v16772_v52  ;;  %v7761_v9 = vadd.f32 %v19191_v51, %v7672_v13  ;;  %vm8784_vm14 = vcmp.eq.f32.partialorder %v8783_v23, 8.507059e+37  ;;  %v8537_v13 = vpop.permute.xlu1 %8536  ;;  %v19198_v23 = vld [vmem:[#allocation4_spill] sm:$0xff] }
 0xba9   : > { %v8763_v25 = vadd.f32 %v11210_v36, %v8762_v6  ;;  %v8776_v21 = vsub.f32 1.0, %v8775_v14  ;;  %v8135_v17 = vpop.f32.mrf.mxu0  ;;  %v8580_v46 = vadd.f32 %v8564_v60, %v8447_v59  ;;  %vm16815_vm12 = vmor %vm8779_vm11, %vm8780_vm10  ;;  %v8786_v37 = vor.u32 1.1754944e-38, %v8785_v26 }
 0xbaa   : > { %11217 = vrcp.f32 %v16782_v45  ;;  %v8246_v42 = vpop.f32.mrf.mxu1  ;;  %v8136_v16 = vadd.f32 %v8135_v17, %v8027_v5  ;;  %v8798_v38 = vand.u32 2147483647, %v16782_v45  ;;  %v8800_v1 = vand.u32 2147483648, %v16782_v45  ;;  %v19196_v5 = vld [vmem:[#allocation3_spill] sm:$0xff] }
 0xbab   : > { %v8767_v0 = vsel %vm8766_vm8, %v11210_v36, %v8763_v25  ;;  %v8361_v33 = vpop.f32.mrf.mxu2  ;;  %v8247_v22 = vadd.f32 %v8246_v42, %v8131_v62  ;;  %v8777_v15 = vmul.f32 %v16772_v52, %v8776_v21  ;;  %v16792_v31 = vadd.f32 %v10745_v34, %v8580_v46 }
 0xbac   : > { %v8772_v30 = vsel %vm8769_vm9, %v8771_v24, %v8767_v0  ;;  %v7898_v36 = vadd.f32 %v16568_v32, %v7757_v39  ;;  %vm8794_vm15 = vweird.f32 %v16782_v45  ;;  %vm8799_vm2 = vcmp.eq.f32.partialorder %v8798_v38, 8.507059e+37 }
 0xbad   : > { %v11216_v18 = vpop.eup %11215  ;;  %v8929_v8 = vmul.f32 %v8772_v30, %v16693_v57  ;;  %v8362_v54 = vadd.f32 %v8361_v33, %v8247_v22  ;;  %v10761_v44 = vmul.f32 -1.442695, %v16792_v31  ;;  %v8565_v57 = vmul.f32 %v16615_v27, %v8527_v2  ;;  %v10747_v33 = vld [vmem:[%s13698_s27 + $0xd8] sm:$0xff]  ;;  %v19194_v2 = vld [vmem:[#allocation88_spill] sm:$0xff] }
 0xbae   : > { %v16794_v58 = vadd.f32 1.0, %v11216_v18  ;;  %v8450_v29 = vpop.f32.mrf.mxu3  ;;  %v8778_v50 = vadd.f32 %v16772_v52, %v8777_v15  ;;  %v8031_v4 = vadd.f32 %v19190_v40, %v7898_v36  ;;  %v8801_v62 = vor.u32 1.1754944e-38, %v8800_v1 }
 0xbaf   : > { %v8942_v35 = vpack.c.bf16 %v8929_v8, %v8928_v11  ;;  %v8451_v53 = vadd.f32 %v8450_v29, %v8362_v54  ;;  %v19195_v11 = vld [vmem:[#allocation6_spill] sm:$0xff]  ;;  %v7906_v36 = vadd.f32 %v19196_v5, %v7761_v9 }
 0xbb0   : > { %v11218_v49 = vpop.eup %11217  ;;  %11219 = vrcp.f32 %v16794_v58  ;;  %v8782_v61 = vsel %vm16815_vm12, %v16772_v52, %v8778_v50  ;;  %v7765_v8 = vadd.f32 %v19195_v11, %v19194_v2  ;;  %v8815_v19 = vand.u32 2147483648, %v16794_v58 }
 0xbb1   : > { %v8790_v47 = vmul.f32 %v11218_v49, %v16782_v45  ;;  %10782 = vmatmul.msk.bf16.gmra.mxu0 %vm18334_vm0, %v8942_v35  ;;  %v8140_v32 = vpop.f32.mrf.mxu0  ;;  %11221 = vpow2.f32 %v10761_v44  ;;  %v8581_v41 = vadd.f32 %v8565_v57, %v8451_v53  ;;  %vm8795_vm13 = vweird.f32 %v11218_v49 }
 0xbb2   : > { %v8252_v12 = vpop.f32.mrf.mxu1  ;;  %v8787_v24 = vsel %vm8784_vm14, %v8786_v37, %v8782_v61  ;;  %vm8796_vm1 = vmor %vm8794_vm15, %vm8795_vm13  ;;  %v8141_v45 = vadd.f32 %v8140_v32, %v8031_v4  ;;  %v8035_v26 = vadd.f32 %v19198_v23, %v7906_v36  ;;  %v8567_v53 = vmul.f32 %v16615_v27, %v8537_v13  ;;  %v8547_v23 = vpop.permute.xlu0 %8546 }
 0xbb3   : > { %v8791_v60 = vsub.f32 1.0, %v8790_v47  ;;  %v8253_v7 = vadd.f32 %v8252_v12, %v8136_v16  ;;  %v8365_v55 = vpop.f32.mrf.mxu2  ;;  %v16827_v59 = vadd.f32 %v10746_v3, %v8581_v41  ;;  %v8930_v15 = vmul.f32 %v8787_v24, %v16717_v43  ;;  %v19197_v43 = vld [vmem:[#allocation7_spill] sm:$0xff]  ;;  %v10748_v3 = vld [vmem:[%s13698_s27 + $0xe0] sm:$0xff]  ;;  %v19201_v41 = vld [vmem:[#allocation8_spill] sm:$0xff] }
 0xbb4   : > { %v7914_v32 = vadd.f32 %v19197_v43, %v7765_v8  ;;  %vm8809_vm4 = vweird.f32 %v16794_v58 }
 0xbb5   : > { %v8792_v28 = vmul.f32 %v11218_v49, %v8791_v60  ;;  %v8366_v6 = vadd.f32 %v8365_v55, %v8253_v7  ;;  %v10762_v34 = vmul.f32 -1.442695, %v16827_v59  ;;  %v19199_v7 = vld [vmem:[#allocation81_spill] sm:$0xff] }
 0xbb6   : > { %v16824_v14 = vpop.eup %11219  ;;  %v8454_v25 = vpop.f32.mrf.mxu3  ;;  %v19200_v55 = vld [vmem:[#allocation5_spill] sm:$0xff]  ;;  %v8039_v61 = vadd.f32 %v19201_v41, %v7914_v32 }
 0xbb7   : > { %v8793_v21 = vadd.f32 %v11218_v49, %v8792_v28  ;;  %v8805_v17 = vmul.f32 %v16824_v14, %v16794_v58  ;;  %v8455_v52 = vadd.f32 %v8454_v25, %v8366_v6  ;;  %v11222_v20 = vpop.eup %11221  ;;  %11223 = vpow2.f32 %v10762_v34  ;;  %v8542_v25 = vpop.permute.xlu2 %8541 }
 0xbb8   : > { %v16833_v0 = vadd.f32 1.0, %v11222_v20  ;;  %vm8810_vm3 = vweird.f32 %v16824_v14  ;;  %v7680_v51 = vadd.f32 %v19200_v55, %v19199_v7  ;;  %v8813_v28 = vand.u32 2147483647, %v16794_v58 }
 0xbb9   : > { %v8797_v42 = vsel %vm8796_vm1, %v11218_v49, %v8793_v21  ;;  %v8806_v39 = vsub.f32 1.0, %v8805_v17  ;;  %v8582_v46 = vadd.f32 %v8566_v48, %v8455_v52  ;;  %v8145_v22 = vpop.f32.mrf.mxu0  ;;  %v19202_v48 = vld [vmem:[#allocation9_spill] sm:$0xff]  ;;  %vm16866_vm5 = vmor %vm8809_vm4, %vm8810_vm3  ;;  %v10750_v21 = vld [vmem:[%s13698_s27 + $0xf0] sm:$0xff] }
 0xbba   : > { %v8802_v30 = vsel %vm8799_vm2, %v8801_v62, %v8797_v42  ;;  %v8258_v18 = vpop.f32.mrf.mxu1  ;;  %11225 = vrcp.f32 %v16833_v0  ;;  %v8146_v10 = vadd.f32 %v8145_v22, %v8035_v26  ;;  %v7769_v37 = vadd.f32 %v19202_v48, %v7680_v51 }
 0xbbb   : > { %v8931_v54 = vmul.f32 %v8802_v30, %v16740_v56  ;;  %v8369_v29 = vpop.f32.mrf.mxu2  ;;  %v16842_v44 = vadd.f32 %v10747_v33, %v8582_v46  ;;  %v8259_v35 = vadd.f32 %v8258_v18, %v8141_v45  ;;  %v8807_v49 = vmul.f32 %v16824_v14, %v8806_v39 }
 0xbbc   : > { %v8816_v62 = vor.u32 1.1754944e-38, %v8815_v19  ;;  %v8828_v34 = vand.u32 2147483647, %v16833_v0  ;;  %v8830_v42 = vand.u32 2147483648, %v16833_v0  ;;  %v8568_v22 = vmul.f32 %v16615_v27, %v8542_v25 }
 0xbbd   : > { %v8943_v57 = vpack.c.bf16 %v8931_v54, %v8930_v15  ;;  %v10763_v50 = vmul.f32 -1.442695, %v16842_v44  ;;  %v8370_v47 = vadd.f32 %v8369_v29, %v8259_v35  ;;  %v11224_v56 = vpop.eup %11223  ;;  %v8808_v4 = vadd.f32 %v16824_v14, %v8807_v49  ;;  %v10749_v54 = vld [vmem:[%s13698_s27 + $0xe8] sm:$0xff]  ;;  %v19205_v49 = vld [vmem:[#allocation10_spill] sm:$0xff] }
 0xbbe   : > { %v8458_v16 = vpop.f32.mrf.mxu3  ;;  %v16852_v60 = vadd.f32 1.0, %v11224_v56  ;;  %vm8814_vm7 = vcmp.eq.f32.partialorder %v8813_v28, 8.507059e+37  ;;  %vm8824_vm8 = vweird.f32 %v16833_v0  ;;  %vm8829_vm10 = vcmp.eq.f32.partialorder %v8828_v34, 8.507059e+37 }
 0xbbf   : > { %11227 = vpow2.f32 %v10763_v50  ;;  %v8459_v12 = vadd.f32 %v8458_v16, %v8370_v47  ;;  %v8812_v58 = vsel %vm16866_vm5, %v16824_v14, %v8808_v4  ;;  %v8831_v15 = vor.u32 1.1754944e-38, %v8830_v42 }
 0xbc0   : > { %v11226_v40 = vpop.eup %11225  ;;  %11229 = vrcp.f32 %v16852_v60  ;;  %v8817_v14 = vsel %vm8814_vm7, %v8816_v62, %v8812_v58  ;;  %v7922_v13 = vadd.f32 %v19205_v49, %v7769_v37  ;;  %vm8839_vm12 = vweird.f32 %v16852_v60 }
 0xbc1   : > { %10783 = vmatmul.msk.bf16.gmra.mxu0 %vm18334_vm0, %v8943_v57  ;;  %v8820_v9 = vmul.f32 %v11226_v40, %v16833_v0  ;;  %v8583_v38 = vadd.f32 %v8567_v53, %v8459_v12  ;;  %v8150_v20 = vpop.f32.mrf.mxu0  ;;  %vm8825_vm6 = vweird.f32 %v11226_v40  ;;  %v8932_v57 = vmul.f32 %v8817_v14, %v16759_v63  ;;  %v19206_v63 = vld [vmem:[#allocation14_spill] sm:$0xff] }
 0xbc2   : > { %v8264_v1 = vpop.f32.mrf.mxu1  ;;  %vm8826_vm9 = vmor %vm8824_vm8, %vm8825_vm6  ;;  %v8151_v36 = vadd.f32 %v8150_v20, %v8039_v61  ;;  %v8043_v55 = vadd.f32 %v19206_v63, %v7922_v13  ;;  %v8843_v41 = vand.u32 2147483647, %v16852_v60 }
 0xbc3   : > { %v8373_v6 = vpop.f32.mrf.mxu2  ;;  %v8821_v17 = vsub.f32 1.0, %v8820_v9  ;;  %v16870_v52 = vadd.f32 %v10748_v3, %v8583_v38  ;;  %v8265_v24 = vadd.f32 %v8264_v1, %v8146_v10  ;;  %v8845_v10 = vand.u32 2147483648, %v16852_v60 }
 0xbc4   : > { %v8569_v38 = vmul.f32 %v16615_v27, %v8547_v23  ;;  %vm8844_vm15 = vcmp.eq.f32.partialorder %v8843_v41, 8.507059e+37 }
 0xbc5   : > { %v11228_v39 = vpop.eup %11227  ;;  %v8822_v46 = vmul.f32 %v11226_v40, %v8821_v17  ;;  %v10764_v33 = vmul.f32 -1.442695, %v16870_v52  ;;  %v8374_v30 = vadd.f32 %v8373_v6, %v8265_v24  ;;  %v8846_v62 = vor.u32 1.1754944e-38, %v8845_v10 }
 0xbc6   : > { %v8462_v45 = vpop.f32.mrf.mxu3  ;;  %v16880_v18 = vadd.f32 1.0, %v11228_v39  ;;  %v16882_v8 = vpop.eup %11229 }
 0xbc7   : > { %v8823_v2 = vadd.f32 %v11226_v40, %v8822_v46  ;;  %11231 = vpow2.f32 %v10764_v33  ;;  %v8463_v11 = vadd.f32 %v8462_v45, %v8374_v30  ;;  %v8835_v5 = vmul.f32 %v16882_v8, %v16852_v60  ;;  %v8552_v46 = vpop.permute.xlu1 %8551 }
 0xbc8   : > { %11233 = vrcp.f32 %v16880_v18  ;;  %vm8840_vm11 = vweird.f32 %v16882_v8  ;;  %v8858_v37 = vand.u32 2147483647, %v16880_v18  ;;  %v8860_v25 = vand.u32 2147483648, %v16880_v18 }
 0xbc9   : > { %v8827_v29 = vsel %vm8826_vm9, %v11226_v40, %v8823_v2  ;;  %v8584_v0 = vadd.f32 %v8568_v22, %v8463_v11  ;;  %v8836_v43 = vsub.f32 1.0, %v8835_v5  ;;  %v8155_v40 = vpop.f32.mrf.mxu0  ;;  %vm16907_vm13 = vmor %vm8839_vm12, %vm8840_vm11  ;;  %vm8854_vm1 = vweird.f32 %v16880_v18 }
 0xbca   : > { %v8270_v35 = vpop.f32.mrf.mxu1  ;;  %v8832_v50 = vsel %vm8829_vm10, %v8831_v15, %v8827_v29  ;;  %v8156_v1 = vadd.f32 %v8155_v40, %v8043_v55  ;;  %v8861_v14 = vor.u32 1.1754944e-38, %v8860_v25  ;;  %vm8859_vm3 = vcmp.eq.f32.partialorder %v8858_v37, 8.507059e+37 }
 0xbcb   : > { %v8377_v47 = vpop.f32.mrf.mxu2  ;;  %v8933_v16 = vmul.f32 %v8832_v50, %v16792_v31  ;;  %v16891_v32 = vadd.f32 %v10749_v54, %v8584_v0  ;;  %v8271_v56 = vadd.f32 %v8270_v35, %v8151_v36  ;;  %v8837_v53 = vmul.f32 %v16882_v8, %v8836_v43  ;;  %v10751_v35 = vld [vmem:[%s13698_s27 + $0xf8] sm:$0xff] }
 0xbcd   : > { %v11232_v26 = vpop.eup %11231  ;;  %v10765_v12 = vmul.f32 -1.442695, %v16891_v32  ;;  %v8378_v4 = vadd.f32 %v8377_v47, %v8271_v56  ;;  %v8944_v19 = vpack.c.bf16 %v8933_v16, %v8932_v57  ;;  %v8838_v31 = vadd.f32 %v16882_v8, %v8837_v53 }
 0xbce   : > { %v8466_v3 = vpop.f32.mrf.mxu3  ;;  %v11234_v7 = vpop.eup %11233  ;;  %v16896_v51 = vadd.f32 1.0, %v11232_v26 }
 0xbcf   : > { %v8850_v9 = vmul.f32 %v11234_v7, %v16880_v18  ;;  %11235 = vpow2.f32 %v10765_v12  ;;  %v8467_v28 = vadd.f32 %v8466_v3, %v8378_v4  ;;  %v8842_v24 = vsel %vm16907_vm13, %v16882_v8, %v8838_v31 }
 0xbd0   : > { %11237 = vrcp.f32 %v16896_v51  ;;  %vm8855_vm14 = vweird.f32 %v11234_v7  ;;  %v8847_v22 = vsel %vm8844_vm15, %v8846_v62, %v8842_v24  ;;  %v8570_v18 = vmul.f32 %v16615_v27, %v8552_v46 }
 0xbd1   : > { %10784 = vmatmul.msk.bf16.gmra.mxu0 %vm18334_vm0, %v8944_v19  ;;  %v8851_v61 = vsub.f32 1.0, %v8850_v9  ;;  %v8585_v60 = vadd.f32 %v8569_v38, %v8467_v28  ;;  %vm8856_vm2 = vmor %vm8854_vm1, %vm8855_vm14  ;;  %v8934_v5 = vmul.f32 %v8847_v22, %v16827_v59  ;;  %v8875_v23 = vand.u32 2147483648, %v16896_v51 }
 0xbd2   : > { %v8276_v6 = vpop.f32.mrf.mxu1  ;;  %vm8869_vm5 = vweird.f32 %v16896_v51 }
 0xbd3   : > { %v8277_v17 = vadd.f32 %v8276_v6, %v8156_v1  ;;  %v8381_v20 = vpop.f32.mrf.mxu2  ;;  %v8852_v58 = vmul.f32 %v11234_v7, %v8851_v61  ;;  %v16918_v33 = vadd.f32 %v10750_v21, %v8585_v60  ;;  %v8876_v19 = vor.u32 1.1754944e-38, %v8875_v23 }
 0xbd5   : > { %v8382_v34 = vadd.f32 %v8381_v20, %v8277_v17  ;;  %v11236_v42 = vpop.eup %11235  ;;  %v8853_v39 = vadd.f32 %v11234_v7, %v8852_v58  ;;  %v10766_v54 = vmul.f32 -1.442695, %v16918_v33 }
 0xbd6   : > { %v8470_v30 = vpop.f32.mrf.mxu3  ;;  %v11238_v45 = vpop.eup %11237  ;;  %v8681_v2 = vadd.f32 1.0, %v11236_v42 }
 0xbd7   : > { %v8471_v11 = vadd.f32 %v8470_v30, %v8382_v34  ;;  %v8857_v8 = vsel %vm8856_vm2, %v11234_v7, %v8853_v39  ;;  %v8865_v15 = vmul.f32 %v11238_v45, %v16896_v51  ;;  %vm8870_vm4 = vweird.f32 %v11238_v45 }
 0xbd8   : > { %v8862_v29 = vsel %vm8859_vm3, %v8861_v14, %v8857_v8  ;;  %11239 = vrcp.f32 %v8681_v2  ;;  %vm8871_vm6 = vmor %vm8869_vm5, %vm8870_vm4  ;;  %v8890_v53 = vand.u32 2147483648, %v8681_v2  ;;  %v8888_v4 = vand.u32 2147483647, %v8681_v2 }
 0xbd9   : > { %v8935_v36 = vmul.f32 %v8862_v29, %v16842_v44  ;;  %v8866_v0 = vsub.f32 1.0, %v8865_v15  ;;  %11241 = vpow2.f32 %v10766_v54  ;;  %v8586_v49 = vadd.f32 %v8570_v18, %v8471_v11 }
 0xbda   : > { %v8873_v44 = vand.u32 2147483647, %v16896_v51  ;;  %vm8884_vm9 = vweird.f32 %v8681_v2  ;;  %v8891_v55 = vor.u32 1.1754944e-38, %v8890_v53  ;;  %vm8889_vm11 = vcmp.eq.f32.partialorder %v8888_v4, 8.507059e+37 }
 0xbdb   : > { %v8867_v13 = vmul.f32 %v11238_v45, %v8866_v0  ;;  %v8945_v57 = vpack.c.bf16 %v8935_v36, %v8934_v5  ;;  %v16926_v50 = vadd.f32 %v10751_v35, %v8586_v49  ;;  %v16942_v36 = vld [vmem:[%s17898_s8 + $0x8] ss:$0 sm:$0xff] }
 0xbdc   : > { %vm8874_vm8 = vcmp.eq.f32.partialorder %v8873_v44, 8.507059e+37 }
 0xbdd   : > { %v10767_v16 = vmul.f32 -1.442695, %v16926_v50  ;;  %v8868_v56 = vadd.f32 %v11238_v45, %v8867_v13 }
 0xbde   : > { %v11240_v47 = vpop.eup %11239 }
 0xbdf   : > { %v11242_v43 = vpop.eup %11241  ;;  %v8880_v27 = vmul.f32 %v11240_v47, %v8681_v2  ;;  %11243 = vpow2.f32 %v10767_v16  ;;  %v8872_v12 = vsel %vm8871_vm6, %v11238_v45, %v8868_v56  ;;  %vm8885_vm7 = vweird.f32 %v11240_v47 }
 0xbe0   : > { %v8682_v59 = vadd.f32 1.0, %v11242_v43  ;;  %v8877_v63 = vsel %vm8874_vm8, %v8876_v19, %v8872_v12  ;;  %vm8886_vm10 = vmor %vm8884_vm9, %vm8885_vm7 }
 0xbe1   : > { %10785 = vmatmul.msk.bf16.gmra.mxu0 %vm18334_vm0, %v8945_v57  ;;  %v8881_v26 = vsub.f32 1.0, %v8880_v27  ;;  %v8936_v38 = vmul.f32 %v8877_v63, %v16870_v52 }
 0xbe2   : > { %11245 = vrcp.f32 %v8682_v59  ;;  %v8905_v21 = vand.u32 2147483648, %v8682_v59  ;;  %vm8899_vm13 = vweird.f32 %v8682_v59  ;;  %v8903_v17 = vand.u32 2147483647, %v8682_v59 }
 0xbe3   : > { %v8882_v40 = vmul.f32 %v11240_v47, %v8881_v26 }
 0xbe4   : > { %v8906_v60 = vor.u32 1.1754944e-38, %v8905_v21  ;;  %vm8904_vm1 = vcmp.eq.f32.partialorder %v8903_v17, 8.507059e+37 }
 0xbe5   : > { %v8883_v3 = vadd.f32 %v11240_v47, %v8882_v40  ;;  %v11244_v7 = vpop.eup %11243 }
 0xbe6   : > { %v8683_v9 = vadd.f32 1.0, %v11244_v7 }
 0xbe7   : > { %v8887_v31 = vsel %vm8886_vm10, %v11240_v47, %v8883_v3 }
 0xbe8   : > { %v11246_v51 = vpop.eup %11245  ;;  %v8892_v10 = vsel %vm8889_vm11, %v8891_v55, %v8887_v31  ;;  %11247 = vrcp.f32 %v8683_v9  ;;  %v8920_v24 = vand.u32 2147483648, %v8683_v9  ;;  %vm8914_vm2 = vweird.f32 %v8683_v9 }
 0xbe9   : > { %v8937_v1 = vmul.f32 %v8892_v10, %v16891_v32  ;;  %v8895_v41 = vmul.f32 %v11246_v51, %v8682_v59  ;;  %vm8900_vm12 = vweird.f32 %v11246_v51  ;;  %v8918_v32 = vand.u32 2147483647, %v8683_v9 }
 0xbea   : > { %vm8901_vm14 = vmor %vm8899_vm13, %vm8900_vm12  ;;  %v8921_v42 = vor.u32 1.1754944e-38, %v8920_v24 }
 0xbeb   : > { %v8896_v61 = vsub.f32 1.0, %v8895_v41  ;;  %v8946_v28 = vpack.c.bf16 %v8937_v1, %v8936_v38  ;;  %vm8919_vm4 = vcmp.eq.f32.partialorder %v8918_v32, 8.507059e+37 }
 0xbed   : > { %v8897_v6 = vmul.f32 %v11246_v51, %v8896_v61 }
 0xbee   : > { %v11248_v48 = vpop.eup %11247 }
 0xbef   : > { %v8898_v37 = vadd.f32 %v11246_v51, %v8897_v6  ;;  %v8910_v25 = vmul.f32 %v11248_v48, %v8683_v9  ;;  %vm8915_vm15 = vweird.f32 %v11248_v48 }
 0xbf0   : > { %vm8916_vm3 = vmor %vm8914_vm2, %vm8915_vm15 }
 0xbf1   : > { %10786 = vmatmul.msk.bf16.gmra.mxu0 %vm18334_vm0, %v8946_v28  ;;  %v8911_v20 = vsub.f32 1.0, %v8910_v25  ;;  %v8902_v52 = vsel %vm8901_vm14, %v11246_v51, %v8898_v37 }
 0xbf2   : > { %v8907_v34 = vsel %vm8904_vm1, %v8906_v60, %v8902_v52 }
 0xbf3   : > { %v8912_v58 = vmul.f32 %v11248_v48, %v8911_v20  ;;  %v8938_v30 = vmul.f32 %v8907_v34, %v16918_v33 }
 0xbf5   : > { %v8913_v62 = vadd.f32 %v11248_v48, %v8912_v58 }
 0xbf7   : > { %v8917_v39 = vsel %vm8916_vm3, %v11248_v48, %v8913_v62 }
 0xbf8   : > { %v8922_v46 = vsel %vm8919_vm4, %v8921_v42, %v8917_v39 }
 0xbf9   : > { %v8939_v45 = vmul.f32 %v8922_v46, %v16926_v50 }
 0xbfb   : > { %v8947_v22 = vpack.c.bf16 %v8939_v45, %v8938_v30 }
 0xc01   : > { %10787 = vmatmul.msk.bf16.gmra.mxu0 %vm18334_vm0, %v8947_v22 }
 0xc0a   : > { %v9000_v14 = vpop.f32.mrf.mxu0 }
 0xc0b   : > { %v16945_v0 = vadd.f32 %v16942_v36, %v9000_v14 }
 0xc0d   : > { %19209 = vst [vmem:[#allocation11_spill] sm:$0xff] %v16945_v0  ;;  %v10788_v13 = vmul.f32 -1.442695, %v16945_v0 }
 0xc0f   : > { %11249 = vpow2.f32 %v10788_v13 }
 0xc12   : > { %v9002_v2 = vpop.f32.mrf.mxu0 }
 0xc13   : > { %v16948_v35 = vadd.f32 %v16942_v36, %v9002_v2 }
 0xc15   : > { %19210 = vst [vmem:[#allocation12_spill] sm:$0xff] %v16948_v35  ;;  %v10789_v47 = vmul.f32 -1.442695, %v16948_v35  ;;  %v11250_v59 = vpop.eup %11249 }
 0xc16   : > { %v16967_v12 = vadd.f32 1.0, %v11250_v59 }
 0xc17   : > { %11251 = vpow2.f32 %v10789_v47 }
 0xc1a   : > { %v9005_v11 = vpop.f32.mrf.mxu0 }
 0xc1b   : > { %v16951_v49 = vadd.f32 %v16942_v36, %v9005_v11 }
 0xc1d   : > { %19211 = vst [vmem:[#allocation16_spill] sm:$0xff] %v16951_v49  ;;  %v10790_v16 = vmul.f32 -1.442695, %v16951_v49  ;;  %v11252_v26 = vpop.eup %11251 }
 0xc1e   : > { %v16973_v3 = vadd.f32 1.0, %v11252_v26 }
 0xc1f   : > { %11253 = vpow2.f32 %v10790_v16 }
 0xc22   : > { %v9007_v8 = vpop.f32.mrf.mxu0 }
 0xc23   : > { %v16955_v57 = vadd.f32 %v16942_v36, %v9007_v8 }
 0xc25   : > { %19212 = vst [vmem:[#allocation21_spill] sm:$0xff] %v16955_v57  ;;  %v10791_v43 = vmul.f32 -1.442695, %v16955_v57  ;;  %v11254_v53 = vpop.eup %11253 }
 0xc26   : > { %v16978_v63 = vadd.f32 1.0, %v11254_v53 }
 0xc27   : > { %11255 = vpow2.f32 %v10791_v43 }
 0xc2d   : > { %v11256_v40 = vpop.eup %11255 }
 0xc2e   : > { %v9010_v15 = vpop.f32.mrf.mxu0  ;;  %v16984_v31 = vadd.f32 1.0, %v11256_v40 }
 0xc2f   : > { %v16961_v56 = vadd.f32 %v16942_v36, %v9010_v15 }
 0xc31   : > { %19213 = vst [vmem:[#allocation17_spill] sm:$0xff] %v16961_v56  ;;  %v10792_v27 = vmul.f32 -1.442695, %v16961_v56 }
 0xc33   : > { %11257 = vpow2.f32 %v10792_v27 }
 0xc34   : > { %11259 = vrcp.f32 %v16967_v12 }
 0xc36   : > { %v9012_v54 = vpop.f32.mrf.mxu0 }
 0xc37   : > { %v16965_v44 = vadd.f32 %v16942_v36, %v9012_v54 }
 0xc39   : > { %19214 = vst [vmem:[#allocation18_spill] sm:$0xff] %v16965_v44  ;;  %v10793_v4 = vmul.f32 -1.442695, %v16965_v44  ;;  %v11258_v51 = vpop.eup %11257 }
 0xc3a   : > { %v17001_v6 = vadd.f32 1.0, %v11258_v51  ;;  %v17007_v25 = vpop.eup %11259 }
 0xc3b   : > { %11261 = vpow2.f32 %v10793_v4  ;;  %v9105_v22 = vmul.f32 %v17007_v25, %v16967_v12 }
 0xc3c   : > { %11263 = vrcp.f32 %v16973_v3 }
 0xc3d   : > { %11265 = vrcp.f32 %v16978_v63  ;;  %v9106_v13 = vsub.f32 1.0, %v9105_v22 }
 0xc3e   : > { %v9015_v29 = vpop.f32.mrf.mxu0  ;;  %11267 = vrcp.f32 %v16984_v31 }
 0xc3f   : > { %v16971_v19 = vadd.f32 %v16942_v36, %v9015_v29 }
 0xc41   : > { %19215 = vst [vmem:[#allocation22_spill] sm:$0xff] %v16971_v19  ;;  %v10794_v10 = vmul.f32 -1.442695, %v16971_v19  ;;  %v11262_v17 = vpop.eup %11261 }
 0xc42   : > { %v17011_v24 = vpop.eup %11263  ;;  %v17022_v34 = vadd.f32 1.0, %v11262_v17 }
 0xc43   : > { %11269 = vpow2.f32 %v10794_v10  ;;  %v17015_v32 = vpop.eup %11265  ;;  %v9120_v11 = vmul.f32 %v17011_v24, %v16973_v3 }
 0xc44   : > { %v17020_v62 = vpop.eup %11267 }
 0xc45   : > { %v9121_v43 = vsub.f32 1.0, %v9120_v11  ;;  %v9150_v59 = vmul.f32 %v17020_v62, %v16984_v31 }
 0xc46   : > { %v9017_v18 = vpop.f32.mrf.mxu0 }
 0xc47   : > { %v16988_v38 = vadd.f32 %v16942_v36, %v9017_v18  ;;  %v9151_v17 = vsub.f32 1.0, %v9150_v59 }
 0xc49   : > { %v10795_v37 = vmul.f32 -1.442695, %v16988_v38  ;;  %v11270_v42 = vpop.eup %11269 }
 0xc4a   : > { %v17030_v14 = vadd.f32 1.0, %v11270_v42 }
 0xc4c   : > { %vm9199_vm0 = vweird.f32 %v17030_v14 }
 0xc4e   : > { %v9020_v5 = vpop.f32.mrf.mxu0 }
 0xc4f   : > { %v16976_v7 = vadd.f32 %v16942_v36, %v9020_v5 }
 0xc51   : > { %v10796_v1 = vmul.f32 -1.442695, %v16976_v7 }
 0xc53   : > { %11271 = vpow2.f32 %v10796_v1 }
 0xc56   : > { %v9022_v33 = vpop.f32.mrf.mxu0 }
 0xc57   : > { %v16981_v55 = vadd.f32 %v16942_v36, %v9022_v33 }
 0xc59   : > { %v10797_v61 = vmul.f32 -1.442695, %v16981_v55  ;;  %v11272_v46 = vpop.eup %11271 }
 0xc5a   : > { %v17034_v8 = vadd.f32 1.0, %v11272_v46 }
 0xc5b   : > { %11273 = vpow2.f32 %v10797_v61 }
 0xc5c   : > { %11275 = vrcp.f32 %v17001_v6 }
 0xc5d   : > { %11277 = vpow2.f32 %v10795_v37 }
 0xc5e   : > { %v9025_v50 = vpop.f32.mrf.mxu0 }
 0xc5f   : > { %v16993_v41 = vadd.f32 %v16942_v36, %v9025_v50  ;;  %v9135_v50 = vmul.f32 %v17015_v32, %v16978_v63 }
 0xc61   : > { %v10798_v21 = vmul.f32 -1.442695, %v16993_v41  ;;  %v11274_v30 = vpop.eup %11273  ;;  %v9136_v51 = vsub.f32 1.0, %v9135_v50  ;;  %v9152_v50 = vmul.f32 %v17020_v62, %v9151_v17 }
 0xc62   : > { %v17025_v45 = vpop.eup %11275  ;;  %v17036_v54 = vadd.f32 1.0, %v11274_v30 }
 0xc63   : > { %11279 = vpow2.f32 %v10798_v21  ;;  %v11278_v2 = vpop.eup %11277  ;;  %v9165_v40 = vmul.f32 %v17025_v45, %v17001_v6  ;;  %v9122_v21 = vmul.f32 %v17011_v24, %v9121_v43 }
 0xc64   : > { %v17044_v47 = vadd.f32 1.0, %v11278_v2  ;;  %v9137_v2 = vmul.f32 %v17015_v32, %v9136_v51  ;;  %vm9244_vm2 = vweird.f32 %v17036_v54 }
 0xc65   : > { %v9166_v42 = vsub.f32 1.0, %v9165_v40 }
 0xc66   : > { %v9027_v23 = vpop.f32.mrf.mxu0 }
 0xc67   : > { %v16998_v28 = vadd.f32 %v16942_v36, %v9027_v23  ;;  %v9167_v59 = vmul.f32 %v17025_v45, %v9166_v42 }
 0xc69   : > { %v10799_v20 = vmul.f32 -1.442695, %v16998_v28  ;;  %v11280_v15 = vpop.eup %11279  ;;  %v17132_v17 = vadd.f32 %v17025_v45, %v9167_v59 }
 0xc6a   : > { %v17053_v26 = vadd.f32 1.0, %v11280_v15 }
 0xc6b   : > { %11281 = vpow2.f32 %v10799_v20 }
 0xc6c   : > { %vm9259_vm10 = vweird.f32 %v17053_v26 }
 0xc6e   : > { %v9030_v9 = vpop.f32.mrf.mxu0 }
 0xc6f   : > { %v17004_v48 = vadd.f32 %v16942_v36, %v9030_v9  ;;  %v9107_v9 = vmul.f32 %v17007_v25, %v9106_v13  ;;  %v17094_v13 = vadd.f32 %v17011_v24, %v9122_v21 }
 0xc71   : > { %v10800_v52 = vmul.f32 -1.442695, %v17004_v48  ;;  %v11282_v18 = vpop.eup %11281  ;;  %v17083_v30 = vadd.f32 %v17007_v25, %v9107_v9  ;;  %19217 = vst [vmem:[#allocation23_spill] sm:$0xff] %v17094_v13 }
 0xc72   : > { %v17063_v10 = vadd.f32 1.0, %v11282_v18 }
 0xc73   : > { %11283 = vpow2.f32 %v10800_v52  ;;  %19216 = vst [vmem:[#allocation27_spill] sm:$0xff] %v17083_v30 }
 0xc74   : > { %vm9274_vm6 = vweird.f32 %v17063_v10 }
 0xc76   : > { %v9032_v58 = vpop.f32.mrf.mxu0 }
 0xc77   : > { %v17018_v60 = vadd.f32 %v16942_v36, %v9032_v58 }
 0xc79   : > { %v10801_v39 = vmul.f32 -1.442695, %v17018_v60  ;;  %v11284_v33 = vpop.eup %11283 }
 0xc7a   : > { %v17059_v4 = vadd.f32 1.0, %v11284_v33 }
 0xc7b   : > { %11285 = vpow2.f32 %v10801_v39 }
 0xc7c   : > { %11287 = vrcp.f32 %v17022_v34  ;;  %vm9289_vm13 = vweird.f32 %v17059_v4 }
 0xc7d   : > { %11289 = vrcp.f32 %v17030_v14 }
 0xc7e   : > { %v9035_v29 = vpop.f32.mrf.mxu0  ;;  %11291 = vrcp.f32 %v17034_v8 }
 0xc7f   : > { %v17039_v5 = vadd.f32 %v16942_v36, %v9035_v29  ;;  %11293 = vrcp.f32 %v17036_v54 }
 0xc81   : > { %v11286_v16 = vpop.eup %11285  ;;  %v10802_v27 = vmul.f32 -1.442695, %v17039_v5 }
 0xc82   : > { %v17048_v23 = vpop.eup %11287  ;;  %v17055_v53 = vadd.f32 1.0, %v11286_v16 }
 0xc83   : > { %11295 = vpow2.f32 %v10802_v27  ;;  %v9180_v1 = vmul.f32 %v17048_v23, %v17022_v34  ;;  %v17068_v61 = vpop.eup %11289 }
 0xc84   : > { %11297 = vrcp.f32 %v17044_v47  ;;  %v17073_v52 = vpop.eup %11291  ;;  %v9195_v40 = vmul.f32 %v17068_v61, %v17030_v14  ;;  %vm9304_vm3 = vweird.f32 %v17055_v53 }
 0xc85   : > { %11299 = vrcp.f32 %v17055_v53  ;;  %v17080_v46 = vpop.eup %11293  ;;  %v9181_v18 = vsub.f32 1.0, %v9180_v1  ;;  %v9225_v16 = vmul.f32 %v17073_v52, %v17034_v8  ;;  %v17111_v1 = vadd.f32 %v17015_v32, %v9137_v2 }
 0xc86   : > { %11301 = vrcp.f32 %v17053_v26  ;;  %v9037_v20 = vpop.f32.mrf.mxu0  ;;  %v9240_v9 = vmul.f32 %v17080_v46, %v17036_v54  ;;  %v17126_v2 = vadd.f32 %v17020_v62, %v9152_v50  ;;  %vm9245_vm9 = vweird.f32 %v17080_v46 }
 0xc87   : > { %11303 = vrcp.f32 %v17059_v4  ;;  %v17078_v39 = vadd.f32 %v16942_v36, %v9037_v20  ;;  %19218 = vst [vmem:[#allocation24_spill] sm:$0xff] %v17111_v1  ;;  %v9182_v37 = vmul.f32 %v17048_v23, %v9181_v18  ;;  %v9226_v29 = vsub.f32 1.0, %v9225_v16 }
 0xc88   : > { %11305 = vrcp.f32 %v17063_v10  ;;  %19219 = vst [vmem:[#allocation29_spill] sm:$0xff] %v17126_v2  ;;  %v9196_v18 = vsub.f32 1.0, %v9195_v40  ;;  %vm9230_vm1 = vweird.f32 %v17073_v52  ;;  %v9295_v1 = vand.u32 2147483648, %v17059_v4 }
 0xc89   : > { %v11296_v11 = vpop.eup %11295  ;;  %v10803_v36 = vmul.f32 -1.442695, %v17078_v39  ;;  %v17142_v35 = vadd.f32 %v17048_v23, %v9182_v37  ;;  %v9227_v0 = vmul.f32 %v17073_v52, %v9226_v29  ;;  %v9308_v37 = vand.u32 2147483647, %v17055_v53 }
 0xc8a   : > { %v17091_v33 = vpop.eup %11297  ;;  %v17099_v43 = vadd.f32 1.0, %v11296_v11  ;;  %v9241_v11 = vsub.f32 1.0, %v9240_v9  ;;  %v17154_v57 = vmul.f32 %v17068_v61, %v9196_v18 }
 0xc8b   : > { %v17101_v27 = vpop.eup %11299  ;;  %11307 = vpow2.f32 %v10803_v36  ;;  %v9210_v36 = vmul.f32 %v17091_v33, %v17044_v47  ;;  %v17167_v21 = vadd.f32 %v17073_v52, %v9227_v0 }
 0xc8c   : > { %v17108_v51 = vpop.eup %11301  ;;  %11309 = vrcp.f32 %v17099_v43  ;;  %v9300_v15 = vmul.f32 %v17101_v27, %v17055_v53  ;;  %vm9305_vm11 = vweird.f32 %v17101_v27  ;;  %vm9319_vm12 = vweird.f32 %v17099_v43 }
 0xc8d   : > { %v17116_v20 = vpop.eup %11303  ;;  %v9255_v50 = vmul.f32 %v17108_v51, %v17053_v26  ;;  %v9211_v59 = vsub.f32 1.0, %v9210_v36  ;;  %v9242_v36 = vmul.f32 %v17080_v46, %v9241_v11  ;;  %vm9260_vm5 = vweird.f32 %v17108_v51  ;;  %vm17219_vm4 = vmor %vm9304_vm3, %vm9305_vm11 }
 0xc8e   : > { %v17123_v22 = vpop.eup %11305  ;;  %v9285_v16 = vmul.f32 %v17116_v20, %v17059_v4  ;;  %v9301_v42 = vsub.f32 1.0, %v9300_v15  ;;  %vm9290_vm14 = vweird.f32 %v17116_v20 }
 0xc8f   : > { %v9270_v40 = vmul.f32 %v17123_v22, %v17063_v10  ;;  %v9256_v13 = vsub.f32 1.0, %v9255_v50  ;;  %v17163_v15 = vmul.f32 %v17091_v33, %v9211_v59  ;;  %v17173_v50 = vadd.f32 %v17080_v46, %v9242_v36  ;;  %vm17233_vm11 = vmor %vm9289_vm13, %vm9290_vm14 }
 0xc90   : > { %v9286_v44 = vsub.f32 1.0, %v9285_v16  ;;  %v9302_v56 = vmul.f32 %v17101_v27, %v9301_v42  ;;  %vm9275_vm7 = vweird.f32 %v17123_v22  ;;  %vm9309_vm13 = vcmp.eq.f32.partialorder %v9308_v37, 8.507059e+37  ;;  %vm17271_vm14 = vmor %vm9259_vm10, %vm9260_vm5 }
 0xc91   : > { %v11308_v58 = vpop.eup %11307  ;;  %v9271_v29 = vsub.f32 1.0, %v9270_v40  ;;  %v9310_v40 = vand.u32 2147483648, %v17055_v53  ;;  %vm9155_vm5 = vweird.f32 %v17020_v62  ;;  %vm9169_vm10 = vweird.f32 %v17001_v6 }
 0xc92   : > { %v17147_v9 = vpop.eup %11309  ;;  %v17151_v30 = vadd.f32 1.0, %v11308_v58  ;;  %v9287_v0 = vmul.f32 %v17116_v20, %v9286_v44  ;;  %v9323_v44 = vand.u32 2147483647, %v17099_v43 }
 0xc93   : > { %v9315_v49 = vmul.f32 %v17147_v9, %v17099_v43  ;;  %vm9320_vm8 = vweird.f32 %v17147_v9  ;;  %v9272_v42 = vmul.f32 %v17123_v22, %v9271_v29 }
 0xc94   : > { %11311 = vrcp.f32 %v17151_v30  ;;  %vm17201_vm15 = vmor %vm9319_vm12, %vm9320_vm8  ;;  %vm9215_vm8 = vweird.f32 %v17091_v33  ;;  %vm9229_vm12 = vweird.f32 %v17034_v8  ;;  %v9338_v19 = vand.u32 2147483647, %v17151_v30 }
 0xc95   : > { %v9316_v18 = vsub.f32 1.0, %v9315_v49  ;;  %v9257_v49 = vmul.f32 %v17108_v51, %v9256_v13  ;;  %v9303_v13 = vadd.f32 %v17101_v27, %v9302_v56  ;;  %v9273_v59 = vadd.f32 %v17123_v22, %v9272_v42 }
 0xc96   : > { %v9340_v42 = vand.u32 2147483648, %v17151_v30 }
 0xc97   : > { %v9317_v58 = vmul.f32 %v17147_v9, %v9316_v18  ;;  %v9325_v18 = vand.u32 2147483648, %v17099_v43  ;;  %v9288_v43 = vadd.f32 %v17116_v20, %v9287_v0  ;;  %v9307_v53 = vsel %vm17219_vm4, %v17101_v27, %v9303_v13 }
 0xc98   : > { %v9258_v27 = vadd.f32 %v17108_v51, %v9257_v49  ;;  %vm9334_vm4 = vweird.f32 %v17151_v30 }
 0xc99   : > { %v9318_v36 = vadd.f32 %v17147_v9, %v9317_v58  ;;  %v9293_v58 = vand.u32 2147483647, %v17059_v4  ;;  %v9326_v2 = vor.u32 1.1754944e-38, %v9325_v18  ;;  %v9292_v4 = vsel %vm17233_vm11, %v17116_v20, %v9288_v43 }
 0xc9a   : > { %v17188_v11 = vpop.eup %11311 }
 0xc9b   : > { %v9330_v56 = vmul.f32 %v17188_v11, %v17151_v30  ;;  %v9322_v16 = vsel %vm17201_vm15, %v17147_v9, %v9318_v36  ;;  %v9311_v9 = vor.u32 1.1754944e-38, %v9310_v40  ;;  %vm9324_vm15 = vcmp.eq.f32.partialorder %v9323_v44, 8.507059e+37 }
 0xc9c   : > { %v9327_v18 = vsel %vm9324_vm15, %v9326_v2, %v9322_v16  ;;  %vm9335_vm3 = vweird.f32 %v17188_v11  ;;  %v9278_v40 = vand.u32 2147483647, %v17063_v10  ;;  %vm17252_vm15 = vmor %vm9274_vm6, %vm9275_vm7  ;;  %v9296_v16 = vor.u32 1.1754944e-38, %v9295_v1 }
 0xc9d   : > { %v9331_v0 = vsub.f32 1.0, %v9330_v56  ;;  %v9312_v13 = vsel %vm9309_vm13, %v9311_v9, %v9307_v53  ;;  %v9277_v20 = vsel %vm17252_vm15, %v17123_v22, %v9273_v59  ;;  %vm9294_vm11 = vcmp.eq.f32.partialorder %v9293_v58, 8.507059e+37  ;;  %vm9336_vm6 = vmor %vm9334_vm4, %vm9335_vm3 }
 0xc9e   : > { %v9358_v37 = vmul.f32 %v9327_v18, %v17039_v5  ;;  %v9341_v44 = vor.u32 1.1754944e-38, %v9340_v42  ;;  %vm9170_vm7 = vweird.f32 %v17025_v45  ;;  %vm9184_vm13 = vweird.f32 %v17022_v34  ;;  %vm17290_vm15 = vmor %vm9244_vm2, %vm9245_vm9 }
 0xc9f   : > { %v9332_v29 = vmul.f32 %v17188_v11, %v9331_v0  ;;  %v19230_v22 = vand.u32 2147483648, %v17063_v10  ;;  %v9297_v5 = vsel %vm9294_vm11, %v9296_v16, %v9292_v4  ;;  %vm9339_vm3 = vcmp.eq.f32.partialorder %v9338_v19, 8.507059e+37  ;;  %vm17314_vm11 = vmor %vm9229_vm12, %vm9230_vm1 }
 0xca0   : > { %v9262_v58 = vsel %vm17271_vm14, %v17108_v51, %v9258_v27  ;;  %vm9279_vm4 = vcmp.eq.f32.partialorder %v9278_v40, 8.507059e+37  ;;  %v9357_v56 = vmul.f32 %v9312_v13, %v17018_v60  ;;  %v9213_v10 = vadd.f32 %v17091_v33, %v17163_v15 }
 0xca1   : > { %v9333_v49 = vadd.f32 %v17188_v11, %v9332_v29  ;;  %v9281_v1 = vor.u32 1.1754944e-38, %v19230_v22  ;;  %v19233_v51 = vand.u32 2147483648, %v17053_v26  ;;  %v9247_v9 = vsel %vm17290_vm15, %v17080_v46, %v17173_v50 }
 0xca2   : > { %v19234_v15 = vand.u32 2147483647, %v17053_v26  ;;  %v9356_v42 = vmul.f32 %v9297_v5, %v17004_v48  ;;  %v17304_v36 = vand.u32 4294901760, %v9358_v37  ;;  %vm9140_vm9 = vweird.f32 %v17015_v32 }
 0xca3   : > { %v9337_v59 = vsel %vm9336_vm6, %v17188_v11, %v9333_v49  ;;  %v9266_v0 = vor.u32 1.1754944e-38, %v19233_v51  ;;  %v9282_v60 = vsel %vm9279_vm4, %v9281_v1, %v9277_v20  ;;  %vm9154_vm2 = vweird.f32 %v16984_v31 }
 0xca4   : > { %v9342_v43 = vsel %vm9339_vm3, %v9341_v44, %v9337_v59  ;;  %vm9264_vm14 = vcmp.eq.f32.partialorder %v19234_v15, 8.507059e+37  ;;  %v9198_v18 = vadd.f32 %v17068_v61, %v17154_v57  ;;  %v19237_v26 = vand.u32 2147483648, %v17036_v54 }
 0xca5   : > { %v9359_v53 = vmul.f32 %v9342_v43, %v17078_v39  ;;  %v9267_v46 = vsel %vm9264_vm14, %v9266_v0, %v9262_v58  ;;  %v9232_v29 = vsel %vm17314_vm11, %v17073_v52, %v17167_v21  ;;  %v19238_v57 = vand.u32 2147483647, %v17036_v54 }
 0xca6   : > { %v9251_v48 = vor.u32 1.1754944e-38, %v19237_v26  ;;  %v9355_v19 = vmul.f32 %v9282_v60, %v16998_v28  ;;  %v17329_v27 = vand.u32 4294901760, %v9357_v56  ;;  %vm9125_vm1 = vweird.f32 %v17011_v24 }
 0xca7   : > { %v17320_v50 = vand.u32 4294901760, %v9359_v53  ;;  %vm9249_vm6 = vcmp.eq.f32.partialorder %v19238_v57, 8.507059e+37  ;;  %vm9139_vm12 = vweird.f32 %v16978_v63  ;;  %vm19239_vm3 = vweird.f32 %v17044_v47 }
 0xca8   : > { %vm17337_vm4 = vmor %vm19239_vm3, %vm9215_vm8  ;;  %v19242_v52 = vand.u32 2147483647, %v17034_v8  ;;  %v19243_v54 = vand.u32 2147483648, %v17034_v8  ;;  %v9252_v21 = vsel %vm9249_vm6, %v9251_v48, %v9247_v9  ;;  %v9354_v16 = vmul.f32 %v9267_v46, %v16993_v41 }
 0xca9   : > { %v17346_v4 = vsub.f32 %v9359_v53, %v17320_v50  ;;  %9361 = vmatpush.msrb.mxu1 %v17320_v50  ;;  %9676 = vmatpush.msrb.mxu3 %v17320_v50  ;;  %v9217_v2 = vsel %vm17337_vm4, %v17091_v33, %v9213_v10  ;;  %v17354_v13 = vand.u32 4294901760, %v9356_v42  ;;  %v17357_v49 = vsub.f32 %v9358_v37, %v17304_v36 }
 0xcaa   : > { %vm9234_vm15 = vcmp.eq.f32.partialorder %v19242_v52, 8.507059e+37  ;;  %v9236_v28 = vor.u32 1.1754944e-38, %v19243_v54  ;;  %vm9124_vm8 = vweird.f32 %v16973_v3  ;;  %vm19244_vm14 = vweird.f32 %v17068_v61  ;;  %v19270_v52 = vld [vmem:[#allocation24_spill] sm:$0xff] }
 0xcab   : > { %vm17364_vm11 = vmor %vm9199_vm0, %vm19244_vm14  ;;  %v19247_v20 = vand.u32 2147483647, %v17044_v47  ;;  %v19250_v41 = vand.u32 2147483648, %v17044_v47  ;;  %9363 = vmatpush.msrb.mxu1 %v17304_v36  ;;  %9588 = vmatpush.msra.mxu2 %v17346_v4  ;;  %v9459_v30 = vand.u32 4294901760, %v17346_v4  ;;  %vm19251_vm0 = vweird.f32 %v17048_v23 }
 0xcac   : > { %v9237_v44 = vsel %vm9234_vm15, %v9236_v28, %v9232_v29  ;;  %vm17383_vm3 = vmor %vm9184_vm13, %vm19251_vm0  ;;  %v9202_v47 = vsel %vm17364_vm11, %v17068_v61, %v9198_v18  ;;  %v9353_v1 = vmul.f32 %v9252_v21, %v16981_v55  ;;  %v17391_v5 = vand.u32 4294901760, %v9355_v19  ;;  %9678 = vmatpush.msrb.mxu3 %v17304_v36  ;;  %v19264_v18 = vld [vmem:[#allocation29_spill] sm:$0xff] }
 0xcad   : > { %vm17370_vm6 = vcmp.eq.f32.partialorder %v19247_v20, 8.507059e+37  ;;  %v9221_v37 = vor.u32 1.1754944e-38, %v19250_v41  ;;  %v17395_v59 = vsub.f32 %v9357_v56, %v17329_v27  ;;  %vm9110_vm4 = vweird.f32 %v17007_v25  ;;  %9365 = vmatpush.msrb.mxu1 %v17329_v27  ;;  %9591 = vmatpush.msra.mxu2 %v17357_v49  ;;  %vm17418_vm15 = vmor %vm9169_vm10, %vm9170_vm7  ;;  %v19279_v61 = vld [vmem:[#allocation17_spill] sm:$0xff] }
 0xcae   : > { %v9187_v58 = vsel %vm17383_vm3, %v17048_v23, %v17142_v35  ;;  %v19254_v43 = vand.u32 2147483647, %v17030_v14  ;;  %v19257_v55 = vand.u32 2147483648, %v17030_v14  ;;  %v9352_v23 = vmul.f32 %v9237_v44, %v16976_v7  ;;  %9680 = vmatpush.msrb.mxu3 %v17329_v27  ;;  %9759 = vmatpush.msra.mxu0 %v9459_v30  ;;  %vm17449_vm10 = vmor %vm9154_vm2, %vm9155_vm5 }
 0xcaf   : > { %v9222_v56 = vsel %vm17370_vm6, %v9221_v37, %v9217_v2  ;;  %v17423_v11 = vand.u32 4294901760, %v9354_v16  ;;  %v9465_v14 = vand.u32 4294901760, %v17357_v49  ;;  %v17430_v51 = vsub.f32 %v9356_v42, %v17354_v13  ;;  %9367 = vmatpush.msrb.mxu1 %v17354_v13  ;;  %9594 = vmatpush.msra.mxu2 %v17395_v59  ;;  %vm17477_vm2 = vmor %vm9139_vm12, %vm9140_vm9  ;;  %v19276_v37 = vld [vmem:[#allocation23_spill] sm:$0xff] }
 0xcb0   : > { %vm17404_vm13 = vcmp.eq.f32.partialorder %v19254_v43, 8.507059e+37  ;;  %v9206_v10 = vor.u32 1.1754944e-38, %v19257_v55  ;;  %vm9109_vm14 = vweird.f32 %v16967_v12  ;;  %v9172_v0 = vsel %vm17418_vm15, %v17025_v45, %v17132_v17  ;;  %9682 = vmatpush.msrb.mxu3 %v17354_v13  ;;  %vm17505_vm12 = vmor %vm9124_vm8, %vm9125_vm1 }
 0xcb1   : > { %v19260_v7 = vand.u32 2147483647, %v17022_v34  ;;  %v19261_v60 = vand.u32 2147483648, %v17022_v34  ;;  %v9351_v45 = vmul.f32 %v9222_v56, %v16988_v38  ;;  %v17454_v17 = vand.u32 4294901760, %v9353_v1  ;;  %9763 = vmatpush.msra.mxu0 %v9465_v14  ;;  %9369 = vmatpush.msrb.mxu1 %v17391_v5  ;;  %vm17550_vm11 = vmor %vm9109_vm14, %vm9110_vm4 }
 0xcb2   : > { %v9207_v9 = vsel %vm17404_vm13, %v9206_v10, %v9202_v47  ;;  %v9471_v34 = vand.u32 4294901760, %v17395_v59  ;;  %v17461_v42 = vsub.f32 %v9355_v19, %v17391_v5  ;;  %v9157_v39 = vsel %vm17449_vm10, %v17020_v62, %v19264_v18  ;;  %9597 = vmatpush.msra.mxu2 %v17430_v51  ;;  %v19269_v62 = vld [vmem:[#allocation22_spill] sm:$0xff]  ;;  %9684 = vmatpush.msrb.mxu3 %v17391_v5  ;;  %v19285_v18 = vld [vmem:[#allocation27_spill] sm:$0xff] }
 0xcb3   : > { %vm9189_vm7 = vcmp.eq.f32.partialorder %v19260_v7, 8.507059e+37  ;;  %v9191_v53 = vor.u32 1.1754944e-38, %v19261_v60  ;;  %v19265_v26 = vand.u32 2147483647, %v17001_v6  ;;  %v19266_v38 = vand.u32 2147483648, %v17001_v6  ;;  %9371 = vmatpush.msrb.mxu1 %v17423_v11  ;;  %v19284_v60 = vld [vmem:[#allocation21_spill] sm:$0xff] }
 0xcb4   : > { %v9350_v57 = vmul.f32 %v9207_v9, %v19269_v62  ;;  %v17482_v19 = vand.u32 4294901760, %v9352_v23  ;;  %9767 = vmatpush.msra.mxu0 %v9471_v34  ;;  %v9477_v6 = vand.u32 4294901760, %v17430_v51  ;;  %v17489_v40 = vsub.f32 %v9354_v16, %v17423_v11  ;;  %9600 = vmatpush.msra.mxu2 %v17461_v42 }
 0xcb5   : > { %vm9174_vm5 = vcmp.eq.f32.partialorder %v19265_v26, 8.507059e+37  ;;  %v9176_v48 = vor.u32 1.1754944e-38, %v19266_v38  ;;  %v9192_v46 = vsel %vm9189_vm7, %v9191_v53, %v9187_v58  ;;  %v9142_v54 = vsel %vm17477_vm2, %v17015_v32, %v19270_v52  ;;  %v19275_v32 = vld [vmem:[#allocation18_spill] sm:$0xff]  ;;  %9686 = vmatpush.msrb.mxu3 %v17423_v11  ;;  %9373 = vmatpush.msrb.mxu1 %v17454_v17 }
 0xcb6   : > { %v19271_v28 = vand.u32 2147483647, %v16984_v31  ;;  %v19272_v21 = vand.u32 2147483648, %v16984_v31  ;;  %v9349_v20 = vmul.f32 %v9192_v46, %v19275_v32  ;;  %v17510_v33 = vand.u32 4294901760, %v9351_v45  ;;  %9771 = vmatpush.msra.mxu0 %v9477_v6  ;;  %9603 = vmatpush.msra.mxu2 %v17489_v40  ;;  %v19287_v46 = vld [vmem:[#allocation16_spill] sm:$0xff]  ;;  %v19289_v32 = vld [vmem:[#allocation11_spill] sm:$0xff] }
 0xcb7   : > { %v9177_v8 = vsel %vm9174_vm5, %v9176_v48, %v9172_v0  ;;  %v9483_v31 = vand.u32 4294901760, %v17461_v42  ;;  %v17517_v41 = vsub.f32 %v9353_v1, %v17454_v17  ;;  %v9127_v44 = vsel %vm17505_vm12, %v17011_v24, %v19276_v37  ;;  %9688 = vmatpush.msrb.mxu3 %v17454_v17  ;;  %9375 = vmatpush.msrb.mxu1 %v17482_v19 }
 0xcb8   : > { %vm9159_vm9 = vcmp.eq.f32.partialorder %v19271_v28, 8.507059e+37  ;;  %v9161_v2 = vor.u32 1.1754944e-38, %v19272_v21  ;;  %v19277_v22 = vand.u32 2147483647, %v16978_v63  ;;  %v19278_v47 = vand.u32 2147483648, %v16978_v63 }
 0xcb9   : > { %v9348_v55 = vmul.f32 %v9177_v8, %v19279_v61  ;;  %v17530_v1 = vand.u32 4294901760, %v9350_v57  ;;  %9775 = vmatpush.msra.mxu0 %v9483_v31  ;;  %v9489_v24 = vand.u32 4294901760, %v17489_v40  ;;  %v17537_v10 = vsub.f32 %v9352_v23, %v17482_v19  ;;  %9606 = vmatpush.msra.mxu2 %v17517_v41  ;;  %v19291_v23 = vld [vmem:[#allocation87_spill] sm:$0xff] }
 0xcba   : > { %vm9144_vm1 = vcmp.eq.f32.partialorder %v19277_v22, 8.507059e+37  ;;  %v9146_v58 = vor.u32 1.1754944e-38, %v19278_v47  ;;  %v9162_v43 = vsel %vm9159_vm9, %v9161_v2, %v9157_v39  ;;  %v9113_v63 = vand.u32 2147483647, %v16967_v12  ;;  %9690 = vmatpush.msrb.mxu3 %v17482_v19  ;;  %9377 = vmatpush.msrb.mxu1 %v17510_v33 }
 0xcbb   : > { %v19280_v56 = vand.u32 2147483647, %v16973_v3  ;;  %v19281_v35 = vand.u32 2147483648, %v16973_v3  ;;  %v9347_v53 = vmul.f32 %v9162_v43, %v19284_v60  ;;  %v17555_v9 = vand.u32 4294901760, %v9349_v20  ;;  %9779 = vmatpush.msra.mxu0 %v9489_v24  ;;  %9609 = vmatpush.msra.mxu2 %v17537_v10 }
 0xcbc   : > { %v9147_v7 = vsel %vm9144_vm1, %v9146_v58, %v9142_v54  ;;  %v9495_v3 = vand.u32 4294901760, %v17517_v41  ;;  %v17562_v15 = vsub.f32 %v9351_v45, %v17510_v33  ;;  %v9112_v39 = vsel %vm17550_vm11, %v17007_v25, %v19285_v18  ;;  %9692 = vmatpush.msrb.mxu3 %v17510_v33  ;;  %9379 = vmatpush.msrb.mxu1 %v17530_v1  ;;  %v19292_v18 = vld [vmem:[#allocation154_spill] sm:$0xff] }
 0xcbd   : > { %vm9129_vm8 = vcmp.eq.f32.partialorder %v19280_v56, 8.507059e+37  ;;  %v9131_v0 = vor.u32 1.1754944e-38, %v19281_v35  ;;  %v19286_v26 = vand.u32 2147483648, %v16967_v12  ;;  %v9346_v29 = vmul.f32 %v9147_v7, %v19287_v46  ;;  %v19290_v7 = vld [vmem:[#allocation80_spill] sm:$0xff]  ;;  %v19295_v46 = vld [vmem:[#allocation93_spill] sm:$0xff] }
 0xcbe   : > { %v17573_v62 = vand.u32 4294901760, %v9348_v55  ;;  %9783 = vmatpush.msra.mxu0 %v9495_v3  ;;  %v9501_v45 = vand.u32 4294901760, %v17537_v10  ;;  %v17580_v25 = vsub.f32 %v9350_v57, %v17530_v1  ;;  %vm9114_vm6 = vcmp.eq.f32.partialorder %v9113_v63, 8.507059e+37  ;;  %9612 = vmatpush.msra.mxu2 %v17562_v15  ;;  %v19288_v57 = vld [vmem:[#allocation12_spill] sm:$0xff] }
 0xcbf   : > { %v9116_v38 = vor.u32 1.1754944e-38, %v19286_v26  ;;  %v9132_v48 = vsel %vm9129_vm8, %v9131_v0, %v9127_v44  ;;  %v17584_v52 = vand.u32 4294901760, %v9347_v53  ;;  %9694 = vmatpush.msrb.mxu3 %v17530_v1  ;;  %v9507_v54 = vand.u32 4294901760, %v17562_v15  ;;  %9381 = vmatpush.msrb.mxu1 %v17555_v9 }
 0xcc0   : > { %9787 = vmatpush.msra.mxu0 %v9501_v45  ;;  %v17591_v28 = vsub.f32 %v9349_v20, %v17555_v9  ;;  %v9345_v21 = vmul.f32 %v9132_v48, %v19288_v57  ;;  %9615 = vmatpush.msra.mxu2 %v17580_v25  ;;  %v17596_v2 = vand.u32 4294901760, %v9346_v29  ;;  %v9513_v8 = vand.u32 4294901760, %v17580_v25  ;;  %v19294_v48 = vld [vmem:[#allocation72_spill] sm:$0xff] }
 0xcc1   : > { %v9117_v12 = vsel %vm9114_vm6, %v9116_v38, %v9112_v39  ;;  %9696 = vmatpush.msrb.mxu3 %v17555_v9  ;;  %v17603_v16 = vsub.f32 %v9348_v55, %v17573_v62  ;;  %9383 = vmatpush.msrb.mxu1 %v17573_v62  ;;  %v17613_v44 = vsub.f32 %v9347_v53, %v17584_v52  ;;  %v19293_v38 = vld [vmem:[#allocation111_spill] sm:$0xff]  ;;  %vm19323_vm0 = vcmask 261120  }
 0xcc2   : > { %9791 = vmatpush.msra.mxu0 %v9507_v54  ;;  %v9344_v20 = vmul.f32 %v9117_v12, %v19289_v32  ;;  %9618 = vmatpush.msra.mxu2 %v17591_v28  ;;  %v9519_v37 = vand.u32 4294901760, %v17591_v28  ;;  %v17615_v22 = vand.u32 4294901760, %v9345_v21  ;;  %v17624_v58 = vsub.f32 %v9346_v29, %v17596_v2  ;;  %v19296_v29 = vld [vmem:[#allocation83_spill] sm:$0xff]  ;;  %v19297_v12 = vld [vmem:[#allocation100_spill] sm:$0xff]  ;;  %vm19325_vm3 = vmmov %vm19323_vm0 }
 0xcc3   : > { %9698 = vmatpush.msrb.mxu3 %v17573_v62  ;;  %9385 = vmatpush.msrb.mxu1 %v17584_v52  ;;  %v9525_v47 = vand.u32 4294901760, %v17603_v16  ;;  %v9531_v61 = vand.u32 4294901760, %v17613_v44  ;;  %v9460_v55 = vsub.f32 %v17346_v4, %v9459_v30  ;;  %v9466_v35 = vsub.f32 %v17357_v49, %v9465_v14  ;;  %v19300_v32 = vld [vmem:[#allocation76_spill] sm:$0xff]  ;;  %vm19327_vm4 = vmmov %vm19323_vm0 }
 0xcc4   : > { %9795 = vmatpush.msra.mxu0 %v9513_v8  ;;  %9621 = vmatpush.msra.mxu2 %v17603_v16  ;;  %v17626_v43 = vand.u32 4294901760, %v9344_v20  ;;  %v17640_v63 = vsub.f32 %v9345_v21, %v17615_v22  ;;  %v9537_v56 = vand.u32 4294901760, %v17624_v58  ;;  %v9472_v0 = vsub.f32 %v17395_v59, %v9471_v34  ;;  %v19299_v21 = vld [vmem:[#allocation68_spill] sm:$0xff]  ;;  %vm19329_vm13 = vmmov %vm19323_vm0 }
 0xcc5   : > { %9700 = vmatpush.msrb.mxu3 %v17584_v52  ;;  %9387 = vmatpush.msrb.mxu1 %v17596_v2  ;;  %v9461_v30 = vand.u32 4294901760, %v9460_v55  ;;  %v9467_v14 = vand.u32 4294901760, %v9466_v35  ;;  %v9478_v60 = vsub.f32 %v17430_v51, %v9477_v6  ;;  %v9484_v59 = vsub.f32 %v17461_v42, %v9483_v31  ;;  %vm19330_vm15 = vmmov %vm19323_vm0 }
 0xcc6   : > { %9799 = vmatpush.msra.mxu0 %v9519_v37  ;;  %9624 = vmatpush.msra.mxu2 %v17613_v44  ;;  %v9548_v4 = vsub.f32 %v9344_v20, %v17626_v43  ;;  %v9543_v49 = vand.u32 4294901760, %v17640_v63  ;;  %v9473_v39 = vand.u32 4294901760, %v9472_v0  ;;  %v9490_v26 = vsub.f32 %v17489_v40, %v9489_v24  ;;  %v19303_v0 = vld [vmem:[#allocation119_spill] sm:$0xff]  ;;  %vm19331_vm14 = vmmov %vm19323_vm0 }
 0xcc7   : > { %9702 = vmatpush.msrb.mxu3 %v17596_v2  ;;  %9389 = vmatpush.msrb.mxu1 %v17615_v22  ;;  %v9479_v34 = vand.u32 4294901760, %v9478_v60  ;;  %v9485_v51 = vand.u32 4294901760, %v9484_v59  ;;  %v9496_v6 = vsub.f32 %v17517_v41, %v9495_v3  ;;  %v9502_v31 = vsub.f32 %v17537_v10, %v9501_v45  ;;  %v19298_v45 = vld [vmem:[#allocation102_spill] sm:$0xff]  ;;  %v19310_v60 = vld [vmem:[#allocation213_spill] sm:$0xff]  ;;  %vm19332_vm7 = vmmov %vm19323_vm0 }
 0xcc8   : > { %9803 = vmatpush.msra.mxu0 %v9525_v47  ;;  %9627 = vmatpush.msra.mxu2 %v17624_v58  ;;  %v9549_v53 = vand.u32 4294901760, %v9548_v4  ;;  %v9491_v42 = vand.u32 4294901760, %v9490_v26  ;;  %v9508_v24 = vsub.f32 %v17562_v15, %v9507_v54  ;;  %v9514_v3 = vsub.f32 %v17580_v25, %v9513_v8  ;;  %vm19333_vm10 = vmmov %vm19323_vm0 }
 0xcc9   : > { %9704 = vmatpush.msrb.mxu3 %v17615_v22  ;;  %9391 = vmatpush.msrb.mxu1 %v17626_v43  ;;  %v9497_v40 = vand.u32 4294901760, %v9496_v6  ;;  %v9503_v41 = vand.u32 4294901760, %v9502_v31  ;;  %v9520_v10 = vsub.f32 %v17591_v28, %v9519_v37  ;;  %v9526_v54 = vsub.f32 %v17603_v16, %v9525_v47  ;;  %v19301_v37 = vld [vmem:[#allocation89_spill] sm:$0xff] }
 0xcca   : > { %9807 = vmatpush.msra.mxu0 %v9531_v61  ;;  %9630 = vmatpush.msra.mxu2 %v17640_v63  ;;  %v9509_v57 = vand.u32 4294901760, %v9508_v24  ;;  %v9515_v15 = vand.u32 4294901760, %v9514_v3  ;;  %v9532_v8 = vsub.f32 %v17613_v44, %v9531_v61  ;;  %v9538_v28 = vsub.f32 %v17624_v58, %v9537_v56  ;;  %v10911_v44 = vld [vmem:[%s17897_s7 + $0xd8] sm:$0xff]  ;;  %v19304_v61 = vld [vmem:[#allocation238_spill] sm:$0xff]  ;;  %v10913_v24 = vld [vmem:[%s17897_s7 + $0xe8] sm:$0xff] }
 0xccb   : > { %9706 = vmatpush.msrb.mxu3 %v17626_v43  ;;  %9397 = vmatmul.f32.vlgmr.msrb.gmra.mxu1 %v19290_v7  ;;  %v9521_v25 = vand.u32 4294901760, %v9520_v10  ;;  %v9527_v20 = vand.u32 4294901760, %v9526_v54  ;;  %v9544_v35 = vsub.f32 %v17640_v63, %v9543_v49  ;;  %v9550_v47 = vsub.f32 %v9548_v4, %v9549_v53  ;;  %v10910_v63 = vld [vmem:[%s17897_s7 + $0xd0] sm:$0xff] }
 0xccc   : > { %9811 = vmatpush.msra.mxu0 %v9537_v56  ;;  %9710 = vmatmul.f32.vlgmr.msrb.gmra.mxu3 %v19291_v23  ;;  %v9533_v55 = vand.u32 4294901760, %v9532_v8  ;;  %v9539_v16 = vand.u32 4294901760, %v9538_v28  ;;  %v19305_v7 = vld [vmem:[#allocation96_spill] sm:$0xff]  ;;  %v19307_v23 = vld [vmem:[#allocation243_spill] sm:$0xff] }
 0xccd   : > { %9462 = vmatpush.msra.mxu1 %v9461_v30  ;;  %9633 = vmatpush.msra.mxu2 %v9548_v4  ;;  %v19302_v30 = vld [vmem:[#allocation239_spill] sm:$0xff]  ;;  %v9545_v58 = vand.u32 4294901760, %v9544_v35  ;;  %v9551_v56 = vand.u32 4294901760, %v9550_v47  ;;  %v19306_v4 = vld [vmem:[#allocation242_spill] sm:$0xff] }
 0xcce   : > { %9815 = vmatpush.msra.mxu0 %v9543_v49  ;;  %9636 = vmatmul.f32.vlgmr.msra.gmra.mxu2 %v19292_v18  ;;  %v19308_v49 = vld [vmem:[#allocation241_spill] sm:$0xff] }
 0xccf   : > { %9468 = vmatpush.msra.mxu1 %v9467_v14  ;;  %10003 = vmatpush.bf16.msra.mxu3 %v10911_v44  ;;  %v19309_v14 = vld [vmem:[#allocation240_spill] sm:$0xff] }
 0xcd0   : > { %9819 = vmatpush.msra.mxu0 %v9549_v53  ;;  %v19311_v53 = vld [vmem:[#allocation221_spill] sm:$0xff]  ;;  %9962 = vmatpush.bf16.msrb.mxu2 %v10913_v24 }
 0xcd1   : > { %9474 = vmatpush.msra.mxu1 %v9473_v39  ;;  %9821 = vmatmul.f32.vlgmr.msra.gmra.mxu0 %v19293_v38 }
 0xcd3   : > { %9480 = vmatpush.msra.mxu1 %v9479_v34  ;;  %10004 = vmatpush.bf16.msra.mxu3 %v10910_v63 }
 0xcd4   : > { %9405 = vmatmul.f32.gmra.mxu1 %v19294_v48  ;;  %9716 = vmatmul.f32.gmra.mxu3 %v19295_v46 }
 0xcd5   : > { %9486 = vmatpush.msra.mxu1 %v9485_v51 }
 0xcd6   : > { %9641 = vmatmul.f32.gmra.mxu2 %v19296_v29 }
 0xcd7   : > { %9492 = vmatpush.msra.mxu1 %v9491_v42 }
 0xcd9   : > { %9498 = vmatpush.msra.mxu1 %v9497_v40  ;;  %9825 = vmatmul.f32.gmra.mxu0 %v19297_v12 }
 0xcdb   : > { %9504 = vmatpush.msra.mxu1 %v9503_v41 }
 0xcdc   : > { %9413 = vmatmul.f32.gmra.mxu1 %v19298_v45  ;;  %9722 = vmatmul.f32.gmra.mxu3 %v19299_v21 }
 0xcdd   : > { %9510 = vmatpush.msra.mxu1 %v9509_v57 }
 0xcde   : > { %9646 = vmatmul.f32.gmra.mxu2 %v19300_v32 }
 0xcdf   : > { %9516 = vmatpush.msra.mxu1 %v9515_v15 }
 0xce1   : > { %9522 = vmatpush.msra.mxu1 %v9521_v25  ;;  %9829 = vmatmul.f32.gmra.mxu0 %v19301_v37 }
 0xce3   : > { %9528 = vmatpush.msra.mxu1 %v9527_v20 }
 0xce4   : > { %9421 = vmatmul.f32.gmra.mxu1 %v19302_v30  ;;  %9728 = vmatmul.f32.gmra.mxu3 %v19303_v0 }
 0xce5   : > { %9534 = vmatpush.msra.mxu1 %v9533_v55 }
 0xce6   : > { %9651 = vmatmul.f32.gmra.mxu2 %v19304_v61 }
 0xce7   : > { %9540 = vmatpush.msra.mxu1 %v9539_v16 }
 0xce9   : > { %9546 = vmatpush.msra.mxu1 %v9545_v58  ;;  %9833 = vmatmul.f32.gmra.mxu0 %v19305_v7 }
 0xceb   : > { %9552 = vmatpush.msra.mxu1 %v9551_v56 }
 0xcec   : > { %9734 = vmatmul.f32.gmra.mxu3 %v19306_v4  ;;  %9429 = vmatmul.f32.gmra.mxu1 %v19307_v23 }
 0xced   : > { %9854 = vmatpush.msrb.mxu1 %v17320_v50  ;;  %v19312_v50 = vld [vmem:[#allocation124_spill] sm:$0xff] }
 0xcee   : > { %9656 = vmatmul.f32.gmra.mxu2 %v19308_v49 }
 0xcef   : > { %9856 = vmatpush.msrb.mxu1 %v17304_v36  ;;  %v19313_v36 = vld [vmem:[#allocation210_spill] sm:$0xff] }
 0xcf1   : > { %9858 = vmatpush.msrb.mxu1 %v17329_v27  ;;  %9837 = vmatmul.f32.gmra.mxu0 %v19309_v14  ;;  %v19314_v27 = vld [vmem:[#allocation142_spill] sm:$0xff] }
 0xcf3   : > { %9860 = vmatpush.msrb.mxu1 %v17354_v13  ;;  %v19315_v13 = vld [vmem:[#allocation229_spill] sm:$0xff] }
 0xcf4   : > { %9740 = vmatmul.f32.gmra.mxu3 %v19310_v60  ;;  %9437 = vmatmul.f32.gmra.mxu1 %v19311_v53 }
 0xcf5   : > { %9862 = vmatpush.msrb.mxu1 %v17391_v5  ;;  %v19316_v5 = vld [vmem:[#allocation222_spill] sm:$0xff] }
 0xcf6   : > { %9661 = vmatmul.f32.gmra.mxu2 %v19312_v50 }
 0xcf7   : > { %9864 = vmatpush.msrb.mxu1 %v17423_v11  ;;  %v19317_v11 = vld [vmem:[#allocation219_spill] sm:$0xff] }
 0xcf9   : > { %9866 = vmatpush.msrb.mxu1 %v17454_v17  ;;  %9841 = vmatmul.f32.gmra.mxu0 %v19313_v36  ;;  %v19318_v17 = vld [vmem:[#allocation231_spill] sm:$0xff] }
 0xcfb   : > { %9868 = vmatpush.msrb.mxu1 %v17482_v19  ;;  %v19319_v19 = vld [vmem:[#allocation135_spill] sm:$0xff] }
 0xcfc   : > { %9746 = vmatmul.f32.gmra.mxu3 %v19314_v27  ;;  %9445 = vmatmul.f32.gmra.mxu1 %v19315_v13 }
 0xcfd   : > { %9870 = vmatpush.msrb.mxu1 %v17510_v33  ;;  %v19320_v33 = vld [vmem:[#allocation230_spill] sm:$0xff] }
 0xcfe   : > { %9666 = vmatmul.f32.gmra.mxu2 %v19316_v5 }
 0xcff   : > { %9872 = vmatpush.msrb.mxu1 %v17530_v1  ;;  %v19321_v1 = vld [vmem:[#allocation228_spill] sm:$0xff] }
 0xd01   : > { %9874 = vmatpush.msrb.mxu1 %v17555_v9  ;;  %9845 = vmatmul.f32.gmra.mxu0 %v19317_v11  ;;  %v19322_v9 = vld [vmem:[#allocation234_spill] sm:$0xff] }
 0xd03   : > { %9876 = vmatpush.msrb.mxu1 %v17573_v62  ;;  %v19324_v62 = vld [vmem:[#allocation237_spill] sm:$0xff] }
 0xd04   : > { %9752 = vmatmul.f32.gmra.mxu3 %v19318_v17  ;;  %9453 = vmatmul.f32.gmra.mxu1 %v19319_v19 }
 0xd05   : > { %9878 = vmatpush.msrb.mxu1 %v17584_v52  ;;  %v19326_v52 = vld [vmem:[#allocation25_spill] sm:$0xff] }
 0xd06   : > { %9671 = vmatmul.f32.gmra.mxu2 %v19320_v33 }
 0xd07   : > { %9880 = vmatpush.msrb.mxu1 %v17596_v2  ;;  %v19328_v2 = vld [vmem:[#allocation41_spill] sm:$0xff] }
 0xd09   : > { %9882 = vmatpush.msrb.mxu1 %v17615_v22  ;;  %9849 = vmatmul.f32.gmra.mxu0 %v19321_v1 }
 0xd0b   : > { %9884 = vmatpush.msrb.mxu1 %v17626_v43 }
 0xd0c   : > { %10832 = vmatmul.msk.bf16.vlgmr.msra.gmra.mxu3 %vm19323_vm0, %v19322_v9  ;;  %9554 = vmatmul.f32.vlgmr.msra.gmra.mxu1 %v19293_v38 }
 0xd14   : > { %9558 = vmatmul.f32.gmra.mxu1 %v19297_v12 }
 0xd1c   : > { %10833 = vmatmul.msk.bf16.gmra.mxu3 %vm19325_vm3, %v19324_v62  ;;  %9562 = vmatmul.f32.gmra.mxu1 %v19301_v37 }
 0xd24   : > { %9566 = vmatmul.f32.gmra.mxu1 %v19305_v7 }
 0xd2c   : > { %10834 = vmatmul.msk.bf16.gmra.mxu3 %vm19327_vm4, %v19326_v52  ;;  %9570 = vmatmul.f32.gmra.mxu1 %v19309_v14 }
 0xd34   : > { %9574 = vmatmul.f32.gmra.mxu1 %v19313_v36 }
 0xd3c   : > { %10835 = vmatmul.msk.bf16.gmra.mxu3 %vm19329_vm13, %v19328_v2  ;;  %9578 = vmatmul.f32.gmra.mxu1 %v19317_v11 }
 0xd44   : > { %9582 = vmatmul.f32.gmra.mxu1 %v19321_v1 }
 0xd48   : > { %v9398_v22 = vpop.f32.mrf.mxu1 }
 0xd4c   : > { %9886 = vmatmul.f32.vlgmr.msrb.gmra.mxu1 %v19293_v38 }
 0xd4e   : > { %v9822_v10 = vpop.f32.mrf.mxu0 }
 0xd4f   : > { %v9711_v57 = vpop.f32.mrf.mxu3 }
 0xd51   : > { %v9406_v43 = vpop.f32.mrf.mxu1  ;;  %v9637_v41 = vpop.f32.mrf.mxu2 }
 0xd54   : > { %9890 = vmatmul.f32.gmra.mxu1 %v19297_v12  ;;  %v10912_v12 = vld [vmem:[%s17897_s7 + $0xe0] sm:$0xff] }
 0xd55   : > { %9963 = vmatpush.bf16.msrb.mxu2 %v10912_v12 }
 0xd56   : > { %v9826_v25 = vpop.f32.mrf.mxu0 }
 0xd57   : > { %v9717_v54 = vpop.f32.mrf.mxu3 }
 0xd59   : > { %v9414_v18 = vpop.f32.mrf.mxu1  ;;  %v9642_v21 = vpop.f32.mrf.mxu2 }
 0xd5c   : > { %9894 = vmatmul.f32.gmra.mxu1 %v19301_v37 }
 0xd5e   : > { %v9830_v30 = vpop.f32.mrf.mxu0 }
 0xd5f   : > { %v9723_v55 = vpop.f32.mrf.mxu3 }
 0xd61   : > { %v9422_v39 = vpop.f32.mrf.mxu1  ;;  %v9647_v8 = vpop.f32.mrf.mxu2 }
 0xd64   : > { %9898 = vmatmul.f32.gmra.mxu1 %v19305_v7 }
 0xd66   : > { %v9834_v49 = vpop.f32.mrf.mxu0 }
 0xd67   : > { %v9729_v7 = vpop.f32.mrf.mxu3 }
 0xd69   : > { %v9430_v59 = vpop.f32.mrf.mxu1  ;;  %v9652_v47 = vpop.f32.mrf.mxu2 }
 0xd6c   : > { %9902 = vmatmul.f32.gmra.mxu1 %v19309_v14 }
 0xd6e   : > { %v9838_v5 = vpop.f32.mrf.mxu0 }
 0xd6f   : > { %v9735_v13 = vpop.f32.mrf.mxu3 }
 0xd71   : > { %v9438_v34 = vpop.f32.mrf.mxu1  ;;  %v9657_v14 = vpop.f32.mrf.mxu2 }
 0xd74   : > { %9906 = vmatmul.f32.gmra.mxu1 %v19313_v36 }
 0xd77   : > { %v9741_v2 = vpop.f32.mrf.mxu3 }
 0xd79   : > { %v9446_v26 = vpop.f32.mrf.mxu1  ;;  %v9662_v33 = vpop.f32.mrf.mxu2 }
 0xd7c   : > { %9910 = vmatmul.f32.gmra.mxu1 %v19317_v11 }
 0xd81   : > { %v17762_v51 = vpop.f32.mrf.mxu1 }
 0xd84   : > { %9914 = vmatmul.f32.gmra.mxu1 %v19321_v1 }
 0xd89   : > { %v9555_v38 = vpop.f32.mrf.mxu1 }
 0xd8a   : > { %v9556_v6 = vadd.f32 %v9555_v38, %v9398_v22 }
 0xd8c   : > { %v9638_v28 = vadd.f32 %v9637_v41, %v9556_v6 }
 0xd8e   : > { %v9712_v0 = vadd.f32 %v9711_v57, %v9638_v28 }
 0xd90   : > { %v9823_v44 = vadd.f32 %v9822_v10, %v9712_v0 }
 0xd91   : > { %v9559_v48 = vpop.f32.mrf.mxu1 }
 0xd92   : > { %v9560_v20 = vadd.f32 %v9559_v48, %v9406_v43 }
 0xd94   : > { %v9643_v37 = vadd.f32 %v9642_v21, %v9560_v20 }
 0xd96   : > { %v9718_v16 = vadd.f32 %v9717_v54, %v9643_v37 }
 0xd98   : > { %v9827_v61 = vadd.f32 %v9826_v25, %v9718_v16 }
 0xd99   : > { %v9563_v46 = vpop.f32.mrf.mxu1 }
 0xd9a   : > { %v9564_v42 = vadd.f32 %v9563_v46, %v9414_v18  ;;  %v9842_v18 = vpop.f32.mrf.mxu0  ;;  %v9747_v46 = vpop.f32.mrf.mxu3 }
 0xd9c   : > { %v9648_v60 = vadd.f32 %v9647_v8, %v9564_v42 }
 0xd9e   : > { %v9724_v36 = vadd.f32 %v9723_v55, %v9648_v60 }
 0xda0   : > { %v9831_v11 = vadd.f32 %v9830_v30, %v9724_v36 }
 0xda1   : > { %v9567_v31 = vpop.f32.mrf.mxu1 }
 0xda2   : > { %v9568_v4 = vadd.f32 %v9567_v31, %v9422_v39  ;;  %v9846_v24 = vpop.f32.mrf.mxu0  ;;  %v9753_v10 = vpop.f32.mrf.mxu3 }
 0xda4   : > { %v9653_v53 = vadd.f32 %v9652_v47, %v9568_v4  ;;  %v10915_v47 = vld [vmem:[%s17897_s7 + $0xf8] sm:$0xff] }
 0xda5   : > { %10235 = vmatpush.bf16.msrb.mxu0 %v10915_v47 }
 0xda6   : > { %v9730_v27 = vadd.f32 %v9729_v7, %v9653_v53 }
 0xda8   : > { %v9835_v17 = vadd.f32 %v9834_v49, %v9730_v27 }
 0xda9   : > { %v9571_v29 = vpop.f32.mrf.mxu1 }
 0xdaa   : > { %v9572_v40 = vadd.f32 %v9571_v29, %v9430_v59  ;;  %v9667_v59 = vpop.f32.mrf.mxu2  ;;  %v9850_v54 = vpop.f32.mrf.mxu0 }
 0xdac   : > { %v9658_v22 = vadd.f32 %v9657_v14, %v9572_v40 }
 0xdb1   : > { %v9575_v3 = vpop.f32.mrf.mxu1 }
 0xdb2   : > { %v9576_v62 = vadd.f32 %v9575_v3, %v9438_v34  ;;  %v9672_v3 = vpop.f32.mrf.mxu2 }
 0xdb4   : > { %v9663_v43 = vadd.f32 %v9662_v33, %v9576_v62 }
 0xdb6   : > { %v9742_v38 = vadd.f32 %v9741_v2, %v9663_v43 }
 0xdb8   : > { %v9843_v48 = vadd.f32 %v9842_v18, %v9742_v38 }
 0xdb9   : > { %v9579_v45 = vpop.f32.mrf.mxu1 }
 0xdba   : > { %v9580_v15 = vadd.f32 %v9579_v45, %v9446_v26  ;;  %v9736_v26 = vadd.f32 %v9735_v13, %v9658_v22 }
 0xdbc   : > { %v9839_v6 = vadd.f32 %v9838_v5, %v9736_v26  ;;  %v9668_v40 = vadd.f32 %v9667_v59, %v9580_v15  ;;  %v17779_v15 = vld [vmem:[%s17898_s8 + $0x9] ss:$0 sm:$0xff] }
 0xdbe   : > { %v9748_v45 = vadd.f32 %v9747_v46, %v9668_v40 }
 0xdc0   : > { %v9847_v25 = vadd.f32 %v9846_v24, %v9748_v45 }
 0xdc1   : > { %v9583_v32 = vpop.f32.mrf.mxu1 }
 0xdc2   : > { %v9584_v34 = vadd.f32 %v9583_v32, %v17762_v51  ;;  %v10006_v51 = vpop.f32.mrf.mxu3 }
 0xdc4   : > { %v9673_v12 = vadd.f32 %v9672_v3, %v9584_v34 }
 0xdc6   : > { %v9754_v21 = vadd.f32 %v9753_v10, %v9673_v12 }
 0xdc8   : > { %v9851_v8 = vadd.f32 %v9850_v54, %v9754_v21 }
 0xdc9   : > { %v9887_v35 = vpop.f32.mrf.mxu1 }
 0xdca   : > { %v9888_v56 = vadd.f32 %v9887_v35, %v9823_v44  ;;  %v10008_v32 = vpop.f32.mrf.mxu3 }
 0xdd1   : > { %v9891_v58 = vpop.f32.mrf.mxu1 }
 0xdd2   : > { %v9892_v63 = vadd.f32 %v9891_v58, %v9827_v61  ;;  %v10011_v44 = vpop.f32.mrf.mxu3 }
 0xdd4   : > { %v9923_v23 = vpack.c.bf16 %v9892_v63, %v9888_v56  ;;  %v10914_v56 = vld [vmem:[%s17897_s7 + $0xf0] sm:$0xff] }
 0xdd5   : > { %10236 = vmatpush.bf16.msrb.mxu0 %v10914_v56 }
 0xdd6   : > { %10820 = vmatmul.msk.bf16.vlgmr.msrb.gmra.mxu2 %vm19330_vm15, %v9923_v23 }
 0xdd9   : > { %v9895_v50 = vpop.f32.mrf.mxu1 }
 0xdda   : > { %v9896_v1 = vadd.f32 %v9895_v50, %v9831_v11  ;;  %v10013_v49 = vpop.f32.mrf.mxu3 }
 0xde1   : > { %v9899_v19 = vpop.f32.mrf.mxu1 }
 0xde2   : > { %v9900_v9 = vadd.f32 %v9899_v19, %v9835_v17  ;;  %v10016_v33 = vpop.f32.mrf.mxu3 }
 0xde4   : > { %v9924_v52 = vpack.c.bf16 %v9900_v9, %v9896_v1 }
 0xde6   : > { %10821 = vmatmul.msk.bf16.gmra.mxu2 %vm19331_vm14, %v9924_v52 }
 0xde9   : > { %v9903_v39 = vpop.f32.mrf.mxu1 }
 0xdea   : > { %v9904_v31 = vadd.f32 %v9903_v39, %v9839_v6  ;;  %v10018_v34 = vpop.f32.mrf.mxu3 }
 0xdf1   : > { %v9907_v42 = vpop.f32.mrf.mxu1 }
 0xdf2   : > { %v9908_v29 = vadd.f32 %v9907_v42, %v9843_v48 }
 0xdf4   : > { %v9925_v41 = vpack.c.bf16 %v9908_v29, %v9904_v31 }
 0xdf6   : > { %10822 = vmatmul.msk.bf16.gmra.mxu2 %vm19332_vm7, %v9925_v41 }
 0xdf9   : > { %v9911_v57 = vpop.f32.mrf.mxu1 }
 0xdfa   : > { %v9912_v28 = vadd.f32 %v9911_v57, %v9847_v25 }
 0xe01   : > { %v9915_v20 = vpop.f32.mrf.mxu1 }
 0xe02   : > { %v9916_v37 = vadd.f32 %v9915_v20, %v9851_v8 }
 0xe04   : > { %v9926_v55 = vpack.c.bf16 %v9916_v37, %v9912_v28 }
 0xe06   : > { %10823 = vmatmul.msk.bf16.gmra.mxu2 %vm19333_vm10, %v9926_v55 }
 0xe59   : > { %v9965_v35 = vpop.f32.mrf.mxu2 }
 0xe5a   : > { %v10007_v30 = vadd.f32 %v10006_v51, %v9965_v35 }
 0xe5c   : > { %v17782_v0 = vadd.f32 %v17779_v15, %v10007_v30 }
 0xe5e   : > { %v10836_v16 = vmul.f32 -1.442695, %v17782_v0 }
 0xe60   : > { %11313 = vpow2.f32 %v10836_v16 }
 0xe61   : > { %v9967_v61 = vpop.f32.mrf.mxu2 }
 0xe62   : > { %v10009_v58 = vadd.f32 %v10008_v32, %v9967_v61  ;;  %v10021_v61 = vpop.f32.mrf.mxu3 }
 0xe64   : > { %v17792_v63 = vadd.f32 %v17779_v15, %v10009_v58 }
 0xe66   : > { %v11314_v7 = vpop.eup %11313  ;;  %v10837_v4 = vmul.f32 -1.442695, %v17792_v63 }
 0xe67   : > { %v10060_v23 = vadd.f32 1.0, %v11314_v7 }
 0xe68   : > { %11315 = vpow2.f32 %v10837_v4 }
 0xe69   : > { %11317 = vrcp.f32 %v10060_v23  ;;  %v9970_v14 = vpop.f32.mrf.mxu2  ;;  %v10079_v39 = vand.u32 2147483648, %v10060_v23  ;;  %vm10073_vm2 = vweird.f32 %v10060_v23  ;;  %v10077_v26 = vand.u32 2147483647, %v10060_v23 }
 0xe6a   : > { %v10012_v60 = vadd.f32 %v10011_v44, %v9970_v14 }
 0xe6b   : > { %v10080_v41 = vor.u32 1.1754944e-38, %v10079_v39  ;;  %vm10078_vm1 = vcmp.eq.f32.partialorder %v10077_v26, 8.507059e+37 }
 0xe6c   : > { %v17796_v53 = vadd.f32 %v17779_v15, %v10012_v60 }
 0xe6e   : > { %v11316_v50 = vpop.eup %11315  ;;  %v10838_v36 = vmul.f32 -1.442695, %v17796_v53 }
 0xe6f   : > { %v11318_v27 = vpop.eup %11317  ;;  %v10061_v13 = vadd.f32 1.0, %v11316_v50 }
 0xe70   : > { %v10069_v5 = vmul.f32 %v11318_v27, %v10060_v23  ;;  %11319 = vpow2.f32 %v10838_v36  ;;  %vm10074_vm5 = vweird.f32 %v11318_v27 }
 0xe71   : > { %11321 = vrcp.f32 %v10061_v13  ;;  %v9972_v11 = vpop.f32.mrf.mxu2  ;;  %vm17806_vm9 = vmor %vm10073_vm2, %vm10074_vm5  ;;  %v10092_v46 = vand.u32 2147483647, %v10061_v13  ;;  %v10094_v42 = vand.u32 2147483648, %v10061_v13  ;;  %vm10088_vm8 = vweird.f32 %v10061_v13 }
 0xe72   : > { %v10070_v17 = vsub.f32 1.0, %v10069_v5  ;;  %v10014_v19 = vadd.f32 %v10013_v49, %v9972_v11  ;;  %vm19336_vm2 = vmmov %vm19323_vm0 }
 0xe73   : > { %v10095_v45 = vor.u32 1.1754944e-38, %v10094_v42  ;;  %vm10093_vm6 = vcmp.eq.f32.partialorder %v10092_v46, 8.507059e+37 }
 0xe74   : > { %v10071_v1 = vmul.f32 %v11318_v27, %v10070_v17  ;;  %v17800_v9 = vadd.f32 %v17779_v15, %v10014_v19 }
 0xe76   : > { %v11320_v62 = vpop.eup %11319  ;;  %v10839_v52 = vmul.f32 -1.442695, %v17800_v9  ;;  %v10072_v43 = vadd.f32 %v11318_v27, %v10071_v1 }
 0xe77   : > { %v11322_v2 = vpop.eup %11321  ;;  %v17803_v22 = vadd.f32 1.0, %v11320_v62 }
 0xe78   : > { %v10084_v18 = vmul.f32 %v11322_v2, %v10061_v13  ;;  %11323 = vpow2.f32 %v10839_v52  ;;  %v10076_v31 = vsel %vm17806_vm9, %v11318_v27, %v10072_v43  ;;  %vm10089_vm12 = vweird.f32 %v11322_v2 }
 0xe79   : > { %11325 = vrcp.f32 %v17803_v22  ;;  %v9975_v59 = vpop.f32.mrf.mxu2  ;;  %v10081_v10 = vsel %vm10078_vm1, %v10080_v41, %v10076_v31  ;;  %vm10090_vm11 = vmor %vm10088_vm8, %vm10089_vm12  ;;  %vm10103_vm4 = vweird.f32 %v17803_v22  ;;  %v10107_v4 = vand.u32 2147483647, %v17803_v22 }
 0xe7a   : > { %v10085_v38 = vsub.f32 1.0, %v10084_v18  ;;  %v10017_v6 = vadd.f32 %v10016_v33, %v9975_v59  ;;  %v10188_v28 = vmul.f32 %v10081_v10, %v17782_v0 }
 0xe7b   : > { %vm10108_vm14 = vcmp.eq.f32.partialorder %v10107_v4, 8.507059e+37 }
 0xe7c   : > { %v10086_v29 = vmul.f32 %v11322_v2, %v10085_v38  ;;  %v17813_v24 = vadd.f32 %v17779_v15, %v10017_v6 }
 0xe7e   : > { %v11324_v3 = vpop.eup %11323  ;;  %v10087_v40 = vadd.f32 %v11322_v2, %v10086_v29  ;;  %v10840_v12 = vmul.f32 -1.442695, %v17813_v24 }
 0xe7f   : > { %v11326_v57 = vpop.eup %11325  ;;  %v10063_v21 = vadd.f32 1.0, %v11324_v3 }
 0xe80   : > { %v10091_v54 = vsel %vm10090_vm11, %v11322_v2, %v10087_v40  ;;  %v10099_v25 = vmul.f32 %v11326_v57, %v17803_v22  ;;  %11327 = vpow2.f32 %v10840_v12  ;;  %vm10104_vm3 = vweird.f32 %v11326_v57 }
 0xe81   : > { %v10096_v8 = vsel %vm10093_vm6, %v10095_v45, %v10091_v54  ;;  %11329 = vrcp.f32 %v10063_v21  ;;  %v9977_v20 = vpop.f32.mrf.mxu2  ;;  %vm10105_vm13 = vmor %vm10103_vm4, %vm10104_vm3  ;;  %v10122_v14 = vand.u32 2147483647, %v10063_v21  ;;  %v10124_v60 = vand.u32 2147483648, %v10063_v21 }
 0xe82   : > { %v10189_v37 = vmul.f32 %v10096_v8, %v17792_v63  ;;  %v10100_v55 = vsub.f32 1.0, %v10099_v25  ;;  %v10019_v51 = vadd.f32 %v10018_v34, %v9977_v20  ;;  %v10109_v63 = vand.u32 2147483648, %v17803_v22  ;;  %v10023_v22 = vpop.f32.mrf.mxu3  ;;  %vm19337_vm4 = vmmov %vm19336_vm2 }
 0xe83   : > { %vm10118_vm7 = vweird.f32 %v10063_v21  ;;  %v10125_v1 = vor.u32 1.1754944e-38, %v10124_v60  ;;  %vm10123_vm5 = vcmp.eq.f32.partialorder %v10122_v14, 8.507059e+37 }
 0xe84   : > { %v10196_v32 = vpack.c.bf16 %v10189_v37, %v10188_v28  ;;  %v10101_v35 = vmul.f32 %v11326_v57, %v10100_v55  ;;  %v17820_v30 = vadd.f32 %v17779_v15, %v10019_v51  ;;  %v10110_v13 = vor.u32 1.1754944e-38, %v10109_v63 }
 0xe86   : > { %v11328_v16 = vpop.eup %11327  ;;  %v10841_v47 = vmul.f32 -1.442695, %v17820_v30  ;;  %10856 = vmatmul.msk.bf16.vlgmr.msrb.gmra.mxu0 %vm19323_vm0, %v10196_v32  ;;  %v10102_v56 = vadd.f32 %v11326_v57, %v10101_v35 }
 0xe87   : > { %v11330_v44 = vpop.eup %11329  ;;  %v17824_v58 = vadd.f32 1.0, %v11328_v16 }
 0xe88   : > { %v10114_v0 = vmul.f32 %v11330_v44, %v10063_v21  ;;  %11331 = vpow2.f32 %v10841_v47  ;;  %v10106_v50 = vsel %vm10105_vm13, %v11326_v57, %v10102_v56  ;;  %vm10119_vm15 = vweird.f32 %v11330_v44 }
 0xe89   : > { %11333 = vrcp.f32 %v17824_v58  ;;  %v9980_v7 = vpop.f32.mrf.mxu2  ;;  %v10111_v33 = vsel %vm10108_vm14, %v10110_v13, %v10106_v50  ;;  %vm10120_vm10 = vmor %vm10118_vm7, %vm10119_vm15  ;;  %vm10133_vm12 = vweird.f32 %v17824_v58 }
 0xe8a   : > { %v10115_v23 = vsub.f32 1.0, %v10114_v0  ;;  %v10022_v49 = vadd.f32 %v10021_v61, %v9980_v7  ;;  %v10190_v39 = vmul.f32 %v10111_v33, %v17796_v53  ;;  %v10139_v53 = vand.u32 2147483648, %v17824_v58  ;;  %v10916_v33 = vld [vmem:[%s17897_s7 + $0x10] sm:$0xff] }
 0xe8c   : > { %v10116_v36 = vmul.f32 %v11330_v44, %v10115_v23  ;;  %v17831_v27 = vadd.f32 %v17779_v15, %v10022_v49  ;;  %v10140_v45 = vor.u32 1.1754944e-38, %v10139_v53 }
 0xe8e   : > { %v11332_v5 = vpop.eup %11331  ;;  %v10117_v11 = vadd.f32 %v11330_v44, %v10116_v36  ;;  %v10842_v17 = vmul.f32 -1.442695, %v17831_v27 }
 0xe8f   : > { %v11334_v19 = vpop.eup %11333  ;;  %v10065_v62 = vadd.f32 1.0, %v11332_v5 }
 0xe90   : > { %v10121_v52 = vsel %vm10120_vm10, %v11330_v44, %v10117_v11  ;;  %v10129_v2 = vmul.f32 %v11334_v19, %v17824_v58  ;;  %11335 = vpow2.f32 %v10842_v17  ;;  %vm10134_vm9 = vweird.f32 %v11334_v19 }
 0xe91   : > { %v10126_v43 = vsel %vm10123_vm5, %v10125_v1, %v10121_v52  ;;  %11337 = vrcp.f32 %v10065_v62  ;;  %v9982_v18 = vpop.f32.mrf.mxu2  ;;  %vm10135_vm1 = vmor %vm10133_vm12, %vm10134_vm9  ;;  %v10154_v40 = vand.u32 2147483648, %v10065_v62  ;;  %v10152_v10 = vand.u32 2147483647, %v10065_v62 }
 0xe92   : > { %v10191_v59 = vmul.f32 %v10126_v43, %v17800_v9  ;;  %v10130_v26 = vsub.f32 1.0, %v10129_v2  ;;  %v10024_v38 = vadd.f32 %v10023_v22, %v9982_v18  ;;  %v10137_v9 = vand.u32 2147483647, %v17824_v58  ;;  %vm19338_vm12 = vmmov %vm19337_vm4  ;;  %v19340_v22 = vld [vmem:[#allocation233_spill] sm:$0xff] }
 0xe93   : > { %vm10148_vm6 = vweird.f32 %v10065_v62  ;;  %v10155_v20 = vor.u32 1.1754944e-38, %v10154_v40  ;;  %vm10153_vm3 = vcmp.eq.f32.partialorder %v10152_v10, 8.507059e+37 }
 0xe94   : > { %v10197_v6 = vpack.c.bf16 %v10191_v59, %v10190_v39  ;;  %v10131_v48 = vmul.f32 %v11334_v19, %v10130_v26  ;;  %v17838_v46 = vadd.f32 %v17779_v15, %v10024_v38  ;;  %vm10138_vm11 = vcmp.eq.f32.partialorder %v10137_v9, 8.507059e+37  ;;  %v19342_v38 = vld [vmem:[#allocation235_spill] sm:$0xff] }
 0xe96   : > { %v11336_v42 = vpop.eup %11335  ;;  %v10843_v31 = vmul.f32 -1.442695, %v17838_v46  ;;  %10857 = vmatmul.msk.bf16.gmra.mxu0 %vm19336_vm2, %v10197_v6  ;;  %v10132_v41 = vadd.f32 %v11334_v19, %v10131_v48 }
 0xe97   : > { %v11338_v29 = vpop.eup %11337  ;;  %v10066_v34 = vadd.f32 1.0, %v11336_v42 }
 0xe98   : > { %v10144_v3 = vmul.f32 %v11338_v29, %v10065_v62  ;;  %11339 = vpow2.f32 %v10843_v31  ;;  %v10136_v12 = vsel %vm10135_vm1, %v11334_v19, %v10132_v41  ;;  %vm10149_vm8 = vweird.f32 %v11338_v29  ;;  %v10917_v19 = vld [vmem:[%s17897_s7 + $0x18] sm:$0xff]  ;;  %v19339_v62 = vld [vmem:[#allocation232_spill] sm:$0xff]  ;;  %vm19341_vm1 = vmmov %vm19337_vm4 }
 0xe99   : > { %11341 = vrcp.f32 %v10066_v34  ;;  %v10141_v8 = vsel %vm10138_vm11, %v10140_v45, %v10136_v12  ;;  %vm10150_vm0 = vmor %vm10148_vm6, %vm10149_vm8  ;;  %v10169_v0 = vand.u32 2147483648, %v10066_v34  ;;  %vm10163_vm15 = vweird.f32 %v10066_v34  ;;  %10317 = vmatpush.bf16.msra.mxu1 %v10917_v19 }
 0xe9a   : > { %v10145_v15 = vsub.f32 1.0, %v10144_v3  ;;  %v10192_v32 = vmul.f32 %v10141_v8, %v17813_v24  ;;  %v10167_v63 = vand.u32 2147483647, %v10066_v34  ;;  %vm19344_vm8 = vmmov %vm19341_vm1  ;;  %v19345_v3 = vld [vmem:[#allocation13_spill] sm:$0xff]  ;;  %v19349_v8 = vld [vmem:[#allocation38_spill] sm:$0xff] }
 0xe9b   : > { %vm19347_vm11 = vmmov %vm19341_vm1 }
 0xe9c   : > { %v10146_v57 = vmul.f32 %v11338_v29, %v10145_v15  ;;  %vm10168_vm10 = vcmp.eq.f32.partialorder %v10167_v63, 8.507059e+37  ;;  %v19346_v15 = vld [vmem:[#allocation19_spill] sm:$0xff]  ;;  %vm19350_vm6 = vmmov %vm19341_vm1 }
 0xe9d   : > { %10318 = vmatpush.bf16.msra.mxu1 %v10916_v33 }
 0xe9e   : > { %v11340_v21 = vpop.eup %11339  ;;  %v10147_v54 = vadd.f32 %v11338_v29, %v10146_v57 }
 0xe9f   : > { %v11342_v25 = vpop.eup %11341  ;;  %v10067_v28 = vadd.f32 1.0, %v11340_v21  ;;  %v19348_v21 = vld [vmem:[#allocation32_spill] sm:$0xff] }
 0xea0   : > { %v10151_v37 = vsel %vm10150_vm0, %v11338_v29, %v10147_v54  ;;  %v10159_v55 = vmul.f32 %v11342_v25, %v10066_v34  ;;  %vm10164_vm13 = vweird.f32 %v11342_v25  ;;  %vm19351_vm0 = vmmov %vm19341_vm1 }
 0xea1   : > { %v10156_v51 = vsel %vm10153_vm3, %v10155_v20, %v10151_v37  ;;  %11343 = vrcp.f32 %v10067_v28  ;;  %vm10165_vm14 = vmor %vm10163_vm15, %vm10164_vm13  ;;  %v10184_v4 = vand.u32 2147483648, %v10067_v28  ;;  %v10182_v24 = vand.u32 2147483647, %v10067_v28 }
 0xea2   : > { %v10193_v35 = vmul.f32 %v10156_v51, %v17820_v30  ;;  %v10160_v16 = vsub.f32 1.0, %v10159_v55  ;;  %v10170_v30 = vor.u32 1.1754944e-38, %v10169_v0  ;;  %vm10178_vm5 = vweird.f32 %v10067_v28  ;;  %v10960_v51 = vld [vmem:[%s17898_s8 + $0x1] ss:$0 sm:$0xff]  ;;  %vm19352_vm3 = vmmov %vm19351_vm0 }
 0xea3   : > { %v10185_v50 = vor.u32 1.1754944e-38, %v10184_v4  ;;  %vm10183_vm9 = vcmp.eq.f32.partialorder %v10182_v24, 8.507059e+37  ;;  %vm19354_vm13 = vmmov %vm19351_vm0 }
 0xea4   : > { %v10198_v47 = vpack.c.bf16 %v10193_v35, %v10192_v32  ;;  %v10161_v44 = vmul.f32 %v11342_v25, %v10160_v16  ;;  %vm19355_vm15 = vmmov %vm19351_vm0 }
 0xea6   : > { %10858 = vmatmul.msk.bf16.gmra.mxu0 %vm19337_vm4, %v10198_v47  ;;  %v10162_v58 = vadd.f32 %v11342_v25, %v10161_v44  ;;  %vm19353_vm4 = vmmov %vm19351_vm0 }
 0xea7   : > { %v11344_v61 = vpop.eup %11343 }
 0xea8   : > { %v10174_v56 = vmul.f32 %v11344_v61, %v10067_v28  ;;  %v10166_v23 = vsel %vm10165_vm14, %v11342_v25, %v10162_v58  ;;  %vm10179_vm7 = vweird.f32 %v11344_v61  ;;  %vm19356_vm14 = vmmov %vm19351_vm0 }
 0xea9   : > { %v10171_v60 = vsel %vm10168_vm10, %v10170_v30, %v10166_v23  ;;  %vm10180_vm2 = vmor %vm10178_vm5, %vm10179_vm7 }
 0xeaa   : > { %v10175_v7 = vsub.f32 1.0, %v10174_v56  ;;  %v10194_v5 = vmul.f32 %v10171_v60, %v17831_v27  ;;  %v10959_v27 = vld [vmem:[%s17898_s8 + $0xa] ss:$0 sm:$0xff]  ;;  %vm19357_vm7 = vmmov %vm19351_vm0 }
 0xeab   : > { %vm19358_vm10 = vmmov %vm19351_vm0 }
 0xeac   : > { %v10176_v49 = vmul.f32 %v11344_v61, %v10175_v7 }
 0xeae   : > { %v10177_v14 = vadd.f32 %v11344_v61, %v10176_v49 }
 0xeb0   : > { %v10181_v36 = vsel %vm10180_vm2, %v11344_v61, %v10177_v14 }
 0xeb1   : > { %v10186_v13 = vsel %vm10183_vm9, %v10185_v50, %v10181_v36 }
 0xeb2   : > { %v10195_v11 = vmul.f32 %v10186_v13, %v17838_v46  ;;  %v19343_v46 = vld [vmem:[#allocation236_spill] sm:$0xff] }
 0xeb4   : > { %v10199_v17 = vpack.c.bf16 %v10195_v11, %v10194_v5 }
 0xeb6   : > { %10859 = vmatmul.msk.bf16.gmra.mxu0 %vm19338_vm12, %v10199_v17 }
 0xf03   : > { %v10238_v1 = vpop.f32.mrf.mxu0 }
 0xf04   : > { %v10258_v52 = vadd.f32 %v10238_v1, %v19339_v62 }
 0xf06   : > { %v10268_v18 = vadd.f32 %v10959_v27, %v10258_v52 }
 0xf0b   : > { %v10240_v2 = vpop.f32.mrf.mxu0 }
 0xf0c   : > { %v10259_v43 = vadd.f32 %v10240_v2, %v19340_v22 }
 0xf0e   : > { %v10269_v39 = vadd.f32 %v10959_v27, %v10259_v43 }
 0xf10   : > { %v10276_v59 = vpack.c.bf16 %v10269_v39, %v10268_v18 }
 0xf12   : > { %10872 = vmatmul.msk.bf16.vlgmr.msra.gmra.mxu1 %vm19341_vm1, %v10276_v59 }
 0xf13   : > { %v10243_v26 = vpop.f32.mrf.mxu0 }
 0xf14   : > { %v10260_v6 = vadd.f32 %v10243_v26, %v19342_v38 }
 0xf16   : > { %v10270_v31 = vadd.f32 %v10959_v27, %v10260_v6 }
 0xf1b   : > { %v10245_v48 = vpop.f32.mrf.mxu0 }
 0xf1c   : > { %v10261_v42 = vadd.f32 %v10245_v48, %v19343_v46 }
 0xf1e   : > { %v10271_v29 = vadd.f32 %v10959_v27, %v10261_v42 }
 0xf20   : > { %v10277_v34 = vpack.c.bf16 %v10271_v29, %v10270_v31 }
 0xf22   : > { %10873 = vmatmul.msk.bf16.gmra.mxu1 %vm19344_vm8, %v10277_v34 }
 0xf23   : > { %v10248_v41 = vpop.f32.mrf.mxu0 }
 0xf24   : > { %v10262_v53 = vadd.f32 %v10248_v41, %v19345_v3 }
 0xf26   : > { %v10272_v12 = vadd.f32 %v10959_v27, %v10262_v53 }
 0xf2b   : > { %v10250_v9 = vpop.f32.mrf.mxu0 }
 0xf2c   : > { %v10263_v40 = vadd.f32 %v10250_v9, %v19346_v15 }
 0xf2e   : > { %v10273_v57 = vadd.f32 %v10959_v27, %v10263_v40 }
 0xf30   : > { %v10278_v10 = vpack.c.bf16 %v10273_v57, %v10272_v12 }
 0xf32   : > { %10874 = vmatmul.msk.bf16.gmra.mxu1 %vm19347_vm11, %v10278_v10 }
 0xf33   : > { %v10253_v45 = vpop.f32.mrf.mxu0 }
 0xf34   : > { %v10264_v54 = vadd.f32 %v10253_v45, %v19348_v21 }
 0xf36   : > { %v10274_v28 = vadd.f32 %v10959_v27, %v10264_v54 }
 0xf3b   : > { %v10255_v25 = vpop.f32.mrf.mxu0 }
 0xf3c   : > { %v10265_v20 = vadd.f32 %v10255_v25, %v19349_v8 }
 0xf3e   : > { %v10275_v37 = vadd.f32 %v10959_v27, %v10265_v20 }
 0xf40   : > { %v10279_v55 = vpack.c.bf16 %v10275_v37, %v10274_v28 }
 0xf42   : > { %10875 = vmatmul.msk.bf16.gmra.mxu1 %vm19350_vm6, %v10279_v55 }
 0xf8f   : > { %v10320_v32 = vpop.f32.mrf.mxu1 }
 0xf90   : > { %v10321_v35 = vadd.f32 %v10960_v51, %v10320_v32 }
 0xf92   : > { %10340 = vst.msk [vmem:[%s452_s24] sm:$0xff] %vm19351_vm0, %v10321_v35 }
 0xf97   : > { %v10322_v16 = vpop.f32.mrf.mxu1 }
 0xf98   : > { %v10323_v47 = vadd.f32 %v10960_v51, %v10322_v16 }
 0xf9a   : > { %10341 = vst.msk [vmem:[%s452_s24 + $0x8] sm:$0xff] %vm19352_vm3, %v10323_v47 }
 0xf9f   : > { %v10325_v44 = vpop.f32.mrf.mxu1 }
 0xfa0   : > { %v10326_v61 = vadd.f32 %v10960_v51, %v10325_v44 }
 0xfa2   : > { %10342 = vst.msk [vmem:[%s452_s24 + $0x10] sm:$0xff] %vm19353_vm4, %v10326_v61 }
 0xfa7   : > { %v10327_v58 = vpop.f32.mrf.mxu1 }
 0xfa8   : > { %v10328_v56 = vadd.f32 %v10960_v51, %v10327_v58 }
 0xfaa   : > { %10343 = vst.msk [vmem:[%s452_s24 + $0x18] sm:$0xff] %vm19354_vm13, %v10328_v56 }
 0xfaf   : > { %v10330_v0 = vpop.f32.mrf.mxu1 }
 0xfb0   : > { %v10331_v63 = vadd.f32 %v10960_v51, %v10330_v0 }
 0xfb2   : > { %10344 = vst.msk [vmem:[%s452_s24 + $0x20] sm:$0xff] %vm19355_vm15, %v10331_v63 }
 0xfb7   : > { %v10332_v7 = vpop.f32.mrf.mxu1 }
 0xfb8   : > { %v10333_v4 = vadd.f32 %v10960_v51, %v10332_v7 }
 0xfba   : > { %10345 = vst.msk [vmem:[%s452_s24 + $0x28] sm:$0xff] %vm19356_vm14, %v10333_v4 }
 0xfbf   : > { %v10335_v23 = vpop.f32.mrf.mxu1 }
 0xfc0   : > { %v10336_v49 = vadd.f32 %v10960_v51, %v10335_v23 }
 0xfc2   : > { %10346 = vst.msk [vmem:[%s452_s24 + $0x30] sm:$0xff] %vm19357_vm7, %v10336_v49 }
 0xfc7   : > { %v10337_v24 = vpop.f32.mrf.mxu1 }
 0xfc8   : > { %v10338_v30 = vadd.f32 %v10960_v51, %v10337_v24 }
 0xfca   : > { %10347 = vst.msk [vmem:[%s452_s24 + $0x38] sm:$0xff] %vm19358_vm10, %v10338_v30 }
 0xfcb PF: > { %s19_s30 = sadd.s32 1, %s11378_s30  }
 0xfcc   : > { %p16_p4 = scmp.ge.s32.totalorder %s19_s30, 4  }
 0xfce   :  { %18 = sbr.rel (!%p16_p4) target bundleno = 1 (0x1), region = 120 }

</bundles_post_ra>
